<compile_context>
chip_gen: v5e
topology: v5e:2x2
jax: 0.10.0
libtpu: 0.0.40
codegen_flags: <defaults>
</compile_context>

<pallas_src>
import math
import functools

import jax
import jax.numpy as jnp
from jax.experimental import pallas as pl
from jax.experimental.pallas import tpu as pltpu

# ----------------------------- config (small, consistent with the module) -----------------------------
BATCH = 2
N_DATA = 8          # n_data tokens of model_input
CTX_TOKENS = 4      # context tokens
INPUT_CH = 8        # input_channels
OUTPUT_CH = 8       # output_channels
WIDTH = 32          # width (must be divisible by HEADS)
LAYERS = 2          # encoder/decoder depth
HEADS = 4
CONTEXT_DIM = 16
INIT_SCALE = 0.25 * math.sqrt(1.0 / WIDTH)
LN_EPS = 1e-5       # PyTorch nn.LayerNorm default
OUT_PAD = 128       # lane-dense output slab width (sliced back to OUTPUT_CH in the wrapper)
NEG_INF = -1e30     # additive mask value for cross-batch / padded-key attention
R_PAD = 32          # padded token-row count (data + ctx + t_emb + pad), multiple of 8

N_BLOCKS = 2 * LAYERS + 1   # encoder blocks + middle + decoder blocks

assert WIDTH % HEADS == 0
assert 4 * WIDTH == 128 and OUT_PAD == 128          # vec-slab lane layout assumes this
assert BATCH * (N_DATA + CTX_TOKENS + 1) <= R_PAD and R_PAD % 8 == 0


# ----------------------------- math helpers -----------------------------
def _erf(x):
    # Abramowitz & Stegun 7.1.26 (f32-accurate); used only in the plain-JAX reference.
    a1, a2, a3, a4, a5 = 0.254829592, -0.284496736, 1.421413741, -1.453152027, 1.061405429
    p = 0.3275911
    sgn = jnp.where(x >= 0.0, 1.0, -1.0)
    ax = jnp.abs(x)
    t = 1.0 / (1.0 + p * ax)
    poly = ((((a5 * t + a4) * t + a3) * t + a2) * t + a1) * t
    return sgn * (1.0 - poly * jnp.exp(-ax * ax))


def _gelu_exact(x):
    # exact (erf-based) GELU matching torch nn.GELU default — reference path.
    return 0.5 * x * (1.0 + _erf(x * (1.0 / math.sqrt(2.0))))


def _gelu_tanh(x):
    # tanh GELU (issues on the EUP slot) — kernel path; ~1e-3 max deviation from exact.
    c = 0.7978845608028654  # sqrt(2/pi)
    return 0.5 * x * (1.0 + jnp.tanh(c * (x + 0.044715 * x * x * x)))


def _ln(x, g, b, eps=LN_EPS):
    mu = jnp.mean(x, axis=-1, keepdims=True)
    var = jnp.mean(jnp.square(x - mu), axis=-1, keepdims=True)
    return (x - mu) * jax.lax.rsqrt(var + eps) * g + b


# ----------------------------- fused kernel -----------------------------
# Weight slabs (order of kernel args after the 3 data inputs):
_KP_ORDER = (
    "w_time1",   # (W, 4W)        bf16
    "w_time2",   # (4W, W)        bf16
    "w_in",      # (Cin, W)       bf16
    "w_ctx",     # (Cd, W)        bf16
    "w_out",     # (W, OUT_PAD)   bf16 (zero-padded past OUTPUT_CH)
    "vec_misc",  # (4, 128) f32:  r0=[in_b|ctx_b|time_b2|post_ln_g] r1=[post_ln_b|ctx_ln_g|ctx_ln_b|0]
                 #                r2=time_b1  r3=out_b(padded)
    "blk_w1",    # (NB, W, 3W)    bf16  head-major [Wq|Wk|Wv], 1/sqrt(sqrt(d)) folded into Wq,Wk
    "blk_proj",  # (NB, W, W)     bf16  c_proj weight
    "blk_fc",    # (NB, W, 4W)    bf16
    "blk_p2",    # (NB, 4W, W)    bf16
    "blk_vec",   # (NB, 4, 128) f32: r0=[ln1_g|ln1_b|ln2_g|ln2_b] r1=[bproj|bp2|0] r2=bfc r3=0
    "skip_w",    # (L, 2W, W)     bf16  rows 0:W act on skip, W:2W act on x
    "skip_b",    # (L, 1, W)      f32
)


def _denoiser_kernel(t_sin_ref, ctx_ref, xin_ref,
                     w_time1_ref, w_time2_ref, w_in_ref, w_ctx_ref, w_out_ref, mvec_ref,
                     blk_w1_ref, blk_proj_ref, blk_fc_ref, blk_p2_ref, blk_vec_ref,
                     skip_w_ref, skip_b_ref,
                     out_ref, *, batch, ctx_tokens, n_data, heads, layers, r_pad):
    f32 = jnp.float32
    bf16 = jnp.bfloat16
    w = w_in_ref.shape[-1]
    cd = ctx_ref.shape[-1]
    d_head = w // heads
    nd = batch * n_data
    nc = batch * ctx_tokens

    # ---- unpack misc vector slab (lane slices; no extra DMAs) ----
    mvec = mvec_ref[...]
    in_b = mvec[0:1, 0:w]
    ctx_b = mvec[0:1, w:2 * w]
    time_b2 = mvec[0:1, 2 * w:3 * w]
    post_ln_g = mvec[0:1, 3 * w:4 * w]
    post_ln_b = mvec[1:2, 0:w]
    ctx_ln_g = mvec[1:2, w:w + cd]
    ctx_ln_b = mvec[1:2, w + cd:w + 2 * cd]
    time_b1 = mvec[2:3, :]
    out_b = mvec[3:4, :]

    # ---- masks built in-kernel (iota + compares only; no integer div/mod, no mask DMA) ----
    def row_bid(t):
        # batch id per token row; padded t_emb rows get unique ids >= batch (attend only to self)
        bid_data = jnp.zeros_like(t)
        bid_ctx = jnp.zeros_like(t)
        for bb in range(1, batch):
            bid_data = bid_data + (t >= bb * n_data).astype(jnp.int32)
            bid_ctx = bid_ctx + (t >= nd + bb * ctx_tokens).astype(jnp.int32)
        bid_time = t - (nd + nc)
        return jnp.where(t < nd, bid_data, jnp.where(t < nd + nc, bid_ctx, bid_time))

    qtok = jax.lax.broadcasted_iota(jnp.int32, (r_pad, r_pad), 0)
    ktok = jax.lax.broadcasted_iota(jnp.int32, (r_pad, r_pad), 1)
    mask1 = jnp.where(row_bid(qtok) == row_bid(ktok), 0.0, NEG_INF).astype(f32)
    attn_mask = jnp.concatenate([mask1] * heads, axis=0)                      # (H*R, R)

    colw = jax.lax.broadcasted_iota(jnp.int32, (r_pad, w), 1)
    head_mask = jnp.concatenate(
        [jnp.where((colw >= hh * d_head) & (colw < (hh + 1) * d_head), 1.0, 0.0)
         for hh in range(heads)], axis=0).astype(f32)                         # (H*R, W)

    # ---- time embedding MLP: Linear -> GELU -> Linear (padded rows give finite constants) ----
    t = jnp.dot(t_sin_ref[...].astype(bf16), w_time1_ref[...],
                preferred_element_type=f32) + time_b1
    t = _gelu_tanh(t)
    t = jnp.dot(t.astype(bf16), w_time2_ref[...], preferred_element_type=f32) + time_b2   # (8, W)

    # ---- context embed: LayerNorm -> Linear ----
    c = _ln(ctx_ref[...], ctx_ln_g, ctx_ln_b)
    c = jnp.dot(c.astype(bf16), w_ctx_ref[...], preferred_element_type=f32) + ctx_b       # (B*Tc, W)

    # ---- input projection ----
    xi = jnp.dot(xin_ref[...].astype(bf16), w_in_ref[...],
                 preferred_element_type=f32) + in_b                                        # (B*Nd, W)

    # ---- token "concat": rows [data | context | t_emb | pad]  (exact permutation of the
    # torch layout: attention is masked per batch, everything else is row-wise) ----
    x = jnp.concatenate([xi, c, t], axis=0)                                                # (R_PAD, W)

    def resblock(x, blk):
        bvec = blk_vec_ref[blk]                                   # (4, 128)
        ln1_g = bvec[0:1, 0:w];        ln1_b = bvec[0:1, w:2 * w]
        ln2_g = bvec[0:1, 2 * w:3 * w]; ln2_b = bvec[0:1, 3 * w:4 * w]
        bproj = bvec[1:2, 0:w];        bp2 = bvec[1:2, w:2 * w]
        bfc = bvec[2:3, :]

        # --- x = x + c_proj(attention(ln_1(x))) ---
        h = _ln(x, ln1_g, ln1_b)
        qkv = jnp.dot(h.astype(bf16), blk_w1_ref[blk], preferred_element_type=f32)         # (R, 3W)
        q = qkv[:, 0:w]
        k = qkv[:, w:2 * w]
        v = qkv[:, 2 * w:3 * w]

        # sublane-stacked heads: (H*R, W) with only head h's columns live in block h
        q_blk = (jnp.concatenate([q] * heads, axis=0) * head_mask).astype(bf16)            # (H*R, W)
        s = jax.lax.dot_general(q_blk, k.astype(bf16), (((1,), (1,)), ((), ())),
                                preferred_element_type=f32) + attn_mask                    # (H*R, R)
        smax = jnp.max(s, axis=-1, keepdims=True)
        p = jnp.exp(s - smax)
        a = p * pl.reciprocal(jnp.sum(p, axis=-1, keepdims=True), approx=True)
        o = jnp.dot(a.astype(bf16), v.astype(bf16), preferred_element_type=f32)            # (H*R, W)
        o = (o * head_mask).astype(bf16)
        pr = jnp.dot(o, blk_proj_ref[blk], preferred_element_type=f32)                     # (H*R, W)
        attn = pr[0:r_pad]
        for hh in range(1, heads):
            attn = attn + pr[hh * r_pad:(hh + 1) * r_pad]                                  # (R, W)
        x = x + attn + bproj

        # --- x = x + mlp(ln_2(x)) ---
        h2 = _ln(x, ln2_g, ln2_b)
        f = jnp.dot(h2.astype(bf16), blk_fc_ref[blk], preferred_element_type=f32) + bfc
        f = _gelu_tanh(f)
        m = jnp.dot(f.astype(bf16), blk_p2_ref[blk], preferred_element_type=f32) + bp2
        return x + m

    # ---- UNet backbone: encoder -> middle -> decoder (with fused skip linears) ----
    enc_outs = []
    for l in range(layers):
        x = resblock(x, l)
        enc_outs.append(x)
    x = resblock(x, layers)                       # middle block
    for l in range(layers):
        skip = enc_outs.pop()
        sw = skip_w_ref[l]                        # (2W, W)
        # torch.cat([skip, x], -1) @ W_skip + b == skip @ W_top + x @ W_bot + b
        x = (jnp.dot(skip.astype(bf16), sw[0:w], preferred_element_type=f32)
             + jnp.dot(x.astype(bf16), sw[w:2 * w], preferred_element_type=f32)
             + skip_b_ref[l])
        x = resblock(x, layers + 1 + l)

    # ---- ln_post on the data rows, lane-dense (padded) output projection ----
    xd = x[0:nd]                                  # data tokens are rows [0, B*Nd)
    xd = _ln(xd, post_ln_g, post_ln_b)
    out = jnp.dot(xd.astype(bf16), w_out_ref[...], preferred_element_type=f32) + out_b
    out_ref[...] = out.astype(out_ref.dtype)


# ----------------------------- glue: timestep embedding -----------------------------
def timestep_embedding(timesteps, dim):
    # diffusers Timesteps(width, flip_sin_to_cos=False, downscale_freq_shift=0), max_period=10000
    half = dim // 2
    exponent = -math.log(10000.0) * jnp.arange(half, dtype=jnp.float32) / float(half)
    freqs = jnp.exp(exponent)
    args = timesteps.astype(jnp.float32)[:, None] * freqs[None, :]
    return jnp.concatenate([jnp.sin(args), jnp.cos(args)], axis=-1)   # (B, dim)


# ----------------------------- forward wrapper (single pallas_call) -----------------------------
def simple_denoiser_forward(kparams, model_input, timestep, encoder_hidden_states):
    """
    model_input:           (B, n_data, input_channels)
    timestep:              (B,) int
    encoder_hidden_states: (B, ctx_tokens, context_dim)
    returns sample:        (B, n_data, output_channels)
    """
    b, n_data, _ = model_input.shape
    _, tc, cd = encoder_hidden_states.shape
    w = WIDTH
    n_time_rows = R_PAD - b * (n_data + tc)       # real t_emb rows (b) + pad rows

    t_sin = timestep_embedding(timestep, w)                        # (B, W)
    t_sin = jnp.pad(t_sin, ((0, n_time_rows - b), (0, 0)))         # (n_time_rows, W)
    ctx2d = encoder_hidden_states.reshape(b * tc, cd)              # (B*Tc, Cd)
    xin2d = model_input.reshape(b * n_data, -1)                    # (B*Nd, Cin)

    kernel = functools.partial(_denoiser_kernel, batch=b, ctx_tokens=tc, n_data=n_data,
                               heads=HEADS, layers=LAYERS, r_pad=R_PAD)

    args = (t_sin, ctx2d, xin2d) + tuple(kparams[name] for name in _KP_ORDER)
    vmem = lambda: pl.BlockSpec(memory_space=pltpu.MemorySpace.VMEM)
    out = pl.pallas_call(
        kernel,
        out_shape=jax.ShapeDtypeStruct((b * n_data, OUT_PAD), jnp.float32),
        in_specs=[vmem() for _ in args],
        out_specs=vmem(),
    )(*args)

    return out[:, :OUTPUT_CH].reshape(b, n_data, OUTPUT_CH)


# ----------------------------- parameters -----------------------------
def init_params(key):
    """Parameters in the original (torch-convention) layout."""
    keys = iter(jax.random.split(key, 256))

    def nrm(shape, std=INIT_SCALE):
        return jax.random.normal(next(keys), shape, jnp.float32) * std

    def zeros(shape):
        return jnp.zeros(shape, jnp.float32)

    def ones(shape):
        return jnp.ones(shape, jnp.float32)

    w = WIDTH

    def block_params():
        return dict(
            ln1_g=ones((1, w)), ln1_b=zeros((1, w)),
            wqkv=nrm((w, 3 * w)),                 # columns: [h0:(q,k,v) | h1:(q,k,v) | ...]
            wproj=nrm((w, w)), bproj=zeros((1, w)),
            ln2_g=ones((1, w)), ln2_b=zeros((1, w)),
            wfc=nrm((w, 4 * w)), bfc=zeros((1, 4 * w)),
            wp2=nrm((4 * w, w)), bp2=zeros((1, w)),
        )

    return dict(
        in_w=nrm((INPUT_CH, w), 0.05), in_b=zeros((1, w)),
        out_w=nrm((w, OUTPUT_CH), 0.05), out_b=zeros((1, OUTPUT_CH)),
        time_w1=nrm((w, 4 * w)), time_b1=zeros((1, 4 * w)),
        time_w2=nrm((4 * w, w)), time_b2=zeros((1, w)),
        ctx_ln_g=ones((1, CONTEXT_DIM)), ctx_ln_b=zeros((1, CONTEXT_DIM)),
        ctx_w=nrm((CONTEXT_DIM, w), 0.05), ctx_b=zeros((1, w)),
        post_ln_g=ones((1, w)), post_ln_b=zeros((1, w)),
        encoder=[block_params() for _ in range(LAYERS)],
        middle=block_params(),
        decoder=[dict(block_params(),
                      skip_w=nrm((2 * w, w)), skip_b=zeros((1, w)))
                 for _ in range(LAYERS)],
    )


def prepare_kernel_params(params):
    """One-time host-side repack of the module weights into the fused-kernel slab layout."""
    w, hds = WIDTH, HEADS
    d = w // hds
    scale = 1.0 / math.sqrt(math.sqrt(d))        # applied to both q and k in the module
    bf16 = jnp.bfloat16
    blocks = list(params["encoder"]) + [params["middle"]] + list(params["decoder"])
    nb = len(blocks)

    def stack(name):
        return jnp.stack([blk[name] for blk in blocks])

    # wqkv columns are [head, (q,k,v), d]; split into head-major Wq/Wk/Wv with scale folded in.
    wqkv = stack("wqkv").reshape(nb, w, hds, 3, d)
    wq = (wqkv[:, :, :, 0, :] * scale).reshape(nb, w, w)
    wk = (wqkv[:, :, :, 1, :] * scale).reshape(nb, w, w)
    wv = wqkv[:, :, :, 2, :].reshape(nb, w, w)
    blk_w1 = jnp.concatenate([wq, wk, wv], axis=-1).astype(bf16)        # (NB, W, 3W)

    row0 = jnp.concatenate([stack("ln1_g"), stack("ln1_b"),
                            stack("ln2_g"), stack("ln2_b")], axis=-1)   # (NB,1,4W)
    row1 = jnp.concatenate([stack("bproj"), stack("bp2"),
                            jnp.zeros((nb, 1, 2 * w), jnp.float32)], axis=-1)
    row2 = stack("bfc")
    row3 = jnp.zeros((nb, 1, 4 * w), jnp.float32)
    blk_vec = jnp.concatenate([row0, row1, row2, row3], axis=1)         # (NB, 4, 4W)

    out_w = jnp.pad(params["out_w"], ((0, 0), (0, OUT_PAD - OUTPUT_CH)))
    out_b = jnp.pad(params["out_b"], ((0, 0), (0, OUT_PAD - OUTPUT_CH)))

    m0 = jnp.concatenate([params["in_b"], params["ctx_b"],
                          params["time_b2"], params["post_ln_g"]], axis=-1)       # (1,128)
    m1 = jnp.concatenate([params["post_ln_b"], params["ctx_ln_g"], params["ctx_ln_b"],
                          jnp.zeros((1, 4 * w - w - 2 * CONTEXT_DIM), jnp.float32)], axis=-1)
    vec_misc = jnp.concatenate([m0, m1, params["time_b1"], out_b], axis=0)        # (4, 128)

    return dict(
        w_time1=params["time_w1"].astype(bf16),
        w_time2=params["time_w2"].astype(bf16),
        w_in=params["in_w"].astype(bf16),
        w_ctx=params["ctx_w"].astype(bf16),
        w_out=out_w.astype(bf16),
        vec_misc=vec_misc,
        blk_w1=blk_w1,
        blk_proj=stack("wproj").astype(bf16),
        blk_fc=stack("wfc").astype(bf16),
        blk_p2=stack("wp2").astype(bf16),
        blk_vec=blk_vec,
        skip_w=jnp.stack([blk["skip_w"] for blk in params["decoder"]]).astype(bf16),
        skip_b=jnp.stack([blk["skip_b"] for blk in params["decoder"]]),
    )


# ----------------------------- plain-JAX reference (self-check only) -----------------------------
_HI = jax.lax.Precision.HIGHEST


def _mm(a, b):
    return jnp.dot(a, b, precision=_HI)


def _reference_forward(params, model_input, timestep, encoder_hidden_states):
    """Direct transcription of the PyTorch module in plain JAX (original token layout, f32)."""
    _, n_data, _ = model_input.shape
    w, hds = WIDTH, HEADS
    d = w // hds
    scale = 1.0 / math.sqrt(math.sqrt(d))

    t = _gelu_exact(_mm(timestep_embedding(timestep, w), params["time_w1"]) + params["time_b1"])
    t = (_mm(t, params["time_w2"]) + params["time_b2"])[:, None, :]            # (B, 1, W)
    c = _ln(encoder_hidden_states, params["ctx_ln_g"], params["ctx_ln_b"])
    c = _mm(c, params["ctx_w"]) + params["ctx_b"]                              # (B, Tc, W)
    x = _mm(model_input, params["in_w"]) + params["in_b"]                      # (B, Nd, W)
    x = jnp.concatenate([t, c, x], axis=1)                                     # (B, N, W)

    def resblock(x, p):
        h = _ln(x, p["ln1_g"], p["ln1_b"])
        qkv = _mm(h, p["wqkv"])
        outs = []
        for hh in range(hds):
            base = hh * 3 * d
            q = qkv[..., base:base + d] * scale
            k = qkv[..., base + d:base + 2 * d] * scale
            v = qkv[..., base + 2 * d:base + 3 * d]
            a = jax.nn.softmax(jnp.einsum("bqd,bkd->bqk", q, k, precision=_HI), axis=-1)
            outs.append(jnp.einsum("bqk,bkd->bqd", a, v, precision=_HI))
        x = x + _mm(jnp.concatenate(outs, axis=-1), p["wproj"]) + p["bproj"]
        h2 = _ln(x, p["ln2_g"], p["ln2_b"])
        return x + _mm(_gelu_exact(_mm(h2, p["wfc"]) + p["bfc"]), p["wp2"]) + p["bp2"]

    enc = []
    for p in params["encoder"]:
        x = resblock(x, p)
        enc.append(x)
    x = resblock(x, params["middle"])
    for p in params["decoder"]:
        x = _mm(jnp.concatenate([enc.pop(), x], axis=-1), p["skip_w"]) + p["skip_b"]
        x = resblock(x, p)

    x = _ln(x, params["post_ln_g"], params["post_ln_b"])
    return _mm(x[:, -n_data:], params["out_w"]) + params["out_b"]


# TODO(synk): pretrained checkpoint loading (torch.load / state_dict) and use_checkpoint
#             gradient checkpointing are intentionally omitted; weights are synthetic.

# ----------------------------- main -----------------------------
if __name__ == "__main__":
    key = jax.random.PRNGKey(0)
    k_params, k_x, k_ctx = jax.random.split(key, 3)

    params = init_params(k_params)
    kparams = prepare_kernel_params(params)   # one-time weight repack for the fused kernel

    model_input = jax.random.normal(k_x, (BATCH, N_DATA, INPUT_CH), jnp.float32)
    timestep = jnp.array([17, 503], dtype=jnp.int32)
    encoder_hidden_states = jax.random.normal(k_ctx, (BATCH, CTX_TOKENS, CONTEXT_DIM), jnp.float32)

    fwd = jax.jit(simple_denoiser_forward)
    sample = fwd(kparams, model_input, timestep, encoder_hidden_states)
    sample = jax.block_until_ready(sample)

    assert sample.shape == (BATCH, N_DATA, OUTPUT_CH), sample.shape
    assert bool(jnp.all(jnp.isfinite(sample)))

    # Numerical self-check against a plain-JAX transcription of the PyTorch module.
    # (kernel uses bf16 MXU operands, tanh-GELU and an approx reciprocal, so allow ~3e-2.)
    ref = jax.jit(_reference_forward)(params, model_input, timestep, encoder_hidden_states)
    ref = jax.block_until_ready(ref)
    assert bool(jnp.allclose(sample, ref, rtol=3e-2, atol=3e-2)), \
        float(jnp.max(jnp.abs(sample - ref)))

    print("KERNEL_OK")
</pallas_src>

<mosaic_0001>
module attributes {stable_mosaic.version = 11 : i64} {
  func.func @_denoiser_kernel(%arg0: memref<8x32xf32, #tpu.memory_space<vmem>>, %arg1: memref<8x16xf32, #tpu.memory_space<vmem>>, %arg2: memref<16x8xf32, #tpu.memory_space<vmem>>, %arg3: memref<32x128xbf16, #tpu.memory_space<vmem>>, %arg4: memref<128x32xbf16, #tpu.memory_space<vmem>>, %arg5: memref<8x32xbf16, #tpu.memory_space<vmem>>, %arg6: memref<16x32xbf16, #tpu.memory_space<vmem>>, %arg7: memref<32x128xbf16, #tpu.memory_space<vmem>>, %arg8: memref<4x128xf32, #tpu.memory_space<vmem>>, %arg9: memref<5x32x96xbf16, #tpu.memory_space<vmem>>, %arg10: memref<5x32x32xbf16, #tpu.memory_space<vmem>>, %arg11: memref<5x32x128xbf16, #tpu.memory_space<vmem>>, %arg12: memref<5x128x32xbf16, #tpu.memory_space<vmem>>, %arg13: memref<5x4x128xf32, #tpu.memory_space<vmem>>, %arg14: memref<2x64x32xbf16, #tpu.memory_space<vmem>>, %arg15: memref<2x1x32xf32, #tpu.memory_space<vmem>>, %arg16: memref<16x128xf32, #tpu.memory_space<vmem>>) attributes {dimension_semantics = [], scalar_prefetch = 0 : i64, scratch_operands = 0 : i64, tpu.core_type = #tpu.core_type<tc>} {
    %c0 = arith.constant 0 : index
    %c0_0 = arith.constant 0 : index
    %0 = vector.load %arg8[%c0, %c0_0] : memref<4x128xf32, #tpu.memory_space<vmem>>, vector<4x128xf32>
    %1 = vector.extract_strided_slice %0 {offsets = [0, 0], sizes = [1, 32], strides = [1, 1]} : vector<4x128xf32> to vector<1x32xf32>
    %2 = vector.extract_strided_slice %0 {offsets = [0, 32], sizes = [1, 32], strides = [1, 1]} : vector<4x128xf32> to vector<1x32xf32>
    %3 = vector.extract_strided_slice %0 {offsets = [0, 64], sizes = [1, 32], strides = [1, 1]} : vector<4x128xf32> to vector<1x32xf32>
    %4 = vector.extract_strided_slice %0 {offsets = [0, 96], sizes = [1, 32], strides = [1, 1]} : vector<4x128xf32> to vector<1x32xf32>
    %5 = vector.extract_strided_slice %0 {offsets = [1, 0], sizes = [1, 32], strides = [1, 1]} : vector<4x128xf32> to vector<1x32xf32>
    %6 = vector.extract_strided_slice %0 {offsets = [1, 32], sizes = [1, 16], strides = [1, 1]} : vector<4x128xf32> to vector<1x16xf32>
    %7 = vector.extract_strided_slice %0 {offsets = [1, 48], sizes = [1, 16], strides = [1, 1]} : vector<4x128xf32> to vector<1x16xf32>
    %8 = vector.extract_strided_slice %0 {offsets = [2, 0], sizes = [1, 128], strides = [1, 1]} : vector<4x128xf32> to vector<1x128xf32>
    %9 = vector.extract_strided_slice %0 {offsets = [3, 0], sizes = [1, 128], strides = [1, 1]} : vector<4x128xf32> to vector<1x128xf32>
    %10 = tpu.iota {dimensions = array<i32: 0>} : vector<32x32xi32>
    %11 = tpu.iota {dimensions = array<i32: 1>} : vector<32x32xi32>
    %c0_i32 = arith.constant 0 : i32
    %12 = vector.broadcast %c0_i32 : i32 to vector<32x32xi32>
    %c0_i32_1 = arith.constant 0 : i32
    %13 = vector.broadcast %c0_i32_1 : i32 to vector<32x32xi32>
    %c8_i32 = arith.constant 8 : i32
    %14 = vector.broadcast %c8_i32 : i32 to vector<32x32xi32>
    %15 = arith.cmpi sge, %10, %14 : vector<32x32xi32>
    %16 = arith.extui %15 : vector<32x32xi1> to vector<32x32xi32>
    %17 = arith.addi %12, %16 : vector<32x32xi32>
    %c20_i32 = arith.constant 20 : i32
    %18 = vector.broadcast %c20_i32 : i32 to vector<32x32xi32>
    %19 = arith.cmpi sge, %10, %18 : vector<32x32xi32>
    %20 = arith.extui %19 : vector<32x32xi1> to vector<32x32xi32>
    %21 = arith.addi %13, %20 : vector<32x32xi32>
    %c24_i32 = arith.constant 24 : i32
    %22 = vector.broadcast %c24_i32 : i32 to vector<32x32xi32>
    %23 = arith.subi %10, %22 : vector<32x32xi32>
    %c16_i32 = arith.constant 16 : i32
    %24 = vector.broadcast %c16_i32 : i32 to vector<32x32xi32>
    %25 = arith.cmpi slt, %10, %24 : vector<32x32xi32>
    %c24_i32_2 = arith.constant 24 : i32
    %26 = vector.broadcast %c24_i32_2 : i32 to vector<32x32xi32>
    %27 = arith.cmpi slt, %10, %26 : vector<32x32xi32>
    %28 = arith.select %27, %21, %23 : vector<32x32xi1>, vector<32x32xi32>
    %29 = arith.select %25, %17, %28 : vector<32x32xi1>, vector<32x32xi32>
    %c0_i32_3 = arith.constant 0 : i32
    %30 = vector.broadcast %c0_i32_3 : i32 to vector<32x32xi32>
    %c0_i32_4 = arith.constant 0 : i32
    %31 = vector.broadcast %c0_i32_4 : i32 to vector<32x32xi32>
    %c8_i32_5 = arith.constant 8 : i32
    %32 = vector.broadcast %c8_i32_5 : i32 to vector<32x32xi32>
    %33 = arith.cmpi sge, %11, %32 : vector<32x32xi32>
    %34 = arith.extui %33 : vector<32x32xi1> to vector<32x32xi32>
    %35 = arith.addi %30, %34 : vector<32x32xi32>
    %c20_i32_6 = arith.constant 20 : i32
    %36 = vector.broadcast %c20_i32_6 : i32 to vector<32x32xi32>
    %37 = arith.cmpi sge, %11, %36 : vector<32x32xi32>
    %38 = arith.extui %37 : vector<32x32xi1> to vector<32x32xi32>
    %39 = arith.addi %31, %38 : vector<32x32xi32>
    %c24_i32_7 = arith.constant 24 : i32
    %40 = vector.broadcast %c24_i32_7 : i32 to vector<32x32xi32>
    %41 = arith.subi %11, %40 : vector<32x32xi32>
    %c16_i32_8 = arith.constant 16 : i32
    %42 = vector.broadcast %c16_i32_8 : i32 to vector<32x32xi32>
    %43 = arith.cmpi slt, %11, %42 : vector<32x32xi32>
    %c24_i32_9 = arith.constant 24 : i32
    %44 = vector.broadcast %c24_i32_9 : i32 to vector<32x32xi32>
    %45 = arith.cmpi slt, %11, %44 : vector<32x32xi32>
    %46 = arith.select %45, %39, %41 : vector<32x32xi1>, vector<32x32xi32>
    %47 = arith.select %43, %35, %46 : vector<32x32xi1>, vector<32x32xi32>
    %48 = arith.cmpi eq, %29, %47 : vector<32x32xi32>
    %cst = arith.constant 0.000000e+00 : f32
    %cst_10 = arith.constant -1.000000e+30 : f32
    %49 = vector.broadcast %cst : f32 to vector<32x32xf32>
    %50 = vector.broadcast %cst_10 : f32 to vector<32x32xf32>
    %51 = arith.select %48, %49, %50 : vector<32x32xi1>, vector<32x32xf32>
    %52 = tpu.concatenate %51, %51, %51, %51 in 0 : vector<32x32xf32>, vector<32x32xf32>, vector<32x32xf32>, vector<32x32xf32> -> vector<128x32xf32>
    %53 = tpu.iota {dimensions = array<i32: 1>} : vector<32x32xi32>
    %c0_i32_11 = arith.constant 0 : i32
    %54 = vector.broadcast %c0_i32_11 : i32 to vector<32x32xi32>
    %55 = arith.cmpi sge, %53, %54 : vector<32x32xi32>
    %c8_i32_12 = arith.constant 8 : i32
    %56 = vector.broadcast %c8_i32_12 : i32 to vector<32x32xi32>
    %57 = arith.cmpi slt, %53, %56 : vector<32x32xi32>
    %58 = arith.andi %55, %57 : vector<32x32xi1>
    %cst_13 = arith.constant 1.000000e+00 : f32
    %cst_14 = arith.constant 0.000000e+00 : f32
    %59 = vector.broadcast %cst_13 : f32 to vector<32x32xf32>
    %60 = vector.broadcast %cst_14 : f32 to vector<32x32xf32>
    %61 = arith.select %58, %59, %60 : vector<32x32xi1>, vector<32x32xf32>
    %c8_i32_15 = arith.constant 8 : i32
    %62 = vector.broadcast %c8_i32_15 : i32 to vector<32x32xi32>
    %63 = arith.cmpi sge, %53, %62 : vector<32x32xi32>
    %c16_i32_16 = arith.constant 16 : i32
    %64 = vector.broadcast %c16_i32_16 : i32 to vector<32x32xi32>
    %65 = arith.cmpi slt, %53, %64 : vector<32x32xi32>
    %66 = arith.andi %63, %65 : vector<32x32xi1>
    %cst_17 = arith.constant 1.000000e+00 : f32
    %cst_18 = arith.constant 0.000000e+00 : f32
    %67 = vector.broadcast %cst_17 : f32 to vector<32x32xf32>
    %68 = vector.broadcast %cst_18 : f32 to vector<32x32xf32>
    %69 = arith.select %66, %67, %68 : vector<32x32xi1>, vector<32x32xf32>
    %c16_i32_19 = arith.constant 16 : i32
    %70 = vector.broadcast %c16_i32_19 : i32 to vector<32x32xi32>
    %71 = arith.cmpi sge, %53, %70 : vector<32x32xi32>
    %c24_i32_20 = arith.constant 24 : i32
    %72 = vector.broadcast %c24_i32_20 : i32 to vector<32x32xi32>
    %73 = arith.cmpi slt, %53, %72 : vector<32x32xi32>
    %74 = arith.andi %71, %73 : vector<32x32xi1>
    %cst_21 = arith.constant 1.000000e+00 : f32
    %cst_22 = arith.constant 0.000000e+00 : f32
    %75 = vector.broadcast %cst_21 : f32 to vector<32x32xf32>
    %76 = vector.broadcast %cst_22 : f32 to vector<32x32xf32>
    %77 = arith.select %74, %75, %76 : vector<32x32xi1>, vector<32x32xf32>
    %c24_i32_23 = arith.constant 24 : i32
    %78 = vector.broadcast %c24_i32_23 : i32 to vector<32x32xi32>
    %79 = arith.cmpi sge, %53, %78 : vector<32x32xi32>
    %c32_i32 = arith.constant 32 : i32
    %80 = vector.broadcast %c32_i32 : i32 to vector<32x32xi32>
    %81 = arith.cmpi slt, %53, %80 : vector<32x32xi32>
    %82 = arith.andi %79, %81 : vector<32x32xi1>
    %cst_24 = arith.constant 1.000000e+00 : f32
    %cst_25 = arith.constant 0.000000e+00 : f32
    %83 = vector.broadcast %cst_24 : f32 to vector<32x32xf32>
    %84 = vector.broadcast %cst_25 : f32 to vector<32x32xf32>
    %85 = arith.select %82, %83, %84 : vector<32x32xi1>, vector<32x32xf32>
    %86 = tpu.concatenate %61, %69, %77, %85 in 0 : vector<32x32xf32>, vector<32x32xf32>, vector<32x32xf32>, vector<32x32xf32> -> vector<128x32xf32>
    %c0_26 = arith.constant 0 : index
    %c0_27 = arith.constant 0 : index
    %87 = vector.load %arg0[%c0_26, %c0_27] : memref<8x32xf32, #tpu.memory_space<vmem>>, vector<8x32xf32>
    %88 = arith.truncf %87 : vector<8x32xf32> to vector<8x32xbf16>
    %c0_28 = arith.constant 0 : index
    %c0_29 = arith.constant 0 : index
    %89 = vector.load %arg3[%c0_28, %c0_29] : memref<32x128xbf16, #tpu.memory_space<vmem>>, vector<32x128xbf16>
    %cst_30 = arith.constant dense<0.000000e+00> : vector<8x128xf32>
    %90 = tpu.matmul %88, %89, %cst_30 {dimension_numbers = #tpu.dot_dimension_numbers<[1], [0], [0], [1], [0, 0, 1, 1], [], []>} : vector<8x32xbf16>, vector<32x128xbf16>, vector<8x128xf32> -> vector<8x128xf32>
    %91 = vector.broadcast %8 : vector<1x128xf32> to vector<8x128xf32>
    %92 = arith.addf %90, %91 : vector<8x128xf32>
    %cst_31 = arith.constant 5.000000e-01 : f32
    %93 = vector.broadcast %cst_31 : f32 to vector<8x128xf32>
    %94 = arith.mulf %93, %92 : vector<8x128xf32>
    %cst_32 = arith.constant 4.471500e-02 : f32
    %95 = vector.broadcast %cst_32 : f32 to vector<8x128xf32>
    %96 = arith.mulf %95, %92 : vector<8x128xf32>
    %97 = arith.mulf %96, %92 : vector<8x128xf32>
    %98 = arith.mulf %97, %92 : vector<8x128xf32>
    %99 = arith.addf %92, %98 : vector<8x128xf32>
    %cst_33 = arith.constant 0.797884583 : f32
    %100 = vector.broadcast %cst_33 : f32 to vector<8x128xf32>
    %101 = arith.mulf %100, %99 : vector<8x128xf32>
    %102 = math.tanh %101 : vector<8x128xf32>
    %cst_34 = arith.constant 1.000000e+00 : f32
    %103 = vector.broadcast %cst_34 : f32 to vector<8x128xf32>
    %104 = arith.addf %103, %102 : vector<8x128xf32>
    %105 = arith.mulf %94, %104 : vector<8x128xf32>
    %106 = arith.truncf %105 : vector<8x128xf32> to vector<8x128xbf16>
    %c0_35 = arith.constant 0 : index
    %c0_36 = arith.constant 0 : index
    %107 = vector.load %arg4[%c0_35, %c0_36] : memref<128x32xbf16, #tpu.memory_space<vmem>>, vector<128x32xbf16>
    %cst_37 = arith.constant dense<0.000000e+00> : vector<8x32xf32>
    %108 = tpu.matmul %106, %107, %cst_37 {dimension_numbers = #tpu.dot_dimension_numbers<[1], [0], [0], [1], [0, 0, 1, 1], [], []>} : vector<8x128xbf16>, vector<128x32xbf16>, vector<8x32xf32> -> vector<8x32xf32>
    %109 = vector.broadcast %3 : vector<1x32xf32> to vector<8x32xf32>
    %110 = arith.addf %108, %109 : vector<8x32xf32>
    %c0_38 = arith.constant 0 : index
    %c0_39 = arith.constant 0 : index
    %111 = vector.load %arg1[%c0_38, %c0_39] : memref<8x16xf32, #tpu.memory_space<vmem>>, vector<8x16xf32>
    %cst_40 = arith.constant dense<0.000000e+00> : vector<8xf32>
    %112 = vector.multi_reduction <add>, %111, %cst_40 [1] : vector<8x16xf32> to vector<8xf32>
    %113 = vector.shape_cast %112 : vector<8xf32> to vector<8x1xf32>
    %cst_41 = arith.constant 1.600000e+01 : f32
    %114 = vector.broadcast %cst_41 : f32 to vector<8x1xf32>
    %115 = arith.divf %113, %114 : vector<8x1xf32>
    %116 = vector.broadcast %115 : vector<8x1xf32> to vector<8x16xf32>
    %117 = arith.subf %111, %116 : vector<8x16xf32>
    %118 = arith.mulf %117, %117 : vector<8x16xf32>
    %cst_42 = arith.constant dense<0.000000e+00> : vector<8xf32>
    %119 = vector.multi_reduction <add>, %118, %cst_42 [1] : vector<8x16xf32> to vector<8xf32>
    %120 = vector.shape_cast %119 : vector<8xf32> to vector<8x1xf32>
    %cst_43 = arith.constant 1.600000e+01 : f32
    %121 = vector.broadcast %cst_43 : f32 to vector<8x1xf32>
    %122 = arith.divf %120, %121 : vector<8x1xf32>
    %123 = vector.broadcast %115 : vector<8x1xf32> to vector<8x16xf32>
    %124 = arith.subf %111, %123 : vector<8x16xf32>
    %cst_44 = arith.constant 9.99999974E-6 : f32
    %125 = vector.broadcast %cst_44 : f32 to vector<8x1xf32>
    %126 = arith.addf %122, %125 : vector<8x1xf32>
    %127 = math.rsqrt %126 : vector<8x1xf32>
    %128 = vector.broadcast %127 : vector<8x1xf32> to vector<8x16xf32>
    %129 = arith.mulf %124, %128 : vector<8x16xf32>
    %130 = vector.broadcast %6 : vector<1x16xf32> to vector<8x16xf32>
    %131 = arith.mulf %129, %130 : vector<8x16xf32>
    %132 = vector.broadcast %7 : vector<1x16xf32> to vector<8x16xf32>
    %133 = arith.addf %131, %132 : vector<8x16xf32>
    %134 = arith.truncf %133 : vector<8x16xf32> to vector<8x16xbf16>
    %c0_45 = arith.constant 0 : index
    %c0_46 = arith.constant 0 : index
    %135 = vector.load %arg6[%c0_45, %c0_46] : memref<16x32xbf16, #tpu.memory_space<vmem>>, vector<16x32xbf16>
    %cst_47 = arith.constant dense<0.000000e+00> : vector<8x32xf32>
    %136 = tpu.matmul %134, %135, %cst_47 {dimension_numbers = #tpu.dot_dimension_numbers<[1], [0], [0], [1], [0, 0, 1, 1], [], []>} : vector<8x16xbf16>, vector<16x32xbf16>, vector<8x32xf32> -> vector<8x32xf32>
    %137 = vector.broadcast %2 : vector<1x32xf32> to vector<8x32xf32>
    %138 = arith.addf %136, %137 : vector<8x32xf32>
    %c0_48 = arith.constant 0 : index
    %c0_49 = arith.constant 0 : index
    %139 = vector.load %arg2[%c0_48, %c0_49] : memref<16x8xf32, #tpu.memory_space<vmem>>, vector<16x8xf32>
    %140 = arith.truncf %139 : vector<16x8xf32> to vector<16x8xbf16>
    %c0_50 = arith.constant 0 : index
    %c0_51 = arith.constant 0 : index
    %141 = vector.load %arg5[%c0_50, %c0_51] : memref<8x32xbf16, #tpu.memory_space<vmem>>, vector<8x32xbf16>
    %cst_52 = arith.constant dense<0.000000e+00> : vector<16x32xf32>
    %142 = tpu.matmul %140, %141, %cst_52 {dimension_numbers = #tpu.dot_dimension_numbers<[1], [0], [0], [1], [0, 0, 1, 1], [], []>} : vector<16x8xbf16>, vector<8x32xbf16>, vector<16x32xf32> -> vector<16x32xf32>
    %143 = vector.broadcast %1 : vector<1x32xf32> to vector<16x32xf32>
    %144 = arith.addf %142, %143 : vector<16x32xf32>
    %145 = tpu.concatenate %144, %138, %110 in 0 : vector<16x32xf32>, vector<8x32xf32>, vector<8x32xf32> -> vector<32x32xf32>
    %c0_53 = arith.constant 0 : index
    %c0_54 = arith.constant 0 : index
    %c0_55 = arith.constant 0 : index
    %146 = vector.load %arg13[%c0_53, %c0_54, %c0_55] : memref<5x4x128xf32, #tpu.memory_space<vmem>>, vector<1x4x128xf32>
    %147 = vector.shape_cast %146 : vector<1x4x128xf32> to vector<4x128xf32>
    %148 = vector.extract_strided_slice %147 {offsets = [0, 0], sizes = [1, 32], strides = [1, 1]} : vector<4x128xf32> to vector<1x32xf32>
    %149 = vector.extract_strided_slice %147 {offsets = [0, 32], sizes = [1, 32], strides = [1, 1]} : vector<4x128xf32> to vector<1x32xf32>
    %150 = vector.extract_strided_slice %147 {offsets = [0, 64], sizes = [1, 32], strides = [1, 1]} : vector<4x128xf32> to vector<1x32xf32>
    %151 = vector.extract_strided_slice %147 {offsets = [0, 96], sizes = [1, 32], strides = [1, 1]} : vector<4x128xf32> to vector<1x32xf32>
    %152 = vector.extract_strided_slice %147 {offsets = [1, 0], sizes = [1, 32], strides = [1, 1]} : vector<4x128xf32> to vector<1x32xf32>
    %153 = vector.extract_strided_slice %147 {offsets = [1, 32], sizes = [1, 32], strides = [1, 1]} : vector<4x128xf32> to vector<1x32xf32>
    %154 = vector.extract_strided_slice %147 {offsets = [2, 0], sizes = [1, 128], strides = [1, 1]} : vector<4x128xf32> to vector<1x128xf32>
    %cst_56 = arith.constant dense<0.000000e+00> : vector<32xf32>
    %155 = vector.multi_reduction <add>, %145, %cst_56 [1] : vector<32x32xf32> to vector<32xf32>
    %156 = vector.shape_cast %155 : vector<32xf32> to vector<32x1xf32>
    %cst_57 = arith.constant 3.200000e+01 : f32
    %157 = vector.broadcast %cst_57 : f32 to vector<32x1xf32>
    %158 = arith.divf %156, %157 : vector<32x1xf32>
    %159 = vector.broadcast %158 : vector<32x1xf32> to vector<32x32xf32>
    %160 = arith.subf %145, %159 : vector<32x32xf32>
    %161 = arith.mulf %160, %160 : vector<32x32xf32>
    %cst_58 = arith.constant dense<0.000000e+00> : vector<32xf32>
    %162 = vector.multi_reduction <add>, %161, %cst_58 [1] : vector<32x32xf32> to vector<32xf32>
    %163 = vector.shape_cast %162 : vector<32xf32> to vector<32x1xf32>
    %cst_59 = arith.constant 3.200000e+01 : f32
    %164 = vector.broadcast %cst_59 : f32 to vector<32x1xf32>
    %165 = arith.divf %163, %164 : vector<32x1xf32>
    %166 = vector.broadcast %158 : vector<32x1xf32> to vector<32x32xf32>
    %167 = arith.subf %145, %166 : vector<32x32xf32>
    %cst_60 = arith.constant 9.99999974E-6 : f32
    %168 = vector.broadcast %cst_60 : f32 to vector<32x1xf32>
    %169 = arith.addf %165, %168 : vector<32x1xf32>
    %170 = math.rsqrt %169 : vector<32x1xf32>
    %171 = vector.broadcast %170 : vector<32x1xf32> to vector<32x32xf32>
    %172 = arith.mulf %167, %171 : vector<32x32xf32>
    %173 = vector.broadcast %148 : vector<1x32xf32> to vector<32x32xf32>
    %174 = arith.mulf %172, %173 : vector<32x32xf32>
    %175 = vector.broadcast %149 : vector<1x32xf32> to vector<32x32xf32>
    %176 = arith.addf %174, %175 : vector<32x32xf32>
    %177 = arith.truncf %176 : vector<32x32xf32> to vector<32x32xbf16>
    %c0_61 = arith.constant 0 : index
    %c0_62 = arith.constant 0 : index
    %c0_63 = arith.constant 0 : index
    %178 = vector.load %arg9[%c0_61, %c0_62, %c0_63] : memref<5x32x96xbf16, #tpu.memory_space<vmem>>, vector<1x32x96xbf16>
    %179 = vector.shape_cast %178 : vector<1x32x96xbf16> to vector<32x96xbf16>
    %cst_64 = arith.constant dense<0.000000e+00> : vector<32x96xf32>
    %180 = tpu.matmul %177, %179, %cst_64 {dimension_numbers = #tpu.dot_dimension_numbers<[1], [0], [0], [1], [0, 0, 1, 1], [], []>} : vector<32x32xbf16>, vector<32x96xbf16>, vector<32x96xf32> -> vector<32x96xf32>
    %181 = vector.extract_strided_slice %180 {offsets = [0, 0], sizes = [32, 32], strides = [1, 1]} : vector<32x96xf32> to vector<32x32xf32>
    %182 = vector.extract_strided_slice %180 {offsets = [0, 32], sizes = [32, 32], strides = [1, 1]} : vector<32x96xf32> to vector<32x32xf32>
    %183 = vector.extract_strided_slice %180 {offsets = [0, 64], sizes = [32, 32], strides = [1, 1]} : vector<32x96xf32> to vector<32x32xf32>
    %184 = tpu.concatenate %181, %181, %181, %181 in 0 : vector<32x32xf32>, vector<32x32xf32>, vector<32x32xf32>, vector<32x32xf32> -> vector<128x32xf32>
    %185 = arith.mulf %184, %86 : vector<128x32xf32>
    %186 = arith.truncf %185 : vector<128x32xf32> to vector<128x32xbf16>
    %187 = arith.truncf %182 : vector<32x32xf32> to vector<32x32xbf16>
    %cst_65 = arith.constant dense<0.000000e+00> : vector<128x32xf32>
    %188 = tpu.matmul %186, %187, %cst_65 {dimension_numbers = #tpu.dot_dimension_numbers<[1], [1], [0], [0], [0, 0, 1, 0], [], []>} : vector<128x32xbf16>, vector<32x32xbf16>, vector<128x32xf32> -> vector<128x32xf32>
    %189 = arith.addf %188, %52 : vector<128x32xf32>
    %cst_66 = arith.constant dense<0xFF800000> : vector<128xf32>
    %190 = vector.multi_reduction <maximumf>, %189, %cst_66 [1] : vector<128x32xf32> to vector<128xf32>
    %191 = vector.shape_cast %190 : vector<128xf32> to vector<128x1xf32>
    %192 = vector.broadcast %191 : vector<128x1xf32> to vector<128x32xf32>
    %193 = arith.subf %189, %192 : vector<128x32xf32>
    %194 = math.exp %193 : vector<128x32xf32>
    %cst_67 = arith.constant dense<0.000000e+00> : vector<128xf32>
    %195 = vector.multi_reduction <add>, %194, %cst_67 [1] : vector<128x32xf32> to vector<128xf32>
    %196 = vector.shape_cast %195 : vector<128xf32> to vector<128x1xf32>
    %197 = tpu.reciprocal %196 {approx = true} : vector<128x1xf32> -> vector<128x1xf32>
    %198 = vector.broadcast %197 : vector<128x1xf32> to vector<128x32xf32>
    %199 = arith.mulf %194, %198 : vector<128x32xf32>
    %200 = arith.truncf %199 : vector<128x32xf32> to vector<128x32xbf16>
    %201 = arith.truncf %183 : vector<32x32xf32> to vector<32x32xbf16>
    %cst_68 = arith.constant dense<0.000000e+00> : vector<128x32xf32>
    %202 = tpu.matmul %200, %201, %cst_68 {dimension_numbers = #tpu.dot_dimension_numbers<[1], [0], [0], [1], [0, 0, 1, 1], [], []>} : vector<128x32xbf16>, vector<32x32xbf16>, vector<128x32xf32> -> vector<128x32xf32>
    %203 = arith.mulf %202, %86 : vector<128x32xf32>
    %204 = arith.truncf %203 : vector<128x32xf32> to vector<128x32xbf16>
    %c0_69 = arith.constant 0 : index
    %c0_70 = arith.constant 0 : index
    %c0_71 = arith.constant 0 : index
    %205 = vector.load %arg10[%c0_69, %c0_70, %c0_71] : memref<5x32x32xbf16, #tpu.memory_space<vmem>>, vector<1x32x32xbf16>
    %206 = vector.shape_cast %205 : vector<1x32x32xbf16> to vector<32x32xbf16>
    %cst_72 = arith.constant dense<0.000000e+00> : vector<128x32xf32>
    %207 = tpu.matmul %204, %206, %cst_72 {dimension_numbers = #tpu.dot_dimension_numbers<[1], [0], [0], [1], [0, 0, 1, 1], [], []>} : vector<128x32xbf16>, vector<32x32xbf16>, vector<128x32xf32> -> vector<128x32xf32>
    %208 = vector.extract_strided_slice %207 {offsets = [0, 0], sizes = [32, 32], strides = [1, 1]} : vector<128x32xf32> to vector<32x32xf32>
    %209 = vector.extract_strided_slice %207 {offsets = [32, 0], sizes = [32, 32], strides = [1, 1]} : vector<128x32xf32> to vector<32x32xf32>
    %210 = arith.addf %208, %209 : vector<32x32xf32>
    %211 = vector.extract_strided_slice %207 {offsets = [64, 0], sizes = [32, 32], strides = [1, 1]} : vector<128x32xf32> to vector<32x32xf32>
    %212 = arith.addf %210, %211 : vector<32x32xf32>
    %213 = vector.extract_strided_slice %207 {offsets = [96, 0], sizes = [32, 32], strides = [1, 1]} : vector<128x32xf32> to vector<32x32xf32>
    %214 = arith.addf %212, %213 : vector<32x32xf32>
    %215 = arith.addf %145, %214 : vector<32x32xf32>
    %216 = vector.broadcast %152 : vector<1x32xf32> to vector<32x32xf32>
    %217 = arith.addf %215, %216 : vector<32x32xf32>
    %cst_73 = arith.constant dense<0.000000e+00> : vector<32xf32>
    %218 = vector.multi_reduction <add>, %217, %cst_73 [1] : vector<32x32xf32> to vector<32xf32>
    %219 = vector.shape_cast %218 : vector<32xf32> to vector<32x1xf32>
    %cst_74 = arith.constant 3.200000e+01 : f32
    %220 = vector.broadcast %cst_74 : f32 to vector<32x1xf32>
    %221 = arith.divf %219, %220 : vector<32x1xf32>
    %222 = vector.broadcast %221 : vector<32x1xf32> to vector<32x32xf32>
    %223 = arith.subf %217, %222 : vector<32x32xf32>
    %224 = arith.mulf %223, %223 : vector<32x32xf32>
    %cst_75 = arith.constant dense<0.000000e+00> : vector<32xf32>
    %225 = vector.multi_reduction <add>, %224, %cst_75 [1] : vector<32x32xf32> to vector<32xf32>
    %226 = vector.shape_cast %225 : vector<32xf32> to vector<32x1xf32>
    %cst_76 = arith.constant 3.200000e+01 : f32
    %227 = vector.broadcast %cst_76 : f32 to vector<32x1xf32>
    %228 = arith.divf %226, %227 : vector<32x1xf32>
    %229 = vector.broadcast %221 : vector<32x1xf32> to vector<32x32xf32>
    %230 = arith.subf %217, %229 : vector<32x32xf32>
    %cst_77 = arith.constant 9.99999974E-6 : f32
    %231 = vector.broadcast %cst_77 : f32 to vector<32x1xf32>
    %232 = arith.addf %228, %231 : vector<32x1xf32>
    %233 = math.rsqrt %232 : vector<32x1xf32>
    %234 = vector.broadcast %233 : vector<32x1xf32> to vector<32x32xf32>
    %235 = arith.mulf %230, %234 : vector<32x32xf32>
    %236 = vector.broadcast %150 : vector<1x32xf32> to vector<32x32xf32>
    %237 = arith.mulf %235, %236 : vector<32x32xf32>
    %238 = vector.broadcast %151 : vector<1x32xf32> to vector<32x32xf32>
    %239 = arith.addf %237, %238 : vector<32x32xf32>
    %240 = arith.truncf %239 : vector<32x32xf32> to vector<32x32xbf16>
    %c0_78 = arith.constant 0 : index
    %c0_79 = arith.constant 0 : index
    %c0_80 = arith.constant 0 : index
    %241 = vector.load %arg11[%c0_78, %c0_79, %c0_80] : memref<5x32x128xbf16, #tpu.memory_space<vmem>>, vector<1x32x128xbf16>
    %242 = vector.shape_cast %241 : vector<1x32x128xbf16> to vector<32x128xbf16>
    %cst_81 = arith.constant dense<0.000000e+00> : vector<32x128xf32>
    %243 = tpu.matmul %240, %242, %cst_81 {dimension_numbers = #tpu.dot_dimension_numbers<[1], [0], [0], [1], [0, 0, 1, 1], [], []>} : vector<32x32xbf16>, vector<32x128xbf16>, vector<32x128xf32> -> vector<32x128xf32>
    %244 = vector.broadcast %154 : vector<1x128xf32> to vector<32x128xf32>
    %245 = arith.addf %243, %244 : vector<32x128xf32>
    %cst_82 = arith.constant 5.000000e-01 : f32
    %246 = vector.broadcast %cst_82 : f32 to vector<32x128xf32>
    %247 = arith.mulf %246, %245 : vector<32x128xf32>
    %cst_83 = arith.constant 4.471500e-02 : f32
    %248 = vector.broadcast %cst_83 : f32 to vector<32x128xf32>
    %249 = arith.mulf %248, %245 : vector<32x128xf32>
    %250 = arith.mulf %249, %245 : vector<32x128xf32>
    %251 = arith.mulf %250, %245 : vector<32x128xf32>
    %252 = arith.addf %245, %251 : vector<32x128xf32>
    %cst_84 = arith.constant 0.797884583 : f32
    %253 = vector.broadcast %cst_84 : f32 to vector<32x128xf32>
    %254 = arith.mulf %253, %252 : vector<32x128xf32>
    %255 = math.tanh %254 : vector<32x128xf32>
    %cst_85 = arith.constant 1.000000e+00 : f32
    %256 = vector.broadcast %cst_85 : f32 to vector<32x128xf32>
    %257 = arith.addf %256, %255 : vector<32x128xf32>
    %258 = arith.mulf %247, %257 : vector<32x128xf32>
    %259 = arith.truncf %258 : vector<32x128xf32> to vector<32x128xbf16>
    %c0_86 = arith.constant 0 : index
    %c0_87 = arith.constant 0 : index
    %c0_88 = arith.constant 0 : index
    %260 = vector.load %arg12[%c0_86, %c0_87, %c0_88] : memref<5x128x32xbf16, #tpu.memory_space<vmem>>, vector<1x128x32xbf16>
    %261 = vector.shape_cast %260 : vector<1x128x32xbf16> to vector<128x32xbf16>
    %cst_89 = arith.constant dense<0.000000e+00> : vector<32x32xf32>
    %262 = tpu.matmul %259, %261, %cst_89 {dimension_numbers = #tpu.dot_dimension_numbers<[1], [0], [0], [1], [0, 0, 1, 1], [], []>} : vector<32x128xbf16>, vector<128x32xbf16>, vector<32x32xf32> -> vector<32x32xf32>
    %263 = vector.broadcast %153 : vector<1x32xf32> to vector<32x32xf32>
    %264 = arith.addf %262, %263 : vector<32x32xf32>
    %265 = arith.addf %217, %264 : vector<32x32xf32>
    %c1 = arith.constant 1 : index
    %c0_90 = arith.constant 0 : index
    %c0_91 = arith.constant 0 : index
    %266 = vector.load %arg13[%c1, %c0_90, %c0_91] : memref<5x4x128xf32, #tpu.memory_space<vmem>>, vector<1x4x128xf32>
    %267 = vector.shape_cast %266 : vector<1x4x128xf32> to vector<4x128xf32>
    %268 = vector.extract_strided_slice %267 {offsets = [0, 0], sizes = [1, 32], strides = [1, 1]} : vector<4x128xf32> to vector<1x32xf32>
    %269 = vector.extract_strided_slice %267 {offsets = [0, 32], sizes = [1, 32], strides = [1, 1]} : vector<4x128xf32> to vector<1x32xf32>
    %270 = vector.extract_strided_slice %267 {offsets = [0, 64], sizes = [1, 32], strides = [1, 1]} : vector<4x128xf32> to vector<1x32xf32>
    %271 = vector.extract_strided_slice %267 {offsets = [0, 96], sizes = [1, 32], strides = [1, 1]} : vector<4x128xf32> to vector<1x32xf32>
    %272 = vector.extract_strided_slice %267 {offsets = [1, 0], sizes = [1, 32], strides = [1, 1]} : vector<4x128xf32> to vector<1x32xf32>
    %273 = vector.extract_strided_slice %267 {offsets = [1, 32], sizes = [1, 32], strides = [1, 1]} : vector<4x128xf32> to vector<1x32xf32>
    %274 = vector.extract_strided_slice %267 {offsets = [2, 0], sizes = [1, 128], strides = [1, 1]} : vector<4x128xf32> to vector<1x128xf32>
    %cst_92 = arith.constant dense<0.000000e+00> : vector<32xf32>
    %275 = vector.multi_reduction <add>, %265, %cst_92 [1] : vector<32x32xf32> to vector<32xf32>
    %276 = vector.shape_cast %275 : vector<32xf32> to vector<32x1xf32>
    %cst_93 = arith.constant 3.200000e+01 : f32
    %277 = vector.broadcast %cst_93 : f32 to vector<32x1xf32>
    %278 = arith.divf %276, %277 : vector<32x1xf32>
    %279 = vector.broadcast %278 : vector<32x1xf32> to vector<32x32xf32>
    %280 = arith.subf %265, %279 : vector<32x32xf32>
    %281 = arith.mulf %280, %280 : vector<32x32xf32>
    %cst_94 = arith.constant dense<0.000000e+00> : vector<32xf32>
    %282 = vector.multi_reduction <add>, %281, %cst_94 [1] : vector<32x32xf32> to vector<32xf32>
    %283 = vector.shape_cast %282 : vector<32xf32> to vector<32x1xf32>
    %cst_95 = arith.constant 3.200000e+01 : f32
    %284 = vector.broadcast %cst_95 : f32 to vector<32x1xf32>
    %285 = arith.divf %283, %284 : vector<32x1xf32>
    %286 = vector.broadcast %278 : vector<32x1xf32> to vector<32x32xf32>
    %287 = arith.subf %265, %286 : vector<32x32xf32>
    %cst_96 = arith.constant 9.99999974E-6 : f32
    %288 = vector.broadcast %cst_96 : f32 to vector<32x1xf32>
    %289 = arith.addf %285, %288 : vector<32x1xf32>
    %290 = math.rsqrt %289 : vector<32x1xf32>
    %291 = vector.broadcast %290 : vector<32x1xf32> to vector<32x32xf32>
    %292 = arith.mulf %287, %291 : vector<32x32xf32>
    %293 = vector.broadcast %268 : vector<1x32xf32> to vector<32x32xf32>
    %294 = arith.mulf %292, %293 : vector<32x32xf32>
    %295 = vector.broadcast %269 : vector<1x32xf32> to vector<32x32xf32>
    %296 = arith.addf %294, %295 : vector<32x32xf32>
    %297 = arith.truncf %296 : vector<32x32xf32> to vector<32x32xbf16>
    %c1_97 = arith.constant 1 : index
    %c0_98 = arith.constant 0 : index
    %c0_99 = arith.constant 0 : index
    %298 = vector.load %arg9[%c1_97, %c0_98, %c0_99] : memref<5x32x96xbf16, #tpu.memory_space<vmem>>, vector<1x32x96xbf16>
    %299 = vector.shape_cast %298 : vector<1x32x96xbf16> to vector<32x96xbf16>
    %cst_100 = arith.constant dense<0.000000e+00> : vector<32x96xf32>
    %300 = tpu.matmul %297, %299, %cst_100 {dimension_numbers = #tpu.dot_dimension_numbers<[1], [0], [0], [1], [0, 0, 1, 1], [], []>} : vector<32x32xbf16>, vector<32x96xbf16>, vector<32x96xf32> -> vector<32x96xf32>
    %301 = vector.extract_strided_slice %300 {offsets = [0, 0], sizes = [32, 32], strides = [1, 1]} : vector<32x96xf32> to vector<32x32xf32>
    %302 = vector.extract_strided_slice %300 {offsets = [0, 32], sizes = [32, 32], strides = [1, 1]} : vector<32x96xf32> to vector<32x32xf32>
    %303 = vector.extract_strided_slice %300 {offsets = [0, 64], sizes = [32, 32], strides = [1, 1]} : vector<32x96xf32> to vector<32x32xf32>
    %304 = tpu.concatenate %301, %301, %301, %301 in 0 : vector<32x32xf32>, vector<32x32xf32>, vector<32x32xf32>, vector<32x32xf32> -> vector<128x32xf32>
    %305 = arith.mulf %304, %86 : vector<128x32xf32>
    %306 = arith.truncf %305 : vector<128x32xf32> to vector<128x32xbf16>
    %307 = arith.truncf %302 : vector<32x32xf32> to vector<32x32xbf16>
    %cst_101 = arith.constant dense<0.000000e+00> : vector<128x32xf32>
    %308 = tpu.matmul %306, %307, %cst_101 {dimension_numbers = #tpu.dot_dimension_numbers<[1], [1], [0], [0], [0, 0, 1, 0], [], []>} : vector<128x32xbf16>, vector<32x32xbf16>, vector<128x32xf32> -> vector<128x32xf32>
    %309 = arith.addf %308, %52 : vector<128x32xf32>
    %cst_102 = arith.constant dense<0xFF800000> : vector<128xf32>
    %310 = vector.multi_reduction <maximumf>, %309, %cst_102 [1] : vector<128x32xf32> to vector<128xf32>
    %311 = vector.shape_cast %310 : vector<128xf32> to vector<128x1xf32>
    %312 = vector.broadcast %311 : vector<128x1xf32> to vector<128x32xf32>
    %313 = arith.subf %309, %312 : vector<128x32xf32>
    %314 = math.exp %313 : vector<128x32xf32>
    %cst_103 = arith.constant dense<0.000000e+00> : vector<128xf32>
    %315 = vector.multi_reduction <add>, %314, %cst_103 [1] : vector<128x32xf32> to vector<128xf32>
    %316 = vector.shape_cast %315 : vector<128xf32> to vector<128x1xf32>
    %317 = tpu.reciprocal %316 {approx = true} : vector<128x1xf32> -> vector<128x1xf32>
    %318 = vector.broadcast %317 : vector<128x1xf32> to vector<128x32xf32>
    %319 = arith.mulf %314, %318 : vector<128x32xf32>
    %320 = arith.truncf %319 : vector<128x32xf32> to vector<128x32xbf16>
    %321 = arith.truncf %303 : vector<32x32xf32> to vector<32x32xbf16>
    %cst_104 = arith.constant dense<0.000000e+00> : vector<128x32xf32>
    %322 = tpu.matmul %320, %321, %cst_104 {dimension_numbers = #tpu.dot_dimension_numbers<[1], [0], [0], [1], [0, 0, 1, 1], [], []>} : vector<128x32xbf16>, vector<32x32xbf16>, vector<128x32xf32> -> vector<128x32xf32>
    %323 = arith.mulf %322, %86 : vector<128x32xf32>
    %324 = arith.truncf %323 : vector<128x32xf32> to vector<128x32xbf16>
    %c1_105 = arith.constant 1 : index
    %c0_106 = arith.constant 0 : index
    %c0_107 = arith.constant 0 : index
    %325 = vector.load %arg10[%c1_105, %c0_106, %c0_107] : memref<5x32x32xbf16, #tpu.memory_space<vmem>>, vector<1x32x32xbf16>
    %326 = vector.shape_cast %325 : vector<1x32x32xbf16> to vector<32x32xbf16>
    %cst_108 = arith.constant dense<0.000000e+00> : vector<128x32xf32>
    %327 = tpu.matmul %324, %326, %cst_108 {dimension_numbers = #tpu.dot_dimension_numbers<[1], [0], [0], [1], [0, 0, 1, 1], [], []>} : vector<128x32xbf16>, vector<32x32xbf16>, vector<128x32xf32> -> vector<128x32xf32>
    %328 = vector.extract_strided_slice %327 {offsets = [0, 0], sizes = [32, 32], strides = [1, 1]} : vector<128x32xf32> to vector<32x32xf32>
    %329 = vector.extract_strided_slice %327 {offsets = [32, 0], sizes = [32, 32], strides = [1, 1]} : vector<128x32xf32> to vector<32x32xf32>
    %330 = arith.addf %328, %329 : vector<32x32xf32>
    %331 = vector.extract_strided_slice %327 {offsets = [64, 0], sizes = [32, 32], strides = [1, 1]} : vector<128x32xf32> to vector<32x32xf32>
    %332 = arith.addf %330, %331 : vector<32x32xf32>
    %333 = vector.extract_strided_slice %327 {offsets = [96, 0], sizes = [32, 32], strides = [1, 1]} : vector<128x32xf32> to vector<32x32xf32>
    %334 = arith.addf %332, %333 : vector<32x32xf32>
    %335 = arith.addf %265, %334 : vector<32x32xf32>
    %336 = vector.broadcast %272 : vector<1x32xf32> to vector<32x32xf32>
    %337 = arith.addf %335, %336 : vector<32x32xf32>
    %cst_109 = arith.constant dense<0.000000e+00> : vector<32xf32>
    %338 = vector.multi_reduction <add>, %337, %cst_109 [1] : vector<32x32xf32> to vector<32xf32>
    %339 = vector.shape_cast %338 : vector<32xf32> to vector<32x1xf32>
    %cst_110 = arith.constant 3.200000e+01 : f32
    %340 = vector.broadcast %cst_110 : f32 to vector<32x1xf32>
    %341 = arith.divf %339, %340 : vector<32x1xf32>
    %342 = vector.broadcast %341 : vector<32x1xf32> to vector<32x32xf32>
    %343 = arith.subf %337, %342 : vector<32x32xf32>
    %344 = arith.mulf %343, %343 : vector<32x32xf32>
    %cst_111 = arith.constant dense<0.000000e+00> : vector<32xf32>
    %345 = vector.multi_reduction <add>, %344, %cst_111 [1] : vector<32x32xf32> to vector<32xf32>
    %346 = vector.shape_cast %345 : vector<32xf32> to vector<32x1xf32>
    %cst_112 = arith.constant 3.200000e+01 : f32
    %347 = vector.broadcast %cst_112 : f32 to vector<32x1xf32>
    %348 = arith.divf %346, %347 : vector<32x1xf32>
    %349 = vector.broadcast %341 : vector<32x1xf32> to vector<32x32xf32>
    %350 = arith.subf %337, %349 : vector<32x32xf32>
    %cst_113 = arith.constant 9.99999974E-6 : f32
    %351 = vector.broadcast %cst_113 : f32 to vector<32x1xf32>
    %352 = arith.addf %348, %351 : vector<32x1xf32>
    %353 = math.rsqrt %352 : vector<32x1xf32>
    %354 = vector.broadcast %353 : vector<32x1xf32> to vector<32x32xf32>
    %355 = arith.mulf %350, %354 : vector<32x32xf32>
    %356 = vector.broadcast %270 : vector<1x32xf32> to vector<32x32xf32>
    %357 = arith.mulf %355, %356 : vector<32x32xf32>
    %358 = vector.broadcast %271 : vector<1x32xf32> to vector<32x32xf32>
    %359 = arith.addf %357, %358 : vector<32x32xf32>
    %360 = arith.truncf %359 : vector<32x32xf32> to vector<32x32xbf16>
    %c1_114 = arith.constant 1 : index
    %c0_115 = arith.constant 0 : index
    %c0_116 = arith.constant 0 : index
    %361 = vector.load %arg11[%c1_114, %c0_115, %c0_116] : memref<5x32x128xbf16, #tpu.memory_space<vmem>>, vector<1x32x128xbf16>
    %362 = vector.shape_cast %361 : vector<1x32x128xbf16> to vector<32x128xbf16>
    %cst_117 = arith.constant dense<0.000000e+00> : vector<32x128xf32>
    %363 = tpu.matmul %360, %362, %cst_117 {dimension_numbers = #tpu.dot_dimension_numbers<[1], [0], [0], [1], [0, 0, 1, 1], [], []>} : vector<32x32xbf16>, vector<32x128xbf16>, vector<32x128xf32> -> vector<32x128xf32>
    %364 = vector.broadcast %274 : vector<1x128xf32> to vector<32x128xf32>
    %365 = arith.addf %363, %364 : vector<32x128xf32>
    %cst_118 = arith.constant 5.000000e-01 : f32
    %366 = vector.broadcast %cst_118 : f32 to vector<32x128xf32>
    %367 = arith.mulf %366, %365 : vector<32x128xf32>
    %cst_119 = arith.constant 4.471500e-02 : f32
    %368 = vector.broadcast %cst_119 : f32 to vector<32x128xf32>
    %369 = arith.mulf %368, %365 : vector<32x128xf32>
    %370 = arith.mulf %369, %365 : vector<32x128xf32>
    %371 = arith.mulf %370, %365 : vector<32x128xf32>
    %372 = arith.addf %365, %371 : vector<32x128xf32>
    %cst_120 = arith.constant 0.797884583 : f32
    %373 = vector.broadcast %cst_120 : f32 to vector<32x128xf32>
    %374 = arith.mulf %373, %372 : vector<32x128xf32>
    %375 = math.tanh %374 : vector<32x128xf32>
    %cst_121 = arith.constant 1.000000e+00 : f32
    %376 = vector.broadcast %cst_121 : f32 to vector<32x128xf32>
    %377 = arith.addf %376, %375 : vector<32x128xf32>
    %378 = arith.mulf %367, %377 : vector<32x128xf32>
    %379 = arith.truncf %378 : vector<32x128xf32> to vector<32x128xbf16>
    %c1_122 = arith.constant 1 : index
    %c0_123 = arith.constant 0 : index
    %c0_124 = arith.constant 0 : index
    %380 = vector.load %arg12[%c1_122, %c0_123, %c0_124] : memref<5x128x32xbf16, #tpu.memory_space<vmem>>, vector<1x128x32xbf16>
    %381 = vector.shape_cast %380 : vector<1x128x32xbf16> to vector<128x32xbf16>
    %cst_125 = arith.constant dense<0.000000e+00> : vector<32x32xf32>
    %382 = tpu.matmul %379, %381, %cst_125 {dimension_numbers = #tpu.dot_dimension_numbers<[1], [0], [0], [1], [0, 0, 1, 1], [], []>} : vector<32x128xbf16>, vector<128x32xbf16>, vector<32x32xf32> -> vector<32x32xf32>
    %383 = vector.broadcast %273 : vector<1x32xf32> to vector<32x32xf32>
    %384 = arith.addf %382, %383 : vector<32x32xf32>
    %385 = arith.addf %337, %384 : vector<32x32xf32>
    %c2 = arith.constant 2 : index
    %c0_126 = arith.constant 0 : index
    %c0_127 = arith.constant 0 : index
    %386 = vector.load %arg13[%c2, %c0_126, %c0_127] : memref<5x4x128xf32, #tpu.memory_space<vmem>>, vector<1x4x128xf32>
    %387 = vector.shape_cast %386 : vector<1x4x128xf32> to vector<4x128xf32>
    %388 = vector.extract_strided_slice %387 {offsets = [0, 0], sizes = [1, 32], strides = [1, 1]} : vector<4x128xf32> to vector<1x32xf32>
    %389 = vector.extract_strided_slice %387 {offsets = [0, 32], sizes = [1, 32], strides = [1, 1]} : vector<4x128xf32> to vector<1x32xf32>
    %390 = vector.extract_strided_slice %387 {offsets = [0, 64], sizes = [1, 32], strides = [1, 1]} : vector<4x128xf32> to vector<1x32xf32>
    %391 = vector.extract_strided_slice %387 {offsets = [0, 96], sizes = [1, 32], strides = [1, 1]} : vector<4x128xf32> to vector<1x32xf32>
    %392 = vector.extract_strided_slice %387 {offsets = [1, 0], sizes = [1, 32], strides = [1, 1]} : vector<4x128xf32> to vector<1x32xf32>
    %393 = vector.extract_strided_slice %387 {offsets = [1, 32], sizes = [1, 32], strides = [1, 1]} : vector<4x128xf32> to vector<1x32xf32>
    %394 = vector.extract_strided_slice %387 {offsets = [2, 0], sizes = [1, 128], strides = [1, 1]} : vector<4x128xf32> to vector<1x128xf32>
    %cst_128 = arith.constant dense<0.000000e+00> : vector<32xf32>
    %395 = vector.multi_reduction <add>, %385, %cst_128 [1] : vector<32x32xf32> to vector<32xf32>
    %396 = vector.shape_cast %395 : vector<32xf32> to vector<32x1xf32>
    %cst_129 = arith.constant 3.200000e+01 : f32
    %397 = vector.broadcast %cst_129 : f32 to vector<32x1xf32>
    %398 = arith.divf %396, %397 : vector<32x1xf32>
    %399 = vector.broadcast %398 : vector<32x1xf32> to vector<32x32xf32>
    %400 = arith.subf %385, %399 : vector<32x32xf32>
    %401 = arith.mulf %400, %400 : vector<32x32xf32>
    %cst_130 = arith.constant dense<0.000000e+00> : vector<32xf32>
    %402 = vector.multi_reduction <add>, %401, %cst_130 [1] : vector<32x32xf32> to vector<32xf32>
    %403 = vector.shape_cast %402 : vector<32xf32> to vector<32x1xf32>
    %cst_131 = arith.constant 3.200000e+01 : f32
    %404 = vector.broadcast %cst_131 : f32 to vector<32x1xf32>
    %405 = arith.divf %403, %404 : vector<32x1xf32>
    %406 = vector.broadcast %398 : vector<32x1xf32> to vector<32x32xf32>
    %407 = arith.subf %385, %406 : vector<32x32xf32>
    %cst_132 = arith.constant 9.99999974E-6 : f32
    %408 = vector.broadcast %cst_132 : f32 to vector<32x1xf32>
    %409 = arith.addf %405, %408 : vector<32x1xf32>
    %410 = math.rsqrt %409 : vector<32x1xf32>
    %411 = vector.broadcast %410 : vector<32x1xf32> to vector<32x32xf32>
    %412 = arith.mulf %407, %411 : vector<32x32xf32>
    %413 = vector.broadcast %388 : vector<1x32xf32> to vector<32x32xf32>
    %414 = arith.mulf %412, %413 : vector<32x32xf32>
    %415 = vector.broadcast %389 : vector<1x32xf32> to vector<32x32xf32>
    %416 = arith.addf %414, %415 : vector<32x32xf32>
    %417 = arith.truncf %416 : vector<32x32xf32> to vector<32x32xbf16>
    %c2_133 = arith.constant 2 : index
    %c0_134 = arith.constant 0 : index
    %c0_135 = arith.constant 0 : index
    %418 = vector.load %arg9[%c2_133, %c0_134, %c0_135] : memref<5x32x96xbf16, #tpu.memory_space<vmem>>, vector<1x32x96xbf16>
    %419 = vector.shape_cast %418 : vector<1x32x96xbf16> to vector<32x96xbf16>
    %cst_136 = arith.constant dense<0.000000e+00> : vector<32x96xf32>
    %420 = tpu.matmul %417, %419, %cst_136 {dimension_numbers = #tpu.dot_dimension_numbers<[1], [0], [0], [1], [0, 0, 1, 1], [], []>} : vector<32x32xbf16>, vector<32x96xbf16>, vector<32x96xf32> -> vector<32x96xf32>
    %421 = vector.extract_strided_slice %420 {offsets = [0, 0], sizes = [32, 32], strides = [1, 1]} : vector<32x96xf32> to vector<32x32xf32>
    %422 = vector.extract_strided_slice %420 {offsets = [0, 32], sizes = [32, 32], strides = [1, 1]} : vector<32x96xf32> to vector<32x32xf32>
    %423 = vector.extract_strided_slice %420 {offsets = [0, 64], sizes = [32, 32], strides = [1, 1]} : vector<32x96xf32> to vector<32x32xf32>
    %424 = tpu.concatenate %421, %421, %421, %421 in 0 : vector<32x32xf32>, vector<32x32xf32>, vector<32x32xf32>, vector<32x32xf32> -> vector<128x32xf32>
    %425 = arith.mulf %424, %86 : vector<128x32xf32>
    %426 = arith.truncf %425 : vector<128x32xf32> to vector<128x32xbf16>
    %427 = arith.truncf %422 : vector<32x32xf32> to vector<32x32xbf16>
    %cst_137 = arith.constant dense<0.000000e+00> : vector<128x32xf32>
    %428 = tpu.matmul %426, %427, %cst_137 {dimension_numbers = #tpu.dot_dimension_numbers<[1], [1], [0], [0], [0, 0, 1, 0], [], []>} : vector<128x32xbf16>, vector<32x32xbf16>, vector<128x32xf32> -> vector<128x32xf32>
    %429 = arith.addf %428, %52 : vector<128x32xf32>
    %cst_138 = arith.constant dense<0xFF800000> : vector<128xf32>
    %430 = vector.multi_reduction <maximumf>, %429, %cst_138 [1] : vector<128x32xf32> to vector<128xf32>
    %431 = vector.shape_cast %430 : vector<128xf32> to vector<128x1xf32>
    %432 = vector.broadcast %431 : vector<128x1xf32> to vector<128x32xf32>
    %433 = arith.subf %429, %432 : vector<128x32xf32>
    %434 = math.exp %433 : vector<128x32xf32>
    %cst_139 = arith.constant dense<0.000000e+00> : vector<128xf32>
    %435 = vector.multi_reduction <add>, %434, %cst_139 [1] : vector<128x32xf32> to vector<128xf32>
    %436 = vector.shape_cast %435 : vector<128xf32> to vector<128x1xf32>
    %437 = tpu.reciprocal %436 {approx = true} : vector<128x1xf32> -> vector<128x1xf32>
    %438 = vector.broadcast %437 : vector<128x1xf32> to vector<128x32xf32>
    %439 = arith.mulf %434, %438 : vector<128x32xf32>
    %440 = arith.truncf %439 : vector<128x32xf32> to vector<128x32xbf16>
    %441 = arith.truncf %423 : vector<32x32xf32> to vector<32x32xbf16>
    %cst_140 = arith.constant dense<0.000000e+00> : vector<128x32xf32>
    %442 = tpu.matmul %440, %441, %cst_140 {dimension_numbers = #tpu.dot_dimension_numbers<[1], [0], [0], [1], [0, 0, 1, 1], [], []>} : vector<128x32xbf16>, vector<32x32xbf16>, vector<128x32xf32> -> vector<128x32xf32>
    %443 = arith.mulf %442, %86 : vector<128x32xf32>
    %444 = arith.truncf %443 : vector<128x32xf32> to vector<128x32xbf16>
    %c2_141 = arith.constant 2 : index
    %c0_142 = arith.constant 0 : index
    %c0_143 = arith.constant 0 : index
    %445 = vector.load %arg10[%c2_141, %c0_142, %c0_143] : memref<5x32x32xbf16, #tpu.memory_space<vmem>>, vector<1x32x32xbf16>
    %446 = vector.shape_cast %445 : vector<1x32x32xbf16> to vector<32x32xbf16>
    %cst_144 = arith.constant dense<0.000000e+00> : vector<128x32xf32>
    %447 = tpu.matmul %444, %446, %cst_144 {dimension_numbers = #tpu.dot_dimension_numbers<[1], [0], [0], [1], [0, 0, 1, 1], [], []>} : vector<128x32xbf16>, vector<32x32xbf16>, vector<128x32xf32> -> vector<128x32xf32>
    %448 = vector.extract_strided_slice %447 {offsets = [0, 0], sizes = [32, 32], strides = [1, 1]} : vector<128x32xf32> to vector<32x32xf32>
    %449 = vector.extract_strided_slice %447 {offsets = [32, 0], sizes = [32, 32], strides = [1, 1]} : vector<128x32xf32> to vector<32x32xf32>
    %450 = arith.addf %448, %449 : vector<32x32xf32>
    %451 = vector.extract_strided_slice %447 {offsets = [64, 0], sizes = [32, 32], strides = [1, 1]} : vector<128x32xf32> to vector<32x32xf32>
    %452 = arith.addf %450, %451 : vector<32x32xf32>
    %453 = vector.extract_strided_slice %447 {offsets = [96, 0], sizes = [32, 32], strides = [1, 1]} : vector<128x32xf32> to vector<32x32xf32>
    %454 = arith.addf %452, %453 : vector<32x32xf32>
    %455 = arith.addf %385, %454 : vector<32x32xf32>
    %456 = vector.broadcast %392 : vector<1x32xf32> to vector<32x32xf32>
    %457 = arith.addf %455, %456 : vector<32x32xf32>
    %cst_145 = arith.constant dense<0.000000e+00> : vector<32xf32>
    %458 = vector.multi_reduction <add>, %457, %cst_145 [1] : vector<32x32xf32> to vector<32xf32>
    %459 = vector.shape_cast %458 : vector<32xf32> to vector<32x1xf32>
    %cst_146 = arith.constant 3.200000e+01 : f32
    %460 = vector.broadcast %cst_146 : f32 to vector<32x1xf32>
    %461 = arith.divf %459, %460 : vector<32x1xf32>
    %462 = vector.broadcast %461 : vector<32x1xf32> to vector<32x32xf32>
    %463 = arith.subf %457, %462 : vector<32x32xf32>
    %464 = arith.mulf %463, %463 : vector<32x32xf32>
    %cst_147 = arith.constant dense<0.000000e+00> : vector<32xf32>
    %465 = vector.multi_reduction <add>, %464, %cst_147 [1] : vector<32x32xf32> to vector<32xf32>
    %466 = vector.shape_cast %465 : vector<32xf32> to vector<32x1xf32>
    %cst_148 = arith.constant 3.200000e+01 : f32
    %467 = vector.broadcast %cst_148 : f32 to vector<32x1xf32>
    %468 = arith.divf %466, %467 : vector<32x1xf32>
    %469 = vector.broadcast %461 : vector<32x1xf32> to vector<32x32xf32>
    %470 = arith.subf %457, %469 : vector<32x32xf32>
    %cst_149 = arith.constant 9.99999974E-6 : f32
    %471 = vector.broadcast %cst_149 : f32 to vector<32x1xf32>
    %472 = arith.addf %468, %471 : vector<32x1xf32>
    %473 = math.rsqrt %472 : vector<32x1xf32>
    %474 = vector.broadcast %473 : vector<32x1xf32> to vector<32x32xf32>
    %475 = arith.mulf %470, %474 : vector<32x32xf32>
    %476 = vector.broadcast %390 : vector<1x32xf32> to vector<32x32xf32>
    %477 = arith.mulf %475, %476 : vector<32x32xf32>
    %478 = vector.broadcast %391 : vector<1x32xf32> to vector<32x32xf32>
    %479 = arith.addf %477, %478 : vector<32x32xf32>
    %480 = arith.truncf %479 : vector<32x32xf32> to vector<32x32xbf16>
    %c2_150 = arith.constant 2 : index
    %c0_151 = arith.constant 0 : index
    %c0_152 = arith.constant 0 : index
    %481 = vector.load %arg11[%c2_150, %c0_151, %c0_152] : memref<5x32x128xbf16, #tpu.memory_space<vmem>>, vector<1x32x128xbf16>
    %482 = vector.shape_cast %481 : vector<1x32x128xbf16> to vector<32x128xbf16>
    %cst_153 = arith.constant dense<0.000000e+00> : vector<32x128xf32>
    %483 = tpu.matmul %480, %482, %cst_153 {dimension_numbers = #tpu.dot_dimension_numbers<[1], [0], [0], [1], [0, 0, 1, 1], [], []>} : vector<32x32xbf16>, vector<32x128xbf16>, vector<32x128xf32> -> vector<32x128xf32>
    %484 = vector.broadcast %394 : vector<1x128xf32> to vector<32x128xf32>
    %485 = arith.addf %483, %484 : vector<32x128xf32>
    %cst_154 = arith.constant 5.000000e-01 : f32
    %486 = vector.broadcast %cst_154 : f32 to vector<32x128xf32>
    %487 = arith.mulf %486, %485 : vector<32x128xf32>
    %cst_155 = arith.constant 4.471500e-02 : f32
    %488 = vector.broadcast %cst_155 : f32 to vector<32x128xf32>
    %489 = arith.mulf %488, %485 : vector<32x128xf32>
    %490 = arith.mulf %489, %485 : vector<32x128xf32>
    %491 = arith.mulf %490, %485 : vector<32x128xf32>
    %492 = arith.addf %485, %491 : vector<32x128xf32>
    %cst_156 = arith.constant 0.797884583 : f32
    %493 = vector.broadcast %cst_156 : f32 to vector<32x128xf32>
    %494 = arith.mulf %493, %492 : vector<32x128xf32>
    %495 = math.tanh %494 : vector<32x128xf32>
    %cst_157 = arith.constant 1.000000e+00 : f32
    %496 = vector.broadcast %cst_157 : f32 to vector<32x128xf32>
    %497 = arith.addf %496, %495 : vector<32x128xf32>
    %498 = arith.mulf %487, %497 : vector<32x128xf32>
    %499 = arith.truncf %498 : vector<32x128xf32> to vector<32x128xbf16>
    %c2_158 = arith.constant 2 : index
    %c0_159 = arith.constant 0 : index
    %c0_160 = arith.constant 0 : index
    %500 = vector.load %arg12[%c2_158, %c0_159, %c0_160] : memref<5x128x32xbf16, #tpu.memory_space<vmem>>, vector<1x128x32xbf16>
    %501 = vector.shape_cast %500 : vector<1x128x32xbf16> to vector<128x32xbf16>
    %cst_161 = arith.constant dense<0.000000e+00> : vector<32x32xf32>
    %502 = tpu.matmul %499, %501, %cst_161 {dimension_numbers = #tpu.dot_dimension_numbers<[1], [0], [0], [1], [0, 0, 1, 1], [], []>} : vector<32x128xbf16>, vector<128x32xbf16>, vector<32x32xf32> -> vector<32x32xf32>
    %503 = vector.broadcast %393 : vector<1x32xf32> to vector<32x32xf32>
    %504 = arith.addf %502, %503 : vector<32x32xf32>
    %505 = arith.addf %457, %504 : vector<32x32xf32>
    %c0_162 = arith.constant 0 : index
    %c0_163 = arith.constant 0 : index
    %c0_164 = arith.constant 0 : index
    %506 = vector.load %arg14[%c0_162, %c0_163, %c0_164] : memref<2x64x32xbf16, #tpu.memory_space<vmem>>, vector<1x64x32xbf16>
    %507 = vector.shape_cast %506 : vector<1x64x32xbf16> to vector<64x32xbf16>
    %508 = arith.truncf %385 : vector<32x32xf32> to vector<32x32xbf16>
    %509 = vector.extract_strided_slice %507 {offsets = [0, 0], sizes = [32, 32], strides = [1, 1]} : vector<64x32xbf16> to vector<32x32xbf16>
    %cst_165 = arith.constant dense<0.000000e+00> : vector<32x32xf32>
    %510 = tpu.matmul %508, %509, %cst_165 {dimension_numbers = #tpu.dot_dimension_numbers<[1], [0], [0], [1], [0, 0, 1, 1], [], []>} : vector<32x32xbf16>, vector<32x32xbf16>, vector<32x32xf32> -> vector<32x32xf32>
    %511 = arith.truncf %505 : vector<32x32xf32> to vector<32x32xbf16>
    %512 = vector.extract_strided_slice %507 {offsets = [32, 0], sizes = [32, 32], strides = [1, 1]} : vector<64x32xbf16> to vector<32x32xbf16>
    %cst_166 = arith.constant dense<0.000000e+00> : vector<32x32xf32>
    %513 = tpu.matmul %511, %512, %cst_166 {dimension_numbers = #tpu.dot_dimension_numbers<[1], [0], [0], [1], [0, 0, 1, 1], [], []>} : vector<32x32xbf16>, vector<32x32xbf16>, vector<32x32xf32> -> vector<32x32xf32>
    %514 = arith.addf %510, %513 : vector<32x32xf32>
    %c0_167 = arith.constant 0 : index
    %c0_168 = arith.constant 0 : index
    %c0_169 = arith.constant 0 : index
    %515 = vector.load %arg15[%c0_167, %c0_168, %c0_169] : memref<2x1x32xf32, #tpu.memory_space<vmem>>, vector<1x1x32xf32>
    %516 = vector.shape_cast %515 : vector<1x1x32xf32> to vector<1x32xf32>
    %517 = vector.broadcast %516 : vector<1x32xf32> to vector<32x32xf32>
    %518 = arith.addf %514, %517 : vector<32x32xf32>
    %c3 = arith.constant 3 : index
    %c0_170 = arith.constant 0 : index
    %c0_171 = arith.constant 0 : index
    %519 = vector.load %arg13[%c3, %c0_170, %c0_171] : memref<5x4x128xf32, #tpu.memory_space<vmem>>, vector<1x4x128xf32>
    %520 = vector.shape_cast %519 : vector<1x4x128xf32> to vector<4x128xf32>
    %521 = vector.extract_strided_slice %520 {offsets = [0, 0], sizes = [1, 32], strides = [1, 1]} : vector<4x128xf32> to vector<1x32xf32>
    %522 = vector.extract_strided_slice %520 {offsets = [0, 32], sizes = [1, 32], strides = [1, 1]} : vector<4x128xf32> to vector<1x32xf32>
    %523 = vector.extract_strided_slice %520 {offsets = [0, 64], sizes = [1, 32], strides = [1, 1]} : vector<4x128xf32> to vector<1x32xf32>
    %524 = vector.extract_strided_slice %520 {offsets = [0, 96], sizes = [1, 32], strides = [1, 1]} : vector<4x128xf32> to vector<1x32xf32>
    %525 = vector.extract_strided_slice %520 {offsets = [1, 0], sizes = [1, 32], strides = [1, 1]} : vector<4x128xf32> to vector<1x32xf32>
    %526 = vector.extract_strided_slice %520 {offsets = [1, 32], sizes = [1, 32], strides = [1, 1]} : vector<4x128xf32> to vector<1x32xf32>
    %527 = vector.extract_strided_slice %520 {offsets = [2, 0], sizes = [1, 128], strides = [1, 1]} : vector<4x128xf32> to vector<1x128xf32>
    %cst_172 = arith.constant dense<0.000000e+00> : vector<32xf32>
    %528 = vector.multi_reduction <add>, %518, %cst_172 [1] : vector<32x32xf32> to vector<32xf32>
    %529 = vector.shape_cast %528 : vector<32xf32> to vector<32x1xf32>
    %cst_173 = arith.constant 3.200000e+01 : f32
    %530 = vector.broadcast %cst_173 : f32 to vector<32x1xf32>
    %531 = arith.divf %529, %530 : vector<32x1xf32>
    %532 = vector.broadcast %531 : vector<32x1xf32> to vector<32x32xf32>
    %533 = arith.subf %518, %532 : vector<32x32xf32>
    %534 = arith.mulf %533, %533 : vector<32x32xf32>
    %cst_174 = arith.constant dense<0.000000e+00> : vector<32xf32>
    %535 = vector.multi_reduction <add>, %534, %cst_174 [1] : vector<32x32xf32> to vector<32xf32>
    %536 = vector.shape_cast %535 : vector<32xf32> to vector<32x1xf32>
    %cst_175 = arith.constant 3.200000e+01 : f32
    %537 = vector.broadcast %cst_175 : f32 to vector<32x1xf32>
    %538 = arith.divf %536, %537 : vector<32x1xf32>
    %539 = vector.broadcast %531 : vector<32x1xf32> to vector<32x32xf32>
    %540 = arith.subf %518, %539 : vector<32x32xf32>
    %cst_176 = arith.constant 9.99999974E-6 : f32
    %541 = vector.broadcast %cst_176 : f32 to vector<32x1xf32>
    %542 = arith.addf %538, %541 : vector<32x1xf32>
    %543 = math.rsqrt %542 : vector<32x1xf32>
    %544 = vector.broadcast %543 : vector<32x1xf32> to vector<32x32xf32>
    %545 = arith.mulf %540, %544 : vector<32x32xf32>
    %546 = vector.broadcast %521 : vector<1x32xf32> to vector<32x32xf32>
    %547 = arith.mulf %545, %546 : vector<32x32xf32>
    %548 = vector.broadcast %522 : vector<1x32xf32> to vector<32x32xf32>
    %549 = arith.addf %547, %548 : vector<32x32xf32>
    %550 = arith.truncf %549 : vector<32x32xf32> to vector<32x32xbf16>
    %c3_177 = arith.constant 3 : index
    %c0_178 = arith.constant 0 : index
    %c0_179 = arith.constant 0 : index
    %551 = vector.load %arg9[%c3_177, %c0_178, %c0_179] : memref<5x32x96xbf16, #tpu.memory_space<vmem>>, vector<1x32x96xbf16>
    %552 = vector.shape_cast %551 : vector<1x32x96xbf16> to vector<32x96xbf16>
    %cst_180 = arith.constant dense<0.000000e+00> : vector<32x96xf32>
    %553 = tpu.matmul %550, %552, %cst_180 {dimension_numbers = #tpu.dot_dimension_numbers<[1], [0], [0], [1], [0, 0, 1, 1], [], []>} : vector<32x32xbf16>, vector<32x96xbf16>, vector<32x96xf32> -> vector<32x96xf32>
    %554 = vector.extract_strided_slice %553 {offsets = [0, 0], sizes = [32, 32], strides = [1, 1]} : vector<32x96xf32> to vector<32x32xf32>
    %555 = vector.extract_strided_slice %553 {offsets = [0, 32], sizes = [32, 32], strides = [1, 1]} : vector<32x96xf32> to vector<32x32xf32>
    %556 = vector.extract_strided_slice %553 {offsets = [0, 64], sizes = [32, 32], strides = [1, 1]} : vector<32x96xf32> to vector<32x32xf32>
    %557 = tpu.concatenate %554, %554, %554, %554 in 0 : vector<32x32xf32>, vector<32x32xf32>, vector<32x32xf32>, vector<32x32xf32> -> vector<128x32xf32>
    %558 = arith.mulf %557, %86 : vector<128x32xf32>
    %559 = arith.truncf %558 : vector<128x32xf32> to vector<128x32xbf16>
    %560 = arith.truncf %555 : vector<32x32xf32> to vector<32x32xbf16>
    %cst_181 = arith.constant dense<0.000000e+00> : vector<128x32xf32>
    %561 = tpu.matmul %559, %560, %cst_181 {dimension_numbers = #tpu.dot_dimension_numbers<[1], [1], [0], [0], [0, 0, 1, 0], [], []>} : vector<128x32xbf16>, vector<32x32xbf16>, vector<128x32xf32> -> vector<128x32xf32>
    %562 = arith.addf %561, %52 : vector<128x32xf32>
    %cst_182 = arith.constant dense<0xFF800000> : vector<128xf32>
    %563 = vector.multi_reduction <maximumf>, %562, %cst_182 [1] : vector<128x32xf32> to vector<128xf32>
    %564 = vector.shape_cast %563 : vector<128xf32> to vector<128x1xf32>
    %565 = vector.broadcast %564 : vector<128x1xf32> to vector<128x32xf32>
    %566 = arith.subf %562, %565 : vector<128x32xf32>
    %567 = math.exp %566 : vector<128x32xf32>
    %cst_183 = arith.constant dense<0.000000e+00> : vector<128xf32>
    %568 = vector.multi_reduction <add>, %567, %cst_183 [1] : vector<128x32xf32> to vector<128xf32>
    %569 = vector.shape_cast %568 : vector<128xf32> to vector<128x1xf32>
    %570 = tpu.reciprocal %569 {approx = true} : vector<128x1xf32> -> vector<128x1xf32>
    %571 = vector.broadcast %570 : vector<128x1xf32> to vector<128x32xf32>
    %572 = arith.mulf %567, %571 : vector<128x32xf32>
    %573 = arith.truncf %572 : vector<128x32xf32> to vector<128x32xbf16>
    %574 = arith.truncf %556 : vector<32x32xf32> to vector<32x32xbf16>
    %cst_184 = arith.constant dense<0.000000e+00> : vector<128x32xf32>
    %575 = tpu.matmul %573, %574, %cst_184 {dimension_numbers = #tpu.dot_dimension_numbers<[1], [0], [0], [1], [0, 0, 1, 1], [], []>} : vector<128x32xbf16>, vector<32x32xbf16>, vector<128x32xf32> -> vector<128x32xf32>
    %576 = arith.mulf %575, %86 : vector<128x32xf32>
    %577 = arith.truncf %576 : vector<128x32xf32> to vector<128x32xbf16>
    %c3_185 = arith.constant 3 : index
    %c0_186 = arith.constant 0 : index
    %c0_187 = arith.constant 0 : index
    %578 = vector.load %arg10[%c3_185, %c0_186, %c0_187] : memref<5x32x32xbf16, #tpu.memory_space<vmem>>, vector<1x32x32xbf16>
    %579 = vector.shape_cast %578 : vector<1x32x32xbf16> to vector<32x32xbf16>
    %cst_188 = arith.constant dense<0.000000e+00> : vector<128x32xf32>
    %580 = tpu.matmul %577, %579, %cst_188 {dimension_numbers = #tpu.dot_dimension_numbers<[1], [0], [0], [1], [0, 0, 1, 1], [], []>} : vector<128x32xbf16>, vector<32x32xbf16>, vector<128x32xf32> -> vector<128x32xf32>
    %581 = vector.extract_strided_slice %580 {offsets = [0, 0], sizes = [32, 32], strides = [1, 1]} : vector<128x32xf32> to vector<32x32xf32>
    %582 = vector.extract_strided_slice %580 {offsets = [32, 0], sizes = [32, 32], strides = [1, 1]} : vector<128x32xf32> to vector<32x32xf32>
    %583 = arith.addf %581, %582 : vector<32x32xf32>
    %584 = vector.extract_strided_slice %580 {offsets = [64, 0], sizes = [32, 32], strides = [1, 1]} : vector<128x32xf32> to vector<32x32xf32>
    %585 = arith.addf %583, %584 : vector<32x32xf32>
    %586 = vector.extract_strided_slice %580 {offsets = [96, 0], sizes = [32, 32], strides = [1, 1]} : vector<128x32xf32> to vector<32x32xf32>
    %587 = arith.addf %585, %586 : vector<32x32xf32>
    %588 = arith.addf %518, %587 : vector<32x32xf32>
    %589 = vector.broadcast %525 : vector<1x32xf32> to vector<32x32xf32>
    %590 = arith.addf %588, %589 : vector<32x32xf32>
    %cst_189 = arith.constant dense<0.000000e+00> : vector<32xf32>
    %591 = vector.multi_reduction <add>, %590, %cst_189 [1] : vector<32x32xf32> to vector<32xf32>
    %592 = vector.shape_cast %591 : vector<32xf32> to vector<32x1xf32>
    %cst_190 = arith.constant 3.200000e+01 : f32
    %593 = vector.broadcast %cst_190 : f32 to vector<32x1xf32>
    %594 = arith.divf %592, %593 : vector<32x1xf32>
    %595 = vector.broadcast %594 : vector<32x1xf32> to vector<32x32xf32>
    %596 = arith.subf %590, %595 : vector<32x32xf32>
    %597 = arith.mulf %596, %596 : vector<32x32xf32>
    %cst_191 = arith.constant dense<0.000000e+00> : vector<32xf32>
    %598 = vector.multi_reduction <add>, %597, %cst_191 [1] : vector<32x32xf32> to vector<32xf32>
    %599 = vector.shape_cast %598 : vector<32xf32> to vector<32x1xf32>
    %cst_192 = arith.constant 3.200000e+01 : f32
    %600 = vector.broadcast %cst_192 : f32 to vector<32x1xf32>
    %601 = arith.divf %599, %600 : vector<32x1xf32>
    %602 = vector.broadcast %594 : vector<32x1xf32> to vector<32x32xf32>
    %603 = arith.subf %590, %602 : vector<32x32xf32>
    %cst_193 = arith.constant 9.99999974E-6 : f32
    %604 = vector.broadcast %cst_193 : f32 to vector<32x1xf32>
    %605 = arith.addf %601, %604 : vector<32x1xf32>
    %606 = math.rsqrt %605 : vector<32x1xf32>
    %607 = vector.broadcast %606 : vector<32x1xf32> to vector<32x32xf32>
    %608 = arith.mulf %603, %607 : vector<32x32xf32>
    %609 = vector.broadcast %523 : vector<1x32xf32> to vector<32x32xf32>
    %610 = arith.mulf %608, %609 : vector<32x32xf32>
    %611 = vector.broadcast %524 : vector<1x32xf32> to vector<32x32xf32>
    %612 = arith.addf %610, %611 : vector<32x32xf32>
    %613 = arith.truncf %612 : vector<32x32xf32> to vector<32x32xbf16>
    %c3_194 = arith.constant 3 : index
    %c0_195 = arith.constant 0 : index
    %c0_196 = arith.constant 0 : index
    %614 = vector.load %arg11[%c3_194, %c0_195, %c0_196] : memref<5x32x128xbf16, #tpu.memory_space<vmem>>, vector<1x32x128xbf16>
    %615 = vector.shape_cast %614 : vector<1x32x128xbf16> to vector<32x128xbf16>
    %cst_197 = arith.constant dense<0.000000e+00> : vector<32x128xf32>
    %616 = tpu.matmul %613, %615, %cst_197 {dimension_numbers = #tpu.dot_dimension_numbers<[1], [0], [0], [1], [0, 0, 1, 1], [], []>} : vector<32x32xbf16>, vector<32x128xbf16>, vector<32x128xf32> -> vector<32x128xf32>
    %617 = vector.broadcast %527 : vector<1x128xf32> to vector<32x128xf32>
    %618 = arith.addf %616, %617 : vector<32x128xf32>
    %cst_198 = arith.constant 5.000000e-01 : f32
    %619 = vector.broadcast %cst_198 : f32 to vector<32x128xf32>
    %620 = arith.mulf %619, %618 : vector<32x128xf32>
    %cst_199 = arith.constant 4.471500e-02 : f32
    %621 = vector.broadcast %cst_199 : f32 to vector<32x128xf32>
    %622 = arith.mulf %621, %618 : vector<32x128xf32>
    %623 = arith.mulf %622, %618 : vector<32x128xf32>
    %624 = arith.mulf %623, %618 : vector<32x128xf32>
    %625 = arith.addf %618, %624 : vector<32x128xf32>
    %cst_200 = arith.constant 0.797884583 : f32
    %626 = vector.broadcast %cst_200 : f32 to vector<32x128xf32>
    %627 = arith.mulf %626, %625 : vector<32x128xf32>
    %628 = math.tanh %627 : vector<32x128xf32>
    %cst_201 = arith.constant 1.000000e+00 : f32
    %629 = vector.broadcast %cst_201 : f32 to vector<32x128xf32>
    %630 = arith.addf %629, %628 : vector<32x128xf32>
    %631 = arith.mulf %620, %630 : vector<32x128xf32>
    %632 = arith.truncf %631 : vector<32x128xf32> to vector<32x128xbf16>
    %c3_202 = arith.constant 3 : index
    %c0_203 = arith.constant 0 : index
    %c0_204 = arith.constant 0 : index
    %633 = vector.load %arg12[%c3_202, %c0_203, %c0_204] : memref<5x128x32xbf16, #tpu.memory_space<vmem>>, vector<1x128x32xbf16>
    %634 = vector.shape_cast %633 : vector<1x128x32xbf16> to vector<128x32xbf16>
    %cst_205 = arith.constant dense<0.000000e+00> : vector<32x32xf32>
    %635 = tpu.matmul %632, %634, %cst_205 {dimension_numbers = #tpu.dot_dimension_numbers<[1], [0], [0], [1], [0, 0, 1, 1], [], []>} : vector<32x128xbf16>, vector<128x32xbf16>, vector<32x32xf32> -> vector<32x32xf32>
    %636 = vector.broadcast %526 : vector<1x32xf32> to vector<32x32xf32>
    %637 = arith.addf %635, %636 : vector<32x32xf32>
    %638 = arith.addf %590, %637 : vector<32x32xf32>
    %c1_206 = arith.constant 1 : index
    %c0_207 = arith.constant 0 : index
    %c0_208 = arith.constant 0 : index
    %639 = vector.load %arg14[%c1_206, %c0_207, %c0_208] : memref<2x64x32xbf16, #tpu.memory_space<vmem>>, vector<1x64x32xbf16>
    %640 = vector.shape_cast %639 : vector<1x64x32xbf16> to vector<64x32xbf16>
    %641 = arith.truncf %265 : vector<32x32xf32> to vector<32x32xbf16>
    %642 = vector.extract_strided_slice %640 {offsets = [0, 0], sizes = [32, 32], strides = [1, 1]} : vector<64x32xbf16> to vector<32x32xbf16>
    %cst_209 = arith.constant dense<0.000000e+00> : vector<32x32xf32>
    %643 = tpu.matmul %641, %642, %cst_209 {dimension_numbers = #tpu.dot_dimension_numbers<[1], [0], [0], [1], [0, 0, 1, 1], [], []>} : vector<32x32xbf16>, vector<32x32xbf16>, vector<32x32xf32> -> vector<32x32xf32>
    %644 = arith.truncf %638 : vector<32x32xf32> to vector<32x32xbf16>
    %645 = vector.extract_strided_slice %640 {offsets = [32, 0], sizes = [32, 32], strides = [1, 1]} : vector<64x32xbf16> to vector<32x32xbf16>
    %cst_210 = arith.constant dense<0.000000e+00> : vector<32x32xf32>
    %646 = tpu.matmul %644, %645, %cst_210 {dimension_numbers = #tpu.dot_dimension_numbers<[1], [0], [0], [1], [0, 0, 1, 1], [], []>} : vector<32x32xbf16>, vector<32x32xbf16>, vector<32x32xf32> -> vector<32x32xf32>
    %647 = arith.addf %643, %646 : vector<32x32xf32>
    %c1_211 = arith.constant 1 : index
    %c0_212 = arith.constant 0 : index
    %c0_213 = arith.constant 0 : index
    %648 = vector.load %arg15[%c1_211, %c0_212, %c0_213] : memref<2x1x32xf32, #tpu.memory_space<vmem>>, vector<1x1x32xf32>
    %649 = vector.shape_cast %648 : vector<1x1x32xf32> to vector<1x32xf32>
    %650 = vector.broadcast %649 : vector<1x32xf32> to vector<32x32xf32>
    %651 = arith.addf %647, %650 : vector<32x32xf32>
    %c4 = arith.constant 4 : index
    %c0_214 = arith.constant 0 : index
    %c0_215 = arith.constant 0 : index
    %652 = vector.load %arg13[%c4, %c0_214, %c0_215] : memref<5x4x128xf32, #tpu.memory_space<vmem>>, vector<1x4x128xf32>
    %653 = vector.shape_cast %652 : vector<1x4x128xf32> to vector<4x128xf32>
    %654 = vector.extract_strided_slice %653 {offsets = [0, 0], sizes = [1, 32], strides = [1, 1]} : vector<4x128xf32> to vector<1x32xf32>
    %655 = vector.extract_strided_slice %653 {offsets = [0, 32], sizes = [1, 32], strides = [1, 1]} : vector<4x128xf32> to vector<1x32xf32>
    %656 = vector.extract_strided_slice %653 {offsets = [0, 64], sizes = [1, 32], strides = [1, 1]} : vector<4x128xf32> to vector<1x32xf32>
    %657 = vector.extract_strided_slice %653 {offsets = [0, 96], sizes = [1, 32], strides = [1, 1]} : vector<4x128xf32> to vector<1x32xf32>
    %658 = vector.extract_strided_slice %653 {offsets = [1, 0], sizes = [1, 32], strides = [1, 1]} : vector<4x128xf32> to vector<1x32xf32>
    %659 = vector.extract_strided_slice %653 {offsets = [1, 32], sizes = [1, 32], strides = [1, 1]} : vector<4x128xf32> to vector<1x32xf32>
    %660 = vector.extract_strided_slice %653 {offsets = [2, 0], sizes = [1, 128], strides = [1, 1]} : vector<4x128xf32> to vector<1x128xf32>
    %cst_216 = arith.constant dense<0.000000e+00> : vector<32xf32>
    %661 = vector.multi_reduction <add>, %651, %cst_216 [1] : vector<32x32xf32> to vector<32xf32>
    %662 = vector.shape_cast %661 : vector<32xf32> to vector<32x1xf32>
    %cst_217 = arith.constant 3.200000e+01 : f32
    %663 = vector.broadcast %cst_217 : f32 to vector<32x1xf32>
    %664 = arith.divf %662, %663 : vector<32x1xf32>
    %665 = vector.broadcast %664 : vector<32x1xf32> to vector<32x32xf32>
    %666 = arith.subf %651, %665 : vector<32x32xf32>
    %667 = arith.mulf %666, %666 : vector<32x32xf32>
    %cst_218 = arith.constant dense<0.000000e+00> : vector<32xf32>
    %668 = vector.multi_reduction <add>, %667, %cst_218 [1] : vector<32x32xf32> to vector<32xf32>
    %669 = vector.shape_cast %668 : vector<32xf32> to vector<32x1xf32>
    %cst_219 = arith.constant 3.200000e+01 : f32
    %670 = vector.broadcast %cst_219 : f32 to vector<32x1xf32>
    %671 = arith.divf %669, %670 : vector<32x1xf32>
    %672 = vector.broadcast %664 : vector<32x1xf32> to vector<32x32xf32>
    %673 = arith.subf %651, %672 : vector<32x32xf32>
    %cst_220 = arith.constant 9.99999974E-6 : f32
    %674 = vector.broadcast %cst_220 : f32 to vector<32x1xf32>
    %675 = arith.addf %671, %674 : vector<32x1xf32>
    %676 = math.rsqrt %675 : vector<32x1xf32>
    %677 = vector.broadcast %676 : vector<32x1xf32> to vector<32x32xf32>
    %678 = arith.mulf %673, %677 : vector<32x32xf32>
    %679 = vector.broadcast %654 : vector<1x32xf32> to vector<32x32xf32>
    %680 = arith.mulf %678, %679 : vector<32x32xf32>
    %681 = vector.broadcast %655 : vector<1x32xf32> to vector<32x32xf32>
    %682 = arith.addf %680, %681 : vector<32x32xf32>
    %683 = arith.truncf %682 : vector<32x32xf32> to vector<32x32xbf16>
    %c4_221 = arith.constant 4 : index
    %c0_222 = arith.constant 0 : index
    %c0_223 = arith.constant 0 : index
    %684 = vector.load %arg9[%c4_221, %c0_222, %c0_223] : memref<5x32x96xbf16, #tpu.memory_space<vmem>>, vector<1x32x96xbf16>
    %685 = vector.shape_cast %684 : vector<1x32x96xbf16> to vector<32x96xbf16>
    %cst_224 = arith.constant dense<0.000000e+00> : vector<32x96xf32>
    %686 = tpu.matmul %683, %685, %cst_224 {dimension_numbers = #tpu.dot_dimension_numbers<[1], [0], [0], [1], [0, 0, 1, 1], [], []>} : vector<32x32xbf16>, vector<32x96xbf16>, vector<32x96xf32> -> vector<32x96xf32>
    %687 = vector.extract_strided_slice %686 {offsets = [0, 0], sizes = [32, 32], strides = [1, 1]} : vector<32x96xf32> to vector<32x32xf32>
    %688 = vector.extract_strided_slice %686 {offsets = [0, 32], sizes = [32, 32], strides = [1, 1]} : vector<32x96xf32> to vector<32x32xf32>
    %689 = vector.extract_strided_slice %686 {offsets = [0, 64], sizes = [32, 32], strides = [1, 1]} : vector<32x96xf32> to vector<32x32xf32>
    %690 = tpu.concatenate %687, %687, %687, %687 in 0 : vector<32x32xf32>, vector<32x32xf32>, vector<32x32xf32>, vector<32x32xf32> -> vector<128x32xf32>
    %691 = arith.mulf %690, %86 : vector<128x32xf32>
    %692 = arith.truncf %691 : vector<128x32xf32> to vector<128x32xbf16>
    %693 = arith.truncf %688 : vector<32x32xf32> to vector<32x32xbf16>
    %cst_225 = arith.constant dense<0.000000e+00> : vector<128x32xf32>
    %694 = tpu.matmul %692, %693, %cst_225 {dimension_numbers = #tpu.dot_dimension_numbers<[1], [1], [0], [0], [0, 0, 1, 0], [], []>} : vector<128x32xbf16>, vector<32x32xbf16>, vector<128x32xf32> -> vector<128x32xf32>
    %695 = arith.addf %694, %52 : vector<128x32xf32>
    %cst_226 = arith.constant dense<0xFF800000> : vector<128xf32>
    %696 = vector.multi_reduction <maximumf>, %695, %cst_226 [1] : vector<128x32xf32> to vector<128xf32>
    %697 = vector.shape_cast %696 : vector<128xf32> to vector<128x1xf32>
    %698 = vector.broadcast %697 : vector<128x1xf32> to vector<128x32xf32>
    %699 = arith.subf %695, %698 : vector<128x32xf32>
    %700 = math.exp %699 : vector<128x32xf32>
    %cst_227 = arith.constant dense<0.000000e+00> : vector<128xf32>
    %701 = vector.multi_reduction <add>, %700, %cst_227 [1] : vector<128x32xf32> to vector<128xf32>
    %702 = vector.shape_cast %701 : vector<128xf32> to vector<128x1xf32>
    %703 = tpu.reciprocal %702 {approx = true} : vector<128x1xf32> -> vector<128x1xf32>
    %704 = vector.broadcast %703 : vector<128x1xf32> to vector<128x32xf32>
    %705 = arith.mulf %700, %704 : vector<128x32xf32>
    %706 = arith.truncf %705 : vector<128x32xf32> to vector<128x32xbf16>
    %707 = arith.truncf %689 : vector<32x32xf32> to vector<32x32xbf16>
    %cst_228 = arith.constant dense<0.000000e+00> : vector<128x32xf32>
    %708 = tpu.matmul %706, %707, %cst_228 {dimension_numbers = #tpu.dot_dimension_numbers<[1], [0], [0], [1], [0, 0, 1, 1], [], []>} : vector<128x32xbf16>, vector<32x32xbf16>, vector<128x32xf32> -> vector<128x32xf32>
    %709 = arith.mulf %708, %86 : vector<128x32xf32>
    %710 = arith.truncf %709 : vector<128x32xf32> to vector<128x32xbf16>
    %c4_229 = arith.constant 4 : index
    %c0_230 = arith.constant 0 : index
    %c0_231 = arith.constant 0 : index
    %711 = vector.load %arg10[%c4_229, %c0_230, %c0_231] : memref<5x32x32xbf16, #tpu.memory_space<vmem>>, vector<1x32x32xbf16>
    %712 = vector.shape_cast %711 : vector<1x32x32xbf16> to vector<32x32xbf16>
    %cst_232 = arith.constant dense<0.000000e+00> : vector<128x32xf32>
    %713 = tpu.matmul %710, %712, %cst_232 {dimension_numbers = #tpu.dot_dimension_numbers<[1], [0], [0], [1], [0, 0, 1, 1], [], []>} : vector<128x32xbf16>, vector<32x32xbf16>, vector<128x32xf32> -> vector<128x32xf32>
    %714 = vector.extract_strided_slice %713 {offsets = [0, 0], sizes = [32, 32], strides = [1, 1]} : vector<128x32xf32> to vector<32x32xf32>
    %715 = vector.extract_strided_slice %713 {offsets = [32, 0], sizes = [32, 32], strides = [1, 1]} : vector<128x32xf32> to vector<32x32xf32>
    %716 = arith.addf %714, %715 : vector<32x32xf32>
    %717 = vector.extract_strided_slice %713 {offsets = [64, 0], sizes = [32, 32], strides = [1, 1]} : vector<128x32xf32> to vector<32x32xf32>
    %718 = arith.addf %716, %717 : vector<32x32xf32>
    %719 = vector.extract_strided_slice %713 {offsets = [96, 0], sizes = [32, 32], strides = [1, 1]} : vector<128x32xf32> to vector<32x32xf32>
    %720 = arith.addf %718, %719 : vector<32x32xf32>
    %721 = arith.addf %651, %720 : vector<32x32xf32>
    %722 = vector.broadcast %658 : vector<1x32xf32> to vector<32x32xf32>
    %723 = arith.addf %721, %722 : vector<32x32xf32>
    %cst_233 = arith.constant dense<0.000000e+00> : vector<32xf32>
    %724 = vector.multi_reduction <add>, %723, %cst_233 [1] : vector<32x32xf32> to vector<32xf32>
    %725 = vector.shape_cast %724 : vector<32xf32> to vector<32x1xf32>
    %cst_234 = arith.constant 3.200000e+01 : f32
    %726 = vector.broadcast %cst_234 : f32 to vector<32x1xf32>
    %727 = arith.divf %725, %726 : vector<32x1xf32>
    %728 = vector.broadcast %727 : vector<32x1xf32> to vector<32x32xf32>
    %729 = arith.subf %723, %728 : vector<32x32xf32>
    %730 = arith.mulf %729, %729 : vector<32x32xf32>
    %cst_235 = arith.constant dense<0.000000e+00> : vector<32xf32>
    %731 = vector.multi_reduction <add>, %730, %cst_235 [1] : vector<32x32xf32> to vector<32xf32>
    %732 = vector.shape_cast %731 : vector<32xf32> to vector<32x1xf32>
    %cst_236 = arith.constant 3.200000e+01 : f32
    %733 = vector.broadcast %cst_236 : f32 to vector<32x1xf32>
    %734 = arith.divf %732, %733 : vector<32x1xf32>
    %735 = vector.broadcast %727 : vector<32x1xf32> to vector<32x32xf32>
    %736 = arith.subf %723, %735 : vector<32x32xf32>
    %cst_237 = arith.constant 9.99999974E-6 : f32
    %737 = vector.broadcast %cst_237 : f32 to vector<32x1xf32>
    %738 = arith.addf %734, %737 : vector<32x1xf32>
    %739 = math.rsqrt %738 : vector<32x1xf32>
    %740 = vector.broadcast %739 : vector<32x1xf32> to vector<32x32xf32>
    %741 = arith.mulf %736, %740 : vector<32x32xf32>
    %742 = vector.broadcast %656 : vector<1x32xf32> to vector<32x32xf32>
    %743 = arith.mulf %741, %742 : vector<32x32xf32>
    %744 = vector.broadcast %657 : vector<1x32xf32> to vector<32x32xf32>
    %745 = arith.addf %743, %744 : vector<32x32xf32>
    %746 = arith.truncf %745 : vector<32x32xf32> to vector<32x32xbf16>
    %c4_238 = arith.constant 4 : index
    %c0_239 = arith.constant 0 : index
    %c0_240 = arith.constant 0 : index
    %747 = vector.load %arg11[%c4_238, %c0_239, %c0_240] : memref<5x32x128xbf16, #tpu.memory_space<vmem>>, vector<1x32x128xbf16>
    %748 = vector.shape_cast %747 : vector<1x32x128xbf16> to vector<32x128xbf16>
    %cst_241 = arith.constant dense<0.000000e+00> : vector<32x128xf32>
    %749 = tpu.matmul %746, %748, %cst_241 {dimension_numbers = #tpu.dot_dimension_numbers<[1], [0], [0], [1], [0, 0, 1, 1], [], []>} : vector<32x32xbf16>, vector<32x128xbf16>, vector<32x128xf32> -> vector<32x128xf32>
    %750 = vector.broadcast %660 : vector<1x128xf32> to vector<32x128xf32>
    %751 = arith.addf %749, %750 : vector<32x128xf32>
    %cst_242 = arith.constant 5.000000e-01 : f32
    %752 = vector.broadcast %cst_242 : f32 to vector<32x128xf32>
    %753 = arith.mulf %752, %751 : vector<32x128xf32>
    %cst_243 = arith.constant 4.471500e-02 : f32
    %754 = vector.broadcast %cst_243 : f32 to vector<32x128xf32>
    %755 = arith.mulf %754, %751 : vector<32x128xf32>
    %756 = arith.mulf %755, %751 : vector<32x128xf32>
    %757 = arith.mulf %756, %751 : vector<32x128xf32>
    %758 = arith.addf %751, %757 : vector<32x128xf32>
    %cst_244 = arith.constant 0.797884583 : f32
    %759 = vector.broadcast %cst_244 : f32 to vector<32x128xf32>
    %760 = arith.mulf %759, %758 : vector<32x128xf32>
    %761 = math.tanh %760 : vector<32x128xf32>
    %cst_245 = arith.constant 1.000000e+00 : f32
    %762 = vector.broadcast %cst_245 : f32 to vector<32x128xf32>
    %763 = arith.addf %762, %761 : vector<32x128xf32>
    %764 = arith.mulf %753, %763 : vector<32x128xf32>
    %765 = arith.truncf %764 : vector<32x128xf32> to vector<32x128xbf16>
    %c4_246 = arith.constant 4 : index
    %c0_247 = arith.constant 0 : index
    %c0_248 = arith.constant 0 : index
    %766 = vector.load %arg12[%c4_246, %c0_247, %c0_248] : memref<5x128x32xbf16, #tpu.memory_space<vmem>>, vector<1x128x32xbf16>
    %767 = vector.shape_cast %766 : vector<1x128x32xbf16> to vector<128x32xbf16>
    %cst_249 = arith.constant dense<0.000000e+00> : vector<32x32xf32>
    %768 = tpu.matmul %765, %767, %cst_249 {dimension_numbers = #tpu.dot_dimension_numbers<[1], [0], [0], [1], [0, 0, 1, 1], [], []>} : vector<32x128xbf16>, vector<128x32xbf16>, vector<32x32xf32> -> vector<32x32xf32>
    %769 = vector.broadcast %659 : vector<1x32xf32> to vector<32x32xf32>
    %770 = arith.addf %768, %769 : vector<32x32xf32>
    %771 = arith.addf %723, %770 : vector<32x32xf32>
    %772 = vector.extract_strided_slice %771 {offsets = [0, 0], sizes = [16, 32], strides = [1, 1]} : vector<32x32xf32> to vector<16x32xf32>
    %cst_250 = arith.constant dense<0.000000e+00> : vector<16xf32>
    %773 = vector.multi_reduction <add>, %772, %cst_250 [1] : vector<16x32xf32> to vector<16xf32>
    %774 = vector.shape_cast %773 : vector<16xf32> to vector<16x1xf32>
    %cst_251 = arith.constant 3.200000e+01 : f32
    %775 = vector.broadcast %cst_251 : f32 to vector<16x1xf32>
    %776 = arith.divf %774, %775 : vector<16x1xf32>
    %777 = vector.broadcast %776 : vector<16x1xf32> to vector<16x32xf32>
    %778 = arith.subf %772, %777 : vector<16x32xf32>
    %779 = arith.mulf %778, %778 : vector<16x32xf32>
    %cst_252 = arith.constant dense<0.000000e+00> : vector<16xf32>
    %780 = vector.multi_reduction <add>, %779, %cst_252 [1] : vector<16x32xf32> to vector<16xf32>
    %781 = vector.shape_cast %780 : vector<16xf32> to vector<16x1xf32>
    %cst_253 = arith.constant 3.200000e+01 : f32
    %782 = vector.broadcast %cst_253 : f32 to vector<16x1xf32>
    %783 = arith.divf %781, %782 : vector<16x1xf32>
    %784 = vector.broadcast %776 : vector<16x1xf32> to vector<16x32xf32>
    %785 = arith.subf %772, %784 : vector<16x32xf32>
    %cst_254 = arith.constant 9.99999974E-6 : f32
    %786 = vector.broadcast %cst_254 : f32 to vector<16x1xf32>
    %787 = arith.addf %783, %786 : vector<16x1xf32>
    %788 = math.rsqrt %787 : vector<16x1xf32>
    %789 = vector.broadcast %788 : vector<16x1xf32> to vector<16x32xf32>
    %790 = arith.mulf %785, %789 : vector<16x32xf32>
    %791 = vector.broadcast %4 : vector<1x32xf32> to vector<16x32xf32>
    %792 = arith.mulf %790, %791 : vector<16x32xf32>
    %793 = vector.broadcast %5 : vector<1x32xf32> to vector<16x32xf32>
    %794 = arith.addf %792, %793 : vector<16x32xf32>
    %795 = arith.truncf %794 : vector<16x32xf32> to vector<16x32xbf16>
    %c0_255 = arith.constant 0 : index
    %c0_256 = arith.constant 0 : index
    %796 = vector.load %arg7[%c0_255, %c0_256] : memref<32x128xbf16, #tpu.memory_space<vmem>>, vector<32x128xbf16>
    %cst_257 = arith.constant dense<0.000000e+00> : vector<16x128xf32>
    %797 = tpu.matmul %795, %796, %cst_257 {dimension_numbers = #tpu.dot_dimension_numbers<[1], [0], [0], [1], [0, 0, 1, 1], [], []>} : vector<16x32xbf16>, vector<32x128xbf16>, vector<16x128xf32> -> vector<16x128xf32>
    %798 = vector.broadcast %9 : vector<1x128xf32> to vector<16x128xf32>
    %799 = arith.addf %797, %798 : vector<16x128xf32>
    %c0_258 = arith.constant 0 : index
    %c0_259 = arith.constant 0 : index
    %800 = vector.load %arg16[%c0_258, %c0_259] : memref<16x128xf32, #tpu.memory_space<vmem>>, vector<16x128xf32>
    tpu.vector_store %arg16[%c0_258, %c0_259], %799 {strides = array<i32>} : memref<16x128xf32, #tpu.memory_space<vmem>>, vector<16x128xf32>,
    return
  }
}

</mosaic_0001>

<bundles_post_ra>
// kernel: simple_denoiser_forward.1
= control target key start
LH: loop header
LB: loop body
LE: loop exit
PB: predicated region body
PF: predicated region fallthrough
CT: control target
= control target key end

     0   :  { %vm256_vm0 = vcmask 130048   ;;  %vm332_vm1 = vcmask 1043456   ;;  %vm328_vm2 = vcmask 64512   ;;  %vm146_vm3 = vcmask 261120   ;;  %s6506_s26 = smov 80   ;;  %s6512_s30 = smov 32   ;;  %s8735_s1 = inlined_call_operand.vmem [shape: f32[8,16], index: 1, kind: input, shape index: {}]   ;;  %s8736_s3 = inlined_call_operand.vmem [shape: bf16[32,128], index: 3, kind: input, shape index: {}]   ;;  %s8737_s0 = inlined_call_operand.vmem [shape: f32[8,32], index: 0, kind: input, shape index: {}]   ;;  %s8738_s5 = inlined_call_operand.vmem [shape: bf16[8,32], index: 5, kind: input, shape index: {}]   ;;  %s8739_s2 = inlined_call_operand.vmem [shape: f32[16,8], index: 2, kind: input, shape index: {}]   ;;  %s8740_s4 = inlined_call_operand.vmem [shape: bf16[128,32], index: 4, kind: input, shape index: {}]   ;;  %s8741_s8 = inlined_call_operand.vmem [shape: f32[4,128], index: 8, kind: input, shape index: {}]   ;;  %s8742_s6 = inlined_call_operand.vmem [shape: bf16[16,32], index: 6, kind: input, shape index: {}]   ;;  %s8743_s13 = inlined_call_operand.vmem [shape: f32[5,4,128], index: 13, kind: input, shape index: {}]   ;;  %s8744_s9 = inlined_call_operand.vmem [shape: bf16[5,32,96], index: 9, kind: input, shape index: {}]   ;;  %s8745_s10 = inlined_call_operand.vmem [shape: bf16[5,32,32], index: 10, kind: input, shape index: {}]   ;;  %s8746_s11 = inlined_call_operand.vmem [shape: bf16[5,32,128], index: 11, kind: input, shape index: {}]   ;;  %s8747_s12 = inlined_call_operand.vmem [shape: bf16[5,128,32], index: 12, kind: input, shape index: {}]   ;;  %s8748_s14 = inlined_call_operand.vmem [shape: bf16[2,64,32], index: 14, kind: input, shape index: {}]   ;;  %s8749_s15 = inlined_call_operand.vmem [shape: f32[2,1,32], index: 15, kind: input, shape index: {}]   ;;  %s8750_s7 = inlined_call_operand.vmem [shape: bf16[32,128], index: 7, kind: input, shape index: {}]   ;;  %s8751_s16 = inlined_call_operand.vmem [shape: f32[16,128], index: 16, kind: output, shape index: {}]  }
   0x1   :  { %8752 = sst [smem:[#allocation2_spill]] %s8735_s1  ;;  %v5943_v1 = vld [vmem:[%s8736_s3 + $0x8] sm:$0xff]  ;;  %v327_v3 = vld [vmem:[%s8738_s5] sm:$0xf]  ;;  %v6504_v11 = vmov 16.0   ;;  %v5951_v12 = vld [vmem:[%s8740_s4 + $0x38] sm:$0xff] }
   0x2   :  { %s8753_s23 = sld [smem:[#allocation2_spill]]  ;;  %v324_v4 = vld [vmem:[%s8739_s2] sm:$0xff]  ;;  %156 = vmatpush.bf16.msra.mxu0 %v5943_v1  ;;  %v334_v7 = vsel %vm332_vm1, %v327_v3, 0  ;;  %v325_v8 = vld [vmem:[%s8739_s2 + $0x8] sm:$0xff]  ;;  %6046 = vrcp.f32 %v6504_v11  ;;  %242 = vmatpush.bf16.msra.mxu1 %v5951_v12  ;;  %v5950_v15 = vld [vmem:[%s8740_s4 + $0x30] sm:$0xff]  ;;  %s6507_s5 = smov 64  }
   0x3   :  { %v5942_v5 = vld [vmem:[%s8736_s3] sm:$0xff]  ;;  %343 = vmatpush.bf16.msra.mxu3 %v334_v7  ;;  %v326_v9 = vpack.c.bf16 %v325_v8, %v324_v4  ;;  %v5949_v19 = vld [vmem:[%s8740_s4 + $0x28] sm:$0xff]  ;;  %v5947_v22 = vld [vmem:[%s8740_s4 + $0x18] sm:$0xff]  ;;  %v6508_v62 = vmov 32.0  }
   0x4   :  { %v127_v6 = vld [vmem:[%s8737_s0] sm:$0xff]  ;;  %v5946_v24 = vld [vmem:[%s8740_s4 + $0x10] sm:$0xff]  ;;  %v5945_v27 = vld [vmem:[%s8740_s4 + $0x8] sm:$0xff] }
   0x5   :  { %v128_v10 = vpack.c.bf16 %v127_v6, %v127_v6  ;;  %v54_v13 = vld [vmem:[%s8741_s8] sm:$0xf] }
   0x6   :  { %157 = vmatpush.bf16.msra.mxu0 %v5942_v5  ;;  %5347 = vmatmul.msk.bf16.vlgmr.msra.gmra.mxu3 %vm328_vm2, %v326_v9  ;;  %v6627_v14 = vperm.slane %v54_v13, 1  ;;  %v5948_v20 = vld [vmem:[%s8740_s4 + $0x20] sm:$0xff]  ;;  %v6654_v33 = vperm.slane %v54_v13, 0  ;;  %v133_v34 = vperm.slane %v54_v13, 2 }
   0x7   :  { %243 = vmatpush.bf16.msra.mxu1 %v5950_v15  ;;  %v5944_v30 = vld [vmem:[%s8740_s4] sm:$0xff] }
   0x8   :  { %v255_v0 = vld [vmem:[%s8753_s23] sm:$0xff]  ;;  %v6047_v16 = vpop.eup %6046  ;;  %s6505_s23 = smov 96   ;;  %239 = vrot.lane.b32.xlu2 %v6654_v33, %s6507_s5 }
   0x9   :  { %v257_v2 = vsel %vm256_vm0, %v255_v0, 0.0  ;;  %5309 = vmatmul.msk.bf16.vlgmr.msra.gmra.mxu0 %vm146_vm3, %v128_v10  ;;  %288 = vrot.lane.b32.xlu1 %v6627_v14, %s6505_s23  ;;  %v261_v17 = vmul.f32 16.0, %v6047_v16  ;;  %vm265_vm4 = vweird.f32 %v6047_v16  ;;  %v5952_v54 = vld [vmem:[%s8742_s6] sm:$0xff] }
   0xa   :  { %258 = vadd.xlane.f32.xlu0 %v257_v2  ;;  %318 = vmatpush.bf16.msra.mxu2 %v5952_v54 }
   0xb   :  { %v262_v18 = vsub.f32 1.0, %v261_v17  ;;  %244 = vmatpush.bf16.msra.mxu1 %v5949_v19 }
   0xd   :  { %v263_v21 = vmul.f32 %v6047_v16, %v262_v18 }
   0xf   :  { %245 = vmatpush.bf16.msra.mxu1 %v5948_v20  ;;  %v264_v23 = vadd.f32 %v6047_v16, %v263_v21 }
  0x10   :  { %305 = vrot.lane.b32.xlu2 %v6654_v33, %s6505_s23 }
  0x11   :  { %292 = vrot.lane.b32.xlu1 %v6627_v14, %s6506_s26  ;;  %v266_v25 = vsel %vm265_vm4, %v6047_v16, %v264_v23 }
  0x13   :  { %246 = vmatpush.bf16.msra.mxu1 %v5947_v22 }
  0x17   :  { %247 = vmatpush.bf16.msra.mxu1 %v5946_v24 }
  0x1b   :  { %248 = vmatpush.bf16.msra.mxu1 %v5945_v27 }
  0x1f   :  { %249 = vmatpush.bf16.msra.mxu1 %v5944_v30 }
  0x62   :  { %v240_v17 = vpop.permute.xlu2 %239 }
  0x6a   :  { %v306_v30 = vpop.permute.xlu2 %305 }
  0x7b   :  { %v289_v61 = vpop.permute.xlu1 %288 }
  0x7d   :  { %v259_v26 = vpop.xlane.xlu0 %258 }
  0x7e   :  { %v267_v28 = vmul.f32 %v266_v25, %v259_v26 }
  0x80   :  { %v268_v29 = vsub.f32 %v255_v0, %v267_v28 }
  0x82   :  { %v269_v31 = vmul.f32 %v268_v29, %v268_v29 }
  0x83   :  { %v293_v6 = vpop.permute.xlu1 %292 }
  0x84   :  { %v270_v32 = vsel %vm256_vm0, %v269_v31, 0.0 }
  0x85   :  { %271 = vadd.xlane.f32.xlu0 %v270_v32 }
  0x86   :  { %v159_v35 = vpop.f32.mrf.mxu0 }
  0x87   :  { %v160_v36 = vadd.f32 %v159_v35, %v133_v34 }
  0x89   :  { %v164_v37 = vmul.f32 0.044715, %v160_v36  ;;  %v345_v38 = vpop.f32.mrf.mxu3  ;;  %v163_v49 = vmul.f32 0.5, %v160_v36 }
  0x8a   :  { %v6659_v39 = vadd.f32 %v345_v38, %v6654_v33 }
  0x8b   :  { %v165_v40 = vmul.f32 %v164_v37, %v160_v36 }
  0x8c   :  { %v351_v41 = vsel %vm146_vm3, %v6659_v39, 0.0 }
  0x8d   :  { %v166_v42 = vmul.f32 %v165_v40, %v160_v36  ;;  %352 = vadd.xlane.f32.xlu0 %v351_v41 }
  0x8e   :  { %v161_v43 = vpop.f32.mrf.mxu0 }
  0x8f   :  { %v167_v44 = vadd.f32 %v166_v42, %v160_v36  ;;  %v6693_v36 = vld [vmem:[%s8743_s13] sm:$0xf] }
  0x90   :  { %v6696_v37 = vperm.slane %v6693_v36, 0 }
  0x91   :  { %v168_v45 = vmul.f32 0.7978846, %v167_v44  ;;  %v347_v46 = vpop.f32.mrf.mxu3 }
  0x92   :  { %v6666_v47 = vadd.f32 %v347_v46, %v6654_v33  ;;  %v5954_v46 = vld [vmem:[%s8744_s9 + $0x8] sm:$0xff] }
  0x93   :  { %6048 = vtanh.f32 %v168_v45  ;;  %489 = vmatpush.bf16.msrb.mxu2 %v5954_v46 }
  0x94   :  { %v354_v48 = vsel %vm146_vm3, %v6666_v47, 0.0 }
  0x95   :  { %355 = vadd.xlane.f32.xlu1 %v354_v48 }
  0x99   :  { %v6049_v50 = vpop.eup %6048 }
  0x9a   :  { %v170_v51 = vadd.f32 1.0, %v6049_v50 }
  0x9c   :  { %v171_v52 = vmul.f32 %v170_v51, %v163_v49  ;;  %v5953_v49 = vld [vmem:[%s8744_s9] sm:$0xff] }
  0x9d   :  { %490 = vmatpush.bf16.msrb.mxu2 %v5953_v49 }
  0x9e   :  { %v172_v53 = vpack.c.bf16 %v171_v52, %v171_v52 }
  0xa0   :  { %250 = vmatmul.bf16.vlgmr.msra.gmra.mxu1 %v172_v53 }
  0xf8   :  { %v272_v55 = vpop.xlane.xlu0 %271 }
  0xf9   :  { %v273_v56 = vmul.f32 %v272_v55, %v266_v25 }
  0xfb   :  { %v274_v57 = vadd.f32 1e-05, %v273_v56 }
  0xfd   :  { %6050 = vrsqrt.f32 %v274_v57  ;;  %vm281_vm6 = vweird.f32 %v274_v57 }
  0xfe   :  { %6052 = vrcp.f32 %v6508_v62 }
 0x100   :  { %v353_v15 = vpop.xlane.xlu0 %352 }
 0x103   :  { %v6051_v58 = vpop.eup %6050 }
 0x104   :  { %v276_v59 = vmul.f32 %v6051_v58, %v274_v57  ;;  %vm282_vm5 = vweird.f32 %v6051_v58  ;;  %v6053_v1 = vpop.eup %6052 }
 0x105   :  { %vm283_vm7 = vmor %vm281_vm6, %vm282_vm5  ;;  %v364_v5 = vmul.f32 32.0, %v6053_v1  ;;  %vm368_vm8 = vweird.f32 %v6053_v1 }
 0x106   :  { %v277_v60 = vmul.f32 %v6051_v58, %v276_v59 }
 0x107   :  { %v365_v9 = vsub.f32 1.0, %v364_v5 }
 0x108   :  { %v278_v63 = vmul.f32 0.5, %v277_v60  ;;  %v356_v21 = vpop.xlane.xlu1 %355 }
 0x109   :  { %v366_v11 = vmul.f32 %v6053_v1, %v365_v9 }
 0x10a   :  { %v279_v0 = vsub.f32 1.5, %v278_v63 }
 0x10b   :  { %v367_v12 = vadd.f32 %v6053_v1, %v366_v11 }
 0x10c   :  { %v280_v2 = vmul.f32 %v6051_v58, %v279_v0 }
 0x10d   :  { %v6674_v13 = vsel %vm368_vm8, %v6053_v1, %v367_v12 }
 0x10e   :  { %v284_v3 = vsel %vm283_vm7, %v6051_v58, %v280_v2  ;;  %v370_v16 = vmul.f32 %v6674_v13, %v353_v15  ;;  %v371_v23 = vmul.f32 %v6674_v13, %v356_v21 }
 0x10f   :  { %v285_v4 = vmul.f32 %v284_v3, %v268_v29 }
 0x110   :  { %v374_v20 = vsub.f32 %v6659_v39, %v370_v16  ;;  %v375_v26 = vsub.f32 %v6666_v47, %v371_v23 }
 0x111   :  { %v291_v7 = vmul.f32 %v289_v61, %v285_v4 }
 0x112   :  { %v378_v24 = vmul.f32 %v374_v20, %v374_v20  ;;  %v379_v28 = vmul.f32 %v375_v26, %v375_v26 }
 0x113   :  { %v295_v8 = vadd.f32 %v293_v6, %v291_v7 }
 0x114   :  { %v382_v27 = vsel %vm146_vm3, %v378_v24, 0.0  ;;  %v385_v29 = vsel %vm146_vm3, %v379_v28, 0.0 }
 0x115   :  { %v296_v10 = vpack.c.bf16 %v295_v8, %v295_v8 }
 0x117   :  { %5346 = vmatmul.msk.bf16.vlgmr.msra.gmra.mxu2 %vm256_vm0, %v296_v10 }
 0x11d   :  { %v251_v18 = vpop.f32.mrf.mxu1 }
 0x11e   :  { %v6677_v19 = vadd.f32 %v251_v18, %v240_v17 }
 0x120   :  { %v360_v22 = vsel %vm146_vm3, %v6677_v19, 0.0 }
 0x121   :  { %361 = vadd.xlane.f32.xlu0 %v360_v22 }
 0x125   :  { %v253_v25 = vpop.f32.mrf.mxu1 }
 0x129   :  { %383 = vadd.xlane.f32.xlu0 %v382_v27 }
 0x131   :  { %386 = vadd.xlane.f32.xlu0 %v385_v29 }
 0x194   :  { %v362_v38 = vpop.xlane.xlu0 %361 }
 0x195   :  { %v373_v1 = vmul.f32 %v6674_v13, %v362_v38 }
 0x197   :  { %v377_v6 = vsub.f32 %v6677_v19, %v373_v1 }
 0x199   :  { %v381_v16 = vmul.f32 %v377_v6, %v377_v6 }
 0x19a   :  { %v320_v31 = vpop.f32.mrf.mxu2 }
 0x19b   :  { %v6686_v32 = vadd.f32 %v320_v31, %v306_v30  ;;  %v391_v17 = vsel %vm146_vm3, %v381_v16, 0.0 }
 0x19c   :  { %v384_v40 = vpop.xlane.xlu0 %383 }
 0x19d   :  { %v357_v34 = vsel %vm146_vm3, %v6686_v32, 0.0  ;;  %v394_v42 = vmul.f32 %v384_v40, %v6674_v13 }
 0x19e   :  { %358 = vadd.xlane.f32.xlu2 %v357_v34 }
 0x19f   :  { %v398_v44 = vadd.f32 1e-05, %v394_v42 }
 0x1a1   :  { %6054 = vrsqrt.f32 %v398_v44  ;;  %vm408_vm9 = vweird.f32 %v398_v44 }
 0x1a2   :  { %v322_v35 = vpop.f32.mrf.mxu2 }
 0x1a4   :  { %v387_v41 = vpop.xlane.xlu0 %386 }
 0x1a5   :  { %v395_v43 = vmul.f32 %v387_v41, %v6674_v13 }
 0x1a7   :  { %v399_v45 = vadd.f32 1e-05, %v395_v43  ;;  %v6055_v48 = vpop.eup %6054 }
 0x1a8   :  { %v403_v51 = vmul.f32 %v6055_v48, %v398_v44  ;;  %vm409_vm10 = vweird.f32 %v6055_v48 }
 0x1a9   :  { %6056 = vrsqrt.f32 %v399_v45  ;;  %vm418_vm11 = vweird.f32 %v399_v45  ;;  %vm410_vm13 = vmor %vm408_vm9, %vm409_vm10 }
 0x1aa   :  { %v404_v53 = vmul.f32 %v6055_v48, %v403_v51 }
 0x1ac   :  { %v405_v55 = vmul.f32 0.5, %v404_v53 }
 0x1ae   :  { %v406_v57 = vsub.f32 1.5, %v405_v55 }
 0x1af   :  { %v6057_v50 = vpop.eup %6056 }
 0x1b0   :  { %v413_v52 = vmul.f32 %v6057_v50, %v399_v45  ;;  %vm419_vm12 = vweird.f32 %v6057_v50  ;;  %v407_v59 = vmul.f32 %v6055_v48, %v406_v57 }
 0x1b1   :  { %vm420_vm14 = vmor %vm418_vm11, %vm419_vm12 }
 0x1b2   :  { %v414_v54 = vmul.f32 %v6057_v50, %v413_v52  ;;  %v411_v61 = vsel %vm410_vm13, %v6055_v48, %v407_v59 }
 0x1b3   :  { %v442_v2 = vmul.f32 %v411_v61, %v374_v20 }
 0x1b4   :  { %v415_v56 = vmul.f32 0.5, %v414_v54 }
 0x1b5   :  { %v447_v7 = vmul.f32 %v6696_v37, %v442_v2 }
 0x1b6   :  { %452 = vrot.lane.b32.xlu2 %v6696_v37, %s6505_s23  ;;  %v416_v58 = vsub.f32 1.5, %v415_v56 }
 0x1b8   :  { %v417_v60 = vmul.f32 %v6057_v50, %v416_v58  ;;  %v55_v58 = vlaneseq }
 0x1ba   :  { %v421_v62 = vsel %vm420_vm14, %v6057_v50, %v417_v60  ;;  %v61_v61 = vand.u32 127, %v55_v58 }
 0x1bb   :  { %v443_v3 = vmul.f32 %v421_v62, %v375_v26 }
 0x1bc   :  { %vm115_vm6 = vcmp.lt.s32.totalorder %v61_v61, 8  ;;  %vm97_vm7 = vcmp.ge.s32.totalorder %v61_v61, 8  ;;  %vm102_vm8 = vcmp.lt.s32.totalorder %v61_v61, 16  ;;  %vm103_vm10 = vcmp.lt.s32.totalorder %v61_v61, 24 }
 0x1bd   :  { %v448_v8 = vmul.f32 %v6696_v37, %v443_v3  ;;  %vm118_vm9 = vmand %vm97_vm7, %vm102_vm8  ;;  %vm120_vm11 = vcmp.ge.s32.totalorder %v61_v61, 16  ;;  %vm123_vm13 = vcmp.ge.s32.totalorder %v61_v61, 24  ;;  %vm124_vm14 = vcmp.lt.s32.totalorder %v61_v61, 32 }
 0x1be   :  { %vm121_vm12 = vmand %vm120_vm11, %vm103_vm10 }
 0x211   :  { %v359_v63 = vpop.xlane.xlu2 %358 }
 0x212   :  { %v372_v0 = vmul.f32 %v6674_v13, %v359_v63 }
 0x214   :  { %v376_v4 = vsub.f32 %v6686_v32, %v372_v0  ;;  %v6509_v0 = vmov 0.0  }
 0x215   :  { %v6736_v1 = vsel %vm115_vm6, 1.0, %v6509_v0 }
 0x216   :  { %v380_v5 = vmul.f32 %v376_v4, %v376_v4 }
 0x218   :  { %v388_v9 = vsel %vm146_vm3, %v380_v5, 0.0 }
 0x219   :  { %v453_v10 = vpop.permute.xlu2 %452  ;;  %389 = vadd.xlane.f32.xlu0 %v388_v9 }
 0x21a   :  { %v455_v11 = vadd.f32 %v453_v10, %v447_v7  ;;  %v456_v12 = vadd.f32 %v453_v10, %v448_v8  ;;  %v6747_v8 = vsel %vm118_vm9, 1.0, %v6509_v0 }
 0x21c   :  { %v459_v15 = vpack.c.bf16 %v456_v12, %v455_v11 }
 0x21e   :  { %5356 = vmatmul.msk.bf16.vlgmr.msrb.gmra.mxu2 %vm146_vm3, %v459_v15 }
 0x221   :  { %392 = vadd.xlane.f32.xlu0 %v391_v17  ;;  %v6757_v17 = vsel %vm121_vm12, 1.0, %v6509_v0 }
 0x28c   :  { %v390_v18 = vpop.xlane.xlu0 %389 }
 0x28d   :  { %v396_v20 = vmul.f32 %v390_v18, %v6674_v13 }
 0x28f   :  { %v400_v21 = vadd.f32 1e-05, %v396_v20 }
 0x291   :  { %6058 = vrsqrt.f32 %v400_v21  ;;  %vm428_vm0 = vweird.f32 %v400_v21 }
 0x294   :  { %v393_v22 = vpop.xlane.xlu0 %392 }
 0x295   :  { %v397_v23 = vmul.f32 %v393_v22, %v6674_v13 }
 0x297   :  { %v6059_v24 = vpop.eup %6058  ;;  %v401_v25 = vadd.f32 1e-05, %v397_v23 }
 0x298   :  { %v423_v26 = vmul.f32 %v6059_v24, %v400_v21  ;;  %vm429_vm15 = vweird.f32 %v6059_v24 }
 0x299   :  { %6060 = vrsqrt.f32 %v401_v25  ;;  %vm430_vm1 = vmor %vm428_vm0, %vm429_vm15  ;;  %vm438_vm4 = vweird.f32 %v401_v25  ;;  %vm99_vm0 = vcmp.ge.s32.totalorder %v61_v61, 20 }
 0x29a   :  { %v424_v27 = vmul.f32 %v6059_v24, %v423_v26  ;;  %vm125_vm15 = vmand %vm123_vm13, %vm124_vm14 }
 0x29c   :  { %v425_v28 = vmul.f32 0.5, %v424_v27 }
 0x29e   :  { %v426_v29 = vsub.f32 1.5, %v425_v28 }
 0x29f   :  { %v6061_v30 = vpop.eup %6060 }
 0x2a0   :  { %v427_v31 = vmul.f32 %v6059_v24, %v426_v29  ;;  %v433_v34 = vmul.f32 %v6061_v30, %v401_v25  ;;  %vm439_vm2 = vweird.f32 %v6061_v30  ;;  %v6766_v25 = vsel %vm125_vm15, 1.0, %v6509_v0 }
 0x2a1   :  { %v6719_v35 = vpop.f32.mrf.mxu2  ;;  %vm440_vm5 = vmor %vm438_vm4, %vm439_vm2 }
 0x2a2   :  { %v434_v38 = vmul.f32 %v6061_v30, %v433_v34  ;;  %v431_v40 = vsel %vm430_vm1, %v6059_v24, %v427_v31  ;;  %v502_v3 = vmul.f32 %v6719_v35, %v6736_v1  ;;  %v510_v20 = vmul.f32 %v6719_v35, %v6757_v17 }
 0x2a3   :  { %v444_v43 = vmul.f32 %v431_v40, %v376_v4  ;;  %v514_v27 = vmul.f32 %v6719_v35, %v6766_v25  ;;  %v5298_v34 = vadd.s32 4294967272, %v61_v61 }
 0x2a4   :  { %v435_v41 = vmul.f32 0.5, %v434_v38  ;;  %v6510_v38 = vmov 0  }
 0x2a5   :  { %v449_v50 = vmul.f32 %v6696_v37, %v444_v43  ;;  %v100_v40 = vsel %vm99_vm0, 1, %v6510_v38  ;;  %v56_v43 = vshrl.u32 %v55_v58, 7 }
 0x2a6   :  { %v436_v42 = vsub.f32 1.5, %v435_v41  ;;  %v98_v41 = vsel %vm97_vm7, 1, %v6510_v38 }
 0x2a7   :  { %v457_v52 = vadd.f32 %v453_v10, %v449_v50  ;;  %v58_v50 = vadd.s32 16, %v56_v43 }
 0x2a8   :  { %v437_v44 = vmul.f32 %v6061_v30, %v436_v42  ;;  %v104_v42 = vsel %vm103_vm10, %v100_v40, %v5298_v34 }
 0x2a9   :  { %v494_v45 = vpop.f32.mrf.mxu2  ;;  %vm72_vm4 = vcmp.ge.s32.totalorder %v58_v50, 20 }
 0x2aa   :  { %v441_v46 = vsel %vm440_vm5, %v6061_v30, %v437_v44  ;;  %v6722_v48 = vpack.c.bf16 %v494_v45, %v6719_v35  ;;  %v503_v2 = vmul.f32 %v494_v45, %v6736_v1  ;;  %v507_v9 = vmul.f32 %v494_v45, %v6747_v8 }
 0x2ab   :  { %v445_v49 = vmul.f32 %v441_v46, %v377_v6  ;;  %v511_v18 = vmul.f32 %v494_v45, %v6757_v17  ;;  %v515_v26 = vmul.f32 %v494_v45, %v6766_v25  ;;  %v6511_v44 = vmov -1e+30  }
 0x2ac   :  { %530 = vrot.lane.b32.xlu0 %v6722_v48, %s6505_s23  ;;  %v518_v4 = vpack.c.bf16 %v503_v2, %v502_v3 }
 0x2ad   :  { %v450_v51 = vmul.f32 %v6696_v37, %v445_v49  ;;  %v522_v21 = vpack.c.bf16 %v511_v18, %v510_v20  ;;  %v524_v28 = vpack.c.bf16 %v515_v26, %v514_v27 }
 0x2af   :  { %v458_v53 = vadd.f32 %v453_v10, %v450_v51  ;;  %v506_v10 = vmul.f32 %v6719_v35, %v6747_v8  ;;  %v105_v35 = vsel %vm102_vm8, %v98_v41, %v104_v42 }
 0x2b0   :  { %vm5299_vm1 = vcmp.eq.s32.totalorder %v105_v35, 0  ;;  %vm5300_vm2 = vcmp.eq.s32.totalorder %v105_v35, 1  ;;  %vm109_vm6 = vcmp.eq.s32.totalorder %v56_v43, %v105_v35 }
 0x2b1   :  { %v460_v54 = vpack.c.bf16 %v458_v53, %v457_v52  ;;  %v520_v11 = vpack.c.bf16 %v507_v9, %v506_v10  ;;  %v6779_v45 = vsel %vm5299_vm1, 0.0, %v6511_v44  ;;  %v6783_v52 = vsel %vm5300_vm2, 0.0, %v6511_v44 }
 0x2b3   :  { %5357 = vmatmul.msk.bf16.gmra.mxu2 %vm146_vm3, %v460_v54  ;;  %v76_v54 = vsel %vm72_vm4, 1, %v6510_v38 }
 0x2b4   :  { %vm108_vm5 = vcmp.eq.s32.totalorder %v76_v54, %v105_v35 }
 0x2b5   :  { %v6787_v58 = vsel %vm108_vm5, 0.0, %v6511_v44 }
 0x31e   :  { %v531_v62 = vpop.permute.xlu0 %530 }
 0x31f   :  { %v559_v63 = vsel %vm146_vm3, %v531_v62, 0  ;;  %v6794_v62 = vsel %vm109_vm6, 0.0, %v6511_v44 }
 0x336   :  { %v497_v55 = vpop.f32.mrf.mxu2 }
 0x337   :  { %v504_v6 = vmul.f32 %v497_v55, %v6736_v1  ;;  %v508_v15 = vmul.f32 %v497_v55, %v6747_v8  ;;  %v512_v23 = vmul.f32 %v497_v55, %v6757_v17  ;;  %v516_v30 = vmul.f32 %v497_v55, %v6766_v25 }
 0x33e   :  { %v499_v56 = vpop.f32.mrf.mxu2 }
 0x33f   :  { %v6729_v57 = vpack.c.bf16 %v499_v56, %v497_v55  ;;  %v505_v5 = vmul.f32 %v499_v56, %v6736_v1  ;;  %v509_v12 = vmul.f32 %v499_v56, %v6747_v8  ;;  %v513_v22 = vmul.f32 %v499_v56, %v6757_v17 }
 0x340   :  { %v517_v29 = vmul.f32 %v499_v56, %v6766_v25 }
 0x341   :  { %532 = vrot.lane.b32.xlu1 %v6729_v57, %s6505_s23  ;;  %v519_v7 = vpack.c.bf16 %v505_v5, %v504_v6  ;;  %v521_v16 = vpack.c.bf16 %v509_v12, %v508_v15  ;;  %v523_v24 = vpack.c.bf16 %v513_v22, %v512_v23 }
 0x342   :  { %v525_v31 = vpack.c.bf16 %v517_v29, %v516_v30 }
 0x3b3   :  { %v533_v59 = vpop.permute.xlu1 %532 }
 0x3b4   :  { %v562_v60 = vsel %vm146_vm3, %v533_v59, 0 }
 0x3b5   :  { %570 = vmatpush.bf16.xpose.msrb.mxu3 %v562_v60 }
 0x3bd   :  { %571 = vmatpush.bf16.xpose.msrb.mxu3 %v559_v63 }
 0x3c4   :  { %5358 = vmatmul.msk.bf16.vlgmr.msrb.gmra.mxu3 %vm146_vm3, %v518_v4 }
 0x3d4   :  { %5359 = vmatmul.msk.bf16.gmra.mxu3 %vm146_vm3, %v519_v7 }
 0x3e4   :  { %5360 = vmatmul.msk.bf16.gmra.mxu3 %vm146_vm3, %v520_v11 }
 0x3f4   :  { %5361 = vmatmul.msk.bf16.gmra.mxu3 %vm146_vm3, %v521_v16 }
 0x404   :  { %5362 = vmatmul.msk.bf16.gmra.mxu3 %vm146_vm3, %v522_v21 }
 0x414   :  { %5363 = vmatmul.msk.bf16.gmra.mxu3 %vm146_vm3, %v523_v24 }
 0x424   :  { %5364 = vmatmul.msk.bf16.gmra.mxu3 %vm146_vm3, %v524_v28 }
 0x434   :  { %5365 = vmatmul.msk.bf16.gmra.mxu3 %vm146_vm3, %v525_v31 }
 0x447   :  { %v573_v46 = vpop.f32.mrf.mxu3 }
 0x448   :  { %v574_v49 = vadd.f32 %v573_v46, %v6779_v45 }
 0x44a   :  { %v613_v51 = vsel %vm146_vm3, %v574_v49, -inf }
 0x44b   :  { %614 = vmax.xlane.f32.xlu2 %v613_v51 }
 0x44f   :  { %v575_v53 = vpop.f32.mrf.mxu3 }
 0x450   :  { %v576_v55 = vadd.f32 %v575_v53, %v6783_v52 }
 0x452   :  { %v616_v56 = vsel %vm146_vm3, %v576_v55, -inf }
 0x453   :  { %617 = vmax.xlane.f32.xlu1 %v616_v56 }
 0x457   :  { %v578_v59 = vpop.f32.mrf.mxu3 }
 0x458   :  { %v6790_v60 = vadd.f32 %v578_v59, %v6787_v58 }
 0x45a   :  { %v619_v61 = vsel %vm146_vm3, %v6790_v60, -inf }
 0x45b   :  { %620 = vmax.xlane.f32.xlu0 %v619_v61 }
 0x45f   :  { %v580_v63 = vpop.f32.mrf.mxu3 }
 0x460   :  { %v581_v0 = vadd.f32 %v580_v63, %v6794_v62 }
 0x462   :  { %v622_v2 = vsel %vm146_vm3, %v581_v0, -inf }
 0x463   :  { %623 = vmax.xlane.f32.xlu2 %v622_v2 }
 0x467   :  { %v583_v3 = vpop.f32.mrf.mxu3 }
 0x468   :  { %v584_v4 = vadd.f32 %v583_v3, %v6779_v45 }
 0x46a   :  { %v625_v5 = vsel %vm146_vm3, %v584_v4, -inf }
 0x46b   :  { %626 = vmax.xlane.f32.xlu1 %v625_v5 }
 0x46f   :  { %v585_v6 = vpop.f32.mrf.mxu3 }
 0x470   :  { %v586_v7 = vadd.f32 %v585_v6, %v6783_v52 }
 0x472   :  { %v628_v9 = vsel %vm146_vm3, %v586_v7, -inf }
 0x473   :  { %629 = vmax.xlane.f32.xlu0 %v628_v9 }
 0x477   :  { %v588_v10 = vpop.f32.mrf.mxu3 }
 0x478   :  { %v6803_v11 = vadd.f32 %v588_v10, %v6787_v58 }
 0x47a   :  { %v631_v12 = vsel %vm146_vm3, %v6803_v11, -inf }
 0x47b   :  { %632 = vmax.xlane.f32.xlu2 %v631_v12 }
 0x47f   :  { %v590_v15 = vpop.f32.mrf.mxu3 }
 0x480   :  { %v6808_v16 = vadd.f32 %v590_v15, %v6794_v62 }
 0x482   :  { %v634_v18 = vsel %vm146_vm3, %v6808_v16, -inf }
 0x483   :  { %635 = vmax.xlane.f32.xlu1 %v634_v18 }
 0x487   :  { %v593_v20 = vpop.f32.mrf.mxu3 }
 0x488   :  { %v6813_v21 = vadd.f32 %v593_v20, %v6779_v45 }
 0x48a   :  { %v637_v22 = vsel %vm146_vm3, %v6813_v21, -inf }
 0x48b   :  { %638 = vmax.xlane.f32.xlu2 %v637_v22 }
 0x48f   :  { %v595_v23 = vpop.f32.mrf.mxu3 }
 0x490   :  { %v6818_v24 = vadd.f32 %v595_v23, %v6783_v52 }
 0x492   :  { %v640_v26 = vsel %vm146_vm3, %v6818_v24, -inf }
 0x493   :  { %641 = vmax.xlane.f32.xlu2 %v640_v26 }
 0x497   :  { %v598_v27 = vpop.f32.mrf.mxu3 }
 0x498   :  { %v6825_v30 = vadd.f32 %v598_v27, %v6787_v58 }
 0x49a   :  { %v643_v34 = vsel %vm146_vm3, %v6825_v30, -inf }
 0x49c   :  { %799 = vrot.lane.b32.xlu1 %v6729_v57, %s6507_s5 }
 0x49f   :  { %v600_v44 = vpop.f32.mrf.mxu3 }
 0x4a0   :  { %v6838_v46 = vadd.f32 %v600_v44, %v6794_v62 }
 0x4a2   :  { %v646_v53 = vsel %vm146_vm3, %v6838_v46, -inf }
 0x4be   :  { %v615_v28 = vpop.xlane.xlu2 %614 }
 0x4bf   :  { %v661_v29 = vsub.f32 %v574_v49, %v615_v28 }
 0x4c1   :  { %v677_v31 = vmul.f32 1.442695, %v661_v29 }
 0x4c3   :  { %6062 = vpow2.f32 %v677_v31 }
 0x4c6   :  { %644 = vmax.xlane.f32.xlu1 %v643_v34  ;;  %v618_v38 = vpop.xlane.xlu1 %617 }
 0x4c7   :  { %v662_v40 = vsub.f32 %v576_v55, %v618_v38 }
 0x4c9   :  { %v6829_v41 = vpop.eup %6062  ;;  %v679_v42 = vmul.f32 1.442695, %v662_v40 }
 0x4ca   :  { %v709_v57 = vsel %vm146_vm3, %v6829_v41, 0.0 }
 0x4cb   :  { %6064 = vpow2.f32 %v679_v42  ;;  %710 = vadd.xlane.f32.xlu0 %v709_v57 }
 0x4ce   :  { %v621_v54 = vpop.xlane.xlu0 %620 }
 0x4cf   :  { %v663_v15 = vsub.f32 %v6790_v60, %v621_v54 }
 0x4d1   :  { %v6833_v35 = vpop.eup %6064  ;;  %v681_v26 = vmul.f32 1.442695, %v663_v15 }
 0x4d2   :  { %v712_v43 = vsel %vm146_vm3, %v6833_v35, 0.0 }
 0x4d3   :  { %713 = vadd.xlane.f32.xlu2 %v712_v43 }
 0x4d6   :  { %v624_v49 = vpop.xlane.xlu2 %623 }
 0x4d7   :  { %v664_v50 = vsub.f32 %v581_v0, %v624_v49 }
 0x4d9   :  { %v683_v51 = vmul.f32 1.442695, %v664_v50 }
 0x4db   :  { %6066 = vpow2.f32 %v683_v51  ;;  %647 = vmax.xlane.f32.xlu2 %v646_v53 }
 0x4de   :  { %v627_v55 = vpop.xlane.xlu1 %626 }
 0x4df   :  { %v665_v56 = vsub.f32 %v584_v4, %v627_v55  ;;  %797 = vrot.lane.b32.xlu0 %v6722_v48, %s6507_s5  ;;  %v603_v4 = vpop.f32.mrf.mxu3 }
 0x4e0   :  { %v6857_v10 = vadd.f32 %v603_v4, %v6779_v45 }
 0x4e1   :  { %v6844_v59 = vpop.eup %6066  ;;  %v685_v61 = vmul.f32 1.442695, %v665_v56 }
 0x4e2   :  { %v718_v63 = vsel %vm146_vm3, %v6844_v59, 0.0  ;;  %v649_v23 = vsel %vm146_vm3, %v6857_v10, -inf }
 0x4e3   :  { %6068 = vpow2.f32 %v685_v61  ;;  %719 = vadd.xlane.f32.xlu2 %v718_v63 }
 0x4e6   :  { %v630_v0 = vpop.xlane.xlu0 %629 }
 0x4e7   :  { %v666_v2 = vsub.f32 %v586_v7, %v630_v0  ;;  %v605_v20 = vpop.f32.mrf.mxu3 }
 0x4e8   :  { %v6864_v27 = vadd.f32 %v605_v20, %v6783_v52 }
 0x4e9   :  { %v6848_v3 = vpop.eup %6068  ;;  %v687_v5 = vmul.f32 1.442695, %v666_v2 }
 0x4ea   :  { %v721_v6 = vsel %vm146_vm3, %v6848_v3, 0.0  ;;  %v652_v38 = vsel %vm146_vm3, %v6864_v27, -inf }
 0x4eb   :  { %6070 = vpow2.f32 %v687_v5  ;;  %722 = vadd.xlane.f32.xlu2 %v721_v6 }
 0x4ee   :  { %v633_v12 = vpop.xlane.xlu2 %632 }
 0x4ef   :  { %v667_v29 = vsub.f32 %v6803_v11, %v633_v12  ;;  %v608_v40 = vpop.f32.mrf.mxu3 }
 0x4f0   :  { %v6877_v11 = vadd.f32 %v608_v40, %v6787_v58 }
 0x4f1   :  { %v6852_v48 = vpop.eup %6070  ;;  %v689_v42 = vmul.f32 1.442695, %v667_v29 }
 0x4f2   :  { %v724_v9 = vsel %vm146_vm3, %v6852_v48, 0.0  ;;  %v655_v51 = vsel %vm146_vm3, %v6877_v11, -inf }
 0x4f3   :  { %725 = vadd.xlane.f32.xlu2 %v724_v9 }
 0x4f6   :  { %v636_v7 = vpop.xlane.xlu1 %635 }
 0x4f7   :  { %v668_v18 = vsub.f32 %v6808_v16, %v636_v7  ;;  %v610_v61 = vpop.f32.mrf.mxu3 }
 0x4f8   :  { %v6897_v0 = vadd.f32 %v610_v61, %v6794_v62 }
 0x4f9   :  { %v691_v22 = vmul.f32 1.442695, %v668_v18 }
 0x4fa   :  { %v658_v2 = vsel %vm146_vm3, %v6897_v0, -inf }
 0x4fb   :  { %6072 = vpow2.f32 %v691_v22  ;;  %650 = vmax.xlane.f32.xlu2 %v649_v23 }
 0x4fc   :  { %6074 = vpow2.f32 %v681_v26 }
 0x4fe   :  { %v639_v28 = vpop.xlane.xlu2 %638 }
 0x4ff   :  { %v669_v31 = vsub.f32 %v6813_v21, %v639_v28 }
 0x501   :  { %v6868_v60 = vpop.eup %6072  ;;  %v693_v16 = vmul.f32 1.442695, %v669_v31 }
 0x502   :  { %v730_v34 = vsel %vm146_vm3, %v6868_v60, 0.0  ;;  %v6874_v57 = vpop.eup %6074 }
 0x503   :  { %6076 = vpow2.f32 %v693_v16  ;;  %731 = vadd.xlane.f32.xlu1 %v730_v34  ;;  %653 = vmax.xlane.f32.xlu2 %v652_v38  ;;  %v715_v44 = vsel %vm146_vm3, %v6874_v57, 0.0 }
 0x504   :  { %6078 = vpow2.f32 %v689_v42 }
 0x506   :  { %v642_v21 = vpop.xlane.xlu2 %641 }
 0x507   :  { %v670_v43 = vsub.f32 %v6818_v24, %v642_v21 }
 0x509   :  { %v6882_v49 = vpop.eup %6076  ;;  %v695_v50 = vmul.f32 1.442695, %v670_v43  ;;  %716 = vadd.xlane.f32.xlu0 %v715_v44 }
 0x50a   :  { %v733_v53 = vsel %vm146_vm3, %v6882_v49, 0.0  ;;  %v6888_v54 = vpop.eup %6078 }
 0x50b   :  { %6080 = vpow2.f32 %v695_v50  ;;  %656 = vmax.xlane.f32.xlu2 %v655_v51  ;;  %734 = vadd.xlane.f32.xlu1 %v733_v53  ;;  %v727_v24 = vsel %vm146_vm3, %v6888_v54, 0.0 }
 0x50e   :  { %v800_v55 = vpop.permute.xlu1 %799 }
 0x50f   :  { %833 = vmatpush.bf16.msrb.mxu0 %v800_v55 }
 0x511   :  { %v6892_v56 = vpop.eup %6080  ;;  %728 = vadd.xlane.f32.xlu0 %v727_v24 }
 0x512   :  { %v736_v63 = vsel %vm146_vm3, %v6892_v56, 0.0 }
 0x513   :  { %737 = vadd.xlane.f32.xlu2 %v736_v63 }
 0x519   :  { %659 = vmax.xlane.f32.xlu0 %v658_v2 }
 0x539   :  { %v645_v5 = vpop.xlane.xlu1 %644 }
 0x53a   :  { %v671_v6 = vsub.f32 %v6825_v30, %v645_v5 }
 0x53c   :  { %v697_v4 = vmul.f32 1.442695, %v671_v6 }
 0x53e   :  { %6082 = vpow2.f32 %v697_v4  ;;  %v711_v12 = vpop.xlane.xlu0 %710 }
 0x544   :  { %v6902_v9 = vpop.eup %6082 }
 0x545   :  { %v739_v7 = vsel %vm146_vm3, %v6902_v9, 0.0 }
 0x546   :  { %740 = vadd.xlane.f32.xlu0 %v739_v7  ;;  %v714_v15 = vpop.xlane.xlu2 %713 }
 0x547   :  { %6084 = vrcp.f32 %v714_v15 }
 0x548   :  { %6086 = vrcp.f32 %v711_v12 }
 0x54d   :  { %v6085_v18 = vpop.eup %6084 }
 0x54e   :  { %v6087_v20 = vpop.eup %6086  ;;  %v648_v22 = vpop.xlane.xlu2 %647  ;;  %v774_v23 = vmul.f32 %v6085_v18, %v6833_v35 }
 0x54f   :  { %v672_v26 = vsub.f32 %v6838_v46, %v648_v22  ;;  %v773_v30 = vmul.f32 %v6087_v20, %v6829_v41 }
 0x551   :  { %v699_v28 = vmul.f32 1.442695, %v672_v26  ;;  %v798_v29 = vpop.permute.xlu0 %797  ;;  %v789_v31 = vpack.c.bf16 %v774_v23, %v773_v30 }
 0x552   :  { %834 = vmatpush.bf16.msrb.mxu0 %v798_v29 }
 0x553   :  { %6088 = vpow2.f32 %v699_v28 }
 0x555   :  { %5366 = vmatmul.msk.bf16.vlgmr.msrb.gmra.mxu0 %vm146_vm3, %v789_v31 }
 0x556   :  { %v720_v16 = vpop.xlane.xlu2 %719 }
 0x559   :  { %v6910_v34 = vpop.eup %6088 }
 0x55a   :  { %v742_v38 = vsel %vm146_vm3, %v6910_v34, 0.0 }
 0x55b   :  { %743 = vadd.xlane.f32.xlu1 %v742_v38 }
 0x55e   :  { %v723_v40 = vpop.xlane.xlu2 %722 }
 0x566   :  { %v726_v35 = vpop.xlane.xlu2 %725 }
 0x56e   :  { %v651_v42 = vpop.xlane.xlu2 %650 }
 0x56f   :  { %v673_v46 = vsub.f32 %v6857_v10, %v651_v42 }
 0x571   :  { %v701_v41 = vmul.f32 1.442695, %v673_v46 }
 0x573   :  { %6090 = vpow2.f32 %v701_v41  ;;  %v5956_v41 = vld [vmem:[%s8745_s10 + $0x8] sm:$0xff] }
 0x574   :  { %6092 = vrcp.f32 %v720_v16  ;;  %946 = vmatpush.bf16.msrb.mxu1 %v5956_v41  ;;  %6033 = vmatpush.bf16.msra.mxu2 %v5956_v41 }
 0x576   :  { %v654_v21 = vpop.xlane.xlu2 %653  ;;  %v732_v28 = vpop.xlane.xlu1 %731 }
 0x577   :  { %v674_v43 = vsub.f32 %v6864_v27, %v654_v21 }
 0x579   :  { %v6916_v44 = vpop.eup %6090  ;;  %v703_v50 = vmul.f32 1.442695, %v674_v43 }
 0x57a   :  { %v745_v51 = vsel %vm146_vm3, %v6916_v44, 0.0  ;;  %v6093_v10 = vpop.eup %6092 }
 0x57b   :  { %6094 = vpow2.f32 %v703_v50  ;;  %746 = vadd.xlane.f32.xlu2 %v745_v51  ;;  %v776_v4 = vmul.f32 %v6093_v10, %v6844_v59 }
 0x57c   :  { %v717_v53 = vpop.xlane.xlu0 %716 }
 0x57d   :  { %6096 = vrcp.f32 %v717_v53 }
 0x57e   :  { %v657_v55 = vpop.xlane.xlu2 %656 }
 0x57f   :  { %v675_v24 = vsub.f32 %v6877_v11, %v657_v55 }
 0x581   :  { %v6921_v61 = vpop.eup %6094  ;;  %v705_v63 = vmul.f32 1.442695, %v675_v24 }
 0x582   :  { %v748_v27 = vsel %vm146_vm3, %v6921_v61, 0.0 }
 0x583   :  { %v6097_v2 = vpop.eup %6096  ;;  %6098 = vpow2.f32 %v705_v63  ;;  %749 = vadd.xlane.f32.xlu0 %v748_v27 }
 0x584   :  { %v729_v5 = vpop.xlane.xlu0 %728  ;;  %v775_v6 = vmul.f32 %v6097_v2, %v6874_v57  ;;  %6100 = vrcp.f32 %v726_v35 }
 0x585   :  { %6102 = vrcp.f32 %v723_v40  ;;  %v735_v40 = vpop.xlane.xlu1 %734 }
 0x586   :  { %v790_v12 = vpack.c.bf16 %v776_v4, %v775_v6  ;;  %v738_v38 = vpop.xlane.xlu2 %737 }
 0x588   :  { %5367 = vmatmul.msk.bf16.gmra.mxu0 %vm146_vm3, %v790_v12 }
 0x589   :  { %v6928_v7 = vpop.eup %6098 }
 0x58a   :  { %v751_v11 = vsel %vm146_vm3, %v6928_v7, 0.0  ;;  %v6101_v20 = vpop.eup %6100 }
 0x58b   :  { %752 = vadd.xlane.f32.xlu1 %v751_v11  ;;  %v6103_v23 = vpop.eup %6102  ;;  %v778_v59 = vmul.f32 %v6101_v20, %v6852_v48 }
 0x58c   :  { %v660_v15 = vpop.xlane.xlu0 %659  ;;  %v777_v57 = vmul.f32 %v6103_v23, %v6848_v3 }
 0x58d   :  { %v676_v18 = vsub.f32 %v6897_v0, %v660_v15 }
 0x58e   :  { %v791_v26 = vpack.c.bf16 %v778_v59, %v777_v57 }
 0x58f   :  { %v707_v22 = vmul.f32 1.442695, %v676_v18 }
 0x591   :  { %6104 = vpow2.f32 %v707_v22 }
 0x592   :  { %6106 = vrcp.f32 %v729_v5 }
 0x593   :  { %6108 = vrcp.f32 %v732_v28 }
 0x594   :  { %6110 = vrcp.f32 %v738_v38 }
 0x595   :  { %6112 = vrcp.f32 %v735_v40 }
 0x597   :  { %v6935_v30 = vpop.eup %6104 }
 0x598   :  { %5368 = vmatmul.msk.bf16.gmra.mxu0 %vm146_vm3, %v791_v26  ;;  %v754_v29 = vsel %vm146_vm3, %v6935_v30, 0.0  ;;  %v6107_v0 = vpop.eup %6106 }
 0x599   :  { %755 = vadd.xlane.f32.xlu2 %v754_v29  ;;  %v6109_v31 = vpop.eup %6108  ;;  %v779_v16 = vmul.f32 %v6107_v0, %v6888_v54  ;;  %v5955_v54 = vld [vmem:[%s8745_s10] sm:$0xff] }
 0x59a   :  { %v780_v48 = vmul.f32 %v6109_v31, %v6868_v60  ;;  %v6111_v35 = vpop.eup %6110  ;;  %947 = vmatpush.bf16.msrb.mxu1 %v5955_v54  ;;  %6034 = vmatpush.bf16.msra.mxu2 %v5955_v54 }
 0x59b   :  { %v6113_v42 = vpop.eup %6112  ;;  %v782_v46 = vmul.f32 %v6111_v35, %v6892_v56 }
 0x59c   :  { %v792_v3 = vpack.c.bf16 %v780_v48, %v779_v16  ;;  %v781_v21 = vmul.f32 %v6113_v42, %v6882_v49 }
 0x59e   :  { %v793_v60 = vpack.c.bf16 %v782_v46, %v781_v21 }
 0x5a8   :  { %5369 = vmatmul.msk.bf16.gmra.mxu0 %vm146_vm3, %v792_v3 }
 0x5b8   :  { %5370 = vmatmul.msk.bf16.gmra.mxu0 %vm146_vm3, %v793_v60 }
 0x5b9   :  { %v741_v43 = vpop.xlane.xlu0 %740 }
 0x5ba   :  { %6114 = vrcp.f32 %v741_v43 }
 0x5c0   :  { %v6115_v51 = vpop.eup %6114 }
 0x5c1   :  { %v783_v49 = vmul.f32 %v6115_v51, %v6902_v9 }
 0x5ce   :  { %v744_v56 = vpop.xlane.xlu1 %743 }
 0x5cf   :  { %6116 = vrcp.f32 %v744_v56 }
 0x5d2   :  { %v836_v50 = vpop.f32.mrf.mxu0 }
 0x5d3   :  { %v876_v63 = vmul.f32 %v836_v50, %v6736_v1 }
 0x5d5   :  { %v6117_v53 = vpop.eup %6116 }
 0x5d6   :  { %v784_v55 = vmul.f32 %v6117_v53, %v6910_v34 }
 0x5d8   :  { %v794_v24 = vpack.c.bf16 %v784_v55, %v783_v49 }
 0x5da   :  { %v838_v10 = vpop.f32.mrf.mxu0  ;;  %5371 = vmatmul.msk.bf16.gmra.mxu0 %vm146_vm3, %v794_v24 }
 0x5db   :  { %v877_v27 = vmul.f32 %v838_v10, %v6736_v1 }
 0x5dd   :  { %v892_v2 = vpack.c.bf16 %v877_v27, %v876_v63 }
 0x5df   :  { %5382 = vmatmul.msk.bf16.vlgmr.msrb.gmra.mxu1 %vm146_vm3, %v892_v2 }
 0x5ee   :  { %v747_v5 = vpop.xlane.xlu2 %746 }
 0x5ef   :  { %6118 = vrcp.f32 %v747_v5 }
 0x5f5   :  { %v6119_v4 = vpop.eup %6118 }
 0x5f6   :  { %v750_v6 = vpop.xlane.xlu0 %749  ;;  %v785_v9 = vmul.f32 %v6119_v4, %v6916_v44 }
 0x5f7   :  { %6120 = vrcp.f32 %v750_v6 }
 0x5fd   :  { %v6121_v12 = vpop.eup %6120 }
 0x5fe   :  { %v786_v34 = vmul.f32 %v6121_v12, %v6921_v61  ;;  %v753_v18 = vpop.xlane.xlu1 %752 }
 0x5ff   :  { %6122 = vrcp.f32 %v753_v18 }
 0x600   :  { %v795_v11 = vpack.c.bf16 %v786_v34, %v785_v9 }
 0x602   :  { %5372 = vmatmul.msk.bf16.gmra.mxu0 %vm146_vm3, %v795_v11 }
 0x605   :  { %v841_v15 = vpop.f32.mrf.mxu0  ;;  %v6123_v26 = vpop.eup %6122 }
 0x606   :  { %v878_v23 = vmul.f32 %v841_v15, %v6736_v1  ;;  %v787_v61 = vmul.f32 %v6123_v26, %v6928_v7 }
 0x60c   :  { %v756_v20 = vpop.xlane.xlu2 %755 }
 0x60d   :  { %6124 = vrcp.f32 %v756_v20  ;;  %v843_v22 = vpop.f32.mrf.mxu0 }
 0x60e   :  { %v879_v59 = vmul.f32 %v843_v22, %v6736_v1 }
 0x610   :  { %v893_v57 = vpack.c.bf16 %v879_v59, %v878_v23 }
 0x612   :  { %5383 = vmatmul.msk.bf16.gmra.mxu1 %vm146_vm3, %v893_v57 }
 0x613   :  { %v6125_v44 = vpop.eup %6124 }
 0x614   :  { %v788_v28 = vmul.f32 %v6125_v44, %v6935_v30 }
 0x615   :  { %v846_v29 = vpop.f32.mrf.mxu0 }
 0x616   :  { %v796_v0 = vpack.c.bf16 %v788_v28, %v787_v61  ;;  %v880_v16 = vmul.f32 %v846_v29, %v6747_v8 }
 0x618   :  { %5373 = vmatmul.msk.bf16.gmra.mxu0 %vm146_vm3, %v796_v0  ;;  %v1005_v0 = vperm.slane %v6693_v36, 1 }
 0x61d   :  { %v848_v31 = vpop.f32.mrf.mxu0 }
 0x61e   :  { %v881_v48 = vmul.f32 %v848_v31, %v6747_v8 }
 0x620   :  { %v894_v38 = vpack.c.bf16 %v881_v48, %v880_v16 }
 0x622   :  { %5384 = vmatmul.msk.bf16.gmra.mxu1 %vm146_vm3, %v894_v38 }
 0x625   :  { %v851_v3 = vpop.f32.mrf.mxu0 }
 0x626   :  { %v882_v35 = vmul.f32 %v851_v3, %v6747_v8 }
 0x62d   :  { %v853_v40 = vpop.f32.mrf.mxu0 }
 0x62e   :  { %v883_v7 = vmul.f32 %v853_v40, %v6747_v8 }
 0x630   :  { %v895_v42 = vpack.c.bf16 %v883_v7, %v882_v35 }
 0x632   :  { %5385 = vmatmul.msk.bf16.gmra.mxu1 %vm146_vm3, %v895_v42 }
 0x635   :  { %v856_v30 = vpop.f32.mrf.mxu0 }
 0x636   :  { %v884_v41 = vmul.f32 %v856_v30, %v6757_v17 }
 0x63d   :  { %v858_v46 = vpop.f32.mrf.mxu0 }
 0x63e   :  { %v885_v21 = vmul.f32 %v858_v46, %v6757_v17 }
 0x640   :  { %v896_v60 = vpack.c.bf16 %v885_v21, %v884_v41 }
 0x642   :  { %5386 = vmatmul.msk.bf16.gmra.mxu1 %vm146_vm3, %v896_v60 }
 0x657   :  { %v861_v54 = vpop.f32.mrf.mxu0 }
 0x658   :  { %v886_v56 = vmul.f32 %v861_v54, %v6757_v17 }
 0x65c   :  { %v949_v53 = vpop.f32.mrf.mxu1 }
 0x65f   :  { %v863_v43 = vpop.f32.mrf.mxu0 }
 0x660   :  { %v887_v50 = vmul.f32 %v863_v43, %v6757_v17 }
 0x662   :  { %v897_v51 = vpack.c.bf16 %v887_v50, %v886_v56 }
 0x664   :  { %5387 = vmatmul.msk.bf16.gmra.mxu1 %vm146_vm3, %v897_v51  ;;  %v951_v55 = vpop.f32.mrf.mxu1 }
 0x67f   :  { %v866_v49 = vpop.f32.mrf.mxu0 }
 0x680   :  { %v888_v10 = vmul.f32 %v866_v49, %v6766_v25 }
 0x687   :  { %v868_v24 = vpop.f32.mrf.mxu0 }
 0x688   :  { %v889_v63 = vmul.f32 %v868_v24, %v6766_v25 }
 0x68a   :  { %v898_v27 = vpack.c.bf16 %v889_v63, %v888_v10 }
 0x68c   :  { %5388 = vmatmul.msk.bf16.gmra.mxu1 %vm146_vm3, %v898_v27 }
 0x68f   :  { %v954_v2 = vpop.f32.mrf.mxu1 }
 0x695   :  { %v871_v5 = vpop.f32.mrf.mxu0 }
 0x696   :  { %v890_v12 = vmul.f32 %v871_v5, %v6766_v25 }
 0x697   :  { %v956_v6 = vpop.f32.mrf.mxu1 }
 0x69d   :  { %v873_v4 = vpop.f32.mrf.mxu0 }
 0x69e   :  { %v891_v9 = vmul.f32 %v873_v4, %v6766_v25 }
 0x69f   :  { %v959_v34 = vpop.f32.mrf.mxu1 }
 0x6a0   :  { %v899_v11 = vpack.c.bf16 %v891_v9, %v890_v12  ;;  %v989_v44 = vadd.f32 %v959_v34, %v949_v53 }
 0x6a2   :  { %5389 = vmatmul.msk.bf16.vlgmr.msra.gmra.mxu2 %vm146_vm3, %v899_v11 }
 0x6a7   :  { %v961_v15 = vpop.f32.mrf.mxu1 }
 0x6a8   :  { %v990_v16 = vadd.f32 %v961_v15, %v951_v55 }
 0x6af   :  { %v964_v18 = vpop.f32.mrf.mxu1 }
 0x6b0   :  { %v991_v20 = vadd.f32 %v964_v18, %v954_v2 }
 0x6b7   :  { %v966_v22 = vpop.f32.mrf.mxu1 }
 0x6b8   :  { %v992_v21 = vadd.f32 %v966_v22, %v956_v6 }
 0x6bf   :  { %v969_v23 = vpop.f32.mrf.mxu1 }
 0x6c0   :  { %v993_v61 = vadd.f32 %v989_v44, %v969_v23 }
 0x6c7   :  { %v971_v59 = vpop.f32.mrf.mxu1 }
 0x6c8   :  { %v994_v38 = vadd.f32 %v990_v16, %v971_v59 }
 0x6e1   :  { %v974_v57 = vpop.f32.mrf.mxu1 }
 0x6e2   :  { %v995_v36 = vadd.f32 %v991_v20, %v974_v57 }
 0x6e9   :  { %v976_v26 = vpop.f32.mrf.mxu1 }
 0x6ea   :  { %v996_v54 = vadd.f32 %v992_v21, %v976_v26 }
 0x709   :  { %v979_v28 = vpop.f32.mrf.mxu1 }
 0x70a   :  { %v997_v29 = vadd.f32 %v993_v61, %v979_v28  ;;  %v5958_v28 = vld [vmem:[%s8746_s11 + $0x8] sm:$0xff] }
 0x70b   :  { %1143 = vmatpush.bf16.msrb.mxu2 %v5958_v28 }
 0x70c   :  { %v1001_v31 = vadd.f32 %v997_v29, %v6659_v39 }
 0x70e   :  { %v6987_v48 = vadd.f32 %v1005_v0, %v1001_v31 }
 0x710   :  { %v1010_v3 = vsel %vm146_vm3, %v6987_v48, 0.0 }
 0x711   :  { %1011 = vadd.xlane.f32.xlu0 %v1010_v3  ;;  %v981_v40 = vpop.f32.mrf.mxu1 }
 0x712   :  { %v998_v35 = vadd.f32 %v994_v38, %v981_v40 }
 0x714   :  { %v1002_v7 = vadd.f32 %v998_v35, %v6666_v47 }
 0x716   :  { %v6992_v42 = vadd.f32 %v1005_v0, %v1002_v7 }
 0x718   :  { %v1013_v30 = vsel %vm146_vm3, %v6992_v42, 0.0 }
 0x719   :  { %1014 = vadd.xlane.f32.xlu1 %v1013_v30 }
 0x725   :  { %v984_v39 = vpop.f32.mrf.mxu2 }
 0x726   :  { %v999_v46 = vadd.f32 %v995_v36, %v984_v39 }
 0x728   :  { %v1003_v41 = vadd.f32 %v999_v46, %v6686_v32 }
 0x72a   :  { %v6997_v60 = vadd.f32 %v1005_v0, %v1003_v41 }
 0x72c   :  { %v1016_v43 = vsel %vm146_vm3, %v6997_v60, 0.0 }
 0x72d   :  { %1017 = vadd.xlane.f32.xlu2 %v1016_v43  ;;  %v986_v47 = vpop.f32.mrf.mxu2 }
 0x72e   :  { %v1000_v56 = vadd.f32 %v996_v54, %v986_v47 }
 0x730   :  { %v1004_v50 = vadd.f32 %v1000_v56, %v6677_v19 }
 0x732   :  { %v7002_v51 = vadd.f32 %v1005_v0, %v1004_v50 }
 0x734   :  { %v1019_v53 = vsel %vm146_vm3, %v7002_v51, 0.0 }
 0x735   :  { %1020 = vadd.xlane.f32.xlu0 %v1019_v53 }
 0x784   :  { %v1012_v49 = vpop.xlane.xlu0 %1011 }
 0x785   :  { %v1022_v32 = vmul.f32 %v1012_v49, %v6674_v13 }
 0x787   :  { %v7008_v55 = vsub.f32 %v6987_v48, %v1022_v32 }
 0x789   :  { %v1030_v24 = vmul.f32 %v7008_v55, %v7008_v55 }
 0x78b   :  { %v1034_v10 = vsel %vm146_vm3, %v1030_v24, 0.0 }
 0x78c   :  { %1035 = vadd.xlane.f32.xlu1 %v1034_v10  ;;  %v1015_v63 = vpop.xlane.xlu1 %1014 }
 0x78d   :  { %v1023_v19 = vmul.f32 %v1015_v63, %v6674_v13 }
 0x78f   :  { %v7015_v27 = vsub.f32 %v6992_v42, %v1023_v19 }
 0x791   :  { %v1031_v2 = vmul.f32 %v7015_v27, %v7015_v27 }
 0x793   :  { %v1037_v5 = vsel %vm146_vm3, %v1031_v2, 0.0 }
 0x794   :  { %1038 = vadd.xlane.f32.xlu2 %v1037_v5 }
 0x7a0   :  { %v1018_v6 = vpop.xlane.xlu2 %1017 }
 0x7a1   :  { %v1024_v4 = vmul.f32 %v1018_v6, %v6674_v13 }
 0x7a3   :  { %v7022_v12 = vsub.f32 %v6997_v60, %v1024_v4 }
 0x7a5   :  { %v1032_v9 = vmul.f32 %v7022_v12, %v7022_v12 }
 0x7a7   :  { %v1040_v34 = vsel %vm146_vm3, %v1032_v9, 0.0 }
 0x7a8   :  { %1041 = vadd.xlane.f32.xlu0 %v1040_v34  ;;  %v1021_v11 = vpop.xlane.xlu0 %1020 }
 0x7a9   :  { %v1025_v15 = vmul.f32 %v1021_v11, %v6674_v13 }
 0x7ab   :  { %v7029_v18 = vsub.f32 %v7002_v51, %v1025_v15 }
 0x7ac   :  { %1098 = vrot.lane.b32.xlu2 %v6696_v37, %s6507_s5 }
 0x7ad   :  { %v1033_v20 = vmul.f32 %v7029_v18, %v7029_v18 }
 0x7af   :  { %v1043_v22 = vsel %vm146_vm3, %v1033_v20, 0.0 }
 0x7b0   :  { %1044 = vadd.xlane.f32.xlu1 %v1043_v22 }
 0x7bc   :  { %1105 = vrot.lane.b32.xlu0 %v6696_v37, %s6512_s30  ;;  %v5957_v37 = vld [vmem:[%s8746_s11] sm:$0xff] }
 0x7bd   :  { %1144 = vmatpush.bf16.msrb.mxu2 %v5957_v37 }
 0x7c9   :  { %1259 = vrot.lane.b32.xlu1 %v1005_v0, %s6505_s23 }
 0x7ff   :  { %v1036_v23 = vpop.xlane.xlu1 %1035 }
 0x800   :  { %v1046_v59 = vmul.f32 %v1036_v23, %v6674_v13 }
 0x802   :  { %v1050_v57 = vadd.f32 1e-05, %v1046_v59 }
 0x804   :  { %6126 = vrsqrt.f32 %v1050_v57  ;;  %vm1060_vm9 = vweird.f32 %v1050_v57 }
 0x807   :  { %v1039_v26 = vpop.xlane.xlu2 %1038 }
 0x808   :  { %v1047_v44 = vmul.f32 %v1039_v26, %v6674_v13 }
 0x80a   :  { %v1051_v61 = vadd.f32 1e-05, %v1047_v44  ;;  %v6127_v29 = vpop.eup %6126 }
 0x80b   :  { %v1055_v31 = vmul.f32 %v6127_v29, %v1050_v57  ;;  %vm1061_vm7 = vweird.f32 %v6127_v29 }
 0x80c   :  { %6128 = vrsqrt.f32 %v1051_v61  ;;  %vm1062_vm10 = vmor %vm1060_vm9, %vm1061_vm7  ;;  %vm1070_vm11 = vweird.f32 %v1051_v61 }
 0x80d   :  { %v1056_v38 = vmul.f32 %v6127_v29, %v1055_v31 }
 0x80f   :  { %v1057_v40 = vmul.f32 0.5, %v1056_v38  ;;  %v1099_v63 = vpop.permute.xlu2 %1098  ;;  %v5963_v38 = vld [vmem:[%s8747_s12 + $0x20] sm:$0xff] }
 0x811   :  { %v1058_v36 = vsub.f32 1.5, %v1057_v40  ;;  %v5961_v40 = vld [vmem:[%s8747_s12 + $0x10] sm:$0xff] }
 0x812   :  { %v6129_v0 = vpop.eup %6128 }
 0x813   :  { %v1065_v16 = vmul.f32 %v6129_v0, %v1051_v61  ;;  %v1059_v41 = vmul.f32 %v6127_v29, %v1058_v36  ;;  %vm1071_vm8 = vweird.f32 %v6129_v0 }
 0x814   :  { %vm1072_vm12 = vmor %vm1070_vm11, %vm1071_vm8 }
 0x815   :  { %v1066_v3 = vmul.f32 %v6129_v0, %v1065_v16  ;;  %v1063_v56 = vsel %vm1062_vm10, %v6127_v29, %v1059_v41  ;;  %v5966_v16 = vld [vmem:[%s8747_s12 + $0x38] sm:$0xff] }
 0x816   :  { %v1094_v32 = vmul.f32 %v1063_v56, %v7008_v55  ;;  %1262 = vmatpush.bf16.msra.mxu2 %v5966_v16 }
 0x817   :  { %v1067_v35 = vmul.f32 0.5, %v1066_v3  ;;  %v5962_v3 = vld [vmem:[%s8747_s12 + $0x18] sm:$0xff] }
 0x818   :  { %v1101_v2 = vmul.f32 %v1099_v63, %v1094_v32 }
 0x819   :  { %v1068_v46 = vsub.f32 1.5, %v1067_v35  ;;  %v5960_v35 = vld [vmem:[%s8747_s12 + $0x8] sm:$0xff] }
 0x81b   :  { %v1042_v7 = vpop.xlane.xlu0 %1041  ;;  %v1069_v21 = vmul.f32 %v6129_v0, %v1068_v46 }
 0x81c   :  { %v1048_v30 = vmul.f32 %v1042_v7, %v6674_v13  ;;  %v5959_v7 = vld [vmem:[%s8747_s12] sm:$0xff] }
 0x81d   :  { %v1073_v53 = vsel %vm1072_vm12, %v6129_v0, %v1069_v21 }
 0x81e   :  { %v1052_v39 = vadd.f32 1e-05, %v1048_v30  ;;  %v1095_v10 = vmul.f32 %v1073_v53, %v7015_v27  ;;  %v6498_v30 = vld [vmem:[%s8743_s13] sm:$0xf] }
 0x81f   :  { %v1118_v36 = vperm.slane %v6498_v30, 2 }
 0x820   :  { %6130 = vrsqrt.f32 %v1052_v39  ;;  %v1102_v4 = vmul.f32 %v1099_v63, %v1095_v10  ;;  %vm1080_vm14 = vweird.f32 %v1052_v39 }
 0x823   :  { %v1045_v54 = vpop.xlane.xlu1 %1044 }
 0x824   :  { %v1049_v43 = vmul.f32 %v1045_v54, %v6674_v13 }
 0x826   :  { %v6131_v47 = vpop.eup %6130  ;;  %v1053_v50 = vadd.f32 1e-05, %v1049_v43 }
 0x827   :  { %v1075_v49 = vmul.f32 %v6131_v47, %v1052_v39  ;;  %vm1081_vm13 = vweird.f32 %v6131_v47 }
 0x828   :  { %6132 = vrsqrt.f32 %v1053_v50  ;;  %vm1082_vm15 = vmor %vm1080_vm14, %vm1081_vm13  ;;  %vm1090_vm1 = vweird.f32 %v1053_v50 }
 0x829   :  { %v1076_v24 = vmul.f32 %v6131_v47, %v1075_v49 }
 0x82b   :  { %v1077_v19 = vmul.f32 0.5, %v1076_v24 }
 0x82d   :  { %v1078_v5 = vsub.f32 1.5, %v1077_v19 }
 0x82e   :  { %v6133_v6 = vpop.eup %6132  ;;  %v1106_v9 = vpop.permute.xlu0 %1105 }
 0x82f   :  { %v1079_v34 = vmul.f32 %v6131_v47, %v1078_v5  ;;  %v1085_v11 = vmul.f32 %v6133_v6, %v1053_v50  ;;  %v1108_v15 = vadd.f32 %v1106_v9, %v1101_v2  ;;  %v1109_v20 = vadd.f32 %v1106_v9, %v1102_v4 }
 0x830   :  { %vm1091_vm0 = vweird.f32 %v6133_v6 }
 0x831   :  { %v1086_v22 = vmul.f32 %v6133_v6, %v1085_v11  ;;  %v1112_v23 = vpack.c.bf16 %v1109_v20, %v1108_v15  ;;  %v1083_v55 = vsel %vm1082_vm15, %v6131_v47, %v1079_v34  ;;  %vm1092_vm2 = vmor %vm1090_vm1, %vm1091_vm0 }
 0x832   :  { %v1096_v57 = vmul.f32 %v1083_v55, %v7022_v12  ;;  %v5965_v12 = vld [vmem:[%s8747_s12 + $0x30] sm:$0xff] }
 0x833   :  { %v1087_v59 = vmul.f32 0.5, %v1086_v22  ;;  %5398 = vmatmul.msk.bf16.vlgmr.msrb.gmra.mxu2 %vm146_vm3, %v1112_v23 }
 0x834   :  { %v1103_v28 = vmul.f32 %v1099_v63, %v1096_v57  ;;  %1263 = vmatpush.bf16.msra.mxu2 %v5965_v12 }
 0x835   :  { %v1088_v27 = vsub.f32 1.5, %v1087_v59 }
 0x836   :  { %v1110_v37 = vadd.f32 %v1106_v9, %v1103_v28 }
 0x837   :  { %v1089_v26 = vmul.f32 %v6133_v6, %v1088_v27 }
 0x839   :  { %v1093_v44 = vsel %vm1092_vm2, %v6133_v6, %v1089_v26 }
 0x83a   :  { %v1097_v61 = vmul.f32 %v1093_v44, %v7029_v18  ;;  %v5964_v18 = vld [vmem:[%s8747_s12 + $0x28] sm:$0xff] }
 0x83b   :  { %1264 = vmatpush.bf16.msra.mxu2 %v5964_v18 }
 0x83c   :  { %v1104_v29 = vmul.f32 %v1099_v63, %v1097_v61 }
 0x83e   :  { %v1111_v0 = vadd.f32 %v1106_v9, %v1104_v29 }
 0x83f   :  { %1265 = vmatpush.bf16.msra.mxu2 %v5963_v38 }
 0x840   :  { %v1113_v31 = vpack.c.bf16 %v1111_v0, %v1110_v37 }
 0x843   :  { %5399 = vmatmul.msk.bf16.gmra.mxu2 %vm146_vm3, %v1113_v31 }
 0x844   :  { %1266 = vmatpush.bf16.msra.mxu2 %v5962_v3 }
 0x848   :  { %1267 = vmatpush.bf16.msra.mxu2 %v5961_v40 }
 0x84c   :  { %1268 = vmatpush.bf16.msra.mxu2 %v5960_v35 }
 0x850   :  { %1269 = vmatpush.bf16.msra.mxu2 %v5959_v7  ;;  %v1260_v7 = vpop.permute.xlu1 %1259 }
 0x8b6   :  { %v1146_v39 = vpop.f32.mrf.mxu2 }
 0x8b7   :  { %v1147_v46 = vadd.f32 %v1146_v39, %v1118_v36 }
 0x8b9   :  { %v1160_v41 = vmul.f32 0.044715, %v1147_v46  ;;  %v1156_v23 = vmul.f32 0.5, %v1147_v46 }
 0x8bb   :  { %v1164_v21 = vmul.f32 %v1160_v41, %v1147_v46 }
 0x8bd   :  { %v1168_v54 = vmul.f32 %v1164_v21, %v1147_v46 }
 0x8be   :  { %v1148_v43 = vpop.f32.mrf.mxu2 }
 0x8bf   :  { %v1172_v47 = vadd.f32 %v1168_v54, %v1147_v46  ;;  %v1149_v56 = vadd.f32 %v1148_v43, %v1118_v36 }
 0x8c1   :  { %v1161_v50 = vmul.f32 0.044715, %v1149_v56  ;;  %v1176_v53 = vmul.f32 0.7978846, %v1172_v47  ;;  %v1157_v55 = vmul.f32 0.5, %v1149_v56 }
 0x8c3   :  { %v1165_v49 = vmul.f32 %v1161_v50, %v1149_v56  ;;  %6134 = vtanh.f32 %v1176_v53 }
 0x8c5   :  { %v1169_v32 = vmul.f32 %v1165_v49, %v1149_v56 }
 0x8c6   :  { %v1151_v24 = vpop.f32.mrf.mxu2 }
 0x8c7   :  { %v1152_v10 = vadd.f32 %v1151_v24, %v1118_v36  ;;  %v1173_v63 = vadd.f32 %v1169_v32, %v1149_v56 }
 0x8c9   :  { %v1162_v19 = vmul.f32 0.044715, %v1152_v10  ;;  %v1177_v2 = vmul.f32 0.7978846, %v1173_v63  ;;  %v6135_v6 = vpop.eup %6134  ;;  %v1158_v12 = vmul.f32 0.5, %v1152_v10 }
 0x8ca   :  { %v1184_v15 = vadd.f32 1.0, %v6135_v6 }
 0x8cb   :  { %6136 = vtanh.f32 %v1177_v2  ;;  %v1166_v5 = vmul.f32 %v1162_v19, %v1152_v10 }
 0x8cc   :  { %v1188_v26 = vmul.f32 %v1184_v15, %v1156_v23 }
 0x8cd   :  { %v1170_v4 = vmul.f32 %v1166_v5, %v1152_v10 }
 0x8ce   :  { %v1153_v9 = vpop.f32.mrf.mxu2 }
 0x8cf   :  { %v1154_v34 = vadd.f32 %v1153_v9, %v1118_v36  ;;  %v1174_v11 = vadd.f32 %v1170_v4, %v1152_v10 }
 0x8d1   :  { %v6137_v20 = vpop.eup %6136  ;;  %v1163_v22 = vmul.f32 0.044715, %v1154_v34  ;;  %v1178_v57 = vmul.f32 0.7978846, %v1174_v11  ;;  %v1159_v18 = vmul.f32 0.5, %v1154_v34 }
 0x8d2   :  { %v1185_v59 = vadd.f32 1.0, %v6137_v20 }
 0x8d3   :  { %v1167_v27 = vmul.f32 %v1163_v22, %v1154_v34  ;;  %6138 = vtanh.f32 %v1178_v57 }
 0x8d4   :  { %v1189_v44 = vmul.f32 %v1185_v59, %v1157_v55 }
 0x8d5   :  { %v1171_v61 = vmul.f32 %v1167_v27, %v1154_v34  ;;  %v7128_v27 = vld [vmem:[%s8743_s13 + $0x4] sm:$0xf] }
 0x8d6   :  { %v1192_v28 = vpack.c.bf16 %v1189_v44, %v1188_v26  ;;  %v7132_v26 = vperm.slane %v7128_v27, 0  ;;  %v5968_v44 = vld [vmem:[%s8744_s9 + $0x18] sm:$0xff] }
 0x8d7   :  { %v1175_v29 = vadd.f32 %v1171_v61, %v1154_v34  ;;  %1419 = vmatpush.bf16.msrb.mxu2 %v5968_v44 }
 0x8d8   :  { %1270 = vmatmul.bf16.vlgmr.msra.gmra.mxu2 %v1192_v28 }
 0x8d9   :  { %v1179_v37 = vmul.f32 0.7978846, %v1175_v29  ;;  %v6139_v0 = vpop.eup %6138  ;;  %v5967_v29 = vld [vmem:[%s8744_s9 + $0x10] sm:$0xff] }
 0x8da   :  { %v1186_v31 = vadd.f32 1.0, %v6139_v0 }
 0x8db   :  { %6140 = vtanh.f32 %v1179_v37  ;;  %1420 = vmatpush.bf16.msrb.mxu2 %v5967_v29 }
 0x8dc   :  { %v1190_v3 = vmul.f32 %v1186_v31, %v1158_v12 }
 0x8e1   :  { %v6141_v16 = vpop.eup %6140 }
 0x8e2   :  { %v1187_v38 = vadd.f32 1.0, %v6141_v16 }
 0x8e4   :  { %v1191_v40 = vmul.f32 %v1187_v38, %v1159_v18 }
 0x8e6   :  { %v1193_v35 = vpack.c.bf16 %v1191_v40, %v1190_v3 }
 0x8e8   :  { %1275 = vmatmul.bf16.gmra.mxu2 %v1193_v35 }
 0x95b   :  { %v1271_v30 = vpop.f32.mrf.mxu2 }
 0x95c   :  { %v1272_v36 = vadd.f32 %v1271_v30, %v1260_v7 }
 0x95e   :  { %v7083_v39 = vadd.f32 %v1272_v36, %v6987_v48 }
 0x960   :  { %v1287_v46 = vsel %vm146_vm3, %v7083_v39, 0.0 }
 0x961   :  { %1288 = vadd.xlane.f32.xlu0 %v1287_v46 }
 0x963   :  { %v1273_v41 = vpop.f32.mrf.mxu2 }
 0x964   :  { %v1274_v21 = vadd.f32 %v1273_v41, %v1260_v7 }
 0x966   :  { %v7088_v54 = vadd.f32 %v1274_v21, %v6992_v42 }
 0x968   :  { %v1290_v43 = vsel %vm146_vm3, %v7088_v54, 0.0 }
 0x969   :  { %1291 = vadd.xlane.f32.xlu2 %v1290_v43 }
 0x96b   :  { %v1276_v47 = vpop.f32.mrf.mxu2 }
 0x96c   :  { %v1277_v56 = vadd.f32 %v1276_v47, %v1260_v7 }
 0x96e   :  { %v7093_v50 = vadd.f32 %v1277_v56, %v6997_v60 }
 0x970   :  { %v1293_v48 = vsel %vm146_vm3, %v7093_v50, 0.0 }
 0x971   :  { %1294 = vadd.xlane.f32.xlu1 %v1293_v48 }
 0x973   :  { %v1278_v53 = vpop.f32.mrf.mxu2 }
 0x974   :  { %v1279_v49 = vadd.f32 %v1278_v53, %v1260_v7 }
 0x976   :  { %v7098_v32 = vadd.f32 %v1279_v49, %v7002_v51 }
 0x978   :  { %v1296_v42 = vsel %vm146_vm3, %v7098_v32, 0.0 }
 0x979   :  { %1297 = vadd.xlane.f32.xlu0 %v1296_v42 }
 0x9d4   :  { %v1289_v24 = vpop.xlane.xlu0 %1288 }
 0x9d5   :  { %v1299_v10 = vmul.f32 %v1289_v24, %v6674_v13 }
 0x9d7   :  { %v1303_v63 = vsub.f32 %v7083_v39, %v1299_v10 }
 0x9d9   :  { %v1307_v60 = vmul.f32 %v1303_v63, %v1303_v63 }
 0x9db   :  { %v1311_v19 = vsel %vm146_vm3, %v1307_v60, 0.0 }
 0x9dc   :  { %v1292_v2 = vpop.xlane.xlu2 %1291  ;;  %1312 = vadd.xlane.f32.xlu2 %v1311_v19 }
 0x9dd   :  { %v1300_v5 = vmul.f32 %v1292_v2, %v6674_v13 }
 0x9df   :  { %v7107_v6 = vsub.f32 %v7088_v54, %v1300_v5 }
 0x9e1   :  { %v1308_v51 = vmul.f32 %v7107_v6, %v7107_v6 }
 0x9e3   :  { %v1314_v4 = vsel %vm146_vm3, %v1308_v51, 0.0 }
 0x9e4   :  { %v1295_v9 = vpop.xlane.xlu1 %1294  ;;  %1315 = vadd.xlane.f32.xlu0 %v1314_v4 }
 0x9e5   :  { %v1301_v34 = vmul.f32 %v1295_v9, %v6674_v13 }
 0x9e7   :  { %v7114_v11 = vsub.f32 %v7093_v50, %v1301_v34 }
 0x9e9   :  { %v1309_v15 = vmul.f32 %v7114_v11, %v7114_v11 }
 0x9eb   :  { %v1317_v20 = vsel %vm146_vm3, %v1309_v15, 0.0 }
 0x9ec   :  { %1318 = vadd.xlane.f32.xlu1 %v1317_v20  ;;  %v1298_v22 = vpop.xlane.xlu0 %1297 }
 0x9ed   :  { %v1302_v23 = vmul.f32 %v1298_v22, %v6674_v13 }
 0x9ef   :  { %v7121_v55 = vsub.f32 %v7098_v32, %v1302_v23 }
 0x9f1   :  { %v1310_v59 = vmul.f32 %v7121_v55, %v7121_v55 }
 0x9f3   :  { %v1320_v57 = vsel %vm146_vm3, %v1310_v59, 0.0 }
 0x9f4   :  { %1321 = vadd.xlane.f32.xlu2 %v1320_v57 }
 0x9f8   :  { %1381 = vrot.lane.b32.xlu0 %v7132_v26, %s6505_s23 }
 0xa4f   :  { %v1313_v61 = vpop.xlane.xlu2 %1312 }
 0xa50   :  { %v1323_v28 = vmul.f32 %v1313_v61, %v6674_v13 }
 0xa52   :  { %v1327_v37 = vadd.f32 1e-05, %v1323_v28 }
 0xa54   :  { %6142 = vrsqrt.f32 %v1327_v37  ;;  %vm1337_vm5 = vweird.f32 %v1327_v37 }
 0xa57   :  { %v1316_v0 = vpop.xlane.xlu0 %1315 }
 0xa58   :  { %v1324_v31 = vmul.f32 %v1316_v0, %v6674_v13 }
 0xa5a   :  { %v6143_v16 = vpop.eup %6142  ;;  %v1328_v12 = vadd.f32 1e-05, %v1324_v31 }
 0xa5b   :  { %v1332_v18 = vmul.f32 %v6143_v16, %v1327_v37  ;;  %vm1338_vm4 = vweird.f32 %v6143_v16 }
 0xa5c   :  { %6144 = vrsqrt.f32 %v1328_v12  ;;  %vm1339_vm6 = vmor %vm1337_vm5, %vm1338_vm4  ;;  %vm1347_vm8 = vweird.f32 %v1328_v12 }
 0xa5d   :  { %v1333_v38 = vmul.f32 %v6143_v16, %v1332_v18 }
 0xa5f   :  { %v1334_v3 = vmul.f32 0.5, %v1333_v38  ;;  %v1319_v40 = vpop.xlane.xlu1 %1318 }
 0xa60   :  { %v1325_v35 = vmul.f32 %v1319_v40, %v6674_v13 }
 0xa61   :  { %v1335_v7 = vsub.f32 1.5, %v1334_v3 }
 0xa62   :  { %v6145_v30 = vpop.eup %6144  ;;  %v1329_v36 = vadd.f32 1e-05, %v1325_v35 }
 0xa63   :  { %v1336_v46 = vmul.f32 %v6143_v16, %v1335_v7  ;;  %v1342_v41 = vmul.f32 %v6145_v30, %v1328_v12  ;;  %vm1348_vm7 = vweird.f32 %v6145_v30 }
 0xa64   :  { %6146 = vrsqrt.f32 %v1329_v36  ;;  %vm1349_vm9 = vmor %vm1347_vm8, %vm1348_vm7  ;;  %vm1357_vm11 = vweird.f32 %v1329_v36 }
 0xa65   :  { %v1343_v21 = vmul.f32 %v6145_v30, %v1342_v41  ;;  %v1340_v43 = vsel %vm1339_vm6, %v6143_v16, %v1336_v46 }
 0xa66   :  { %v1371_v42 = vmul.f32 %v1340_v43, %v1303_v63 }
 0xa67   :  { %v1344_v47 = vmul.f32 0.5, %v1343_v21  ;;  %v1322_v56 = vpop.xlane.xlu2 %1321 }
 0xa68   :  { %v1326_v48 = vmul.f32 %v1322_v56, %v6674_v13  ;;  %v1376_v51 = vmul.f32 %v7132_v26, %v1371_v42 }
 0xa69   :  { %v1345_v53 = vsub.f32 1.5, %v1344_v47 }
 0xa6a   :  { %v6147_v49 = vpop.eup %6146  ;;  %v1330_v24 = vadd.f32 1e-05, %v1326_v48  ;;  %v1382_v9 = vpop.permute.xlu0 %1381 }
 0xa6b   :  { %v1346_v10 = vmul.f32 %v6145_v30, %v1345_v53  ;;  %v1352_v60 = vmul.f32 %v6147_v49, %v1329_v36  ;;  %v1384_v22 = vadd.f32 %v1382_v9, %v1376_v51  ;;  %vm1358_vm10 = vweird.f32 %v6147_v49 }
 0xa6c   :  { %6148 = vrsqrt.f32 %v1330_v24  ;;  %vm1359_vm12 = vmor %vm1357_vm11, %vm1358_vm10  ;;  %vm1367_vm14 = vweird.f32 %v1330_v24 }
 0xa6d   :  { %v1350_v19 = vsel %vm1349_vm9, %v6145_v30, %v1346_v10  ;;  %v1353_v2 = vmul.f32 %v6147_v49, %v1352_v60 }
 0xa6e   :  { %v1372_v5 = vmul.f32 %v1350_v19, %v7107_v6 }
 0xa6f   :  { %v1354_v4 = vmul.f32 0.5, %v1353_v2 }
 0xa70   :  { %v1377_v34 = vmul.f32 %v7132_v26, %v1372_v5 }
 0xa71   :  { %v1355_v15 = vsub.f32 1.5, %v1354_v4 }
 0xa72   :  { %v6149_v20 = vpop.eup %6148  ;;  %v1385_v63 = vadd.f32 %v1382_v9, %v1377_v34 }
 0xa73   :  { %v1356_v23 = vmul.f32 %v6147_v49, %v1355_v15  ;;  %v1362_v59 = vmul.f32 %v6149_v20, %v1330_v24  ;;  %vm1368_vm13 = vweird.f32 %v6149_v20 }
 0xa74   :  { %v1388_v57 = vpack.c.bf16 %v1385_v63, %v1384_v22  ;;  %vm1369_vm15 = vmor %vm1367_vm14, %vm1368_vm13 }
 0xa75   :  { %v1363_v44 = vmul.f32 %v6149_v20, %v1362_v59  ;;  %v1360_v6 = vsel %vm1359_vm12, %v6147_v49, %v1356_v23 }
 0xa76   :  { %5445 = vmatmul.msk.bf16.vlgmr.msrb.gmra.mxu2 %vm146_vm3, %v1388_v57  ;;  %v1373_v29 = vmul.f32 %v1360_v6, %v7114_v11 }
 0xa77   :  { %v1364_v61 = vmul.f32 0.5, %v1363_v44 }
 0xa78   :  { %v1378_v16 = vmul.f32 %v7132_v26, %v1373_v29 }
 0xa79   :  { %v1365_v28 = vsub.f32 1.5, %v1364_v61 }
 0xa7a   :  { %v1386_v18 = vadd.f32 %v1382_v9, %v1378_v16 }
 0xa7b   :  { %v1366_v37 = vmul.f32 %v6149_v20, %v1365_v28 }
 0xa7d   :  { %v1370_v0 = vsel %vm1369_vm15, %v6149_v20, %v1366_v37 }
 0xa7e   :  { %v1374_v31 = vmul.f32 %v1370_v0, %v7121_v55 }
 0xa80   :  { %v1379_v12 = vmul.f32 %v7132_v26, %v1374_v31 }
 0xa82   :  { %v1387_v38 = vadd.f32 %v1382_v9, %v1379_v12 }
 0xa84   :  { %v1389_v3 = vpack.c.bf16 %v1387_v38, %v1386_v18 }
 0xa86   :  { %5446 = vmatmul.msk.bf16.gmra.mxu2 %vm146_vm3, %v1389_v3 }
 0xaf9   :  { %v1422_v40 = vpop.f32.mrf.mxu2 }
 0xafa   :  { %v1432_v47 = vmul.f32 %v1422_v40, %v6736_v1  ;;  %v1436_v24 = vmul.f32 %v1422_v40, %v6747_v8  ;;  %v1440_v51 = vmul.f32 %v1422_v40, %v6757_v17  ;;  %v1444_v22 = vmul.f32 %v1422_v40, %v6766_v25 }
 0xb01   :  { %v1424_v35 = vpop.f32.mrf.mxu2 }
 0xb02   :  { %v7155_v7 = vpack.c.bf16 %v1424_v35, %v1422_v40  ;;  %v1433_v43 = vmul.f32 %v1424_v35, %v6736_v1  ;;  %v1437_v42 = vmul.f32 %v1424_v35, %v6747_v8  ;;  %v1441_v5 = vmul.f32 %v1424_v35, %v6757_v17 }
 0xb03   :  { %v1445_v20 = vmul.f32 %v1424_v35, %v6766_v25 }
 0xb04   :  { %1460 = vrot.lane.b32.xlu2 %v7155_v7, %s6505_s23  ;;  %v1448_v56 = vpack.c.bf16 %v1433_v43, %v1432_v47  ;;  %v1450_v10 = vpack.c.bf16 %v1437_v42, %v1436_v24  ;;  %v1452_v4 = vpack.c.bf16 %v1441_v5, %v1440_v51 }
 0xb05   :  { %v1454_v63 = vpack.c.bf16 %v1445_v20, %v1444_v22 }
 0xb09   :  { %v1427_v11 = vpop.f32.mrf.mxu2 }
 0xb0a   :  { %v1434_v53 = vmul.f32 %v1427_v11, %v6736_v1  ;;  %v1438_v19 = vmul.f32 %v1427_v11, %v6747_v8  ;;  %v1442_v34 = vmul.f32 %v1427_v11, %v6757_v17  ;;  %v1446_v59 = vmul.f32 %v1427_v11, %v6766_v25 }
 0xb11   :  { %v1429_v30 = vpop.f32.mrf.mxu2 }
 0xb12   :  { %v7159_v36 = vpack.c.bf16 %v1429_v30, %v1427_v11  ;;  %v1435_v48 = vmul.f32 %v1429_v30, %v6736_v1  ;;  %v1439_v60 = vmul.f32 %v1429_v30, %v6747_v8  ;;  %v1443_v9 = vmul.f32 %v1429_v30, %v6757_v17 }
 0xb13   :  { %v1447_v23 = vmul.f32 %v1429_v30, %v6766_v25 }
 0xb14   :  { %1462 = vrot.lane.b32.xlu1 %v7159_v36, %s6505_s23  ;;  %v1449_v49 = vpack.c.bf16 %v1435_v48, %v1434_v53  ;;  %v1451_v2 = vpack.c.bf16 %v1439_v60, %v1438_v19  ;;  %v1453_v15 = vpack.c.bf16 %v1443_v9, %v1442_v34 }
 0xb15   :  { %v1455_v57 = vpack.c.bf16 %v1447_v23, %v1446_v59 }
 0xb5e   :  { %v1461_v41 = vpop.permute.xlu2 %1460 }
 0xb5f   :  { %v1489_v21 = vsel %vm146_vm3, %v1461_v41, 0 }
 0xb86   :  { %v1463_v55 = vpop.permute.xlu1 %1462 }
 0xb87   :  { %v1492_v46 = vsel %vm146_vm3, %v1463_v55, 0 }
 0xb88   :  { %1500 = vmatpush.bf16.xpose.msra.mxu2 %v1492_v46 }
 0xb90   :  { %1501 = vmatpush.bf16.xpose.msra.mxu2 %v1489_v21 }
 0xb97   :  { %5447 = vmatmul.msk.bf16.vlgmr.msra.gmra.mxu2 %vm146_vm3, %v1448_v56 }
 0xba7   :  { %5448 = vmatmul.msk.bf16.gmra.mxu2 %vm146_vm3, %v1449_v49 }
 0xbb7   :  { %5449 = vmatmul.msk.bf16.gmra.mxu2 %vm146_vm3, %v1450_v10 }
 0xbc7   :  { %5450 = vmatmul.msk.bf16.gmra.mxu2 %vm146_vm3, %v1451_v2 }
 0xbd7   :  { %5451 = vmatmul.msk.bf16.gmra.mxu2 %vm146_vm3, %v1452_v4 }
 0xbe7   :  { %5452 = vmatmul.msk.bf16.gmra.mxu2 %vm146_vm3, %v1453_v15 }
 0xbf7   :  { %5453 = vmatmul.msk.bf16.gmra.mxu2 %vm146_vm3, %v1454_v63 }
 0xc07   :  { %5454 = vmatmul.msk.bf16.gmra.mxu2 %vm146_vm3, %v1455_v57 }
 0xc1a   :  { %v1503_v44 = vpop.f32.mrf.mxu2 }
 0xc1b   :  { %v1504_v6 = vadd.f32 %v1503_v44, %v6779_v45 }
 0xc1d   :  { %v1543_v61 = vsel %vm146_vm3, %v1504_v6, -inf }
 0xc1e   :  { %1544 = vmax.xlane.f32.xlu0 %v1543_v61 }
 0xc22   :  { %v1505_v28 = vpop.f32.mrf.mxu2 }
 0xc23   :  { %v1506_v29 = vadd.f32 %v1505_v28, %v6783_v52 }
 0xc25   :  { %v1546_v37 = vsel %vm146_vm3, %v1506_v29, -inf }
 0xc26   :  { %1547 = vmax.xlane.f32.xlu2 %v1546_v37 }
 0xc2a   :  { %v1508_v0 = vpop.f32.mrf.mxu2 }
 0xc2b   :  { %v1509_v31 = vadd.f32 %v1508_v0, %v6787_v58 }
 0xc2d   :  { %v1549_v16 = vsel %vm146_vm3, %v1509_v31, -inf }
 0xc2e   :  { %1550 = vmax.xlane.f32.xlu1 %v1549_v16 }
 0xc32   :  { %v1510_v12 = vpop.f32.mrf.mxu2 }
 0xc33   :  { %v1511_v18 = vadd.f32 %v1510_v12, %v6794_v62 }
 0xc35   :  { %v1552_v38 = vsel %vm146_vm3, %v1511_v18, -inf }
 0xc36   :  { %1553 = vmax.xlane.f32.xlu0 %v1552_v38 }
 0xc3a   :  { %v1513_v3 = vpop.f32.mrf.mxu2 }
 0xc3b   :  { %v1514_v40 = vadd.f32 %v1513_v3, %v6779_v45 }
 0xc3d   :  { %v1555_v35 = vsel %vm146_vm3, %v1514_v40, -inf }
 0xc3e   :  { %1556 = vmax.xlane.f32.xlu2 %v1555_v35 }
 0xc42   :  { %v1515_v11 = vpop.f32.mrf.mxu2 }
 0xc43   :  { %v7200_v30 = vadd.f32 %v1515_v11, %v6783_v52 }
 0xc45   :  { %v1558_v55 = vsel %vm146_vm3, %v7200_v30, -inf }
 0xc46   :  { %1559 = vmax.xlane.f32.xlu1 %v1558_v55 }
 0xc4a   :  { %v1518_v46 = vpop.f32.mrf.mxu2 }
 0xc4b   :  { %v7205_v41 = vadd.f32 %v1518_v46, %v6787_v58 }
 0xc4d   :  { %v1561_v21 = vsel %vm146_vm3, %v7205_v41, -inf }
 0xc4e   :  { %1562 = vmax.xlane.f32.xlu0 %v1561_v21 }
 0xc52   :  { %v1520_v43 = vpop.f32.mrf.mxu2 }
 0xc53   :  { %v7210_v47 = vadd.f32 %v1520_v43, %v6794_v62 }
 0xc55   :  { %v1564_v56 = vsel %vm146_vm3, %v7210_v47, -inf }
 0xc56   :  { %1565 = vmax.xlane.f32.xlu2 %v1564_v56 }
 0xc5a   :  { %v1523_v48 = vpop.f32.mrf.mxu2 }
 0xc5b   :  { %v7215_v53 = vadd.f32 %v1523_v48, %v6779_v45 }
 0xc5d   :  { %v1567_v49 = vsel %vm146_vm3, %v7215_v53, -inf }
 0xc5e   :  { %1568 = vmax.xlane.f32.xlu0 %v1567_v49 }
 0xc62   :  { %v1525_v42 = vpop.f32.mrf.mxu2 }
 0xc63   :  { %v7220_v24 = vadd.f32 %v1525_v42, %v6783_v52 }
 0xc65   :  { %v1570_v10 = vsel %vm146_vm3, %v7220_v24, -inf }
 0xc66   :  { %1571 = vmax.xlane.f32.xlu0 %v1570_v10 }
 0xc6a   :  { %v7228_v9 = vpop.f32.mrf.mxu2 }
 0xc6e   :  { %1729 = vrot.lane.b32.xlu2 %v7159_v36, %s6507_s5 }
 0xc72   :  { %v1530_v59 = vpop.f32.mrf.mxu2 }
 0xc73   :  { %v7241_v37 = vadd.f32 %v1530_v59, %v6794_v62 }
 0xc91   :  { %v1545_v60 = vpop.xlane.xlu0 %1544 }
 0xc92   :  { %v1591_v19 = vsub.f32 %v1504_v6, %v1545_v60 }
 0xc94   :  { %v1607_v2 = vmul.f32 1.442695, %v1591_v19 }
 0xc96   :  { %6150 = vpow2.f32 %v1607_v2 }
 0xc99   :  { %v1548_v5 = vpop.xlane.xlu2 %1547 }
 0xc9a   :  { %v1592_v51 = vsub.f32 %v1506_v29, %v1548_v5  ;;  %v1533_v29 = vpop.f32.mrf.mxu2 }
 0xc9b   :  { %v7252_v3 = vadd.f32 %v1533_v29, %v6779_v45 }
 0xc9c   :  { %v7226_v4 = vpop.eup %6150  ;;  %v1609_v34 = vmul.f32 1.442695, %v1592_v51 }
 0xc9d   :  { %v1639_v15 = vsel %vm146_vm3, %v7226_v4, 0.0  ;;  %v1579_v55 = vsel %vm146_vm3, %v7252_v3, -inf }
 0xc9e   :  { %6152 = vpow2.f32 %v1609_v34  ;;  %1640 = vadd.xlane.f32.xlu1 %v1639_v15 }
 0xca1   :  { %v1551_v20 = vpop.xlane.xlu1 %1550 }
 0xca2   :  { %v1593_v22 = vsub.f32 %v1509_v31, %v1551_v20  ;;  %v1535_v11 = vpop.f32.mrf.mxu2 }
 0xca3   :  { %v7272_v51 = vadd.f32 %v1535_v11, %v6783_v52 }
 0xca4   :  { %v7232_v63 = vpop.eup %6152  ;;  %v1611_v36 = vmul.f32 1.442695, %v1593_v22 }
 0xca5   :  { %v1642_v23 = vsel %vm146_vm3, %v7232_v63, 0.0 }
 0xca6   :  { %6154 = vpow2.f32 %v1611_v36  ;;  %1643 = vadd.xlane.f32.xlu0 %v1642_v23  ;;  %v1582_v36 = vsel %vm146_vm3, %v7272_v51, -inf }
 0xca9   :  { %v1554_v57 = vpop.xlane.xlu0 %1553 }
 0xcaa   :  { %v1594_v44 = vsub.f32 %v1511_v18, %v1554_v57  ;;  %v1576_v18 = vsel %vm146_vm3, %v7241_v37, -inf  ;;  %v7286_v57 = vadd.f32 %v7228_v9, %v6787_v58 }
 0xcac   :  { %v7236_v6 = vpop.eup %6154  ;;  %v1613_v61 = vmul.f32 1.442695, %v1594_v44 }
 0xcad   :  { %v1645_v28 = vsel %vm146_vm3, %v7236_v6, 0.0 }
 0xcae   :  { %6156 = vpow2.f32 %v1613_v61  ;;  %1646 = vadd.xlane.f32.xlu0 %v1645_v28  ;;  %v1573_v28 = vsel %vm146_vm3, %v7286_v57, -inf }
 0xcb1   :  { %v1557_v0 = vpop.xlane.xlu2 %1556 }
 0xcb2   :  { %v1595_v16 = vsub.f32 %v1514_v40, %v1557_v0 }
 0xcb4   :  { %v7243_v31 = vpop.eup %6156  ;;  %v1615_v38 = vmul.f32 1.442695, %v1595_v16 }
 0xcb5   :  { %v1648_v12 = vsel %vm146_vm3, %v7243_v31, 0.0 }
 0xcb6   :  { %1649 = vadd.xlane.f32.xlu2 %v1648_v12  ;;  %1577 = vmax.xlane.f32.xlu0 %v1576_v18  ;;  %6158 = vpow2.f32 %v1615_v38 }
 0xcb7   :  { %1727 = vrot.lane.b32.xlu1 %v7155_v7, %s6507_s5  ;;  %v1538_v7 = vpop.f32.mrf.mxu2 }
 0xcb8   :  { %v7296_v16 = vadd.f32 %v1538_v7, %v6787_v58 }
 0xcb9   :  { %v1560_v35 = vpop.xlane.xlu1 %1559 }
 0xcba   :  { %v1596_v40 = vsub.f32 %v7200_v30, %v1560_v35  ;;  %v1585_v12 = vsel %vm146_vm3, %v7296_v16, -inf }
 0xcbc   :  { %v1617_v46 = vmul.f32 1.442695, %v1596_v40  ;;  %v7257_v43 = vpop.eup %6158 }
 0xcbd   :  { %v1651_v49 = vsel %vm146_vm3, %v7257_v43, 0.0 }
 0xcbe   :  { %1580 = vmax.xlane.f32.xlu0 %v1579_v55  ;;  %6160 = vpow2.f32 %v1617_v46 }
 0xcbf   :  { %v1540_v2 = vpop.f32.mrf.mxu2 }
 0xcc0   :  { %v7275_v34 = vadd.f32 %v1540_v2, %v6794_v62 }
 0xcc1   :  { %v1563_v21 = vpop.xlane.xlu0 %1562 }
 0xcc2   :  { %v1597_v56 = vsub.f32 %v7205_v41, %v1563_v21  ;;  %v1588_v22 = vsel %vm146_vm3, %v7275_v34, -inf }
 0xcc4   :  { %v1619_v48 = vmul.f32 1.442695, %v1597_v56  ;;  %v7262_v30 = vpop.eup %6160 }
 0xcc5   :  { %v1654_v41 = vsel %vm146_vm3, %v7262_v30, 0.0 }
 0xcc6   :  { %6162 = vpow2.f32 %v1619_v48  ;;  %1652 = vadd.xlane.f32.xlu0 %v1651_v49 }
 0xcc9   :  { %v1566_v42 = vpop.xlane.xlu2 %1565 }
 0xcca   :  { %v1598_v60 = vsub.f32 %v7210_v47, %v1566_v42 }
 0xccc   :  { %v7264_v10 = vpop.eup %6162  ;;  %v1621_v5 = vmul.f32 1.442695, %v1598_v60 }
 0xccd   :  { %v1657_v19 = vsel %vm146_vm3, %v7264_v10, 0.0 }
 0xcce   :  { %1658 = vadd.xlane.f32.xlu2 %v1657_v19  ;;  %1655 = vadd.xlane.f32.xlu0 %v1654_v41  ;;  %6164 = vpow2.f32 %v1621_v5 }
 0xcd1   :  { %v1730_v15 = vpop.permute.xlu2 %1729  ;;  %v1569_v20 = vpop.xlane.xlu0 %1568 }
 0xcd2   :  { %1763 = vmatpush.bf16.msra.mxu3 %v1730_v15  ;;  %v1599_v47 = vsub.f32 %v7215_v53, %v1569_v20 }
 0xcd4   :  { %v1623_v23 = vmul.f32 1.442695, %v1599_v47  ;;  %v7282_v59 = vpop.eup %6164 }
 0xcd5   :  { %v1660_v53 = vsel %vm146_vm3, %v7282_v59, 0.0 }
 0xcd6   :  { %1589 = vmax.xlane.f32.xlu2 %v1588_v22  ;;  %1583 = vmax.xlane.f32.xlu0 %v1582_v36  ;;  %6166 = vpow2.f32 %v1623_v23 }
 0xcd9   :  { %v1572_v44 = vpop.xlane.xlu0 %1571 }
 0xcda   :  { %v1600_v61 = vsub.f32 %v7220_v24, %v1572_v44 }
 0xcdc   :  { %v7293_v29 = vpop.eup %6166  ;;  %v1625_v0 = vmul.f32 1.442695, %v1600_v61 }
 0xcdd   :  { %v1663_v9 = vsel %vm146_vm3, %v7293_v29, 0.0 }
 0xcde   :  { %1661 = vadd.xlane.f32.xlu0 %v1660_v53  ;;  %6168 = vpow2.f32 %v1625_v0 }
 0xce1   :  { %1574 = vmax.xlane.f32.xlu1 %v1573_v28 }
 0xce4   :  { %v7302_v24 = vpop.eup %6168 }
 0xce5   :  { %v1666_v18 = vsel %vm146_vm3, %v7302_v24, 0.0 }
 0xce6   :  { %1664 = vadd.xlane.f32.xlu0 %v1663_v9 }
 0xce9   :  { %1586 = vmax.xlane.f32.xlu1 %v1585_v12 }
 0xcf1   :  { %1667 = vadd.xlane.f32.xlu1 %v1666_v18 }
 0xd11   :  { %v1641_v35 = vpop.xlane.xlu1 %1640 }
 0xd19   :  { %v1644_v38 = vpop.xlane.xlu0 %1643 }
 0xd1a   :  { %6170 = vrcp.f32 %v1644_v38 }
 0xd1b   :  { %6172 = vrcp.f32 %v1641_v35 }
 0xd20   :  { %v6171_v40 = vpop.eup %6170 }
 0xd21   :  { %v1647_v11 = vpop.xlane.xlu0 %1646  ;;  %v6173_v55 = vpop.eup %6172  ;;  %v1704_v46 = vmul.f32 %v6171_v40, %v7232_v63 }
 0xd22   :  { %v1703_v56 = vmul.f32 %v6173_v55, %v7226_v4 }
 0xd24   :  { %v1719_v49 = vpack.c.bf16 %v1704_v46, %v1703_v56 }
 0xd29   :  { %v1578_v21 = vpop.xlane.xlu0 %1577  ;;  %v1728_v48 = vpop.permute.xlu1 %1727 }
 0xd2a   :  { %v1602_v7 = vsub.f32 %v7241_v37, %v1578_v21  ;;  %1764 = vmatpush.bf16.msra.mxu3 %v1728_v48  ;;  %v1650_v42 = vpop.xlane.xlu2 %1649 }
 0xd2c   :  { %v1629_v60 = vmul.f32 1.442695, %v1602_v7 }
 0xd2d   :  { %5455 = vmatmul.msk.bf16.vlgmr.msra.gmra.mxu3 %vm146_vm3, %v1719_v49 }
 0xd2e   :  { %6174 = vpow2.f32 %v1629_v60 }
 0xd2f   :  { %6176 = vrcp.f32 %v1650_v42 }
 0xd30   :  { %6178 = vrcp.f32 %v1647_v11 }
 0xd31   :  { %v1581_v19 = vpop.xlane.xlu0 %1580 }
 0xd32   :  { %v1603_v41 = vsub.f32 %v7252_v3, %v1581_v19 }
 0xd34   :  { %v7311_v2 = vpop.eup %6174  ;;  %v1631_v63 = vmul.f32 1.442695, %v1603_v41 }
 0xd35   :  { %v6177_v5 = vpop.eup %6176  ;;  %v1672_v4 = vsel %vm146_vm3, %v7311_v2, 0.0 }
 0xd36   :  { %6180 = vpow2.f32 %v1631_v63  ;;  %1673 = vadd.xlane.f32.xlu0 %v1672_v4  ;;  %v6179_v37 = vpop.eup %6178  ;;  %v1706_v15 = vmul.f32 %v6177_v5, %v7243_v31 }
 0xd37   :  { %v1705_v47 = vmul.f32 %v6179_v37, %v7236_v6 }
 0xd39   :  { %v1653_v20 = vpop.xlane.xlu0 %1652  ;;  %v1720_v36 = vpack.c.bf16 %v1706_v15, %v1705_v47  ;;  %v5970_v47 = vld [vmem:[%s8745_s10 + $0x18] sm:$0xff] }
 0xd3a   :  { %6182 = vrcp.f32 %v1653_v20  ;;  %1877 = vmatpush.bf16.msra.mxu0 %v5970_v47 }
 0xd3c   :  { %v7317_v22 = vpop.eup %6180 }
 0xd3d   :  { %v1675_v3 = vsel %vm146_vm3, %v7317_v22, 0.0  ;;  %5456 = vmatmul.msk.bf16.gmra.mxu3 %vm146_vm3, %v1720_v36  ;;  %v5969_v36 = vld [vmem:[%s8745_s10 + $0x10] sm:$0xff] }
 0xd3e   :  { %1676 = vadd.xlane.f32.xlu1 %v1675_v3  ;;  %1878 = vmatpush.bf16.msra.mxu0 %v5969_v36 }
 0xd40   :  { %v6183_v53 = vpop.eup %6182 }
 0xd41   :  { %v1659_v23 = vpop.xlane.xlu2 %1658  ;;  %v1656_v44 = vpop.xlane.xlu0 %1655  ;;  %v1707_v6 = vmul.f32 %v6183_v53, %v7257_v43 }
 0xd42   :  { %6184 = vrcp.f32 %v1656_v44 }
 0xd48   :  { %v6185_v61 = vpop.eup %6184 }
 0xd49   :  { %v1590_v28 = vpop.xlane.xlu2 %1589  ;;  %v1584_v31 = vpop.xlane.xlu0 %1583  ;;  %v1708_v9 = vmul.f32 %v6185_v61, %v7262_v30 }
 0xd4a   :  { %v1606_v0 = vsub.f32 %v7275_v34, %v1590_v28  ;;  %v1604_v43 = vsub.f32 %v7272_v51, %v1584_v31 }
 0xd4b   :  { %v1721_v18 = vpack.c.bf16 %v1708_v9, %v1707_v6 }
 0xd4c   :  { %v1637_v12 = vmul.f32 1.442695, %v1606_v0  ;;  %v1633_v7 = vmul.f32 1.442695, %v1604_v43 }
 0xd4d   :  { %5457 = vmatmul.msk.bf16.gmra.mxu3 %vm146_vm3, %v1721_v18 }
 0xd4e   :  { %6186 = vpow2.f32 %v1637_v12 }
 0xd4f   :  { %6188 = vrcp.f32 %v1659_v23 }
 0xd51   :  { %v1662_v38 = vpop.xlane.xlu0 %1661 }
 0xd52   :  { %6190 = vrcp.f32 %v1662_v38 }
 0xd54   :  { %v7326_v35 = vpop.eup %6186  ;;  %v1575_v11 = vpop.xlane.xlu1 %1574 }
 0xd55   :  { %v1601_v40 = vsub.f32 %v7286_v57, %v1575_v11  ;;  %v1684_v34 = vsel %vm146_vm3, %v7326_v35, 0.0  ;;  %v6189_v55 = vpop.eup %6188 }
 0xd56   :  { %1685 = vadd.xlane.f32.xlu1 %v1684_v34  ;;  %v1709_v21 = vmul.f32 %v6189_v55, %v7264_v10 }
 0xd57   :  { %v1627_v30 = vmul.f32 1.442695, %v1601_v40 }
 0xd58   :  { %v6191_v46 = vpop.eup %6190 }
 0xd59   :  { %v1710_v56 = vmul.f32 %v6191_v46, %v7282_v59  ;;  %6192 = vpow2.f32 %v1627_v30  ;;  %v1665_v19 = vpop.xlane.xlu0 %1664 }
 0xd5a   :  { %6194 = vpow2.f32 %v1633_v7 }
 0xd5b   :  { %v1722_v48 = vpack.c.bf16 %v1710_v56, %v1709_v21 }
 0xd5c   :  { %v1587_v49 = vpop.xlane.xlu1 %1586 }
 0xd5d   :  { %v1605_v42 = vsub.f32 %v7296_v16, %v1587_v49  ;;  %5458 = vmatmul.msk.bf16.gmra.mxu3 %vm146_vm3, %v1722_v48 }
 0xd5f   :  { %v6193_v57 = vpop.eup %6192  ;;  %v1635_v60 = vmul.f32 1.442695, %v1605_v42 }
 0xd60   :  { %v1669_v51 = vsel %vm146_vm3, %v6193_v57, 0.0  ;;  %v6195_v41 = vpop.eup %6194 }
 0xd61   :  { %6196 = vpow2.f32 %v1635_v60  ;;  %1670 = vadd.xlane.f32.xlu2 %v1669_v51  ;;  %v1678_v63 = vsel %vm146_vm3, %v6195_v41, 0.0 }
 0xd62   :  { %6198 = vrcp.f32 %v1665_v19 }
 0xd64   :  { %v1668_v10 = vpop.xlane.xlu1 %1667 }
 0xd65   :  { %6200 = vrcp.f32 %v1668_v10 }
 0xd67   :  { %v7337_v59 = vpop.eup %6196 }
 0xd68   :  { %v1681_v16 = vsel %vm146_vm3, %v7337_v59, 0.0  ;;  %v6199_v5 = vpop.eup %6198 }
 0xd69   :  { %1679 = vadd.xlane.f32.xlu2 %v1678_v63  ;;  %1682 = vadd.xlane.f32.xlu0 %v1681_v16  ;;  %v1711_v37 = vmul.f32 %v6199_v5, %v7293_v29 }
 0xd6b   :  { %v6201_v4 = vpop.eup %6200 }
 0xd6c   :  { %v1712_v15 = vmul.f32 %v6201_v4, %v7302_v24 }
 0xd6e   :  { %v1723_v20 = vpack.c.bf16 %v1712_v15, %v1711_v37 }
 0xd70   :  { %5459 = vmatmul.msk.bf16.gmra.mxu3 %vm146_vm3, %v1723_v20 }
 0xda9   :  { %v1674_v6 = vpop.xlane.xlu0 %1673 }
 0xdaa   :  { %6202 = vrcp.f32 %v1674_v6 }
 0xdb0   :  { %v1766_v3 = vpop.f32.mrf.mxu3  ;;  %v6203_v18 = vpop.eup %6202 }
 0xdb1   :  { %v1806_v44 = vmul.f32 %v1766_v3, %v6736_v1  ;;  %v1714_v55 = vmul.f32 %v6203_v18, %v7311_v2  ;;  %v1677_v56 = vpop.xlane.xlu1 %1676 }
 0xdb8   :  { %v1768_v23 = vpop.f32.mrf.mxu3 }
 0xdb9   :  { %v1807_v29 = vmul.f32 %v1768_v23, %v6736_v1 }
 0xdbb   :  { %v1822_v24 = vpack.c.bf16 %v1807_v29, %v1806_v44 }
 0xdbd   :  { %5475 = vmatmul.msk.bf16.vlgmr.msra.gmra.mxu0 %vm146_vm3, %v1822_v24 }
 0xdc0   :  { %v1771_v53 = vpop.f32.mrf.mxu3 }
 0xdc1   :  { %v1808_v28 = vmul.f32 %v1771_v53, %v6736_v1 }
 0xdc8   :  { %v1773_v61 = vpop.f32.mrf.mxu3 }
 0xdc9   :  { %v1809_v31 = vmul.f32 %v1773_v61, %v6736_v1  ;;  %v1686_v16 = vpop.xlane.xlu1 %1685 }
 0xdcb   :  { %v1823_v0 = vpack.c.bf16 %v1809_v31, %v1808_v28 }
 0xdcd   :  { %5476 = vmatmul.msk.bf16.gmra.mxu0 %vm146_vm3, %v1823_v0 }
 0xdd0   :  { %v1776_v9 = vpop.f32.mrf.mxu3 }
 0xdd1   :  { %v1810_v11 = vmul.f32 %v1776_v9, %v6747_v8 }
 0xdd4   :  { %v1671_v12 = vpop.xlane.xlu2 %1670 }
 0xdd5   :  { %6204 = vrcp.f32 %v1671_v12 }
 0xdd8   :  { %v1778_v38 = vpop.f32.mrf.mxu3 }
 0xdd9   :  { %v1811_v40 = vmul.f32 %v1778_v38, %v6747_v8 }
 0xddb   :  { %v6205_v34 = vpop.eup %6204  ;;  %v1824_v30 = vpack.c.bf16 %v1811_v40, %v1810_v11 }
 0xddc   :  { %v1713_v43 = vmul.f32 %v6205_v34, %v6193_v57  ;;  %v1680_v46 = vpop.xlane.xlu2 %1679  ;;  %v1683_v10 = vpop.xlane.xlu0 %1682 }
 0xddd   :  { %5477 = vmatmul.msk.bf16.gmra.mxu0 %vm146_vm3, %v1824_v30  ;;  %6206 = vrcp.f32 %v1680_v46 }
 0xdde   :  { %v1724_v21 = vpack.c.bf16 %v1714_v55, %v1713_v43  ;;  %6208 = vrcp.f32 %v1677_v56 }
 0xddf   :  { %6210 = vrcp.f32 %v1683_v10 }
 0xde0   :  { %5460 = vmatmul.msk.bf16.gmra.mxu3 %vm146_vm3, %v1724_v21  ;;  %v1781_v7 = vpop.f32.mrf.mxu3  ;;  %6212 = vrcp.f32 %v1686_v16 }
 0xde1   :  { %v1812_v19 = vmul.f32 %v1781_v7, %v6747_v8 }
 0xde3   :  { %v6207_v48 = vpop.eup %6206 }
 0xde4   :  { %v6209_v49 = vpop.eup %6208  ;;  %v1716_v60 = vmul.f32 %v6207_v48, %v6195_v41 }
 0xde5   :  { %v1715_v57 = vmul.f32 %v6209_v49, %v7317_v22  ;;  %v6211_v4 = vpop.eup %6210 }
 0xde6   :  { %v6213_v37 = vpop.eup %6212  ;;  %v1717_v41 = vmul.f32 %v6211_v4, %v7337_v59 }
 0xde7   :  { %v1725_v63 = vpack.c.bf16 %v1716_v60, %v1715_v57  ;;  %v1718_v20 = vmul.f32 %v6213_v37, %v7326_v35 }
 0xde8   :  { %v1783_v42 = vpop.f32.mrf.mxu3 }
 0xde9   :  { %v1813_v2 = vmul.f32 %v1783_v42, %v6747_v8  ;;  %v1726_v3 = vpack.c.bf16 %v1718_v20, %v1717_v41 }
 0xdeb   :  { %v1825_v51 = vpack.c.bf16 %v1813_v2, %v1812_v19  ;;  %v1936_v2 = vperm.slane %v7128_v27, 1 }
 0xded   :  { %5478 = vmatmul.msk.bf16.gmra.mxu0 %vm146_vm3, %v1825_v51 }
 0xdf0   :  { %5461 = vmatmul.msk.bf16.gmra.mxu3 %vm146_vm3, %v1725_v63 }
 0xdf3   :  { %v1786_v5 = vpop.f32.mrf.mxu3 }
 0xdf4   :  { %v1814_v22 = vmul.f32 %v1786_v5, %v6757_v17 }
 0xdfb   :  { %v1788_v15 = vpop.f32.mrf.mxu3 }
 0xdfc   :  { %v1815_v47 = vmul.f32 %v1788_v15, %v6757_v17 }
 0xdfe   :  { %v1826_v36 = vpack.c.bf16 %v1815_v47, %v1814_v22 }
 0xe00   :  { %5462 = vmatmul.msk.bf16.gmra.mxu3 %vm146_vm3, %v1726_v3  ;;  %5479 = vmatmul.msk.bf16.gmra.mxu0 %vm146_vm3, %v1826_v36 }
 0xe3a   :  { %v1880_v18 = vpop.f32.mrf.mxu0 }
 0xe42   :  { %v1882_v11 = vpop.f32.mrf.mxu0 }
 0xe4a   :  { %v1885_v40 = vpop.f32.mrf.mxu0 }
 0xe52   :  { %v1887_v34 = vpop.f32.mrf.mxu0 }
 0xe5a   :  { %v1890_v55 = vpop.f32.mrf.mxu0 }
 0xe5b   :  { %v1920_v49 = vadd.f32 %v1890_v55, %v1880_v18 }
 0xe62   :  { %v1892_v43 = vpop.f32.mrf.mxu0 }
 0xe63   :  { %v1791_v23 = vpop.f32.mrf.mxu3  ;;  %v1921_v51 = vadd.f32 %v1892_v43, %v1882_v11 }
 0xe64   :  { %v1816_v29 = vmul.f32 %v1791_v23, %v6757_v17 }
 0xe6a   :  { %v1895_v30 = vpop.f32.mrf.mxu0 }
 0xe6b   :  { %v1793_v44 = vpop.f32.mrf.mxu3  ;;  %v1922_v41 = vadd.f32 %v1895_v30, %v1885_v40 }
 0xe6c   :  { %v1817_v24 = vmul.f32 %v1793_v44, %v6757_v17 }
 0xe6e   :  { %v1827_v59 = vpack.c.bf16 %v1817_v24, %v1816_v29 }
 0xe70   :  { %5480 = vmatmul.msk.bf16.gmra.mxu0 %vm146_vm3, %v1827_v59 }
 0xe72   :  { %v1897_v46 = vpop.f32.mrf.mxu0 }
 0xe73   :  { %v1796_v35 = vpop.f32.mrf.mxu3  ;;  %v1923_v3 = vadd.f32 %v1897_v46, %v1887_v34 }
 0xe74   :  { %v1818_v61 = vmul.f32 %v1796_v35, %v6766_v25 }
 0xe7b   :  { %v1798_v53 = vpop.f32.mrf.mxu3 }
 0xe7c   :  { %v1819_v28 = vmul.f32 %v1798_v53, %v6766_v25 }
 0xe7d   :  { %v1900_v21 = vpop.f32.mrf.mxu0 }
 0xe7e   :  { %v1828_v31 = vpack.c.bf16 %v1819_v28, %v1818_v61  ;;  %v1924_v42 = vadd.f32 %v1920_v49, %v1900_v21 }
 0xe80   :  { %5481 = vmatmul.msk.bf16.gmra.mxu0 %vm146_vm3, %v1828_v31 }
 0xe83   :  { %v1801_v0 = vpop.f32.mrf.mxu3 }
 0xe84   :  { %v1820_v9 = vmul.f32 %v1801_v0, %v6766_v25 }
 0xe85   :  { %v1902_v56 = vpop.f32.mrf.mxu0 }
 0xe86   :  { %v1925_v63 = vadd.f32 %v1921_v51, %v1902_v56  ;;  %v5971_v51 = vld [vmem:[%s8746_s11 + $0x10] sm:$0xff] }
 0xe8b   :  { %v1803_v6 = vpop.f32.mrf.mxu3 }
 0xe8c   :  { %v1821_v12 = vmul.f32 %v1803_v6, %v6766_v25 }
 0xe8e   :  { %v1829_v38 = vpack.c.bf16 %v1821_v12, %v1820_v9 }
 0xe90   :  { %5482 = vmatmul.msk.bf16.gmra.mxu0 %vm146_vm3, %v1829_v38 }
 0xeed   :  { %v1905_v7 = vpop.f32.mrf.mxu0 }
 0xeee   :  { %v1926_v20 = vadd.f32 %v1922_v41, %v1905_v7 }
 0xef5   :  { %v1907_v48 = vpop.f32.mrf.mxu0 }
 0xef6   :  { %v1927_v44 = vadd.f32 %v1923_v3, %v1907_v48 }
 0xefd   :  { %v1910_v60 = vpop.f32.mrf.mxu0 }
 0xefe   :  { %v1928_v19 = vadd.f32 %v1924_v42, %v1910_v60  ;;  %v5972_v42 = vld [vmem:[%s8746_s11 + $0x18] sm:$0xff] }
 0xeff   :  { %2075 = vmatpush.bf16.msra.mxu1 %v5972_v42 }
 0xf00   :  { %v1932_v57 = vadd.f32 %v1928_v19, %v7083_v39 }
 0xf02   :  { %v7384_v10 = vadd.f32 %v1936_v2, %v1932_v57 }
 0xf03   :  { %2076 = vmatpush.bf16.msra.mxu1 %v5971_v51 }
 0xf04   :  { %v1941_v16 = vsel %vm146_vm3, %v7384_v10, 0.0 }
 0xf05   :  { %1942 = vadd.xlane.f32.xlu2 %v1941_v16  ;;  %v1912_v5 = vpop.f32.mrf.mxu0 }
 0xf06   :  { %v1929_v4 = vadd.f32 %v1925_v63, %v1912_v5 }
 0xf08   :  { %v1933_v37 = vadd.f32 %v1929_v4, %v7088_v54 }
 0xf0a   :  { %v7389_v15 = vadd.f32 %v1936_v2, %v1933_v37 }
 0xf0c   :  { %v1944_v27 = vsel %vm146_vm3, %v7389_v15, 0.0 }
 0xf0d   :  { %1945 = vadd.xlane.f32.xlu0 %v1944_v27  ;;  %v1915_v22 = vpop.f32.mrf.mxu0 }
 0xf0e   :  { %v1930_v47 = vadd.f32 %v1926_v20, %v1915_v22 }
 0xf10   :  { %v1934_v36 = vadd.f32 %v1930_v47, %v7093_v50 }
 0xf12   :  { %v7394_v23 = vadd.f32 %v1936_v2, %v1934_v36 }
 0xf14   :  { %v1947_v29 = vsel %vm146_vm3, %v7394_v23, 0.0 }
 0xf15   :  { %1948 = vadd.xlane.f32.xlu1 %v1947_v29  ;;  %v1917_v24 = vpop.f32.mrf.mxu0 }
 0xf16   :  { %v1931_v59 = vadd.f32 %v1927_v44, %v1917_v24 }
 0xf18   :  { %v1935_v35 = vadd.f32 %v1931_v59, %v7098_v32 }
 0xf1a   :  { %v7399_v53 = vadd.f32 %v1936_v2, %v1935_v35 }
 0xf1c   :  { %v1950_v61 = vsel %vm146_vm3, %v7399_v53, 0.0 }
 0xf1d   :  { %1951 = vadd.xlane.f32.xlu2 %v1950_v61 }
 0xf78   :  { %v1943_v28 = vpop.xlane.xlu2 %1942 }
 0xf79   :  { %v1953_v31 = vmul.f32 %v1943_v28, %v6674_v13 }
 0xf7b   :  { %v7405_v0 = vsub.f32 %v7384_v10, %v1953_v31 }
 0xf7d   :  { %v1961_v6 = vmul.f32 %v7405_v0, %v7405_v0 }
 0xf7f   :  { %v1965_v9 = vsel %vm146_vm3, %v1961_v6, 0.0 }
 0xf80   :  { %1966 = vadd.xlane.f32.xlu0 %v1965_v9  ;;  %v1946_v12 = vpop.xlane.xlu0 %1945 }
 0xf81   :  { %v1954_v18 = vmul.f32 %v1946_v12, %v6674_v13 }
 0xf83   :  { %v7412_v38 = vsub.f32 %v7389_v15, %v1954_v18 }
 0xf85   :  { %v1962_v11 = vmul.f32 %v7412_v38, %v7412_v38 }
 0xf87   :  { %v1968_v40 = vsel %vm146_vm3, %v1962_v11, 0.0 }
 0xf88   :  { %1969 = vadd.xlane.f32.xlu1 %v1968_v40  ;;  %v1949_v34 = vpop.xlane.xlu1 %1948 }
 0xf89   :  { %v1955_v55 = vmul.f32 %v1949_v34, %v6674_v13 }
 0xf8b   :  { %v7419_v43 = vsub.f32 %v7394_v23, %v1955_v55 }
 0xf8d   :  { %v1963_v30 = vmul.f32 %v7419_v43, %v7419_v43 }
 0xf8f   :  { %v1971_v46 = vsel %vm146_vm3, %v1963_v30, 0.0 }
 0xf90   :  { %1972 = vadd.xlane.f32.xlu2 %v1971_v46  ;;  %v1952_v21 = vpop.xlane.xlu2 %1951 }
 0xf91   :  { %v1956_v56 = vmul.f32 %v1952_v21, %v6674_v13 }
 0xf93   :  { %v7426_v7 = vsub.f32 %v7399_v53, %v1956_v56 }
 0xf95   :  { %v1964_v48 = vmul.f32 %v7426_v7, %v7426_v7 }
 0xf97   :  { %v1974_v49 = vsel %vm146_vm3, %v1964_v48, 0.0 }
 0xf98   :  { %1975 = vadd.xlane.f32.xlu0 %v1974_v49 }
 0xfa1   :  { %2029 = vrot.lane.b32.xlu1 %v7132_v26, %s6507_s5 }
 0xfa8   :  { %2036 = vrot.lane.b32.xlu2 %v7132_v26, %s6512_s30 }
 0xfac   :  { %2192 = vrot.lane.b32.xlu0 %v1936_v2, %s6505_s23 }
 0xff3   :  { %v1967_v60 = vpop.xlane.xlu0 %1966 }
 0xff4   :  { %v1977_v19 = vmul.f32 %v1967_v60, %v6674_v13 }
 0xff6   :  { %v1981_v57 = vadd.f32 1e-05, %v1977_v19 }
 0xff8   :  { %6214 = vrsqrt.f32 %v1981_v57  ;;  %vm1991_vm1 = vweird.f32 %v1981_v57 }
 0xffb   :  { %v1970_v63 = vpop.xlane.xlu1 %1969 }
 0xffc   :  { %v1978_v26 = vmul.f32 %v1970_v63, %v6674_v13 }
 0xffe   :  { %v6215_v16 = vpop.eup %6214  ;;  %v1982_v2 = vadd.f32 1e-05, %v1978_v26 }
 0xfff   :  { %v1986_v5 = vmul.f32 %v6215_v16, %v1981_v57  ;;  %vm1992_vm0 = vweird.f32 %v6215_v16 }
0x1000   :  { %6216 = vrsqrt.f32 %v1982_v2  ;;  %vm1993_vm4 = vmor %vm1991_vm1, %vm1992_vm0  ;;  %vm2001_vm5 = vweird.f32 %v1982_v2 }
0x1001   :  { %v1987_v4 = vmul.f32 %v6215_v16, %v1986_v5 }
0x1003   :  { %v1988_v37 = vmul.f32 0.5, %v1987_v4  ;;  %v1973_v41 = vpop.xlane.xlu2 %1972 }
0x1004   :  { %v1979_v20 = vmul.f32 %v1973_v41, %v6674_v13 }
0x1005   :  { %v1989_v47 = vsub.f32 1.5, %v1988_v37 }
0x1006   :  { %v6217_v27 = vpop.eup %6216  ;;  %v1983_v22 = vadd.f32 1e-05, %v1979_v20 }
0x1007   :  { %v1996_v36 = vmul.f32 %v6217_v27, %v1982_v2  ;;  %v1990_v44 = vmul.f32 %v6215_v16, %v1989_v47  ;;  %vm2002_vm2 = vweird.f32 %v6217_v27  ;;  %v5977_v47 = vld [vmem:[%s8747_s12 + $0x60] sm:$0xff] }
0x1008   :  { %6218 = vrsqrt.f32 %v1983_v22  ;;  %vm2003_vm6 = vmor %vm2001_vm5, %vm2002_vm2  ;;  %vm2011_vm8 = vweird.f32 %v1983_v22 }
0x1009   :  { %v1997_v3 = vmul.f32 %v6217_v27, %v1996_v36  ;;  %v1994_v31 = vsel %vm1993_vm4, %v6215_v16, %v1990_v44  ;;  %v5976_v36 = vld [vmem:[%s8747_s12 + $0x58] sm:$0xff]  ;;  %v5974_v44 = vld [vmem:[%s8747_s12 + $0x48] sm:$0xff] }
0x100a   :  { %v2025_v11 = vmul.f32 %v1994_v31, %v7405_v0 }
0x100b   :  { %v1998_v29 = vmul.f32 0.5, %v1997_v3  ;;  %v1976_v24 = vpop.xlane.xlu0 %1975  ;;  %v2037_v30 = vpop.permute.xlu2 %2036  ;;  %v5975_v3 = vld [vmem:[%s8747_s12 + $0x50] sm:$0xff] }
0x100c   :  { %v1980_v59 = vmul.f32 %v1976_v24, %v6674_v13  ;;  %v6499_v24 = vld [vmem:[%s8743_s13 + $0x4] sm:$0xf] }
0x100d   :  { %v1999_v35 = vsub.f32 1.5, %v1998_v29  ;;  %v5973_v29 = vld [vmem:[%s8747_s12 + $0x40] sm:$0xff] }
0x100e   :  { %v6219_v61 = vpop.eup %6218  ;;  %v1984_v28 = vadd.f32 1e-05, %v1980_v59  ;;  %v2050_v59 = vperm.slane %v6499_v24, 2 }
0x100f   :  { %v2000_v6 = vmul.f32 %v6217_v27, %v1999_v35  ;;  %v2006_v9 = vmul.f32 %v6219_v61, %v1983_v22  ;;  %vm2012_vm7 = vweird.f32 %v6219_v61  ;;  %v5980_v22 = vld [vmem:[%s8747_s12 + $0x78] sm:$0xff] }
0x1010   :  { %6220 = vrsqrt.f32 %v1984_v28  ;;  %vm2013_vm9 = vmor %vm2011_vm8, %vm2012_vm7  ;;  %vm2021_vm11 = vweird.f32 %v1984_v28  ;;  %2195 = vmatpush.bf16.msrb.mxu1 %v5980_v22 }
0x1011   :  { %v2004_v12 = vsel %vm2003_vm6, %v6217_v27, %v2000_v6  ;;  %v2007_v18 = vmul.f32 %v6219_v61, %v2006_v9 }
0x1012   :  { %v2026_v40 = vmul.f32 %v2004_v12, %v7412_v38 }
0x1013   :  { %v2008_v34 = vmul.f32 0.5, %v2007_v18  ;;  %v2030_v55 = vpop.permute.xlu1 %2029 }
0x1014   :  { %v2032_v46 = vmul.f32 %v2030_v55, %v2025_v11  ;;  %v2033_v21 = vmul.f32 %v2030_v55, %v2026_v40 }
0x1015   :  { %v2009_v56 = vsub.f32 1.5, %v2008_v34 }
0x1016   :  { %v6221_v48 = vpop.eup %6220  ;;  %v2039_v49 = vadd.f32 %v2037_v30, %v2032_v46  ;;  %v2040_v42 = vadd.f32 %v2037_v30, %v2033_v21 }
0x1017   :  { %v2010_v60 = vmul.f32 %v6219_v61, %v2009_v56  ;;  %v2016_v19 = vmul.f32 %v6221_v48, %v1984_v28  ;;  %vm2022_vm10 = vweird.f32 %v6221_v48 }
0x1018   :  { %v2043_v57 = vpack.c.bf16 %v2040_v42, %v2039_v49  ;;  %vm2023_vm12 = vmor %vm2021_vm11, %vm2022_vm10 }
0x1019   :  { %v2017_v51 = vmul.f32 %v6221_v48, %v2016_v19  ;;  %v2014_v0 = vsel %vm2013_vm9, %v6219_v61, %v2010_v60 }
0x101a   :  { %5495 = vmatmul.msk.bf16.vlgmr.msra.gmra.mxu1 %vm146_vm3, %v2043_v57  ;;  %v2027_v26 = vmul.f32 %v2014_v0, %v7419_v43  ;;  %v5979_v43 = vld [vmem:[%s8747_s12 + $0x70] sm:$0xff] }
0x101b   :  { %v2018_v38 = vmul.f32 0.5, %v2017_v51  ;;  %2196 = vmatpush.bf16.msrb.mxu1 %v5979_v43 }
0x101c   :  { %v2034_v4 = vmul.f32 %v2030_v55, %v2027_v26 }
0x101d   :  { %v2019_v63 = vsub.f32 1.5, %v2018_v38 }
0x101e   :  { %v2041_v41 = vadd.f32 %v2037_v30, %v2034_v4 }
0x101f   :  { %v2020_v16 = vmul.f32 %v6221_v48, %v2019_v63 }
0x1021   :  { %v2024_v2 = vsel %vm2023_vm12, %v6221_v48, %v2020_v16 }
0x1022   :  { %v2028_v5 = vmul.f32 %v2024_v2, %v7426_v7  ;;  %v5978_v7 = vld [vmem:[%s8747_s12 + $0x68] sm:$0xff] }
0x1023   :  { %2197 = vmatpush.bf16.msrb.mxu1 %v5978_v7 }
0x1024   :  { %v2035_v37 = vmul.f32 %v2030_v55, %v2028_v5 }
0x1026   :  { %v2042_v20 = vadd.f32 %v2037_v30, %v2035_v37 }
0x1027   :  { %2198 = vmatpush.bf16.msrb.mxu1 %v5977_v47 }
0x1028   :  { %v2044_v27 = vpack.c.bf16 %v2042_v20, %v2041_v41 }
0x102a   :  { %5496 = vmatmul.msk.bf16.gmra.mxu1 %vm146_vm3, %v2044_v27 }
0x102b   :  { %2199 = vmatpush.bf16.msrb.mxu1 %v5976_v36 }
0x102f   :  { %2200 = vmatpush.bf16.msrb.mxu1 %v5975_v3 }
0x1033   :  { %2201 = vmatpush.bf16.msrb.mxu1 %v5974_v44 }
0x1037   :  { %2202 = vmatpush.bf16.msrb.mxu1 %v5973_v29 }
0x1097   :  { %v2078_v35 = vpop.f32.mrf.mxu1 }
0x1098   :  { %v2079_v61 = vadd.f32 %v2078_v35, %v2050_v59 }
0x109a   :  { %v2092_v28 = vmul.f32 0.044715, %v2079_v61  ;;  %v2088_v26 = vmul.f32 0.5, %v2079_v61 }
0x109c   :  { %v2096_v31 = vmul.f32 %v2092_v28, %v2079_v61 }
0x109e   :  { %v2100_v6 = vmul.f32 %v2096_v31, %v2079_v61 }
0x109f   :  { %v2080_v9 = vpop.f32.mrf.mxu1 }
0x10a0   :  { %v2104_v12 = vadd.f32 %v2100_v6, %v2079_v61  ;;  %v2081_v18 = vadd.f32 %v2080_v9, %v2050_v59  ;;  %v2193_v61 = vpop.permute.xlu0 %2192 }
0x10a2   :  { %v2093_v11 = vmul.f32 0.044715, %v2081_v18  ;;  %v2108_v40 = vmul.f32 0.7978846, %v2104_v12  ;;  %v2089_v16 = vmul.f32 0.5, %v2081_v18 }
0x10a4   :  { %v2097_v34 = vmul.f32 %v2093_v11, %v2081_v18  ;;  %6222 = vtanh.f32 %v2108_v40 }
0x10a6   :  { %v2101_v55 = vmul.f32 %v2097_v34, %v2081_v18 }
0x10a7   :  { %v2083_v30 = vpop.f32.mrf.mxu1 }
0x10a8   :  { %v2084_v46 = vadd.f32 %v2083_v30, %v2050_v59  ;;  %v2105_v21 = vadd.f32 %v2101_v55, %v2081_v18 }
0x10aa   :  { %v2094_v56 = vmul.f32 0.044715, %v2084_v46  ;;  %v2109_v48 = vmul.f32 0.7978846, %v2105_v21  ;;  %v6223_v42 = vpop.eup %6222  ;;  %v2090_v3 = vmul.f32 0.5, %v2084_v46 }
0x10ab   :  { %v2116_v0 = vadd.f32 1.0, %v6223_v42 }
0x10ac   :  { %6224 = vtanh.f32 %v2109_v48  ;;  %v2098_v49 = vmul.f32 %v2094_v56, %v2084_v46 }
0x10ad   :  { %v2120_v37 = vmul.f32 %v2116_v0, %v2088_v26 }
0x10ae   :  { %v2102_v60 = vmul.f32 %v2098_v49, %v2084_v46 }
0x10af   :  { %v2085_v19 = vpop.f32.mrf.mxu1 }
0x10b0   :  { %v2086_v57 = vadd.f32 %v2085_v19, %v2050_v59  ;;  %v2106_v51 = vadd.f32 %v2102_v60, %v2084_v46 }
0x10b2   :  { %v6225_v38 = vpop.eup %6224  ;;  %v2095_v63 = vmul.f32 0.044715, %v2086_v57  ;;  %v2110_v4 = vmul.f32 0.7978846, %v2106_v51  ;;  %v2091_v44 = vmul.f32 0.5, %v2086_v57 }
0x10b3   :  { %v2117_v2 = vadd.f32 1.0, %v6225_v38 }
0x10b4   :  { %v2099_v5 = vmul.f32 %v2095_v63, %v2086_v57  ;;  %6226 = vtanh.f32 %v2110_v4 }
0x10b5   :  { %v2121_v41 = vmul.f32 %v2117_v2, %v2089_v16 }
0x10b6   :  { %v2103_v20 = vmul.f32 %v2099_v5, %v2086_v57 }
0x10b7   :  { %v2124_v27 = vpack.c.bf16 %v2121_v41, %v2120_v37 }
0x10b8   :  { %v2107_v22 = vadd.f32 %v2103_v20, %v2086_v57 }
0x10b9   :  { %2203 = vmatmul.bf16.vlgmr.msrb.gmra.mxu1 %v2124_v27  ;;  %v7526_v27 = vld [vmem:[%s8743_s13 + $0x8] sm:$0xf] }
0x10ba   :  { %v2111_v43 = vmul.f32 0.7978846, %v2107_v22  ;;  %v6227_v7 = vpop.eup %6226  ;;  %v7529_v22 = vperm.slane %v7526_v27, 0 }
0x10bb   :  { %v2118_v47 = vadd.f32 1.0, %v6227_v7 }
0x10bc   :  { %6228 = vtanh.f32 %v2111_v43  ;;  %v5982_v43 = vld [vmem:[%s8744_s9 + $0x28] sm:$0xff] }
0x10bd   :  { %v2122_v24 = vmul.f32 %v2118_v47, %v2090_v3  ;;  %2352 = vmatpush.bf16.msra.mxu1 %v5982_v43  ;;  %v5981_v3 = vld [vmem:[%s8744_s9 + $0x20] sm:$0xff] }
0x10c1   :  { %2353 = vmatpush.bf16.msra.mxu1 %v5981_v3 }
0x10c2   :  { %v6229_v36 = vpop.eup %6228 }
0x10c3   :  { %v2119_v29 = vadd.f32 1.0, %v6229_v36 }
0x10c5   :  { %v2123_v59 = vmul.f32 %v2119_v29, %v2091_v44 }
0x10c7   :  { %v2125_v35 = vpack.c.bf16 %v2123_v59, %v2122_v24 }
0x10c9   :  { %2208 = vmatmul.bf16.gmra.mxu1 %v2125_v35 }
0x1136   :  { %v2204_v28 = vpop.f32.mrf.mxu1 }
0x1137   :  { %v2205_v31 = vadd.f32 %v2204_v28, %v2193_v61 }
0x1139   :  { %v7480_v6 = vadd.f32 %v2205_v31, %v7384_v10 }
0x113b   :  { %v2220_v9 = vsel %vm146_vm3, %v7480_v6, 0.0 }
0x113c   :  { %2221 = vadd.xlane.f32.xlu1 %v2220_v9 }
0x113e   :  { %v2206_v12 = vpop.f32.mrf.mxu1 }
0x113f   :  { %v2207_v18 = vadd.f32 %v2206_v12, %v2193_v61 }
0x1141   :  { %v7485_v11 = vadd.f32 %v2207_v18, %v7389_v15 }
0x1143   :  { %v2223_v40 = vsel %vm146_vm3, %v7485_v11, 0.0 }
0x1144   :  { %2224 = vadd.xlane.f32.xlu0 %v2223_v40 }
0x1146   :  { %v2209_v34 = vpop.f32.mrf.mxu1 }
0x1147   :  { %v2210_v55 = vadd.f32 %v2209_v34, %v2193_v61 }
0x1149   :  { %v7490_v30 = vadd.f32 %v2210_v55, %v7394_v23 }
0x114b   :  { %v2226_v10 = vsel %vm146_vm3, %v7490_v30, 0.0 }
0x114c   :  { %2227 = vadd.xlane.f32.xlu2 %v2226_v10 }
0x114e   :  { %v2211_v46 = vpop.f32.mrf.mxu1 }
0x114f   :  { %v2212_v21 = vadd.f32 %v2211_v46, %v2193_v61 }
0x1151   :  { %v7495_v56 = vadd.f32 %v2212_v21, %v7399_v53 }
0x1153   :  { %v2229_v15 = vsel %vm146_vm3, %v7495_v56, 0.0 }
0x1154   :  { %2230 = vadd.xlane.f32.xlu1 %v2229_v15 }
0x11af   :  { %v2222_v48 = vpop.xlane.xlu1 %2221 }
0x11b0   :  { %v2232_v49 = vmul.f32 %v2222_v48, %v6674_v13 }
0x11b2   :  { %v2236_v42 = vsub.f32 %v7480_v6, %v2232_v49 }
0x11b4   :  { %v2240_v23 = vmul.f32 %v2236_v42, %v2236_v42 }
0x11b6   :  { %v2244_v60 = vsel %vm146_vm3, %v2240_v23, 0.0 }
0x11b7   :  { %v2225_v19 = vpop.xlane.xlu0 %2224  ;;  %2245 = vadd.xlane.f32.xlu0 %v2244_v60 }
0x11b8   :  { %v2233_v57 = vmul.f32 %v2225_v19, %v6674_v13 }
0x11ba   :  { %v7504_v51 = vsub.f32 %v7485_v11, %v2233_v57 }
0x11bc   :  { %v2241_v53 = vmul.f32 %v7504_v51, %v7504_v51 }
0x11be   :  { %v2247_v0 = vsel %vm146_vm3, %v2241_v53, 0.0 }
0x11bf   :  { %v2228_v38 = vpop.xlane.xlu2 %2227  ;;  %2248 = vadd.xlane.f32.xlu2 %v2247_v0 }
0x11c0   :  { %v2234_v63 = vmul.f32 %v2228_v38, %v6674_v13 }
0x11c2   :  { %v7511_v26 = vsub.f32 %v7490_v30, %v2234_v63 }
0x11c4   :  { %v2242_v16 = vmul.f32 %v7511_v26, %v7511_v26 }
0x11c6   :  { %v2250_v2 = vsel %vm146_vm3, %v2242_v16, 0.0 }
0x11c7   :  { %2251 = vadd.xlane.f32.xlu1 %v2250_v2  ;;  %v2231_v5 = vpop.xlane.xlu1 %2230 }
0x11c8   :  { %v2235_v4 = vmul.f32 %v2231_v5, %v6674_v13 }
0x11ca   :  { %v7518_v37 = vsub.f32 %v7495_v56, %v2235_v4 }
0x11cc   :  { %v2243_v41 = vmul.f32 %v7518_v37, %v7518_v37 }
0x11ce   :  { %v2253_v20 = vsel %vm146_vm3, %v2243_v41, 0.0 }
0x11cf   :  { %2254 = vadd.xlane.f32.xlu0 %v2253_v20 }
0x11d7   :  { %2314 = vrot.lane.b32.xlu2 %v7529_v22, %s6505_s23 }
0x122a   :  { %v2246_v7 = vpop.xlane.xlu0 %2245 }
0x122b   :  { %v2256_v47 = vmul.f32 %v2246_v7, %v6674_v13 }
0x122d   :  { %v2260_v36 = vadd.f32 1e-05, %v2256_v47 }
0x122f   :  { %6230 = vrsqrt.f32 %v2260_v36  ;;  %vm2270_vm14 = vweird.f32 %v2260_v36 }
0x1232   :  { %v2249_v44 = vpop.xlane.xlu2 %2248 }
0x1233   :  { %v2257_v29 = vmul.f32 %v2249_v44, %v6674_v13 }
0x1235   :  { %v6231_v24 = vpop.eup %6230  ;;  %v2261_v59 = vadd.f32 1e-05, %v2257_v29 }
0x1236   :  { %v2265_v35 = vmul.f32 %v6231_v24, %v2260_v36  ;;  %vm2271_vm13 = vweird.f32 %v6231_v24 }
0x1237   :  { %6232 = vrsqrt.f32 %v2261_v59  ;;  %vm2272_vm15 = vmor %vm2270_vm14, %vm2271_vm13  ;;  %vm2280_vm1 = vweird.f32 %v2261_v59 }
0x1238   :  { %v2266_v61 = vmul.f32 %v6231_v24, %v2265_v35 }
0x123a   :  { %v2267_v28 = vmul.f32 0.5, %v2266_v61  ;;  %v2252_v31 = vpop.xlane.xlu1 %2251  ;;  %v2315_v5 = vpop.permute.xlu2 %2314 }
0x123b   :  { %v2258_v9 = vmul.f32 %v2252_v31, %v6674_v13 }
0x123c   :  { %v2268_v12 = vsub.f32 1.5, %v2267_v28 }
0x123d   :  { %v6233_v18 = vpop.eup %6232  ;;  %v2262_v40 = vadd.f32 1e-05, %v2258_v9 }
0x123e   :  { %v2269_v34 = vmul.f32 %v6231_v24, %v2268_v12  ;;  %v2275_v55 = vmul.f32 %v6233_v18, %v2261_v59  ;;  %vm2281_vm0 = vweird.f32 %v6233_v18 }
0x123f   :  { %6234 = vrsqrt.f32 %v2262_v40  ;;  %vm2282_vm2 = vmor %vm2280_vm1, %vm2281_vm0  ;;  %vm2290_vm5 = vweird.f32 %v2262_v40 }
0x1240   :  { %v2276_v10 = vmul.f32 %v6233_v18, %v2275_v55  ;;  %v2273_v46 = vsel %vm2272_vm15, %v6231_v24, %v2269_v34 }
0x1241   :  { %v2304_v60 = vmul.f32 %v2273_v46, %v2236_v42 }
0x1242   :  { %v2277_v21 = vmul.f32 0.5, %v2276_v10  ;;  %v2255_v15 = vpop.xlane.xlu0 %2254 }
0x1243   :  { %v2259_v48 = vmul.f32 %v2255_v15, %v6674_v13  ;;  %v2309_v16 = vmul.f32 %v7529_v22, %v2304_v60 }
0x1244   :  { %v2278_v49 = vsub.f32 1.5, %v2277_v21 }
0x1245   :  { %v6235_v23 = vpop.eup %6234  ;;  %v2263_v19 = vadd.f32 1e-05, %v2259_v48  ;;  %v2317_v43 = vadd.f32 %v2315_v5, %v2309_v16 }
0x1246   :  { %v2279_v57 = vmul.f32 %v6233_v18, %v2278_v49  ;;  %v2285_v53 = vmul.f32 %v6235_v23, %v2262_v40  ;;  %vm2291_vm4 = vweird.f32 %v6235_v23 }
0x1247   :  { %6236 = vrsqrt.f32 %v2263_v19  ;;  %vm2292_vm6 = vmor %vm2290_vm5, %vm2291_vm4  ;;  %vm2300_vm8 = vweird.f32 %v2263_v19 }
0x1248   :  { %v2283_v0 = vsel %vm2282_vm2, %v6233_v18, %v2279_v57  ;;  %v2286_v38 = vmul.f32 %v6235_v23, %v2285_v53 }
0x1249   :  { %v2305_v63 = vmul.f32 %v2283_v0, %v7504_v51 }
0x124a   :  { %v2287_v2 = vmul.f32 0.5, %v2286_v38 }
0x124b   :  { %v2310_v4 = vmul.f32 %v7529_v22, %v2305_v63 }
0x124c   :  { %v2288_v41 = vsub.f32 1.5, %v2287_v2 }
0x124d   :  { %v6237_v20 = vpop.eup %6236  ;;  %v2318_v42 = vadd.f32 %v2315_v5, %v2310_v4 }
0x124e   :  { %v2289_v7 = vmul.f32 %v6235_v23, %v2288_v41  ;;  %v2295_v47 = vmul.f32 %v6237_v20, %v2263_v19  ;;  %vm2301_vm7 = vweird.f32 %v6237_v20 }
0x124f   :  { %v2321_v36 = vpack.c.bf16 %v2318_v42, %v2317_v43  ;;  %vm2302_vm9 = vmor %vm2300_vm8, %vm2301_vm7 }
0x1250   :  { %v2296_v3 = vmul.f32 %v6237_v20, %v2295_v47  ;;  %v2293_v51 = vsel %vm2292_vm6, %v6235_v23, %v2289_v7 }
0x1251   :  { %5558 = vmatmul.msk.bf16.vlgmr.msra.gmra.mxu1 %vm146_vm3, %v2321_v36  ;;  %v2306_v24 = vmul.f32 %v2293_v51, %v7511_v26 }
0x1252   :  { %v2297_v44 = vmul.f32 0.5, %v2296_v3 }
0x1253   :  { %v2311_v28 = vmul.f32 %v7529_v22, %v2306_v24 }
0x1254   :  { %v2298_v29 = vsub.f32 1.5, %v2297_v44 }
0x1255   :  { %v2319_v9 = vadd.f32 %v2315_v5, %v2311_v28 }
0x1256   :  { %v2299_v59 = vmul.f32 %v6237_v20, %v2298_v29 }
0x1258   :  { %v2303_v35 = vsel %vm2302_vm9, %v6237_v20, %v2299_v59 }
0x1259   :  { %v2307_v61 = vmul.f32 %v2303_v35, %v7518_v37 }
0x125b   :  { %v2312_v31 = vmul.f32 %v7529_v22, %v2307_v61 }
0x125d   :  { %v2320_v12 = vadd.f32 %v2315_v5, %v2312_v31 }
0x125f   :  { %v2322_v18 = vpack.c.bf16 %v2320_v12, %v2319_v9 }
0x1261   :  { %5559 = vmatmul.msk.bf16.gmra.mxu1 %vm146_vm3, %v2322_v18 }
0x12ce   :  { %v2355_v40 = vpop.f32.mrf.mxu1 }
0x12cf   :  { %v2365_v23 = vmul.f32 %v2355_v40, %v6736_v1  ;;  %v2369_v38 = vmul.f32 %v2355_v40, %v6747_v8  ;;  %v2373_v41 = vmul.f32 %v2355_v40, %v6757_v17  ;;  %v2377_v36 = vmul.f32 %v2355_v40, %v6766_v25 }
0x12d6   :  { %v2357_v34 = vpop.f32.mrf.mxu1 }
0x12d7   :  { %v7552_v55 = vpack.c.bf16 %v2357_v34, %v2355_v40  ;;  %v2366_v49 = vmul.f32 %v2357_v34, %v6736_v1  ;;  %v2370_v0 = vmul.f32 %v2357_v34, %v6747_v8  ;;  %v2374_v4 = vmul.f32 %v2357_v34, %v6757_v17 }
0x12d8   :  { %v2378_v47 = vmul.f32 %v2357_v34, %v6766_v25 }
0x12d9   :  { %2393 = vrot.lane.b32.xlu0 %v7552_v55, %s6505_s23  ;;  %v2381_v60 = vpack.c.bf16 %v2366_v49, %v2365_v23  ;;  %v2383_v63 = vpack.c.bf16 %v2370_v0, %v2369_v38  ;;  %v2385_v20 = vpack.c.bf16 %v2374_v4, %v2373_v41 }
0x12da   :  { %v2387_v3 = vpack.c.bf16 %v2378_v47, %v2377_v36 }
0x12de   :  { %v2360_v26 = vpop.f32.mrf.mxu1 }
0x12df   :  { %v2367_v57 = vmul.f32 %v2360_v26, %v6736_v1  ;;  %v2371_v2 = vmul.f32 %v2360_v26, %v6747_v8  ;;  %v2375_v42 = vmul.f32 %v2360_v26, %v6757_v17  ;;  %v2379_v44 = vmul.f32 %v2360_v26, %v6766_v25 }
0x12e6   :  { %v2362_v10 = vpop.f32.mrf.mxu1 }
0x12e7   :  { %v7556_v46 = vpack.c.bf16 %v2362_v10, %v2360_v26  ;;  %v2368_v19 = vmul.f32 %v2362_v10, %v6736_v1  ;;  %v2372_v16 = vmul.f32 %v2362_v10, %v6747_v8  ;;  %v2376_v43 = vmul.f32 %v2362_v10, %v6757_v17 }
0x12e8   :  { %v2380_v51 = vmul.f32 %v2362_v10, %v6766_v25 }
0x12e9   :  { %2395 = vrot.lane.b32.xlu1 %v7556_v46, %s6505_s23  ;;  %v2382_v53 = vpack.c.bf16 %v2368_v19, %v2367_v57  ;;  %v2384_v5 = vpack.c.bf16 %v2372_v16, %v2371_v2  ;;  %v2386_v7 = vpack.c.bf16 %v2376_v43, %v2375_v42 }
0x12ea   :  { %v2388_v29 = vpack.c.bf16 %v2380_v51, %v2379_v44 }
0x134b   :  { %v2394_v15 = vpop.permute.xlu0 %2393 }
0x134c   :  { %v2422_v48 = vsel %vm146_vm3, %v2394_v15, 0 }
0x135b   :  { %v2396_v37 = vpop.permute.xlu1 %2395 }
0x135c   :  { %v2425_v21 = vsel %vm146_vm3, %v2396_v37, 0 }
0x135d   :  { %2433 = vmatpush.bf16.xpose.msrb.mxu1 %v2425_v21 }
0x1365   :  { %2434 = vmatpush.bf16.xpose.msrb.mxu1 %v2422_v48 }
0x136c   :  { %5560 = vmatmul.msk.bf16.vlgmr.msrb.gmra.mxu1 %vm146_vm3, %v2381_v60 }
0x137c   :  { %5561 = vmatmul.msk.bf16.gmra.mxu1 %vm146_vm3, %v2382_v53 }
0x138c   :  { %5562 = vmatmul.msk.bf16.gmra.mxu1 %vm146_vm3, %v2383_v63 }
0x139c   :  { %5563 = vmatmul.msk.bf16.gmra.mxu1 %vm146_vm3, %v2384_v5 }
0x13ac   :  { %5564 = vmatmul.msk.bf16.gmra.mxu1 %vm146_vm3, %v2385_v20 }
0x13bc   :  { %5565 = vmatmul.msk.bf16.gmra.mxu1 %vm146_vm3, %v2386_v7 }
0x13cc   :  { %5566 = vmatmul.msk.bf16.gmra.mxu1 %vm146_vm3, %v2387_v3 }
0x13dc   :  { %5567 = vmatmul.msk.bf16.gmra.mxu1 %vm146_vm3, %v2388_v29 }
0x13e9   :  { %v2436_v24 = vpop.f32.mrf.mxu1 }
0x13ea   :  { %v2437_v59 = vadd.f32 %v2436_v24, %v6779_v45 }
0x13ec   :  { %v2476_v35 = vsel %vm146_vm3, %v2437_v59, -inf }
0x13ed   :  { %2477 = vmax.xlane.f32.xlu2 %v2476_v35 }
0x13f1   :  { %v2438_v61 = vpop.f32.mrf.mxu1 }
0x13f2   :  { %v2439_v28 = vadd.f32 %v2438_v61, %v6783_v52 }
0x13f4   :  { %v2479_v31 = vsel %vm146_vm3, %v2439_v28, -inf }
0x13f5   :  { %2480 = vmax.xlane.f32.xlu0 %v2479_v31 }
0x13f9   :  { %v2441_v9 = vpop.f32.mrf.mxu1 }
0x13fa   :  { %v2442_v12 = vadd.f32 %v2441_v9, %v6787_v58 }
0x13fc   :  { %v2482_v18 = vsel %vm146_vm3, %v2442_v12, -inf }
0x13fd   :  { %2483 = vmax.xlane.f32.xlu1 %v2482_v18 }
0x1401   :  { %v2443_v40 = vpop.f32.mrf.mxu1 }
0x1402   :  { %v2444_v34 = vadd.f32 %v2443_v40, %v6794_v62 }
0x1404   :  { %v2485_v26 = vsel %vm146_vm3, %v2444_v34, -inf }
0x1405   :  { %2486 = vmax.xlane.f32.xlu2 %v2485_v26 }
0x1409   :  { %v2446_v10 = vpop.f32.mrf.mxu1 }
0x140a   :  { %v2447_v37 = vadd.f32 %v2446_v10, %v6779_v45 }
0x140c   :  { %v2488_v21 = vsel %vm146_vm3, %v2447_v37, -inf }
0x140d   :  { %2489 = vmax.xlane.f32.xlu0 %v2488_v21 }
0x1411   :  { %v2448_v15 = vpop.f32.mrf.mxu1 }
0x1412   :  { %v7597_v48 = vadd.f32 %v2448_v15, %v6783_v52 }
0x1414   :  { %v2491_v49 = vsel %vm146_vm3, %v7597_v48, -inf }
0x1415   :  { %2492 = vmax.xlane.f32.xlu1 %v2491_v49 }
0x1419   :  { %v2451_v23 = vpop.f32.mrf.mxu1 }
0x141a   :  { %v7602_v60 = vadd.f32 %v2451_v23, %v6787_v58 }
0x141c   :  { %v2494_v19 = vsel %vm146_vm3, %v7602_v60, -inf }
0x141d   :  { %2495 = vmax.xlane.f32.xlu2 %v2494_v19 }
0x1421   :  { %v2453_v57 = vpop.f32.mrf.mxu1 }
0x1422   :  { %v7607_v53 = vadd.f32 %v2453_v57, %v6794_v62 }
0x1424   :  { %v2497_v0 = vsel %vm146_vm3, %v7607_v53, -inf }
0x1425   :  { %2498 = vmax.xlane.f32.xlu0 %v2497_v0 }
0x1429   :  { %v2456_v38 = vpop.f32.mrf.mxu1 }
0x142a   :  { %v7612_v63 = vadd.f32 %v2456_v38, %v6779_v45 }
0x142c   :  { %v2500_v16 = vsel %vm146_vm3, %v7612_v63, -inf }
0x142d   :  { %2501 = vmax.xlane.f32.xlu2 %v2500_v16 }
0x1431   :  { %v2458_v2 = vpop.f32.mrf.mxu1 }
0x1432   :  { %v7617_v5 = vadd.f32 %v2458_v2, %v6783_v52 }
0x1434   :  { %v2503_v4 = vsel %vm146_vm3, %v7617_v5, -inf }
0x1435   :  { %2504 = vmax.xlane.f32.xlu2 %v2503_v4 }
0x1439   :  { %2662 = vrot.lane.b32.xlu0 %v7556_v46, %s6507_s5  ;;  %v2461_v44 = vpop.f32.mrf.mxu1 }
0x1441   :  { %v2463_v31 = vpop.f32.mrf.mxu1 }
0x1449   :  { %v2466_v15 = vpop.f32.mrf.mxu1 }
0x144a   :  { %v7647_v23 = vadd.f32 %v2466_v15, %v6779_v45 }
0x144c   :  { %v2512_v57 = vsel %vm146_vm3, %v7647_v23, -inf }
0x1451   :  { %v2468_v4 = vpop.f32.mrf.mxu1 }
0x1460   :  { %v2478_v41 = vpop.xlane.xlu2 %2477 }
0x1461   :  { %v2524_v20 = vsub.f32 %v2437_v59, %v2478_v41 }
0x1463   :  { %v2540_v43 = vmul.f32 1.442695, %v2524_v20 }
0x1465   :  { %6238 = vpow2.f32 %v2540_v43 }
0x1468   :  { %v2481_v42 = vpop.xlane.xlu0 %2480 }
0x1469   :  { %v2525_v7 = vsub.f32 %v2439_v28, %v2481_v42 }
0x146b   :  { %v7623_v47 = vpop.eup %6238  ;;  %v2542_v36 = vmul.f32 1.442695, %v2525_v7 }
0x146c   :  { %v2572_v3 = vsel %vm146_vm3, %v7623_v47, 0.0 }
0x146d   :  { %6240 = vpow2.f32 %v2542_v36  ;;  %2573 = vadd.xlane.f32.xlu1 %v2572_v3  ;;  %v2471_v36 = vpop.f32.mrf.mxu1 }
0x1470   :  { %v2484_v51 = vpop.xlane.xlu1 %2483 }
0x1471   :  { %v2526_v29 = vsub.f32 %v2442_v12, %v2484_v51  ;;  %v7636_v12 = vadd.f32 %v2461_v44, %v6787_v58  ;;  %v7667_v51 = vadd.f32 %v2468_v4, %v6783_v52  ;;  %v7670_v44 = vadd.f32 %v2471_v36, %v6787_v58 }
0x1473   :  { %v7627_v24 = vpop.eup %6240  ;;  %v2544_v46 = vmul.f32 1.442695, %v2526_v29 }
0x1474   :  { %v2575_v59 = vsel %vm146_vm3, %v7627_v24, 0.0 }
0x1475   :  { %6242 = vpow2.f32 %v2544_v46  ;;  %2576 = vadd.xlane.f32.xlu2 %v2575_v59  ;;  %v2518_v46 = vsel %vm146_vm3, %v7670_v44, -inf  ;;  %v2515_v59 = vsel %vm146_vm3, %v7667_v51, -inf  ;;  %v2473_v15 = vpop.f32.mrf.mxu1 }
0x1478   :  { %v2487_v35 = vpop.xlane.xlu2 %2486 }
0x1479   :  { %v2527_v61 = vsub.f32 %v2444_v34, %v2487_v35  ;;  %v2506_v34 = vsel %vm146_vm3, %v7636_v12, -inf }
0x147b   :  { %v7631_v28 = vpop.eup %6242  ;;  %v2546_v9 = vmul.f32 1.442695, %v2527_v61 }
0x147c   :  { %v2578_v18 = vsel %vm146_vm3, %v7631_v28, 0.0 }
0x147d   :  { %6244 = vpow2.f32 %v2546_v9  ;;  %2579 = vadd.xlane.f32.xlu2 %v2578_v18 }
0x1480   :  { %v2490_v40 = vpop.xlane.xlu0 %2489 }
0x1481   :  { %v2528_v10 = vsub.f32 %v2447_v37, %v2490_v40  ;;  %v7681_v40 = vadd.f32 %v2463_v31, %v6794_v62  ;;  %v7692_v31 = vadd.f32 %v2473_v15, %v6794_v62 }
0x1483   :  { %v7638_v26 = vpop.eup %6244  ;;  %v2548_v49 = vmul.f32 1.442695, %v2528_v10 }
0x1484   :  { %v2581_v21 = vsel %vm146_vm3, %v7638_v26, 0.0 }
0x1485   :  { %2582 = vadd.xlane.f32.xlu0 %v2581_v21  ;;  %2507 = vmax.xlane.f32.xlu2 %v2506_v34  ;;  %6246 = vpow2.f32 %v2548_v49  ;;  %v2509_v34 = vsel %vm146_vm3, %v7681_v40, -inf }
0x1486   :  { %2660 = vrot.lane.b32.xlu1 %v7552_v55, %s6507_s5 }
0x1488   :  { %v2493_v19 = vpop.xlane.xlu1 %2492 }
0x1489   :  { %v2529_v37 = vsub.f32 %v7597_v48, %v2493_v19 }
0x148b   :  { %v2550_v0 = vmul.f32 1.442695, %v2529_v37  ;;  %v7652_v16 = vpop.eup %6246 }
0x148c   :  { %v2584_v41 = vsel %vm146_vm3, %v7652_v16, 0.0 }
0x148d   :  { %2513 = vmax.xlane.f32.xlu2 %v2512_v57  ;;  %6248 = vpow2.f32 %v2550_v0  ;;  %v2521_v57 = vsel %vm146_vm3, %v7692_v31, -inf }
0x1490   :  { %v2496_v38 = vpop.xlane.xlu2 %2495 }
0x1491   :  { %v2530_v2 = vsub.f32 %v7602_v60, %v2496_v38 }
0x1493   :  { %v2552_v55 = vmul.f32 1.442695, %v2530_v2  ;;  %v7657_v48 = vpop.eup %6248 }
0x1494   :  { %v2587_v60 = vsel %vm146_vm3, %v7657_v48, 0.0 }
0x1495   :  { %6250 = vpow2.f32 %v2552_v55  ;;  %2585 = vadd.xlane.f32.xlu2 %v2584_v41 }
0x1498   :  { %v2499_v20 = vpop.xlane.xlu0 %2498 }
0x1499   :  { %v2531_v42 = vsub.f32 %v7607_v53, %v2499_v20 }
0x149b   :  { %v7659_v43 = vpop.eup %6250  ;;  %v2554_v3 = vmul.f32 1.442695, %v2531_v42 }
0x149c   :  { %v2590_v7 = vsel %vm146_vm3, %v7659_v43, 0.0 }
0x149d   :  { %2591 = vadd.xlane.f32.xlu0 %v2590_v7  ;;  %2588 = vadd.xlane.f32.xlu2 %v2587_v60  ;;  %6252 = vpow2.f32 %v2554_v3 }
0x14a0   :  { %v2502_v29 = vpop.xlane.xlu2 %2501 }
0x14a1   :  { %v2532_v53 = vsub.f32 %v7612_v63, %v2502_v29 }
0x14a3   :  { %v2556_v35 = vmul.f32 1.442695, %v2532_v53  ;;  %v7677_v9 = vpop.eup %6252 }
0x14a4   :  { %v2593_v21 = vsel %vm146_vm3, %v7677_v9, 0.0 }
0x14a5   :  { %2519 = vmax.xlane.f32.xlu0 %v2518_v46  ;;  %2516 = vmax.xlane.f32.xlu2 %v2515_v59  ;;  %6254 = vpow2.f32 %v2556_v35 }
0x14a8   :  { %v2505_v61 = vpop.xlane.xlu2 %2504 }
0x14a9   :  { %v2533_v18 = vsub.f32 %v7617_v5, %v2505_v61 }
0x14ab   :  { %v2558_v10 = vmul.f32 1.442695, %v2533_v18  ;;  %v2663_v63 = vpop.permute.xlu0 %2662  ;;  %v7687_v49 = vpop.eup %6254 }
0x14ac   :  { %2696 = vmatpush.bf16.msrb.mxu2 %v2663_v63  ;;  %v2596_v37 = vsel %vm146_vm3, %v7687_v49, 0.0 }
0x14ad   :  { %6256 = vpow2.f32 %v2558_v10  ;;  %2594 = vadd.xlane.f32.xlu2 %v2593_v21 }
0x14b0   :  { %2510 = vmax.xlane.f32.xlu1 %v2509_v34 }
0x14b3   :  { %v7689_v5 = vpop.eup %6256 }
0x14b4   :  { %v2599_v19 = vsel %vm146_vm3, %v7689_v5, 0.0 }
0x14b5   :  { %2600 = vadd.xlane.f32.xlu0 %v2599_v19  ;;  %2597 = vadd.xlane.f32.xlu2 %v2596_v37 }
0x14b8   :  { %2522 = vmax.xlane.f32.xlu1 %v2521_v57 }
0x14e0   :  { %v2574_v38 = vpop.xlane.xlu1 %2573 }
0x14e8   :  { %v2577_v0 = vpop.xlane.xlu2 %2576 }
0x14e9   :  { %6258 = vrcp.f32 %v2577_v0 }
0x14ea   :  { %6260 = vrcp.f32 %v2574_v38 }
0x14ef   :  { %v6259_v4 = vpop.eup %6258 }
0x14f0   :  { %v2580_v2 = vpop.xlane.xlu2 %2579  ;;  %v6261_v55 = vpop.eup %6260  ;;  %v2637_v41 = vmul.f32 %v6259_v4, %v7627_v24 }
0x14f1   :  { %v2636_v42 = vmul.f32 %v6261_v55, %v7623_v47 }
0x14f3   :  { %v2652_v36 = vpack.c.bf16 %v2637_v41, %v2636_v42 }
0x14f8   :  { %v2508_v20 = vpop.xlane.xlu2 %2507  ;;  %v2661_v60 = vpop.permute.xlu1 %2660 }
0x14f9   :  { %v2534_v7 = vsub.f32 %v7636_v12, %v2508_v20  ;;  %2697 = vmatpush.bf16.msrb.mxu2 %v2661_v60  ;;  %v2583_v3 = vpop.xlane.xlu0 %2582 }
0x14fb   :  { %v2560_v29 = vmul.f32 1.442695, %v2534_v7 }
0x14fc   :  { %5568 = vmatmul.msk.bf16.vlgmr.msrb.gmra.mxu2 %vm146_vm3, %v2652_v36 }
0x14fd   :  { %6262 = vpow2.f32 %v2560_v29 }
0x14fe   :  { %6264 = vrcp.f32 %v2583_v3 }
0x14ff   :  { %6266 = vrcp.f32 %v2580_v2 }
0x1500   :  { %v2514_v53 = vpop.xlane.xlu2 %2513 }
0x1501   :  { %v2536_v46 = vsub.f32 %v7647_v23, %v2514_v53 }
0x1503   :  { %v7705_v59 = vpop.eup %6262  ;;  %v2564_v24 = vmul.f32 1.442695, %v2536_v46 }
0x1504   :  { %v6265_v35 = vpop.eup %6264  ;;  %v2602_v47 = vsel %vm146_vm3, %v7705_v59, 0.0 }
0x1505   :  { %6268 = vpow2.f32 %v2564_v24  ;;  %2603 = vadd.xlane.f32.xlu1 %v2602_v47  ;;  %v6267_v12 = vpop.eup %6266  ;;  %v2639_v61 = vmul.f32 %v6265_v35, %v7638_v26 }
0x1506   :  { %v2638_v10 = vmul.f32 %v6267_v12, %v7631_v28 }
0x1508   :  { %v2586_v18 = vpop.xlane.xlu2 %2585  ;;  %v2653_v21 = vpack.c.bf16 %v2639_v61, %v2638_v10 }
0x1509   :  { %6270 = vrcp.f32 %v2586_v18 }
0x150b   :  { %v7711_v63 = vpop.eup %6268 }
0x150c   :  { %v2608_v23 = vsel %vm146_vm3, %v7711_v63, 0.0  ;;  %5569 = vmatmul.msk.bf16.gmra.mxu2 %vm146_vm3, %v2653_v21 }
0x150d   :  { %2609 = vadd.xlane.f32.xlu0 %v2608_v23 }
0x150f   :  { %v6271_v15 = vpop.eup %6270 }
0x1510   :  { %v2589_v34 = vpop.xlane.xlu2 %2588  ;;  %v2592_v19 = vpop.xlane.xlu0 %2591  ;;  %v2640_v26 = vmul.f32 %v6271_v15, %v7652_v16  ;;  %v5984_v15 = vld [vmem:[%s8745_s10 + $0x28] sm:$0xff] }
0x1511   :  { %6272 = vrcp.f32 %v2589_v34  ;;  %2810 = vmatpush.bf16.msrb.mxu3 %v5984_v15 }
0x1517   :  { %v6273_v37 = vpop.eup %6272 }
0x1518   :  { %v2517_v57 = vpop.xlane.xlu2 %2516  ;;  %v2641_v28 = vmul.f32 %v6273_v37, %v7657_v48  ;;  %v2520_v55 = vpop.xlane.xlu0 %2519 }
0x1519   :  { %v2537_v0 = vsub.f32 %v7667_v51, %v2517_v57  ;;  %v2538_v42 = vsub.f32 %v7670_v44, %v2520_v55 }
0x151a   :  { %v2654_v2 = vpack.c.bf16 %v2641_v28, %v2640_v26 }
0x151b   :  { %v2566_v38 = vmul.f32 1.442695, %v2537_v0  ;;  %v2568_v3 = vmul.f32 1.442695, %v2538_v42 }
0x151c   :  { %5570 = vmatmul.msk.bf16.gmra.mxu2 %vm146_vm3, %v2654_v2 }
0x151d   :  { %6274 = vpow2.f32 %v2566_v38 }
0x151e   :  { %6276 = vrcp.f32 %v2592_v19 }
0x1520   :  { %v2595_v4 = vpop.xlane.xlu2 %2594 }
0x1521   :  { %6278 = vrcp.f32 %v2595_v4 }
0x1523   :  { %v2511_v41 = vpop.xlane.xlu1 %2510  ;;  %v7720_v20 = vpop.eup %6274 }
0x1524   :  { %v2535_v16 = vsub.f32 %v7681_v40, %v2511_v41  ;;  %v6277_v7 = vpop.eup %6276  ;;  %v2611_v48 = vsel %vm146_vm3, %v7720_v20, 0.0 }
0x1525   :  { %2612 = vadd.xlane.f32.xlu1 %v2611_v48  ;;  %v2642_v36 = vmul.f32 %v6277_v7, %v7659_v43 }
0x1526   :  { %v2562_v51 = vmul.f32 1.442695, %v2535_v16 }
0x1527   :  { %v6279_v60 = vpop.eup %6278 }
0x1528   :  { %v2643_v29 = vmul.f32 %v6279_v60, %v7677_v9  ;;  %6280 = vpow2.f32 %v2562_v51  ;;  %v2601_v53 = vpop.xlane.xlu0 %2600  ;;  %v2598_v24 = vpop.xlane.xlu2 %2597 }
0x1529   :  { %6282 = vpow2.f32 %v2568_v3 }
0x152a   :  { %v2655_v46 = vpack.c.bf16 %v2643_v29, %v2642_v36  ;;  %6284 = vrcp.f32 %v2601_v53 }
0x152b   :  { %v2523_v35 = vpop.xlane.xlu1 %2522  ;;  %6286 = vrcp.f32 %v2598_v24 }
0x152c   :  { %v2539_v44 = vsub.f32 %v7692_v31, %v2523_v35  ;;  %5571 = vmatmul.msk.bf16.gmra.mxu2 %vm146_vm3, %v2655_v46 }
0x152e   :  { %v6281_v40 = vpop.eup %6280  ;;  %v2570_v47 = vmul.f32 1.442695, %v2539_v44 }
0x152f   :  { %v2605_v12 = vsel %vm146_vm3, %v6281_v40, 0.0  ;;  %v7731_v43 = vpop.eup %6282 }
0x1530   :  { %6288 = vpow2.f32 %v2570_v47  ;;  %2606 = vadd.xlane.f32.xlu2 %v2605_v12  ;;  %v6285_v9 = vpop.eup %6284  ;;  %v2614_v21 = vsel %vm146_vm3, %v7731_v43, 0.0 }
0x1531   :  { %v6287_v61 = vpop.eup %6286  ;;  %v2645_v10 = vmul.f32 %v6285_v9, %v7689_v5 }
0x1532   :  { %v2644_v31 = vmul.f32 %v6287_v61, %v7687_v49  ;;  %v5983_v49 = vld [vmem:[%s8745_s10 + $0x20] sm:$0xff] }
0x1533   :  { %2811 = vmatpush.bf16.msrb.mxu3 %v5983_v49 }
0x1534   :  { %v2656_v34 = vpack.c.bf16 %v2645_v10, %v2644_v31 }
0x1536   :  { %v7733_v18 = vpop.eup %6288 }
0x1537   :  { %v2617_v23 = vsel %vm146_vm3, %v7733_v18, 0.0 }
0x1538   :  { %2615 = vadd.xlane.f32.xlu2 %v2614_v21  ;;  %2618 = vadd.xlane.f32.xlu0 %v2617_v23 }
0x153c   :  { %5572 = vmatmul.msk.bf16.gmra.mxu2 %vm146_vm3, %v2656_v34 }
0x1578   :  { %v2604_v55 = vpop.xlane.xlu1 %2603 }
0x1579   :  { %6290 = vrcp.f32 %v2604_v55 }
0x157f   :  { %v2699_v5 = vpop.f32.mrf.mxu2  ;;  %v6291_v16 = vpop.eup %6290 }
0x1580   :  { %v2739_v37 = vmul.f32 %v2699_v5, %v6736_v1  ;;  %v2646_v36 = vmul.f32 %v6291_v16, %v7705_v59  ;;  %v2610_v24 = vpop.xlane.xlu0 %2609 }
0x1587   :  { %v2701_v19 = vpop.f32.mrf.mxu2 }
0x1588   :  { %v2740_v57 = vmul.f32 %v2701_v19, %v6736_v1 }
0x158a   :  { %v2755_v26 = vpack.c.bf16 %v2740_v57, %v2739_v37 }
0x158c   :  { %5588 = vmatmul.msk.bf16.vlgmr.msrb.gmra.mxu3 %vm146_vm3, %v2755_v26 }
0x158f   :  { %v2704_v28 = vpop.f32.mrf.mxu2 }
0x1590   :  { %v2741_v38 = vmul.f32 %v2704_v28, %v6736_v1 }
0x1597   :  { %v2706_v0 = vpop.f32.mrf.mxu2 }
0x1598   :  { %v2742_v2 = vmul.f32 %v2706_v0, %v6736_v1  ;;  %v2613_v53 = vpop.xlane.xlu1 %2612 }
0x159a   :  { %v2756_v4 = vpack.c.bf16 %v2742_v2, %v2741_v38 }
0x159c   :  { %5589 = vmatmul.msk.bf16.gmra.mxu3 %vm146_vm3, %v2756_v4 }
0x159f   :  { %v2709_v41 = vpop.f32.mrf.mxu2 }
0x15a0   :  { %v2743_v48 = vmul.f32 %v2709_v41, %v6747_v8 }
0x15a3   :  { %v2607_v42 = vpop.xlane.xlu2 %2606 }
0x15a4   :  { %6292 = vrcp.f32 %v2607_v42 }
0x15a5   :  { %6294 = vrcp.f32 %v2613_v53 }
0x15a6   :  { %6296 = vrcp.f32 %v2610_v24 }
0x15a7   :  { %v2711_v7 = vpop.f32.mrf.mxu2 }
0x15a8   :  { %v2744_v51 = vmul.f32 %v2711_v7, %v6747_v8 }
0x15aa   :  { %v6293_v60 = vpop.eup %6292  ;;  %v2757_v29 = vpack.c.bf16 %v2744_v51, %v2743_v48 }
0x15ab   :  { %v2647_v3 = vmul.f32 %v6293_v60, %v6281_v40  ;;  %v6295_v44 = vpop.eup %6294  ;;  %v2616_v31 = vpop.xlane.xlu2 %2615 }
0x15ac   :  { %5590 = vmatmul.msk.bf16.gmra.mxu3 %vm146_vm3, %v2757_v29  ;;  %v6297_v47 = vpop.eup %6296  ;;  %v2649_v9 = vmul.f32 %v6295_v44, %v7720_v20  ;;  %v2619_v21 = vpop.xlane.xlu0 %2618  ;;  %6298 = vrcp.f32 %v2616_v31 }
0x15ad   :  { %v2657_v46 = vpack.c.bf16 %v2647_v3, %v2646_v36  ;;  %v2648_v40 = vmul.f32 %v6297_v47, %v7711_v63  ;;  %6300 = vrcp.f32 %v2619_v21  ;;  %v2869_v21 = vperm.slane %v7526_v27, 1 }
0x15af   :  { %5573 = vmatmul.msk.bf16.gmra.mxu2 %vm146_vm3, %v2657_v46  ;;  %v2714_v35 = vpop.f32.mrf.mxu2  ;;  %v2658_v23 = vpack.c.bf16 %v2649_v9, %v2648_v40 }
0x15b0   :  { %v2745_v61 = vmul.f32 %v2714_v35, %v6747_v8 }
0x15b2   :  { %v6299_v15 = vpop.eup %6298 }
0x15b3   :  { %v6301_v49 = vpop.eup %6300  ;;  %v2650_v5 = vmul.f32 %v6299_v15, %v7731_v43 }
0x15b4   :  { %v2651_v19 = vmul.f32 %v6301_v49, %v7733_v18 }
0x15b6   :  { %v2659_v26 = vpack.c.bf16 %v2651_v19, %v2650_v5 }
0x15b7   :  { %v2716_v12 = vpop.f32.mrf.mxu2 }
0x15b8   :  { %v2746_v59 = vmul.f32 %v2716_v12, %v6747_v8 }
0x15ba   :  { %v2758_v10 = vpack.c.bf16 %v2746_v59, %v2745_v61 }
0x15bc   :  { %5591 = vmatmul.msk.bf16.gmra.mxu3 %vm146_vm3, %v2758_v10 }
0x15bf   :  { %5574 = vmatmul.msk.bf16.gmra.mxu2 %vm146_vm3, %v2658_v23  ;;  %v2719_v34 = vpop.f32.mrf.mxu2 }
0x15c0   :  { %v2747_v63 = vmul.f32 %v2719_v34, %v6757_v17 }
0x15c7   :  { %v2721_v20 = vpop.f32.mrf.mxu2 }
0x15c8   :  { %v2748_v37 = vmul.f32 %v2721_v20, %v6757_v17 }
0x15ca   :  { %v2759_v57 = vpack.c.bf16 %v2748_v37, %v2747_v63 }
0x15cc   :  { %5592 = vmatmul.msk.bf16.gmra.mxu3 %vm146_vm3, %v2759_v57 }
0x15cf   :  { %5575 = vmatmul.msk.bf16.gmra.mxu2 %vm146_vm3, %v2659_v26 }
0x160f   :  { %v2813_v36 = vpop.f32.mrf.mxu3 }
0x1617   :  { %v2815_v3 = vpop.f32.mrf.mxu3 }
0x161f   :  { %v2818_v29 = vpop.f32.mrf.mxu3 }
0x1627   :  { %v2820_v53 = vpop.f32.mrf.mxu3 }
0x162f   :  { %v2823_v46 = vpop.f32.mrf.mxu3 }
0x1630   :  { %v2853_v59 = vadd.f32 %v2823_v46, %v2813_v36 }
0x1632   :  { %v2724_v28 = vpop.f32.mrf.mxu2 }
0x1633   :  { %v2749_v38 = vmul.f32 %v2724_v28, %v6757_v17 }
0x1637   :  { %v2825_v24 = vpop.f32.mrf.mxu3 }
0x1638   :  { %v2854_v34 = vadd.f32 %v2825_v24, %v2815_v3 }
0x163a   :  { %v2726_v0 = vpop.f32.mrf.mxu2 }
0x163b   :  { %v2750_v2 = vmul.f32 %v2726_v0, %v6757_v17 }
0x163d   :  { %v2760_v4 = vpack.c.bf16 %v2750_v2, %v2749_v38 }
0x163f   :  { %5593 = vmatmul.msk.bf16.gmra.mxu3 %vm146_vm3, %v2760_v4  ;;  %v2828_v35 = vpop.f32.mrf.mxu3 }
0x1640   :  { %v2855_v37 = vadd.f32 %v2828_v35, %v2818_v29 }
0x1642   :  { %v2729_v43 = vpop.f32.mrf.mxu2 }
0x1643   :  { %v2751_v55 = vmul.f32 %v2729_v43, %v6766_v25 }
0x1647   :  { %v2830_v44 = vpop.f32.mrf.mxu3 }
0x1648   :  { %v2856_v2 = vadd.f32 %v2830_v44, %v2820_v53 }
0x164a   :  { %v2731_v18 = vpop.f32.mrf.mxu2 }
0x164b   :  { %v2752_v41 = vmul.f32 %v2731_v18, %v6766_v25 }
0x164d   :  { %v2761_v42 = vpack.c.bf16 %v2752_v41, %v2751_v55 }
0x164f   :  { %5594 = vmatmul.msk.bf16.gmra.mxu3 %vm146_vm3, %v2761_v42  ;;  %v2833_v47 = vpop.f32.mrf.mxu3 }
0x1650   :  { %v2857_v40 = vadd.f32 %v2853_v59, %v2833_v47 }
0x1652   :  { %v2734_v16 = vpop.f32.mrf.mxu2 }
0x1653   :  { %v2753_v48 = vmul.f32 %v2734_v16, %v6766_v25 }
0x1657   :  { %v2835_v12 = vpop.f32.mrf.mxu3 }
0x1658   :  { %v2858_v49 = vadd.f32 %v2854_v34, %v2835_v12 }
0x165a   :  { %v2736_v7 = vpop.f32.mrf.mxu2 }
0x165b   :  { %v2754_v51 = vmul.f32 %v2736_v7, %v6766_v25 }
0x165d   :  { %v2762_v60 = vpack.c.bf16 %v2754_v51, %v2753_v48 }
0x165f   :  { %5595 = vmatmul.msk.bf16.gmra.mxu3 %vm146_vm3, %v2762_v60 }
0x16c2   :  { %v2838_v9 = vpop.f32.mrf.mxu3 }
0x16c3   :  { %v2859_v26 = vadd.f32 %v2855_v37, %v2838_v9  ;;  %v5985_v37 = vld [vmem:[%s8746_s11 + $0x20] sm:$0xff] }
0x16ca   :  { %v2840_v61 = vpop.f32.mrf.mxu3 }
0x16cb   :  { %v2860_v43 = vadd.f32 %v2856_v2, %v2840_v61 }
0x16d2   :  { %v2843_v10 = vpop.f32.mrf.mxu3 }
0x16d3   :  { %v2861_v31 = vadd.f32 %v2857_v40, %v2843_v10 }
0x16d5   :  { %v2865_v23 = vadd.f32 %v2861_v31, %v7480_v6 }
0x16d7   :  { %v7782_v15 = vadd.f32 %v2869_v21, %v2865_v23 }
0x16d9   :  { %v2874_v20 = vsel %vm146_vm3, %v7782_v15, 0.0 }
0x16da   :  { %2875 = vadd.xlane.f32.xlu1 %v2874_v20  ;;  %v2845_v5 = vpop.f32.mrf.mxu3 }
0x16db   :  { %v2862_v19 = vadd.f32 %v2858_v49, %v2845_v5  ;;  %v5986_v5 = vld [vmem:[%s8746_s11 + $0x28] sm:$0xff] }
0x16dc   :  { %3008 = vmatpush.bf16.msrb.mxu0 %v5986_v5 }
0x16dd   :  { %v2866_v63 = vadd.f32 %v2862_v19, %v7485_v11 }
0x16df   :  { %v7787_v57 = vadd.f32 %v2869_v21, %v2866_v63 }
0x16e0   :  { %3009 = vmatpush.bf16.msrb.mxu0 %v5985_v37 }
0x16e1   :  { %v2877_v27 = vsel %vm146_vm3, %v7787_v57, 0.0 }
0x16e2   :  { %2878 = vadd.xlane.f32.xlu2 %v2877_v27  ;;  %v2848_v28 = vpop.f32.mrf.mxu3 }
0x16e3   :  { %v2863_v0 = vadd.f32 %v2859_v26, %v2848_v28 }
0x16e5   :  { %v2867_v38 = vadd.f32 %v2863_v0, %v7490_v30 }
0x16e7   :  { %v7792_v4 = vadd.f32 %v2869_v21, %v2867_v38 }
0x16e9   :  { %v2880_v18 = vsel %vm146_vm3, %v7792_v4, 0.0 }
0x16ea   :  { %2881 = vadd.xlane.f32.xlu0 %v2880_v18  ;;  %v2850_v55 = vpop.f32.mrf.mxu3 }
0x16eb   :  { %v2864_v41 = vadd.f32 %v2860_v43, %v2850_v55 }
0x16ed   :  { %v2868_v42 = vadd.f32 %v2864_v41, %v7495_v56 }
0x16ef   :  { %v7797_v16 = vadd.f32 %v2869_v21, %v2868_v42 }
0x16f1   :  { %v2883_v7 = vsel %vm146_vm3, %v7797_v16, 0.0 }
0x16f2   :  { %2884 = vadd.xlane.f32.xlu1 %v2883_v7 }
0x174d   :  { %v2876_v48 = vpop.xlane.xlu1 %2875 }
0x174e   :  { %v2886_v51 = vmul.f32 %v2876_v48, %v6674_v13 }
0x1750   :  { %v7803_v60 = vsub.f32 %v7782_v15, %v2886_v51 }
0x1752   :  { %v2894_v36 = vmul.f32 %v7803_v60, %v7803_v60 }
0x1754   :  { %v2898_v3 = vsel %vm146_vm3, %v2894_v36, 0.0 }
0x1755   :  { %2899 = vadd.xlane.f32.xlu2 %v2898_v3  ;;  %v2879_v29 = vpop.xlane.xlu2 %2878 }
0x1756   :  { %v2887_v53 = vmul.f32 %v2879_v29, %v6674_v13 }
0x1758   :  { %v7810_v46 = vsub.f32 %v7787_v57, %v2887_v53 }
0x175a   :  { %v2895_v24 = vmul.f32 %v7810_v46, %v7810_v46 }
0x175c   :  { %v2901_v35 = vsel %vm146_vm3, %v2895_v24, 0.0 }
0x175d   :  { %2902 = vadd.xlane.f32.xlu0 %v2901_v35  ;;  %v2882_v44 = vpop.xlane.xlu0 %2881 }
0x175e   :  { %v2888_v47 = vmul.f32 %v2882_v44, %v6674_v13 }
0x1760   :  { %v7817_v12 = vsub.f32 %v7792_v4, %v2888_v47 }
0x1762   :  { %v2896_v9 = vmul.f32 %v7817_v12, %v7817_v12 }
0x1764   :  { %v2904_v61 = vsel %vm146_vm3, %v2896_v9, 0.0 }
0x1765   :  { %2905 = vadd.xlane.f32.xlu1 %v2904_v61  ;;  %v2885_v59 = vpop.xlane.xlu1 %2884 }
0x1766   :  { %v2889_v40 = vmul.f32 %v2885_v59, %v6674_v13 }
0x1768   :  { %v7824_v10 = vsub.f32 %v7797_v16, %v2889_v40 }
0x176a   :  { %v2897_v31 = vmul.f32 %v7824_v10, %v7824_v10 }
0x176c   :  { %v2907_v23 = vsel %vm146_vm3, %v2897_v31, 0.0 }
0x176d   :  { %2908 = vadd.xlane.f32.xlu2 %v2907_v23 }
0x1771   :  { %2962 = vrot.lane.b32.xlu0 %v7529_v22, %s6507_s5 }
0x177e   :  { %2969 = vrot.lane.b32.xlu1 %v7529_v22, %s6512_s30 }
0x1785   :  { %3125 = vrot.lane.b32.xlu2 %v2869_v21, %s6505_s23 }
0x17c8   :  { %v2900_v34 = vpop.xlane.xlu2 %2899 }
0x17c9   :  { %v2910_v49 = vmul.f32 %v2900_v34, %v6674_v13 }
0x17cb   :  { %v2914_v20 = vadd.f32 1e-05, %v2910_v49 }
0x17cd   :  { %6302 = vrsqrt.f32 %v2914_v20  ;;  %vm2924_vm14 = vweird.f32 %v2914_v20 }
0x17d0   :  { %v2903_v19 = vpop.xlane.xlu0 %2902 }
0x17d1   :  { %v2911_v63 = vmul.f32 %v2903_v19, %v6674_v13 }
0x17d3   :  { %v6303_v22 = vpop.eup %6302  ;;  %v2915_v26 = vadd.f32 1e-05, %v2911_v63 }
0x17d4   :  { %v2919_v21 = vmul.f32 %v6303_v22, %v2914_v20  ;;  %vm2925_vm11 = vweird.f32 %v6303_v22 }
0x17d5   :  { %6304 = vrsqrt.f32 %v2915_v26  ;;  %vm2934_vm12 = vweird.f32 %v2915_v26  ;;  %vm2926_vm15 = vmor %vm2924_vm14, %vm2925_vm11 }
0x17d6   :  { %v2920_v0 = vmul.f32 %v6303_v22, %v2919_v21 }
0x17d8   :  { %v2906_v27 = vpop.xlane.xlu1 %2905  ;;  %v2921_v18 = vmul.f32 0.5, %v2920_v0 }
0x17d9   :  { %v2912_v28 = vmul.f32 %v2906_v27, %v6674_v13 }
0x17da   :  { %v2922_v48 = vsub.f32 1.5, %v2921_v18 }
0x17db   :  { %v6305_v38 = vpop.eup %6304  ;;  %v2916_v2 = vadd.f32 1e-05, %v2912_v28 }
0x17dc   :  { %v2929_v43 = vmul.f32 %v6305_v38, %v2915_v26  ;;  %vm2935_vm10 = vweird.f32 %v6305_v38  ;;  %v2923_v24 = vmul.f32 %v6303_v22, %v2922_v48  ;;  %v5990_v48 = vld [vmem:[%s8747_s12 + $0x98] sm:$0xff] }
0x17dd   :  { %6306 = vrsqrt.f32 %v2916_v2  ;;  %vm2936_vm13 = vmor %vm2934_vm12, %vm2935_vm10  ;;  %vm2944_vm2 = vweird.f32 %v2916_v2 }
0x17de   :  { %v2930_v55 = vmul.f32 %v6305_v38, %v2929_v43  ;;  %v2927_v9 = vsel %vm2926_vm15, %v6303_v22, %v2923_v24 }
0x17df   :  { %v2958_v23 = vmul.f32 %v2927_v9, %v7803_v60 }
0x17e0   :  { %v2931_v41 = vmul.f32 0.5, %v2930_v55  ;;  %v2909_v42 = vpop.xlane.xlu2 %2908 }
0x17e1   :  { %v2913_v7 = vmul.f32 %v2909_v42, %v6674_v13 }
0x17e2   :  { %v2932_v51 = vsub.f32 1.5, %v2931_v41 }
0x17e3   :  { %v6307_v36 = vpop.eup %6306  ;;  %v2917_v3 = vadd.f32 1e-05, %v2913_v7  ;;  %v2963_v31 = vpop.permute.xlu0 %2962  ;;  %v5993_v7 = vld [vmem:[%s8747_s12 + $0xb0] sm:$0xff] }
0x17e4   :  { %v2933_v29 = vmul.f32 %v6305_v38, %v2932_v51  ;;  %v2939_v53 = vmul.f32 %v6307_v36, %v2916_v2  ;;  %v2965_v5 = vmul.f32 %v2963_v31, %v2958_v23  ;;  %vm2945_vm0 = vweird.f32 %v6307_v36  ;;  %v5994_v2 = vld [vmem:[%s8747_s12 + $0xb8] sm:$0xff]  ;;  %v5989_v51 = vld [vmem:[%s8747_s12 + $0x90] sm:$0xff] }
0x17e5   :  { %6308 = vrsqrt.f32 %v2917_v3  ;;  %vm2946_vm4 = vmor %vm2944_vm2, %vm2945_vm0  ;;  %vm2954_vm5 = vweird.f32 %v2917_v3  ;;  %3128 = vmatpush.bf16.msra.mxu0 %v5994_v2 }
0x17e6   :  { %v2940_v35 = vmul.f32 %v6307_v36, %v2939_v53  ;;  %v2937_v44 = vsel %vm2936_vm13, %v6305_v38, %v2933_v29  ;;  %v5987_v53 = vld [vmem:[%s8747_s12 + $0x80] sm:$0xff] }
0x17e7   :  { %v2959_v59 = vmul.f32 %v2937_v44, %v7810_v46 }
0x17e8   :  { %v2941_v47 = vmul.f32 0.5, %v2940_v35 }
0x17e9   :  { %v2966_v19 = vmul.f32 %v2963_v31, %v2959_v59  ;;  %3129 = vmatpush.bf16.msra.mxu0 %v5993_v7 }
0x17ea   :  { %v2942_v34 = vsub.f32 1.5, %v2941_v47 }
0x17eb   :  { %v6309_v61 = vpop.eup %6308 }
0x17ec   :  { %v2949_v40 = vmul.f32 %v6309_v61, %v2917_v3  ;;  %v2943_v21 = vmul.f32 %v6307_v36, %v2942_v34  ;;  %vm2955_vm1 = vweird.f32 %v6309_v61  ;;  %v6500_v3 = vld [vmem:[%s8743_s13 + $0x8] sm:$0xf] }
0x17ed   :  { %vm2956_vm6 = vmor %vm2954_vm5, %vm2955_vm1  ;;  %v2983_v29 = vperm.slane %v6500_v3, 2 }
0x17ee   :  { %v2950_v49 = vmul.f32 %v6309_v61, %v2949_v40  ;;  %v2947_v60 = vsel %vm2946_vm4, %v6307_v36, %v2943_v21  ;;  %v5988_v36 = vld [vmem:[%s8747_s12 + $0x88] sm:$0xff] }
0x17ef   :  { %v2960_v38 = vmul.f32 %v2947_v60, %v7817_v12  ;;  %v5992_v12 = vld [vmem:[%s8747_s12 + $0xa8] sm:$0xff] }
0x17f0   :  { %v2951_v63 = vmul.f32 0.5, %v2950_v49  ;;  %v2970_v37 = vpop.permute.xlu1 %2969  ;;  %3130 = vmatpush.bf16.msra.mxu0 %v5992_v12 }
0x17f1   :  { %v2972_v26 = vadd.f32 %v2970_v37, %v2965_v5  ;;  %v2973_v20 = vadd.f32 %v2970_v37, %v2966_v19  ;;  %v2967_v18 = vmul.f32 %v2963_v31, %v2960_v38 }
0x17f2   :  { %v2952_v27 = vsub.f32 1.5, %v2951_v63 }
0x17f3   :  { %v2976_v22 = vpack.c.bf16 %v2973_v20, %v2972_v26  ;;  %v2974_v41 = vadd.f32 %v2970_v37, %v2967_v18 }
0x17f4   :  { %v2953_v46 = vmul.f32 %v6309_v61, %v2952_v27 }
0x17f5   :  { %5608 = vmatmul.msk.bf16.vlgmr.msrb.gmra.mxu0 %vm146_vm3, %v2976_v22 }
0x17f6   :  { %v2957_v28 = vsel %vm2956_vm6, %v6309_v61, %v2953_v46 }
0x17f7   :  { %v2961_v0 = vmul.f32 %v2957_v28, %v7824_v10  ;;  %v5991_v10 = vld [vmem:[%s8747_s12 + $0xa0] sm:$0xff] }
0x17f8   :  { %3131 = vmatpush.bf16.msra.mxu0 %v5991_v10 }
0x17f9   :  { %v2968_v43 = vmul.f32 %v2963_v31, %v2961_v0 }
0x17fb   :  { %v2975_v55 = vadd.f32 %v2970_v37, %v2968_v43 }
0x17fc   :  { %3132 = vmatpush.bf16.msra.mxu0 %v5990_v48 }
0x17fd   :  { %v2977_v42 = vpack.c.bf16 %v2975_v55, %v2974_v41 }
0x1800   :  { %3133 = vmatpush.bf16.msra.mxu0 %v5989_v51 }
0x1804   :  { %3134 = vmatpush.bf16.msra.mxu0 %v5988_v36 }
0x1805   :  { %5609 = vmatmul.msk.bf16.gmra.mxu0 %vm146_vm3, %v2977_v42 }
0x1808   :  { %3135 = vmatpush.bf16.msra.mxu0 %v5987_v53 }
0x1872   :  { %v3011_v24 = vpop.f32.mrf.mxu0 }
0x1873   :  { %v3012_v35 = vadd.f32 %v3011_v24, %v2983_v29 }
0x1875   :  { %v3025_v44 = vmul.f32 0.044715, %v3012_v35  ;;  %v3021_v43 = vmul.f32 0.5, %v3012_v35 }
0x1877   :  { %v3029_v47 = vmul.f32 %v3025_v44, %v3012_v35 }
0x1879   :  { %v3033_v9 = vmul.f32 %v3029_v47, %v3012_v35 }
0x187a   :  { %v3013_v61 = vpop.f32.mrf.mxu0 }
0x187b   :  { %v3037_v59 = vadd.f32 %v3033_v9, %v3012_v35  ;;  %v3014_v40 = vadd.f32 %v3013_v61, %v2983_v29  ;;  %v5998_v61 = vld [vmem:[%s8748_s14 + $0x18] sm:$0xff] }
0x187c   :  { %3187 = vmatpush.bf16.msrb.mxu0 %v5998_v61 }
0x187d   :  { %v3026_v31 = vmul.f32 0.044715, %v3014_v40  ;;  %v3041_v23 = vmul.f32 0.7978846, %v3037_v59  ;;  %v3022_v18 = vmul.f32 0.5, %v3014_v40  ;;  %v5997_v59 = vld [vmem:[%s8748_s14 + $0x10] sm:$0xff] }
0x187f   :  { %v3030_v34 = vmul.f32 %v3026_v31, %v3014_v40  ;;  %6310 = vtanh.f32 %v3041_v23  ;;  %v5995_v23 = vld [vmem:[%s8748_s14] sm:$0xff] }
0x1880   :  { %3188 = vmatpush.bf16.msrb.mxu0 %v5997_v59 }
0x1881   :  { %v3034_v49 = vmul.f32 %v3030_v34, %v3014_v40  ;;  %v3126_v34 = vpop.permute.xlu2 %3125 }
0x1882   :  { %v3016_v5 = vpop.f32.mrf.mxu0 }
0x1883   :  { %v3038_v19 = vadd.f32 %v3034_v49, %v3014_v40  ;;  %v3017_v63 = vadd.f32 %v3016_v5, %v2983_v29  ;;  %v5996_v40 = vld [vmem:[%s8748_s14 + $0x8] sm:$0xff] }
0x1885   :  { %v3042_v37 = vmul.f32 0.7978846, %v3038_v19  ;;  %v3027_v26 = vmul.f32 0.044715, %v3017_v63  ;;  %v6311_v21 = vpop.eup %6310  ;;  %v3023_v53 = vmul.f32 0.5, %v3017_v63 }
0x1886   :  { %v3049_v28 = vadd.f32 1.0, %v6311_v21 }
0x1887   :  { %6312 = vtanh.f32 %v3042_v37  ;;  %v3031_v20 = vmul.f32 %v3027_v26, %v3017_v63 }
0x1888   :  { %v3053_v2 = vmul.f32 %v3049_v28, %v3021_v43 }
0x1889   :  { %v3035_v27 = vmul.f32 %v3031_v20, %v3017_v63 }
0x188a   :  { %v3018_v22 = vpop.f32.mrf.mxu0 }
0x188b   :  { %v3019_v46 = vadd.f32 %v3018_v22, %v2983_v29  ;;  %v3039_v60 = vadd.f32 %v3035_v27, %v3017_v63 }
0x188d   :  { %v6313_v0 = vpop.eup %6312  ;;  %v3028_v38 = vmul.f32 0.044715, %v3019_v46  ;;  %v3043_v42 = vmul.f32 0.7978846, %v3039_v60  ;;  %v3024_v24 = vmul.f32 0.5, %v3019_v46 }
0x188e   :  { %v3050_v55 = vadd.f32 1.0, %v6313_v0  ;;  %v3159_v0 = vpack.c.bf16 %v7485_v11, %v7480_v6 }
0x188f   :  { %v3032_v41 = vmul.f32 %v3028_v38, %v3019_v46  ;;  %6314 = vtanh.f32 %v3043_v42 }
0x1890   :  { %v3054_v7 = vmul.f32 %v3050_v55, %v3022_v18 }
0x1891   :  { %v3036_v12 = vmul.f32 %v3032_v41, %v3019_v46 }
0x1892   :  { %v3057_v10 = vpack.c.bf16 %v3054_v7, %v3053_v2 }
0x1893   :  { %v3040_v48 = vadd.f32 %v3036_v12, %v3019_v46 }
0x1894   :  { %3136 = vmatmul.bf16.vlgmr.msra.gmra.mxu0 %v3057_v10 }
0x1895   :  { %v3044_v51 = vmul.f32 0.7978846, %v3040_v48  ;;  %v6315_v36 = vpop.eup %6314  ;;  %3224 = vmatpush.bf16.msra.mxu0 %v5996_v40 }
0x1896   :  { %v3051_v3 = vadd.f32 1.0, %v6315_v36 }
0x1897   :  { %6316 = vtanh.f32 %v3044_v51 }
0x1898   :  { %v3055_v35 = vmul.f32 %v3051_v3, %v3023_v53 }
0x1899   :  { %3225 = vmatpush.bf16.msra.mxu0 %v5995_v23 }
0x189d   :  { %v6317_v29 = vpop.eup %6316 }
0x189e   :  { %v3052_v44 = vadd.f32 1.0, %v6317_v29 }
0x18a0   :  { %v3056_v47 = vmul.f32 %v3052_v44, %v3024_v24 }
0x18a2   :  { %v3058_v9 = vpack.c.bf16 %v3056_v47, %v3055_v35 }
0x18a4   :  { %3141 = vmatmul.bf16.gmra.mxu0 %v3058_v9 }
0x1911   :  { %v3137_v31 = vpop.f32.mrf.mxu0 }
0x1912   :  { %v3138_v49 = vadd.f32 %v3137_v31, %v3126_v34 }
0x1914   :  { %v3147_v63 = vadd.f32 %v3138_v49, %v7782_v15  ;;  %v3160_v15 = vpack.c.bf16 %v7495_v56, %v7490_v30 }
0x1919   :  { %v3139_v5 = vpop.f32.mrf.mxu0 }
0x191a   :  { %v3140_v19 = vadd.f32 %v3139_v5, %v3126_v34 }
0x191c   :  { %v3148_v37 = vadd.f32 %v3140_v19, %v7787_v57 }
0x191e   :  { %v3161_v26 = vpack.c.bf16 %v3148_v37, %v3147_v63 }
0x1920   :  { %5666 = vmatmul.msk.bf16.vlgmr.msrb.gmra.mxu0 %vm146_vm3, %v3161_v26 }
0x1921   :  { %v3142_v20 = vpop.f32.mrf.mxu0 }
0x1922   :  { %v3143_v21 = vadd.f32 %v3142_v20, %v3126_v34  ;;  %v7946_v20 = vld [vmem:[%s8743_s13 + $0xc] sm:$0xf] }
0x1924   :  { %v3149_v46 = vadd.f32 %v3143_v21, %v7792_v4  ;;  %v6044_v4 = vld [vmem:[%s8749_s15] ss:$0 sm:$0xff] }
0x1929   :  { %v3144_v27 = vpop.f32.mrf.mxu0 }
0x192a   :  { %v3145_v22 = vadd.f32 %v3144_v27, %v3126_v34  ;;  %v7950_v27 = vperm.slane %v7946_v20, 0 }
0x192c   :  { %v3150_v60 = vadd.f32 %v3145_v22, %v7797_v16  ;;  %v6000_v22 = vld [vmem:[%s8744_s9 + $0x38] sm:$0xff] }
0x192d   :  { %3379 = vmatpush.bf16.msra.mxu1 %v6000_v22 }
0x192e   :  { %v3162_v28 = vpack.c.bf16 %v3150_v60, %v3149_v46 }
0x1930   :  { %5667 = vmatmul.msk.bf16.gmra.mxu0 %vm146_vm3, %v3162_v28 }
0x1940   :  { %5676 = vmatmul.msk.bf16.vlgmr.msra.gmra.mxu0 %vm146_vm3, %v3159_v0  ;;  %v5999_v0 = vld [vmem:[%s8744_s9 + $0x30] sm:$0xff] }
0x1941   :  { %3380 = vmatpush.bf16.msra.mxu1 %v5999_v0 }
0x1950   :  { %5677 = vmatmul.msk.bf16.gmra.mxu0 %vm146_vm3, %v3160_v15 }
0x199d   :  { %v3190_v57 = vpop.f32.mrf.mxu0 }
0x19a5   :  { %v3192_v38 = vpop.f32.mrf.mxu0 }
0x19ad   :  { %v3195_v43 = vpop.f32.mrf.mxu0 }
0x19b5   :  { %v3197_v18 = vpop.f32.mrf.mxu0 }
0x19bd   :  { %v3227_v16 = vpop.f32.mrf.mxu0 }
0x19be   :  { %v3228_v55 = vadd.f32 %v3227_v16, %v3190_v57 }
0x19c0   :  { %v7904_v41 = vadd.f32 %v6044_v4, %v3228_v55 }
0x19c2   :  { %v3247_v6 = vsel %vm146_vm3, %v7904_v41, 0.0 }
0x19c3   :  { %3248 = vadd.xlane.f32.xlu0 %v3247_v6 }
0x19c5   :  { %v3229_v11 = vpop.f32.mrf.mxu0 }
0x19c6   :  { %v3230_v30 = vadd.f32 %v3229_v11, %v3192_v38 }
0x19c8   :  { %v7908_v56 = vadd.f32 %v6044_v4, %v3230_v30 }
0x19ca   :  { %v3250_v42 = vsel %vm146_vm3, %v7908_v56, 0.0 }
0x19cb   :  { %3251 = vadd.xlane.f32.xlu1 %v3250_v42 }
0x19cd   :  { %v3232_v2 = vpop.f32.mrf.mxu0 }
0x19ce   :  { %v3233_v7 = vadd.f32 %v3232_v2, %v3195_v43 }
0x19d0   :  { %v7912_v12 = vadd.f32 %v6044_v4, %v3233_v7 }
0x19d2   :  { %v3253_v10 = vsel %vm146_vm3, %v7912_v12, 0.0 }
0x19d3   :  { %3254 = vadd.xlane.f32.xlu2 %v3253_v10 }
0x19d5   :  { %v3234_v48 = vpop.f32.mrf.mxu0 }
0x19d6   :  { %v3235_v51 = vadd.f32 %v3234_v48, %v3197_v18 }
0x19d8   :  { %v7916_v36 = vadd.f32 %v6044_v4, %v3235_v51 }
0x19da   :  { %v3256_v3 = vsel %vm146_vm3, %v7916_v36, 0.0 }
0x19db   :  { %3257 = vadd.xlane.f32.xlu0 %v3256_v3 }
0x1a36   :  { %v3249_v29 = vpop.xlane.xlu0 %3248 }
0x1a37   :  { %v3259_v53 = vmul.f32 %v3249_v29, %v6674_v13 }
0x1a39   :  { %v3263_v24 = vsub.f32 %v7904_v41, %v3259_v53 }
0x1a3b   :  { %v3267_v44 = vmul.f32 %v3263_v24, %v3263_v24 }
0x1a3d   :  { %v3271_v35 = vsel %vm146_vm3, %v3267_v44, 0.0 }
0x1a3e   :  { %v3252_v47 = vpop.xlane.xlu1 %3251  ;;  %3272 = vadd.xlane.f32.xlu1 %v3271_v35 }
0x1a3f   :  { %v3260_v9 = vmul.f32 %v3252_v47, %v6674_v13 }
0x1a41   :  { %v7925_v61 = vsub.f32 %v7908_v56, %v3260_v9 }
0x1a43   :  { %v3268_v59 = vmul.f32 %v7925_v61, %v7925_v61 }
0x1a45   :  { %v3274_v40 = vsel %vm146_vm3, %v3268_v59, 0.0 }
0x1a46   :  { %v3255_v31 = vpop.xlane.xlu2 %3254  ;;  %3275 = vadd.xlane.f32.xlu0 %v3274_v40 }
0x1a47   :  { %v3261_v23 = vmul.f32 %v3255_v31, %v6674_v13 }
0x1a49   :  { %v7932_v34 = vsub.f32 %v7912_v12, %v3261_v23 }
0x1a4b   :  { %v3269_v49 = vmul.f32 %v7932_v34, %v7932_v34 }
0x1a4d   :  { %v3277_v5 = vsel %vm146_vm3, %v3269_v49, 0.0 }
0x1a4e   :  { %3278 = vadd.xlane.f32.xlu2 %v3277_v5  ;;  %v3258_v19 = vpop.xlane.xlu0 %3257 }
0x1a4f   :  { %v3262_v63 = vmul.f32 %v3258_v19, %v6674_v13 }
0x1a51   :  { %v7939_v37 = vsub.f32 %v7916_v36, %v3262_v63 }
0x1a53   :  { %v3270_v26 = vmul.f32 %v7939_v37, %v7939_v37 }
0x1a55   :  { %v3280_v21 = vsel %vm146_vm3, %v3270_v26, 0.0 }
0x1a56   :  { %3281 = vadd.xlane.f32.xlu1 %v3280_v21 }
0x1a5a   :  { %3341 = vrot.lane.b32.xlu0 %v7950_v27, %s6505_s23 }
0x1ab1   :  { %v3273_v46 = vpop.xlane.xlu1 %3272 }
0x1ab2   :  { %v3283_v60 = vmul.f32 %v3273_v46, %v6674_v13 }
0x1ab4   :  { %v3287_v28 = vadd.f32 1e-05, %v3283_v60 }
0x1ab6   :  { %6318 = vrsqrt.f32 %v3287_v28  ;;  %vm3297_vm8 = vweird.f32 %v3287_v28 }
0x1ab9   :  { %v3276_v15 = vpop.xlane.xlu0 %3275 }
0x1aba   :  { %v3284_v57 = vmul.f32 %v3276_v15, %v6674_v13 }
0x1abc   :  { %v6319_v38 = vpop.eup %6318  ;;  %v3288_v43 = vadd.f32 1e-05, %v3284_v57 }
0x1abd   :  { %v3292_v18 = vmul.f32 %v6319_v38, %v3287_v28  ;;  %vm3298_vm7 = vweird.f32 %v6319_v38 }
0x1abe   :  { %6320 = vrsqrt.f32 %v3288_v43  ;;  %vm3299_vm9 = vmor %vm3297_vm8, %vm3298_vm7  ;;  %vm3307_vm11 = vweird.f32 %v3288_v43 }
0x1abf   :  { %v3293_v4 = vmul.f32 %v6319_v38, %v3292_v18 }
0x1ac1   :  { %v3294_v16 = vmul.f32 0.5, %v3293_v4  ;;  %v3279_v55 = vpop.xlane.xlu2 %3278 }
0x1ac2   :  { %v3285_v6 = vmul.f32 %v3279_v55, %v6674_v13 }
0x1ac3   :  { %v3295_v11 = vsub.f32 1.5, %v3294_v16 }
0x1ac4   :  { %v6321_v30 = vpop.eup %6320  ;;  %v3289_v42 = vadd.f32 1e-05, %v3285_v6 }
0x1ac5   :  { %v3296_v2 = vmul.f32 %v6319_v38, %v3295_v11  ;;  %v3302_v7 = vmul.f32 %v6321_v30, %v3288_v43  ;;  %vm3308_vm10 = vweird.f32 %v6321_v30 }
0x1ac6   :  { %6322 = vrsqrt.f32 %v3289_v42  ;;  %vm3309_vm12 = vmor %vm3307_vm11, %vm3308_vm10  ;;  %vm3317_vm14 = vweird.f32 %v3289_v42 }
0x1ac7   :  { %v3303_v10 = vmul.f32 %v6321_v30, %v3302_v7  ;;  %v3300_v48 = vsel %vm3299_vm9, %v6319_v38, %v3296_v2 }
0x1ac8   :  { %v3331_v47 = vmul.f32 %v3300_v48, %v3263_v24 }
0x1ac9   :  { %v3304_v51 = vmul.f32 0.5, %v3303_v10  ;;  %v3282_v3 = vpop.xlane.xlu1 %3281 }
0x1aca   :  { %v3286_v29 = vmul.f32 %v3282_v3, %v6674_v13  ;;  %v3336_v49 = vmul.f32 %v7950_v27, %v3331_v47 }
0x1acb   :  { %v3305_v53 = vsub.f32 1.5, %v3304_v51 }
0x1acc   :  { %v6323_v44 = vpop.eup %6322  ;;  %v3290_v35 = vadd.f32 1e-05, %v3286_v29  ;;  %v3342_v19 = vpop.permute.xlu0 %3341 }
0x1acd   :  { %v3306_v9 = vmul.f32 %v6321_v30, %v3305_v53  ;;  %v3312_v59 = vmul.f32 %v6323_v44, %v3289_v42  ;;  %v3344_v22 = vadd.f32 %v3342_v19, %v3336_v49  ;;  %vm3318_vm13 = vweird.f32 %v6323_v44 }
0x1ace   :  { %6324 = vrsqrt.f32 %v3290_v35  ;;  %vm3319_vm15 = vmor %vm3317_vm14, %vm3318_vm13  ;;  %vm3327_vm1 = vweird.f32 %v3290_v35 }
0x1acf   :  { %v3310_v40 = vsel %vm3309_vm12, %v6321_v30, %v3306_v9  ;;  %v3313_v31 = vmul.f32 %v6323_v44, %v3312_v59 }
0x1ad0   :  { %v3332_v23 = vmul.f32 %v3310_v40, %v7925_v61 }
0x1ad1   :  { %v3314_v5 = vmul.f32 0.5, %v3313_v31 }
0x1ad2   :  { %v3337_v63 = vmul.f32 %v7950_v27, %v3332_v23 }
0x1ad3   :  { %v3315_v26 = vsub.f32 1.5, %v3314_v5 }
0x1ad4   :  { %v6325_v21 = vpop.eup %6324  ;;  %v3345_v46 = vadd.f32 %v3342_v19, %v3337_v63 }
0x1ad5   :  { %v3316_v24 = vmul.f32 %v6323_v44, %v3315_v26  ;;  %v3322_v60 = vmul.f32 %v6325_v21, %v3290_v35  ;;  %vm3328_vm0 = vweird.f32 %v6325_v21 }
0x1ad6   :  { %v3348_v28 = vpack.c.bf16 %v3345_v46, %v3344_v22  ;;  %vm3329_vm2 = vmor %vm3327_vm1, %vm3328_vm0 }
0x1ad7   :  { %v3323_v0 = vmul.f32 %v6325_v21, %v3322_v60  ;;  %v3320_v61 = vsel %vm3319_vm15, %v6323_v44, %v3316_v24 }
0x1ad8   :  { %5691 = vmatmul.msk.bf16.vlgmr.msra.gmra.mxu1 %vm146_vm3, %v3348_v28  ;;  %v3333_v38 = vmul.f32 %v3320_v61, %v7932_v34 }
0x1ad9   :  { %v3324_v15 = vmul.f32 0.5, %v3323_v0 }
0x1ada   :  { %v3338_v16 = vmul.f32 %v7950_v27, %v3333_v38 }
0x1adb   :  { %v3325_v57 = vsub.f32 1.5, %v3324_v15 }
0x1adc   :  { %v3346_v6 = vadd.f32 %v3342_v19, %v3338_v16 }
0x1add   :  { %v3326_v43 = vmul.f32 %v6325_v21, %v3325_v57 }
0x1adf   :  { %v3330_v18 = vsel %vm3329_vm2, %v6325_v21, %v3326_v43 }
0x1ae0   :  { %v3334_v4 = vmul.f32 %v3330_v18, %v7939_v37 }
0x1ae2   :  { %v3339_v55 = vmul.f32 %v7950_v27, %v3334_v4 }
0x1ae4   :  { %v3347_v11 = vadd.f32 %v3342_v19, %v3339_v55 }
0x1ae6   :  { %v3349_v30 = vpack.c.bf16 %v3347_v11, %v3346_v6 }
0x1ae8   :  { %5692 = vmatmul.msk.bf16.gmra.mxu1 %vm146_vm3, %v3349_v30 }
0x1b55   :  { %v3382_v42 = vpop.f32.mrf.mxu1 }
0x1b56   :  { %v3392_v44 = vmul.f32 %v3382_v42, %v6736_v1  ;;  %v3396_v31 = vmul.f32 %v3382_v42, %v6747_v8  ;;  %v3400_v26 = vmul.f32 %v3382_v42, %v6757_v17  ;;  %v3404_v28 = vmul.f32 %v3382_v42, %v6766_v25 }
0x1b5d   :  { %v3384_v2 = vpop.f32.mrf.mxu1 }
0x1b5e   :  { %v7973_v7 = vpack.c.bf16 %v3384_v2, %v3382_v42  ;;  %v3393_v53 = vmul.f32 %v3384_v2, %v6736_v1  ;;  %v3397_v40 = vmul.f32 %v3384_v2, %v6747_v8  ;;  %v3401_v63 = vmul.f32 %v3384_v2, %v6757_v17 }
0x1b5f   :  { %v3405_v60 = vmul.f32 %v3384_v2, %v6766_v25 }
0x1b60   :  { %3420 = vrot.lane.b32.xlu1 %v7973_v7, %s6505_s23  ;;  %v3408_v35 = vpack.c.bf16 %v3393_v53, %v3392_v44  ;;  %v3410_v23 = vpack.c.bf16 %v3397_v40, %v3396_v31  ;;  %v3412_v21 = vpack.c.bf16 %v3401_v63, %v3400_v26 }
0x1b61   :  { %v3414_v0 = vpack.c.bf16 %v3405_v60, %v3404_v28 }
0x1b65   :  { %v3387_v34 = vpop.f32.mrf.mxu1 }
0x1b66   :  { %v3394_v9 = vmul.f32 %v3387_v34, %v6736_v1  ;;  %v3398_v5 = vmul.f32 %v3387_v34, %v6747_v8  ;;  %v3402_v46 = vmul.f32 %v3387_v34, %v6757_v17  ;;  %v3406_v15 = vmul.f32 %v3387_v34, %v6766_v25 }
0x1b6d   :  { %v3389_v10 = vpop.f32.mrf.mxu1 }
0x1b6e   :  { %v7977_v48 = vpack.c.bf16 %v3389_v10, %v3387_v34  ;;  %v3395_v47 = vmul.f32 %v3389_v10, %v6736_v1  ;;  %v3399_v49 = vmul.f32 %v3389_v10, %v6747_v8  ;;  %v3403_v22 = vmul.f32 %v3389_v10, %v6757_v17 }
0x1b6f   :  { %v3407_v61 = vmul.f32 %v3389_v10, %v6766_v25 }
0x1b70   :  { %3422 = vrot.lane.b32.xlu2 %v7977_v48, %s6505_s23  ;;  %v3409_v59 = vpack.c.bf16 %v3395_v47, %v3394_v9  ;;  %v3411_v19 = vpack.c.bf16 %v3399_v49, %v3398_v5  ;;  %v3413_v24 = vpack.c.bf16 %v3403_v22, %v3402_v46 }
0x1b71   :  { %v3415_v57 = vpack.c.bf16 %v3407_v61, %v3406_v15 }
0x1bca   :  { %v3423_v37 = vpop.permute.xlu2 %3422 }
0x1bcb   :  { %v3452_v51 = vsel %vm146_vm3, %v3423_v37, 0 }
0x1bcc   :  { %3460 = vmatpush.bf16.xpose.msra.mxu2 %v3452_v51 }
0x1bd2   :  { %v3421_v3 = vpop.permute.xlu1 %3420 }
0x1bd3   :  { %v3449_v29 = vsel %vm146_vm3, %v3421_v3, 0 }
0x1bd4   :  { %3461 = vmatpush.bf16.xpose.msra.mxu2 %v3449_v29 }
0x1bdb   :  { %5693 = vmatmul.msk.bf16.vlgmr.msra.gmra.mxu2 %vm146_vm3, %v3408_v35 }
0x1beb   :  { %5694 = vmatmul.msk.bf16.gmra.mxu2 %vm146_vm3, %v3409_v59 }
0x1bfb   :  { %5695 = vmatmul.msk.bf16.gmra.mxu2 %vm146_vm3, %v3410_v23 }
0x1c0b   :  { %5696 = vmatmul.msk.bf16.gmra.mxu2 %vm146_vm3, %v3411_v19 }
0x1c1b   :  { %5697 = vmatmul.msk.bf16.gmra.mxu2 %vm146_vm3, %v3412_v21 }
0x1c2b   :  { %5698 = vmatmul.msk.bf16.gmra.mxu2 %vm146_vm3, %v3413_v24 }
0x1c3b   :  { %5699 = vmatmul.msk.bf16.gmra.mxu2 %vm146_vm3, %v3414_v0 }
0x1c4b   :  { %5700 = vmatmul.msk.bf16.gmra.mxu2 %vm146_vm3, %v3415_v57 }
0x1c5e   :  { %v3463_v38 = vpop.f32.mrf.mxu2 }
0x1c5f   :  { %v3464_v43 = vadd.f32 %v3463_v38, %v6779_v45 }
0x1c61   :  { %v3503_v18 = vsel %vm146_vm3, %v3464_v43, -inf }
0x1c62   :  { %3504 = vmax.xlane.f32.xlu0 %v3503_v18 }
0x1c66   :  { %v3465_v4 = vpop.f32.mrf.mxu2 }
0x1c67   :  { %v3466_v16 = vadd.f32 %v3465_v4, %v6783_v52 }
0x1c69   :  { %v3506_v55 = vsel %vm146_vm3, %v3466_v16, -inf }
0x1c6a   :  { %3507 = vmax.xlane.f32.xlu2 %v3506_v55 }
0x1c6e   :  { %v3468_v6 = vpop.f32.mrf.mxu2 }
0x1c6f   :  { %v3469_v11 = vadd.f32 %v3468_v6, %v6787_v58 }
0x1c71   :  { %v3509_v30 = vsel %vm146_vm3, %v3469_v11, -inf }
0x1c72   :  { %3510 = vmax.xlane.f32.xlu1 %v3509_v30 }
0x1c76   :  { %v3470_v42 = vpop.f32.mrf.mxu2 }
0x1c77   :  { %v3471_v2 = vadd.f32 %v3470_v42, %v6794_v62 }
0x1c79   :  { %v3512_v34 = vsel %vm146_vm3, %v3471_v2, -inf }
0x1c7a   :  { %3513 = vmax.xlane.f32.xlu0 %v3512_v34 }
0x1c7e   :  { %v3473_v10 = vpop.f32.mrf.mxu2 }
0x1c7f   :  { %v3474_v37 = vadd.f32 %v3473_v10, %v6779_v45 }
0x1c81   :  { %v3515_v51 = vsel %vm146_vm3, %v3474_v37, -inf }
0x1c82   :  { %3516 = vmax.xlane.f32.xlu2 %v3515_v51 }
0x1c86   :  { %v3475_v3 = vpop.f32.mrf.mxu2 }
0x1c87   :  { %v8018_v29 = vadd.f32 %v3475_v3, %v6783_v52 }
0x1c89   :  { %v3518_v53 = vsel %vm146_vm3, %v8018_v29, -inf }
0x1c8a   :  { %3519 = vmax.xlane.f32.xlu0 %v3518_v53 }
0x1c8e   :  { %v3478_v44 = vpop.f32.mrf.mxu2 }
0x1c8f   :  { %v8023_v35 = vadd.f32 %v3478_v44, %v6787_v58 }
0x1c91   :  { %v3521_v47 = vsel %vm146_vm3, %v8023_v35, -inf }
0x1c92   :  { %3522 = vmax.xlane.f32.xlu1 %v3521_v47 }
0x1c96   :  { %v3480_v9 = vpop.f32.mrf.mxu2 }
0x1c97   :  { %v8028_v59 = vadd.f32 %v3480_v9, %v6794_v62 }
0x1c99   :  { %v3524_v40 = vsel %vm146_vm3, %v8028_v59, -inf }
0x1c9a   :  { %3525 = vmax.xlane.f32.xlu2 %v3524_v40 }
0x1c9e   :  { %v3483_v31 = vpop.f32.mrf.mxu2 }
0x1c9f   :  { %v8033_v23 = vadd.f32 %v3483_v31, %v6779_v45 }
0x1ca1   :  { %v3527_v49 = vsel %vm146_vm3, %v8033_v23, -inf }
0x1ca2   :  { %3528 = vmax.xlane.f32.xlu1 %v3527_v49 }
0x1ca6   :  { %v3485_v5 = vpop.f32.mrf.mxu2 }
0x1ca7   :  { %v8038_v19 = vadd.f32 %v3485_v5, %v6783_v52 }
0x1ca9   :  { %v3530_v63 = vsel %vm146_vm3, %v8038_v19, -inf }
0x1caa   :  { %3531 = vmax.xlane.f32.xlu1 %v3530_v63 }
0x1cae   :  { %v8046_v28 = vpop.f32.mrf.mxu2 }
0x1cb2   :  { %3689 = vrot.lane.b32.xlu2 %v7977_v48, %s6507_s5 }
0x1cb6   :  { %v3490_v18 = vpop.f32.mrf.mxu2 }
0x1cb7   :  { %v8059_v42 = vadd.f32 %v3490_v18, %v6794_v62 }
0x1cb9   :  { %v3536_v53 = vsel %vm146_vm3, %v8059_v42, -inf }
0x1cd5   :  { %v3505_v26 = vpop.xlane.xlu0 %3504 }
0x1cd6   :  { %v3551_v21 = vsub.f32 %v3464_v43, %v3505_v26 }
0x1cd8   :  { %v3567_v22 = vmul.f32 1.442695, %v3551_v21 }
0x1cda   :  { %6326 = vpow2.f32 %v3567_v22 }
0x1cdd   :  { %v3508_v46 = vpop.xlane.xlu2 %3507 }
0x1cde   :  { %v3552_v24 = vsub.f32 %v3466_v16, %v3508_v46 }
0x1ce0   :  { %v8044_v60 = vpop.eup %6326  ;;  %v3569_v0 = vmul.f32 1.442695, %v3552_v24 }
0x1ce1   :  { %v3599_v61 = vsel %vm146_vm3, %v8044_v60, 0.0 }
0x1ce2   :  { %6328 = vpow2.f32 %v3569_v0  ;;  %3600 = vadd.xlane.f32.xlu0 %v3599_v61 }
0x1ce5   :  { %v3511_v15 = vpop.xlane.xlu1 %3510 }
0x1ce6   :  { %v3553_v57 = vsub.f32 %v3469_v11, %v3511_v15  ;;  %v3493_v11 = vpop.f32.mrf.mxu2 }
0x1ce8   :  { %v8050_v38 = vpop.eup %6328  ;;  %v3571_v48 = vmul.f32 1.442695, %v3553_v57 }
0x1ce9   :  { %v3602_v43 = vsel %vm146_vm3, %v8050_v38, 0.0 }
0x1cea   :  { %6330 = vpow2.f32 %v3571_v48  ;;  %3603 = vadd.xlane.f32.xlu1 %v3602_v43 }
0x1ced   :  { %v3514_v4 = vpop.xlane.xlu0 %3513 }
0x1cee   :  { %v3554_v16 = vsub.f32 %v3471_v2, %v3514_v4  ;;  %v3495_v47 = vpop.f32.mrf.mxu2 }
0x1cef   :  { %v8089_v61 = vadd.f32 %v3495_v47, %v6783_v52 }
0x1cf0   :  { %v8054_v55 = vpop.eup %6330  ;;  %v3573_v6 = vmul.f32 1.442695, %v3554_v16 }
0x1cf1   :  { %v3605_v30 = vsel %vm146_vm3, %v8054_v55, 0.0  ;;  %v3542_v18 = vsel %vm146_vm3, %v8089_v61, -inf }
0x1cf2   :  { %6332 = vpow2.f32 %v3573_v6  ;;  %3606 = vadd.xlane.f32.xlu1 %v3605_v30  ;;  %v8101_v6 = vadd.f32 %v8046_v28, %v6787_v58 }
0x1cf5   :  { %v3517_v34 = vpop.xlane.xlu2 %3516 }
0x1cf6   :  { %v3555_v10 = vsub.f32 %v3474_v37, %v3517_v34  ;;  %3687 = vrot.lane.b32.xlu0 %v7973_v7, %s6507_s5  ;;  %v3498_v63 = vpop.f32.mrf.mxu2 }
0x1cf7   :  { %v8104_v30 = vadd.f32 %v3498_v63, %v6787_v58 }
0x1cf8   :  { %v8063_v51 = vpop.eup %6332  ;;  %v3575_v2 = vmul.f32 1.442695, %v3555_v10  ;;  %v3533_v10 = vsel %vm146_vm3, %v8101_v6, -inf }
0x1cf9   :  { %v3608_v3 = vsel %vm146_vm3, %v8063_v51, 0.0 }
0x1cfa   :  { %6334 = vpow2.f32 %v3575_v2  ;;  %3609 = vadd.xlane.f32.xlu2 %v3608_v3  ;;  %3537 = vmax.xlane.f32.xlu1 %v3536_v53  ;;  %v3545_v3 = vsel %vm146_vm3, %v8104_v30, -inf }
0x1cfd   :  { %v3520_v44 = vpop.xlane.xlu0 %3519 }
0x1cfe   :  { %v3556_v9 = vsub.f32 %v8018_v29, %v3520_v44  ;;  %v8080_v29 = vadd.f32 %v3493_v11, %v6779_v45  ;;  %v3500_v0 = vpop.f32.mrf.mxu2 }
0x1cff   :  { %v8092_v15 = vadd.f32 %v3500_v0, %v6794_v62 }
0x1d00   :  { %v8070_v37 = vpop.eup %6334  ;;  %v3577_v40 = vmul.f32 1.442695, %v3556_v9  ;;  %v3539_v24 = vsel %vm146_vm3, %v8080_v29, -inf }
0x1d01   :  { %v3611_v7 = vsel %vm146_vm3, %v8070_v37, 0.0  ;;  %v3548_v4 = vsel %vm146_vm3, %v8092_v15, -inf }
0x1d02   :  { %6336 = vpow2.f32 %v3577_v40  ;;  %3612 = vadd.xlane.f32.xlu1 %v3611_v7 }
0x1d05   :  { %v3523_v31 = vpop.xlane.xlu1 %3522 }
0x1d06   :  { %v3557_v49 = vsub.f32 %v8023_v35, %v3523_v31 }
0x1d08   :  { %v8075_v5 = vpop.eup %6336  ;;  %v3579_v26 = vmul.f32 1.442695, %v3557_v49 }
0x1d09   :  { %v3614_v21 = vsel %vm146_vm3, %v8075_v5, 0.0 }
0x1d0a   :  { %6338 = vpow2.f32 %v3579_v26  ;;  %3615 = vadd.xlane.f32.xlu1 %v3614_v21 }
0x1d0d   :  { %v3526_v22 = vpop.xlane.xlu2 %3525 }
0x1d0e   :  { %v3558_v43 = vsub.f32 %v8028_v59, %v3526_v22 }
0x1d10   :  { %v8082_v46 = vpop.eup %6338  ;;  %v3581_v16 = vmul.f32 1.442695, %v3558_v43 }
0x1d11   :  { %v3617_v35 = vsel %vm146_vm3, %v8082_v46, 0.0 }
0x1d12   :  { %3540 = vmax.xlane.f32.xlu1 %v3539_v24  ;;  %3618 = vadd.xlane.f32.xlu2 %v3617_v35  ;;  %6340 = vpow2.f32 %v3581_v16 }
0x1d15   :  { %v3690_v57 = vpop.permute.xlu2 %3689  ;;  %v3529_v48 = vpop.xlane.xlu1 %3528 }
0x1d16   :  { %3723 = vmatpush.bf16.msra.mxu3 %v3690_v57  ;;  %v3559_v59 = vsub.f32 %v8033_v23, %v3529_v48 }
0x1d18   :  { %v3583_v53 = vmul.f32 1.442695, %v3559_v59  ;;  %v8112_v28 = vpop.eup %6340 }
0x1d19   :  { %v3620_v44 = vsel %vm146_vm3, %v8112_v28, 0.0 }
0x1d1a   :  { %3543 = vmax.xlane.f32.xlu1 %v3542_v18  ;;  %3549 = vmax.xlane.f32.xlu2 %v3548_v4 }
0x1d1d   :  { %v3532_v11 = vpop.xlane.xlu1 %3531 }
0x1d1e   :  { %v3560_v34 = vsub.f32 %v8038_v19, %v3532_v11 }
0x1d20   :  { %v3585_v2 = vmul.f32 1.442695, %v3560_v34  ;;  %3534 = vmax.xlane.f32.xlu0 %v3533_v10 }
0x1d22   :  { %6342 = vpow2.f32 %v3585_v2  ;;  %3546 = vmax.xlane.f32.xlu1 %v3545_v3 }
0x1d23   :  { %6344 = vpow2.f32 %v3583_v53 }
0x1d28   :  { %v8116_v23 = vpop.eup %6342  ;;  %3621 = vadd.xlane.f32.xlu0 %v3620_v44 }
0x1d29   :  { %v3626_v19 = vsel %vm146_vm3, %v8116_v23, 0.0  ;;  %v8120_v47 = vpop.eup %6344 }
0x1d2a   :  { %3627 = vadd.xlane.f32.xlu1 %v3626_v19  ;;  %v3623_v9 = vsel %vm146_vm3, %v8120_v47, 0.0 }
0x1d30   :  { %3624 = vadd.xlane.f32.xlu0 %v3623_v9 }
0x1d55   :  { %v3601_v40 = vpop.xlane.xlu0 %3600 }
0x1d5d   :  { %v3604_v7 = vpop.xlane.xlu1 %3603 }
0x1d5e   :  { %6346 = vrcp.f32 %v3604_v7 }
0x1d5f   :  { %6348 = vrcp.f32 %v3601_v40 }
0x1d64   :  { %v6347_v31 = vpop.eup %6346 }
0x1d65   :  { %v6349_v49 = vpop.eup %6348  ;;  %v3607_v63 = vpop.xlane.xlu1 %3606  ;;  %v3664_v26 = vmul.f32 %v6347_v31, %v8050_v38 }
0x1d66   :  { %v3663_v21 = vmul.f32 %v6349_v49, %v8044_v60 }
0x1d68   :  { %v3688_v22 = vpop.permute.xlu0 %3687  ;;  %v3679_v24 = vpack.c.bf16 %v3664_v26, %v3663_v21 }
0x1d69   :  { %3724 = vmatpush.bf16.msra.mxu3 %v3688_v22 }
0x1d6c   :  { %5701 = vmatmul.msk.bf16.vlgmr.msra.gmra.mxu3 %vm146_vm3, %v3679_v24 }
0x1d6d   :  { %v3610_v35 = vpop.xlane.xlu2 %3609  ;;  %v3538_v0 = vpop.xlane.xlu1 %3537 }
0x1d6e   :  { %6350 = vrcp.f32 %v3610_v35  ;;  %v3562_v57 = vsub.f32 %v8059_v42, %v3538_v0 }
0x1d6f   :  { %6352 = vrcp.f32 %v3607_v63 }
0x1d70   :  { %v3589_v48 = vmul.f32 1.442695, %v3562_v57 }
0x1d72   :  { %6354 = vpow2.f32 %v3589_v48 }
0x1d74   :  { %v6351_v43 = vpop.eup %6350 }
0x1d75   :  { %v6353_v18 = vpop.eup %6352  ;;  %v3613_v4 = vpop.xlane.xlu1 %3612  ;;  %v3666_v38 = vmul.f32 %v6351_v43, %v8063_v51 }
0x1d76   :  { %v3665_v60 = vmul.f32 %v6353_v18, %v8054_v55 }
0x1d78   :  { %v8129_v16 = vpop.eup %6354  ;;  %v3680_v59 = vpack.c.bf16 %v3666_v38, %v3665_v60 }
0x1d79   :  { %v3632_v11 = vsel %vm146_vm3, %v8129_v16, 0.0 }
0x1d7a   :  { %3633 = vadd.xlane.f32.xlu0 %v3632_v11 }
0x1d7c   :  { %5702 = vmatmul.msk.bf16.gmra.mxu3 %vm146_vm3, %v3680_v59 }
0x1d7d   :  { %v3616_v42 = vpop.xlane.xlu1 %3615 }
0x1d7e   :  { %6356 = vrcp.f32 %v3616_v42 }
0x1d7f   :  { %6358 = vrcp.f32 %v3613_v4 }
0x1d84   :  { %v6357_v34 = vpop.eup %6356 }
0x1d85   :  { %v6359_v10 = vpop.eup %6358  ;;  %v3619_v2 = vpop.xlane.xlu2 %3618  ;;  %v3668_v51 = vmul.f32 %v6357_v34, %v8075_v5 }
0x1d86   :  { %v3541_v3 = vpop.xlane.xlu1 %3540  ;;  %v3667_v55 = vmul.f32 %v6359_v10, %v8070_v37 }
0x1d87   :  { %v3563_v53 = vsub.f32 %v8080_v29, %v3541_v3 }
0x1d88   :  { %v3681_v19 = vpack.c.bf16 %v3668_v51, %v3667_v55 }
0x1d89   :  { %v3591_v44 = vmul.f32 1.442695, %v3563_v53  ;;  %v6001_v53 = vld [vmem:[%s8745_s10 + $0x30] sm:$0xff] }
0x1d8b   :  { %6360 = vpow2.f32 %v3591_v44 }
0x1d8c   :  { %5703 = vmatmul.msk.bf16.gmra.mxu3 %vm146_vm3, %v3681_v19 }
0x1d8d   :  { %v3550_v9 = vpop.xlane.xlu2 %3549 }
0x1d8e   :  { %v3544_v40 = vpop.xlane.xlu1 %3543  ;;  %v3566_v7 = vsub.f32 %v8092_v15, %v3550_v9 }
0x1d8f   :  { %v3564_v26 = vsub.f32 %v8089_v61, %v3544_v40 }
0x1d90   :  { %v3597_v49 = vmul.f32 1.442695, %v3566_v7 }
0x1d91   :  { %v8140_v31 = vpop.eup %6360  ;;  %v3593_v0 = vmul.f32 1.442695, %v3564_v26 }
0x1d92   :  { %v3635_v63 = vsel %vm146_vm3, %v8140_v31, 0.0  ;;  %6362 = vpow2.f32 %v3597_v49 }
0x1d93   :  { %3636 = vadd.xlane.f32.xlu1 %v3635_v63  ;;  %v3535_v5 = vpop.xlane.xlu0 %3534 }
0x1d94   :  { %v3561_v37 = vsub.f32 %v8101_v6, %v3535_v5 }
0x1d96   :  { %v3547_v29 = vpop.xlane.xlu1 %3546  ;;  %v3587_v21 = vmul.f32 1.442695, %v3561_v37 }
0x1d97   :  { %v3565_v22 = vsub.f32 %v8104_v30, %v3547_v29 }
0x1d98   :  { %v8147_v24 = vpop.eup %6362  ;;  %6364 = vpow2.f32 %v3587_v21 }
0x1d99   :  { %v3595_v15 = vmul.f32 1.442695, %v3565_v22  ;;  %6366 = vrcp.f32 %v3619_v2  ;;  %v3644_v35 = vsel %vm146_vm3, %v8147_v24, 0.0 }
0x1d9b   :  { %6368 = vpow2.f32 %v3595_v15  ;;  %3645 = vadd.xlane.f32.xlu1 %v3644_v35  ;;  %v3622_v57 = vpop.xlane.xlu0 %3621 }
0x1d9c   :  { %6370 = vrcp.f32 %v3622_v57 }
0x1d9d   :  { %6372 = vpow2.f32 %v3593_v0 }
0x1d9e   :  { %v6365_v6 = vpop.eup %6364  ;;  %v3628_v42 = vpop.xlane.xlu1 %3627 }
0x1d9f   :  { %v6367_v48 = vpop.eup %6366  ;;  %v3629_v61 = vsel %vm146_vm3, %v6365_v6, 0.0 }
0x1da0   :  { %3630 = vadd.xlane.f32.xlu2 %v3629_v61  ;;  %v3669_v4 = vmul.f32 %v6367_v48, %v8082_v46 }
0x1da1   :  { %v8152_v43 = vpop.eup %6368 }
0x1da2   :  { %v3641_v30 = vsel %vm146_vm3, %v8152_v43, 0.0  ;;  %v6371_v18 = vpop.eup %6370 }
0x1da3   :  { %3642 = vadd.xlane.f32.xlu0 %v3641_v30  ;;  %v3670_v38 = vmul.f32 %v6371_v18, %v8112_v28  ;;  %v6373_v60 = vpop.eup %6372  ;;  %v3625_v11 = vpop.xlane.xlu0 %3624  ;;  %v6002_v28 = vld [vmem:[%s8745_s10 + $0x38] sm:$0xff] }
0x1da4   :  { %v3638_v34 = vsel %vm146_vm3, %v6373_v60, 0.0  ;;  %6374 = vrcp.f32 %v3625_v11  ;;  %3837 = vmatpush.bf16.msrb.mxu0 %v6002_v28 }
0x1da5   :  { %v3682_v59 = vpack.c.bf16 %v3670_v38, %v3669_v4  ;;  %6376 = vrcp.f32 %v3628_v42 }
0x1da7   :  { %5704 = vmatmul.msk.bf16.gmra.mxu3 %vm146_vm3, %v3682_v59 }
0x1da8   :  { %3639 = vadd.xlane.f32.xlu2 %v3638_v34  ;;  %3838 = vmatpush.bf16.msrb.mxu0 %v6001_v53 }
0x1daa   :  { %v6375_v10 = vpop.eup %6374 }
0x1dab   :  { %v6377_v2 = vpop.eup %6376  ;;  %v3671_v3 = vmul.f32 %v6375_v10, %v8120_v47 }
0x1dac   :  { %v3672_v51 = vmul.f32 %v6377_v2, %v8116_v23 }
0x1dae   :  { %v3683_v46 = vpack.c.bf16 %v3672_v51, %v3671_v3 }
0x1db7   :  { %5705 = vmatmul.msk.bf16.gmra.mxu3 %vm146_vm3, %v3683_v46 }
0x1ded   :  { %v3634_v5 = vpop.xlane.xlu0 %3633 }
0x1dee   :  { %6378 = vrcp.f32 %v3634_v5 }
0x1def   :  { %v3726_v55 = vpop.f32.mrf.mxu3 }
0x1df0   :  { %v3766_v19 = vmul.f32 %v3726_v55, %v6736_v1 }
0x1df4   :  { %v6379_v21 = vpop.eup %6378 }
0x1df5   :  { %v3674_v57 = vmul.f32 %v6379_v21, %v8129_v16 }
0x1df7   :  { %v3728_v44 = vpop.f32.mrf.mxu3 }
0x1df8   :  { %v3767_v47 = vmul.f32 %v3728_v44, %v6736_v1 }
0x1dfa   :  { %v3782_v23 = vpack.c.bf16 %v3767_v47, %v3766_v19 }
0x1dfc   :  { %5721 = vmatmul.msk.bf16.vlgmr.msrb.gmra.mxu0 %vm146_vm3, %v3782_v23 }
0x1dff   :  { %v3731_v9 = vpop.f32.mrf.mxu3 }
0x1e00   :  { %v3768_v7 = vmul.f32 %v3731_v9, %v6736_v1 }
0x1e06   :  { %v3637_v18 = vpop.xlane.xlu1 %3636 }
0x1e07   :  { %v3733_v40 = vpop.f32.mrf.mxu3 }
0x1e08   :  { %v3769_v49 = vmul.f32 %v3733_v40, %v6736_v1 }
0x1e0a   :  { %v3783_v63 = vpack.c.bf16 %v3769_v49, %v3768_v7 }
0x1e0c   :  { %5722 = vmatmul.msk.bf16.gmra.mxu0 %vm146_vm3, %v3783_v63 }
0x1e0e   :  { %v3646_v2 = vpop.xlane.xlu1 %3645 }
0x1e0f   :  { %v3736_v37 = vpop.f32.mrf.mxu3 }
0x1e10   :  { %v3770_v22 = vmul.f32 %v3736_v37, %v6747_v8 }
0x1e13   :  { %v3631_v29 = vpop.xlane.xlu2 %3630 }
0x1e14   :  { %6380 = vrcp.f32 %v3631_v29 }
0x1e16   :  { %v3643_v34 = vpop.xlane.xlu0 %3642 }
0x1e17   :  { %v3738_v26 = vpop.f32.mrf.mxu3 }
0x1e18   :  { %v3771_v15 = vmul.f32 %v3738_v26, %v6747_v8 }
0x1e1a   :  { %v6381_v35 = vpop.eup %6380  ;;  %v3784_v0 = vpack.c.bf16 %v3771_v15, %v3770_v22 }
0x1e1b   :  { %v3673_v48 = vmul.f32 %v6381_v35, %v6365_v6  ;;  %v3640_v61 = vpop.xlane.xlu2 %3639 }
0x1e1c   :  { %5723 = vmatmul.msk.bf16.gmra.mxu0 %vm146_vm3, %v3784_v0  ;;  %6382 = vrcp.f32 %v3640_v61 }
0x1e1d   :  { %v3684_v30 = vpack.c.bf16 %v3674_v57, %v3673_v48  ;;  %6384 = vrcp.f32 %v3637_v18 }
0x1e1e   :  { %6386 = vrcp.f32 %v3643_v34 }
0x1e1f   :  { %5706 = vmatmul.msk.bf16.gmra.mxu3 %vm146_vm3, %v3684_v30  ;;  %6388 = vrcp.f32 %v3646_v2 }
0x1e22   :  { %v6383_v4 = vpop.eup %6382 }
0x1e23   :  { %v6385_v38 = vpop.eup %6384  ;;  %v3676_v11 = vmul.f32 %v6383_v4, %v6373_v60 }
0x1e24   :  { %v3675_v42 = vmul.f32 %v6385_v38, %v8140_v31  ;;  %v6387_v46 = vpop.eup %6386 }
0x1e25   :  { %v6389_v60 = vpop.eup %6388  ;;  %v3677_v28 = vmul.f32 %v6387_v46, %v8152_v43 }
0x1e26   :  { %v3685_v10 = vpack.c.bf16 %v3676_v11, %v3675_v42  ;;  %v3678_v53 = vmul.f32 %v6389_v60, %v8147_v24 }
0x1e28   :  { %v3686_v55 = vpack.c.bf16 %v3678_v53, %v3677_v28 }
0x1e2a   :  { %v3741_v59 = vpop.f32.mrf.mxu3 }
0x1e2b   :  { %v3772_v6 = vmul.f32 %v3741_v59, %v6747_v8 }
0x1e2f   :  { %5707 = vmatmul.msk.bf16.gmra.mxu3 %vm146_vm3, %v3685_v10 }
0x1e32   :  { %v3743_v16 = vpop.f32.mrf.mxu3 }
0x1e33   :  { %v3773_v3 = vmul.f32 %v3743_v16, %v6747_v8 }
0x1e35   :  { %v3785_v51 = vpack.c.bf16 %v3773_v3, %v3772_v6  ;;  %v3896_v3 = vperm.slane %v7946_v20, 1 }
0x1e37   :  { %5724 = vmatmul.msk.bf16.gmra.mxu0 %vm146_vm3, %v3785_v51 }
0x1e3a   :  { %v3746_v31 = vpop.f32.mrf.mxu3 }
0x1e3b   :  { %v3774_v19 = vmul.f32 %v3746_v31, %v6757_v17 }
0x1e3f   :  { %5708 = vmatmul.msk.bf16.gmra.mxu3 %vm146_vm3, %v3686_v55 }
0x1e42   :  { %v3748_v44 = vpop.f32.mrf.mxu3 }
0x1e43   :  { %v3775_v47 = vmul.f32 %v3748_v44, %v6757_v17 }
0x1e45   :  { %v3786_v23 = vpack.c.bf16 %v3775_v47, %v3774_v19 }
0x1e47   :  { %5725 = vmatmul.msk.bf16.gmra.mxu0 %vm146_vm3, %v3786_v23 }
0x1e79   :  { %v3840_v35 = vpop.f32.mrf.mxu0 }
0x1e81   :  { %v3842_v57 = vpop.f32.mrf.mxu0 }
0x1e89   :  { %v3845_v48 = vpop.f32.mrf.mxu0 }
0x1e91   :  { %v3847_v61 = vpop.f32.mrf.mxu0 }
0x1e99   :  { %v3850_v30 = vpop.f32.mrf.mxu0 }
0x1e9a   :  { %v3880_v10 = vadd.f32 %v3850_v30, %v3840_v35 }
0x1ea1   :  { %v3852_v18 = vpop.f32.mrf.mxu0 }
0x1ea2   :  { %v3751_v9 = vpop.f32.mrf.mxu3  ;;  %v3881_v46 = vadd.f32 %v3852_v18, %v3842_v57 }
0x1ea3   :  { %v3776_v7 = vmul.f32 %v3751_v9, %v6757_v17 }
0x1eaa   :  { %v3753_v40 = vpop.f32.mrf.mxu3 }
0x1eab   :  { %v3777_v43 = vmul.f32 %v3753_v40, %v6757_v17 }
0x1ead   :  { %v3787_v49 = vpack.c.bf16 %v3777_v43, %v3776_v7 }
0x1eaf   :  { %5726 = vmatmul.msk.bf16.gmra.mxu0 %vm146_vm3, %v3787_v49 }
0x1eb2   :  { %v3756_v24 = vpop.f32.mrf.mxu3 }
0x1eb3   :  { %v3778_v5 = vmul.f32 %v3756_v24, %v6766_v25 }
0x1eb4   :  { %v3855_v4 = vpop.f32.mrf.mxu0 }
0x1eb5   :  { %v3882_v19 = vadd.f32 %v3855_v4, %v3845_v48 }
0x1eba   :  { %v3758_v63 = vpop.f32.mrf.mxu3 }
0x1ebb   :  { %v3779_v37 = vmul.f32 %v3758_v63, %v6766_v25 }
0x1ebc   :  { %v3857_v38 = vpop.f32.mrf.mxu0 }
0x1ebd   :  { %v3788_v29 = vpack.c.bf16 %v3779_v37, %v3778_v5  ;;  %v3883_v7 = vadd.f32 %v3857_v38, %v3847_v61 }
0x1ebf   :  { %5727 = vmatmul.msk.bf16.gmra.mxu0 %vm146_vm3, %v3788_v29 }
0x1ec2   :  { %v3761_v26 = vpop.f32.mrf.mxu3 }
0x1ec3   :  { %v3780_v22 = vmul.f32 %v3761_v26, %v6766_v25 }
0x1ec4   :  { %v3860_v11 = vpop.f32.mrf.mxu0 }
0x1ec5   :  { %v3884_v2 = vadd.f32 %v3880_v10, %v3860_v11 }
0x1eca   :  { %v3763_v21 = vpop.f32.mrf.mxu3 }
0x1ecb   :  { %v3781_v15 = vmul.f32 %v3763_v21, %v6766_v25 }
0x1ecc   :  { %v3862_v59 = vpop.f32.mrf.mxu0 }
0x1ecd   :  { %v3789_v0 = vpack.c.bf16 %v3781_v15, %v3780_v22  ;;  %v3885_v28 = vadd.f32 %v3881_v46, %v3862_v59  ;;  %v6003_v46 = vld [vmem:[%s8746_s11 + $0x30] sm:$0xff] }
0x1ecf   :  { %5728 = vmatmul.msk.bf16.gmra.mxu0 %vm146_vm3, %v3789_v0 }
0x1f2c   :  { %v3865_v42 = vpop.f32.mrf.mxu0 }
0x1f2d   :  { %v3886_v23 = vadd.f32 %v3882_v19, %v3865_v42 }
0x1f34   :  { %v3867_v34 = vpop.f32.mrf.mxu0 }
0x1f35   :  { %v3887_v49 = vadd.f32 %v3883_v7, %v3867_v34 }
0x1f3c   :  { %v3870_v16 = vpop.f32.mrf.mxu0 }
0x1f3d   :  { %v3888_v6 = vadd.f32 %v3884_v2, %v3870_v16  ;;  %v6004_v2 = vld [vmem:[%s8746_s11 + $0x38] sm:$0xff] }
0x1f3e   :  { %4035 = vmatpush.bf16.msrb.mxu1 %v6004_v2 }
0x1f3f   :  { %v3892_v51 = vadd.f32 %v3888_v6, %v7904_v41 }
0x1f41   :  { %v8202_v60 = vadd.f32 %v3896_v3, %v3892_v51 }
0x1f42   :  { %4036 = vmatpush.bf16.msrb.mxu1 %v6003_v46 }
0x1f43   :  { %v3901_v31 = vsel %vm146_vm3, %v8202_v60, 0.0 }
0x1f44   :  { %3902 = vadd.xlane.f32.xlu2 %v3901_v31  ;;  %v3872_v53 = vpop.f32.mrf.mxu0 }
0x1f45   :  { %v3889_v55 = vadd.f32 %v3885_v28, %v3872_v53 }
0x1f47   :  { %v3893_v44 = vadd.f32 %v3889_v55, %v7908_v56 }
0x1f49   :  { %v8207_v47 = vadd.f32 %v3896_v3, %v3893_v44 }
0x1f4b   :  { %v3904_v20 = vsel %vm146_vm3, %v8207_v47, 0.0 }
0x1f4c   :  { %3905 = vadd.xlane.f32.xlu0 %v3904_v20  ;;  %v3875_v41 = vpop.f32.mrf.mxu0 }
0x1f4d   :  { %v3890_v9 = vadd.f32 %v3886_v23, %v3875_v41 }
0x1f4f   :  { %v3894_v40 = vadd.f32 %v3890_v9, %v7912_v12 }
0x1f51   :  { %v8212_v43 = vadd.f32 %v3896_v3, %v3894_v40 }
0x1f53   :  { %v3907_v24 = vsel %vm146_vm3, %v8212_v43, 0.0 }
0x1f54   :  { %3908 = vadd.xlane.f32.xlu1 %v3907_v24  ;;  %v3877_v56 = vpop.f32.mrf.mxu0 }
0x1f55   :  { %v3891_v63 = vadd.f32 %v3887_v49, %v3877_v56 }
0x1f57   :  { %v3895_v5 = vadd.f32 %v3891_v63, %v7916_v36 }
0x1f59   :  { %v8217_v37 = vadd.f32 %v3896_v3, %v3895_v5 }
0x1f5b   :  { %v3910_v29 = vsel %vm146_vm3, %v8217_v37, 0.0 }
0x1f5c   :  { %3911 = vadd.xlane.f32.xlu2 %v3910_v29 }
0x1fb7   :  { %v3903_v26 = vpop.xlane.xlu2 %3902 }
0x1fb8   :  { %v3913_v12 = vmul.f32 %v3903_v26, %v6674_v13 }
0x1fba   :  { %v8223_v21 = vsub.f32 %v8202_v60, %v3913_v12 }
0x1fbc   :  { %v3921_v22 = vmul.f32 %v8223_v21, %v8223_v21 }
0x1fbe   :  { %v3925_v15 = vsel %vm146_vm3, %v3921_v22, 0.0 }
0x1fbf   :  { %3926 = vadd.xlane.f32.xlu0 %v3925_v15  ;;  %v3906_v35 = vpop.xlane.xlu0 %3905 }
0x1fc0   :  { %v3914_v36 = vmul.f32 %v3906_v35, %v6674_v13 }
0x1fc2   :  { %v8230_v0 = vsub.f32 %v8207_v47, %v3914_v36 }
0x1fc4   :  { %v3922_v57 = vmul.f32 %v8230_v0, %v8230_v0 }
0x1fc6   :  { %v3928_v48 = vsel %vm146_vm3, %v3922_v57, 0.0 }
0x1fc7   :  { %3929 = vadd.xlane.f32.xlu1 %v3928_v48  ;;  %v3909_v61 = vpop.xlane.xlu1 %3908 }
0x1fc8   :  { %v3915_v30 = vmul.f32 %v3909_v61, %v6674_v13 }
0x1fca   :  { %v8237_v18 = vsub.f32 %v8212_v43, %v3915_v30 }
0x1fcc   :  { %v3923_v4 = vmul.f32 %v8237_v18, %v8237_v18 }
0x1fce   :  { %v3931_v38 = vsel %vm146_vm3, %v3923_v4, 0.0 }
0x1fcf   :  { %3932 = vadd.xlane.f32.xlu2 %v3931_v38  ;;  %v3912_v11 = vpop.xlane.xlu2 %3911 }
0x1fd0   :  { %v3916_v59 = vmul.f32 %v3912_v11, %v6674_v13 }
0x1fd2   :  { %v8244_v42 = vsub.f32 %v8217_v37, %v3916_v59 }
0x1fd4   :  { %v3924_v34 = vmul.f32 %v8244_v42, %v8244_v42 }
0x1fd6   :  { %v3934_v10 = vsel %vm146_vm3, %v3924_v34, 0.0 }
0x1fd7   :  { %3935 = vadd.xlane.f32.xlu0 %v3934_v10 }
0x1fe0   :  { %3989 = vrot.lane.b32.xlu1 %v7950_v27, %s6507_s5 }
0x1fe7   :  { %3996 = vrot.lane.b32.xlu2 %v7950_v27, %s6512_s30 }
0x1feb   :  { %4152 = vrot.lane.b32.xlu0 %v3896_v3, %s6505_s23 }
0x2032   :  { %v3927_v16 = vpop.xlane.xlu0 %3926 }
0x2033   :  { %v3937_v6 = vmul.f32 %v3927_v16, %v6674_v13 }
0x2035   :  { %v3941_v51 = vadd.f32 1e-05, %v3937_v6 }
0x2037   :  { %6390 = vrsqrt.f32 %v3941_v51  ;;  %vm3951_vm5 = vweird.f32 %v3941_v51 }
0x203a   :  { %v3930_v28 = vpop.xlane.xlu1 %3929 }
0x203b   :  { %v3938_v27 = vmul.f32 %v3930_v28, %v6674_v13 }
0x203d   :  { %v6391_v31 = vpop.eup %6390  ;;  %v3942_v3 = vadd.f32 1e-05, %v3938_v27 }
0x203e   :  { %v3946_v53 = vmul.f32 %v6391_v31, %v3941_v51  ;;  %vm3952_vm4 = vweird.f32 %v6391_v31 }
0x203f   :  { %6392 = vrsqrt.f32 %v3942_v3  ;;  %vm3953_vm7 = vmor %vm3951_vm5, %vm3952_vm4  ;;  %vm3961_vm8 = vweird.f32 %v3942_v3 }
0x2040   :  { %v3947_v55 = vmul.f32 %v6391_v31, %v3946_v53 }
0x2042   :  { %v3948_v44 = vmul.f32 0.5, %v3947_v55  ;;  %v3933_v19 = vpop.xlane.xlu2 %3932 }
0x2043   :  { %v3939_v23 = vmul.f32 %v3933_v19, %v6674_v13 }
0x2044   :  { %v3949_v9 = vsub.f32 1.5, %v3948_v44 }
0x2045   :  { %v6393_v20 = vpop.eup %6392  ;;  %v3943_v41 = vadd.f32 1e-05, %v3939_v23 }
0x2046   :  { %v3956_v40 = vmul.f32 %v6393_v20, %v3942_v3  ;;  %v3950_v49 = vmul.f32 %v6391_v31, %v3949_v9  ;;  %vm3962_vm6 = vweird.f32 %v6393_v20  ;;  %v6009_v9 = vld [vmem:[%s8747_s12 + $0xe0] sm:$0xff] }
0x2047   :  { %6394 = vrsqrt.f32 %v3943_v41  ;;  %vm3963_vm9 = vmor %vm3961_vm8, %vm3962_vm6  ;;  %vm3971_vm11 = vweird.f32 %v3943_v41 }
0x2048   :  { %v3957_v7 = vmul.f32 %v6393_v20, %v3956_v40  ;;  %v3954_v15 = vsel %vm3953_vm7, %v6391_v31, %v3950_v49  ;;  %v6008_v40 = vld [vmem:[%s8747_s12 + $0xd8] sm:$0xff]  ;;  %v6006_v49 = vld [vmem:[%s8747_s12 + $0xc8] sm:$0xff] }
0x2049   :  { %v3985_v57 = vmul.f32 %v3954_v15, %v8223_v21 }
0x204a   :  { %v3958_v24 = vmul.f32 0.5, %v3957_v7  ;;  %v3936_v56 = vpop.xlane.xlu0 %3935  ;;  %v3997_v4 = vpop.permute.xlu2 %3996  ;;  %v6007_v7 = vld [vmem:[%s8747_s12 + $0xd0] sm:$0xff] }
0x204b   :  { %v3940_v63 = vmul.f32 %v3936_v56, %v6674_v13 }
0x204c   :  { %v3959_v5 = vsub.f32 1.5, %v3958_v24  ;;  %v6501_v24 = vld [vmem:[%s8743_s13 + $0xc] sm:$0xf] }
0x204d   :  { %v6395_v29 = vpop.eup %6394  ;;  %v3944_v26 = vadd.f32 1e-05, %v3940_v63  ;;  %v4010_v56 = vperm.slane %v6501_v24, 2  ;;  %v6005_v63 = vld [vmem:[%s8747_s12 + $0xc0] sm:$0xff] }
0x204e   :  { %v3960_v12 = vmul.f32 %v6393_v20, %v3959_v5  ;;  %v3966_v22 = vmul.f32 %v6395_v29, %v3943_v41  ;;  %vm3972_vm10 = vweird.f32 %v6395_v29  ;;  %v6012_v41 = vld [vmem:[%s8747_s12 + $0xf8] sm:$0xff] }
0x204f   :  { %6396 = vrsqrt.f32 %v3944_v26  ;;  %vm3973_vm12 = vmor %vm3971_vm11, %vm3972_vm10  ;;  %vm3981_vm14 = vweird.f32 %v3944_v26  ;;  %4155 = vmatpush.bf16.msra.mxu1 %v6012_v41 }
0x2050   :  { %v3967_v35 = vmul.f32 %v6395_v29, %v3966_v22  ;;  %v3964_v36 = vsel %vm3963_vm9, %v6393_v20, %v3960_v12 }
0x2051   :  { %v3986_v48 = vmul.f32 %v3964_v36, %v8230_v0 }
0x2052   :  { %v3968_v61 = vmul.f32 0.5, %v3967_v35  ;;  %v3990_v30 = vpop.permute.xlu1 %3989 }
0x2053   :  { %v3992_v38 = vmul.f32 %v3990_v30, %v3985_v57  ;;  %v3993_v11 = vmul.f32 %v3990_v30, %v3986_v48 }
0x2054   :  { %v3969_v59 = vsub.f32 1.5, %v3968_v61 }
0x2055   :  { %v6397_v34 = vpop.eup %6396  ;;  %v3999_v10 = vadd.f32 %v3997_v4, %v3992_v38  ;;  %v4000_v2 = vadd.f32 %v3997_v4, %v3993_v11 }
0x2056   :  { %v3970_v16 = vmul.f32 %v6395_v29, %v3969_v59  ;;  %v3976_v6 = vmul.f32 %v6397_v34, %v3944_v26  ;;  %vm3982_vm13 = vweird.f32 %v6397_v34 }
0x2057   :  { %v4003_v51 = vpack.c.bf16 %v4000_v2, %v3999_v10  ;;  %vm3983_vm15 = vmor %vm3981_vm14, %vm3982_vm13 }
0x2058   :  { %v3977_v46 = vmul.f32 %v6397_v34, %v3976_v6  ;;  %v3974_v0 = vsel %vm3973_vm12, %v6395_v29, %v3970_v16 }
0x2059   :  { %5741 = vmatmul.msk.bf16.vlgmr.msrb.gmra.mxu1 %vm146_vm3, %v4003_v51  ;;  %v3987_v27 = vmul.f32 %v3974_v0, %v8237_v18  ;;  %v6011_v18 = vld [vmem:[%s8747_s12 + $0xf0] sm:$0xff] }
0x205a   :  { %v3978_v21 = vmul.f32 0.5, %v3977_v46  ;;  %4156 = vmatpush.bf16.msra.mxu1 %v6011_v18 }
0x205b   :  { %v3994_v55 = vmul.f32 %v3990_v30, %v3987_v27 }
0x205c   :  { %v3979_v28 = vsub.f32 1.5, %v3978_v21 }
0x205d   :  { %v4001_v19 = vadd.f32 %v3997_v4, %v3994_v55 }
0x205e   :  { %v3980_v31 = vmul.f32 %v6397_v34, %v3979_v28 }
0x2060   :  { %v3984_v3 = vsel %vm3983_vm15, %v6397_v34, %v3980_v31 }
0x2061   :  { %v3988_v53 = vmul.f32 %v3984_v3, %v8244_v42  ;;  %v6010_v42 = vld [vmem:[%s8747_s12 + $0xe8] sm:$0xff] }
0x2062   :  { %4157 = vmatpush.bf16.msra.mxu1 %v6010_v42 }
0x2063   :  { %v3995_v44 = vmul.f32 %v3990_v30, %v3988_v53 }
0x2065   :  { %v4002_v23 = vadd.f32 %v3997_v4, %v3995_v44 }
0x2066   :  { %4158 = vmatpush.bf16.msra.mxu1 %v6009_v9 }
0x2067   :  { %v4004_v20 = vpack.c.bf16 %v4002_v23, %v4001_v19 }
0x2069   :  { %5742 = vmatmul.msk.bf16.gmra.mxu1 %vm146_vm3, %v4004_v20 }
0x206a   :  { %4159 = vmatpush.bf16.msra.mxu1 %v6008_v40 }
0x206e   :  { %4160 = vmatpush.bf16.msra.mxu1 %v6007_v7 }
0x2072   :  { %4161 = vmatpush.bf16.msra.mxu1 %v6006_v49 }
0x2076   :  { %4162 = vmatpush.bf16.msra.mxu1 %v6005_v63 }
0x20d6   :  { %v4038_v5 = vpop.f32.mrf.mxu1 }
0x20d7   :  { %v4039_v29 = vadd.f32 %v4038_v5, %v4010_v56 }
0x20d9   :  { %v4052_v26 = vmul.f32 0.044715, %v4039_v29  ;;  %v4048_v27 = vmul.f32 0.5, %v4039_v29 }
0x20db   :  { %v4056_v12 = vmul.f32 %v4052_v26, %v4039_v29  ;;  %v6015_v26 = vld [vmem:[%s8748_s14 + $0x30] sm:$0xff] }
0x20dd   :  { %v4060_v22 = vmul.f32 %v4056_v12, %v4039_v29  ;;  %v6014_v12 = vld [vmem:[%s8748_s14 + $0x28] sm:$0xff] }
0x20de   :  { %v4040_v15 = vpop.f32.mrf.mxu1 }
0x20df   :  { %v4064_v35 = vadd.f32 %v4060_v22, %v4039_v29  ;;  %v4041_v36 = vadd.f32 %v4040_v15, %v4010_v56  ;;  %v6016_v29 = vld [vmem:[%s8748_s14 + $0x38] sm:$0xff]  ;;  %v6013_v15 = vld [vmem:[%s8748_s14 + $0x20] sm:$0xff] }
0x20e0   :  { %4215 = vmatpush.bf16.msrb.mxu1 %v6016_v29 }
0x20e1   :  { %v4053_v57 = vmul.f32 0.044715, %v4041_v36  ;;  %v4068_v48 = vmul.f32 0.7978846, %v4064_v35  ;;  %v4049_v31 = vmul.f32 0.5, %v4041_v36  ;;  %v4153_v35 = vpop.permute.xlu0 %4152 }
0x20e3   :  { %v4057_v61 = vmul.f32 %v4053_v57, %v4041_v36  ;;  %6398 = vtanh.f32 %v4068_v48 }
0x20e4   :  { %4216 = vmatpush.bf16.msrb.mxu1 %v6015_v26 }
0x20e5   :  { %v4061_v30 = vmul.f32 %v4057_v61, %v4041_v36 }
0x20e6   :  { %v4043_v4 = vpop.f32.mrf.mxu1 }
0x20e7   :  { %v4065_v38 = vadd.f32 %v4061_v30, %v4041_v36  ;;  %v4044_v11 = vadd.f32 %v4043_v4, %v4010_v56 }
0x20e9   :  { %v4069_v59 = vmul.f32 0.7978846, %v4065_v38  ;;  %v4054_v34 = vmul.f32 0.044715, %v4044_v11  ;;  %v6399_v2 = vpop.eup %6398  ;;  %v4050_v7 = vmul.f32 0.5, %v4044_v11 }
0x20ea   :  { %v4076_v21 = vadd.f32 1.0, %v6399_v2 }
0x20eb   :  { %6400 = vtanh.f32 %v4069_v59  ;;  %v4058_v10 = vmul.f32 %v4054_v34, %v4044_v11 }
0x20ec   :  { %v4080_v44 = vmul.f32 %v4076_v21, %v4048_v27 }
0x20ed   :  { %v4062_v16 = vmul.f32 %v4058_v10, %v4044_v11 }
0x20ee   :  { %v4045_v6 = vpop.f32.mrf.mxu1 }
0x20ef   :  { %v4046_v51 = vadd.f32 %v4045_v6, %v4010_v56  ;;  %v4066_v46 = vadd.f32 %v4062_v16, %v4044_v11  ;;  %v4187_v6 = vpack.c.bf16 %v7088_v54, %v7083_v39 }
0x20f1   :  { %v6401_v0 = vpop.eup %6400  ;;  %v4055_v28 = vmul.f32 0.044715, %v4046_v51  ;;  %v4070_v55 = vmul.f32 0.7978846, %v4066_v46  ;;  %v4051_v49 = vmul.f32 0.5, %v4046_v51 }
0x20f2   :  { %v4077_v3 = vadd.f32 1.0, %v6401_v0 }
0x20f3   :  { %v4059_v53 = vmul.f32 %v4055_v28, %v4046_v51  ;;  %6402 = vtanh.f32 %v4070_v55 }
0x20f4   :  { %v4081_v19 = vmul.f32 %v4077_v3, %v4049_v31 }
0x20f5   :  { %v4063_v23 = vmul.f32 %v4059_v53, %v4046_v51 }
0x20f6   :  { %v4084_v20 = vpack.c.bf16 %v4081_v19, %v4080_v44 }
0x20f7   :  { %v4067_v41 = vadd.f32 %v4063_v23, %v4046_v51 }
0x20f8   :  { %4163 = vmatmul.bf16.vlgmr.msra.gmra.mxu1 %v4084_v20 }
0x20f9   :  { %v4071_v18 = vmul.f32 0.7978846, %v4067_v41  ;;  %v6403_v42 = vpop.eup %6402  ;;  %4252 = vmatpush.bf16.msra.mxu1 %v6014_v12 }
0x20fa   :  { %v4078_v9 = vadd.f32 1.0, %v6403_v42 }
0x20fb   :  { %6404 = vtanh.f32 %v4071_v18 }
0x20fc   :  { %v4082_v56 = vmul.f32 %v4078_v9, %v4050_v7 }
0x20fd   :  { %4253 = vmatpush.bf16.msra.mxu1 %v6013_v15 }
0x2101   :  { %v6405_v40 = vpop.eup %6404 }
0x2102   :  { %v4079_v24 = vadd.f32 1.0, %v6405_v40 }
0x2104   :  { %v4083_v63 = vmul.f32 %v4079_v24, %v4051_v49 }
0x2106   :  { %v4085_v5 = vpack.c.bf16 %v4083_v63, %v4082_v56 }
0x2108   :  { %4168 = vmatmul.bf16.gmra.mxu1 %v4085_v5 }
0x2175   :  { %v4164_v22 = vpop.f32.mrf.mxu1 }
0x2176   :  { %v4165_v36 = vadd.f32 %v4164_v22, %v4153_v35 }
0x2178   :  { %v4174_v61 = vadd.f32 %v4165_v36, %v8202_v60  ;;  %v4188_v60 = vpack.c.bf16 %v7098_v32, %v7093_v50 }
0x217d   :  { %v4166_v57 = vpop.f32.mrf.mxu1 }
0x217e   :  { %v4167_v48 = vadd.f32 %v4166_v57, %v4153_v35 }
0x2180   :  { %v4175_v30 = vadd.f32 %v4167_v48, %v8207_v47 }
0x2182   :  { %v4189_v4 = vpack.c.bf16 %v4175_v30, %v4174_v61  ;;  %v8367_v61 = vld [vmem:[%s8743_s13 + $0x10] sm:$0xf] }
0x2183   :  { %v8370_v30 = vperm.slane %v8367_v61, 0 }
0x2184   :  { %5807 = vmatmul.msk.bf16.vlgmr.msrb.gmra.mxu1 %vm146_vm3, %v4189_v4  ;;  %v6018_v4 = vld [vmem:[%s8744_s9 + $0x48] sm:$0xff] }
0x2185   :  { %v4169_v38 = vpop.f32.mrf.mxu1  ;;  %4408 = vmatpush.bf16.msrb.mxu2 %v6018_v4 }
0x2186   :  { %v4170_v11 = vadd.f32 %v4169_v38, %v4153_v35 }
0x2188   :  { %v4176_v10 = vadd.f32 %v4170_v11, %v8212_v43  ;;  %v6045_v43 = vld [vmem:[%s8749_s15 + $0x1] ss:$0 sm:$0xff] }
0x218d   :  { %v4171_v59 = vpop.f32.mrf.mxu1 }
0x218e   :  { %v4172_v34 = vadd.f32 %v4171_v59, %v4153_v35 }
0x2190   :  { %v4177_v2 = vadd.f32 %v4172_v34, %v8217_v37  ;;  %v6017_v34 = vld [vmem:[%s8744_s9 + $0x40] sm:$0xff] }
0x2191   :  { %4409 = vmatpush.bf16.msrb.mxu2 %v6017_v34 }
0x2192   :  { %v4190_v16 = vpack.c.bf16 %v4177_v2, %v4176_v10 }
0x2194   :  { %5808 = vmatmul.msk.bf16.gmra.mxu1 %vm146_vm3, %v4190_v16 }
0x21a4   :  { %5817 = vmatmul.msk.bf16.vlgmr.msra.gmra.mxu1 %vm146_vm3, %v4187_v6 }
0x21b4   :  { %5818 = vmatmul.msk.bf16.gmra.mxu1 %vm146_vm3, %v4188_v60 }
0x2201   :  { %v4218_v47 = vpop.f32.mrf.mxu1 }
0x2209   :  { %v4220_v51 = vpop.f32.mrf.mxu1 }
0x2211   :  { %v4223_v46 = vpop.f32.mrf.mxu1 }
0x2219   :  { %v4225_v21 = vpop.f32.mrf.mxu1 }
0x2221   :  { %v4255_v37 = vpop.f32.mrf.mxu1 }
0x2222   :  { %v4256_v0 = vadd.f32 %v4255_v37, %v4218_v47 }
0x2224   :  { %v8324_v28 = vadd.f32 %v6045_v43, %v4256_v0 }
0x2226   :  { %v4276_v39 = vsel %vm146_vm3, %v8324_v28, 0.0 }
0x2227   :  { %4277 = vadd.xlane.f32.xlu0 %v4276_v39 }
0x2229   :  { %v4257_v54 = vpop.f32.mrf.mxu1 }
0x222a   :  { %v4258_v50 = vadd.f32 %v4257_v54, %v4220_v51 }
0x222c   :  { %v8328_v32 = vadd.f32 %v6045_v43, %v4258_v50 }
0x222e   :  { %v4279_v27 = vsel %vm146_vm3, %v8328_v32, 0.0 }
0x222f   :  { %4280 = vadd.xlane.f32.xlu1 %v4279_v27 }
0x2231   :  { %v4260_v31 = vpop.f32.mrf.mxu1 }
0x2232   :  { %v4261_v3 = vadd.f32 %v4260_v31, %v4223_v46 }
0x2234   :  { %v8332_v53 = vadd.f32 %v6045_v43, %v4261_v3 }
0x2236   :  { %v4282_v55 = vsel %vm146_vm3, %v8332_v53, 0.0 }
0x2237   :  { %4283 = vadd.xlane.f32.xlu2 %v4282_v55 }
0x2239   :  { %v4262_v44 = vpop.f32.mrf.mxu1 }
0x223a   :  { %v4263_v19 = vadd.f32 %v4262_v44, %v4225_v21 }
0x223c   :  { %v8336_v23 = vadd.f32 %v6045_v43, %v4263_v19 }
0x223e   :  { %v4285_v20 = vsel %vm146_vm3, %v8336_v23, 0.0 }
0x223f   :  { %4286 = vadd.xlane.f32.xlu0 %v4285_v20 }
0x229a   :  { %v4278_v41 = vpop.xlane.xlu0 %4277 }
0x229b   :  { %v4288_v18 = vmul.f32 %v4278_v41, %v6674_v13 }
0x229d   :  { %v4292_v42 = vsub.f32 %v8324_v28, %v4288_v18 }
0x229f   :  { %v4296_v9 = vmul.f32 %v4292_v42, %v4292_v42 }
0x22a1   :  { %v4300_v40 = vsel %vm146_vm3, %v4296_v9, 0.0 }
0x22a2   :  { %v4281_v7 = vpop.xlane.xlu1 %4280  ;;  %4301 = vadd.xlane.f32.xlu1 %v4300_v40 }
0x22a3   :  { %v4289_v49 = vmul.f32 %v4281_v7, %v6674_v13 }
0x22a5   :  { %v8345_v24 = vsub.f32 %v8328_v32, %v4289_v49 }
0x22a7   :  { %v4297_v56 = vmul.f32 %v8345_v24, %v8345_v24 }
0x22a9   :  { %v4303_v63 = vsel %vm146_vm3, %v4297_v56, 0.0 }
0x22aa   :  { %v4284_v5 = vpop.xlane.xlu2 %4283  ;;  %4304 = vadd.xlane.f32.xlu2 %v4303_v63 }
0x22ab   :  { %v4290_v29 = vmul.f32 %v4284_v5, %v6674_v13 }
0x22ad   :  { %v8352_v26 = vsub.f32 %v8332_v53, %v4290_v29 }
0x22af   :  { %v4298_v12 = vmul.f32 %v8352_v26, %v8352_v26 }
0x22b1   :  { %v4306_v22 = vsel %vm146_vm3, %v4298_v12, 0.0 }
0x22b2   :  { %4307 = vadd.xlane.f32.xlu0 %v4306_v22  ;;  %v4287_v15 = vpop.xlane.xlu0 %4286 }
0x22b3   :  { %v4291_v35 = vmul.f32 %v4287_v15, %v6674_v13 }
0x22b5   :  { %v8359_v36 = vsub.f32 %v8336_v23, %v4291_v35 }
0x22b7   :  { %v4299_v57 = vmul.f32 %v8359_v36, %v8359_v36 }
0x22b9   :  { %v4309_v48 = vsel %vm146_vm3, %v4299_v57, 0.0 }
0x22ba   :  { %4310 = vadd.xlane.f32.xlu1 %v4309_v48 }
0x22c2   :  { %4370 = vrot.lane.b32.xlu2 %v8370_v30, %s6505_s23 }
0x2315   :  { %v4302_v38 = vpop.xlane.xlu1 %4301 }
0x2316   :  { %v4312_v11 = vmul.f32 %v4302_v38, %v6674_v13 }
0x2318   :  { %v4316_v59 = vadd.f32 1e-05, %v4312_v11 }
0x231a   :  { %6406 = vrsqrt.f32 %v4316_v59  ;;  %vm4326_vm1 = vweird.f32 %v4316_v59 }
0x231d   :  { %v4305_v10 = vpop.xlane.xlu2 %4304 }
0x231e   :  { %v4313_v2 = vmul.f32 %v4305_v10, %v6674_v13 }
0x2320   :  { %v6407_v16 = vpop.eup %6406  ;;  %v4317_v6 = vadd.f32 1e-05, %v4313_v2 }
0x2321   :  { %v4321_v60 = vmul.f32 %v6407_v16, %v4316_v59  ;;  %vm4327_vm0 = vweird.f32 %v6407_v16 }
0x2322   :  { %6408 = vrsqrt.f32 %v4317_v6  ;;  %vm4328_vm2 = vmor %vm4326_vm1, %vm4327_vm0  ;;  %vm4336_vm5 = vweird.f32 %v4317_v6 }
0x2323   :  { %v4322_v47 = vmul.f32 %v6407_v16, %v4321_v60 }
0x2325   :  { %v4323_v51 = vmul.f32 0.5, %v4322_v47  ;;  %v4308_v46 = vpop.xlane.xlu0 %4307  ;;  %v4371_v5 = vpop.permute.xlu2 %4370 }
0x2326   :  { %v4314_v21 = vmul.f32 %v4308_v46, %v6674_v13 }
0x2327   :  { %v4324_v43 = vsub.f32 1.5, %v4323_v51 }
0x2328   :  { %v6409_v37 = vpop.eup %6408  ;;  %v4318_v0 = vadd.f32 1e-05, %v4314_v21 }
0x2329   :  { %v4325_v39 = vmul.f32 %v6407_v16, %v4324_v43  ;;  %v4331_v54 = vmul.f32 %v6409_v37, %v4317_v6  ;;  %vm4337_vm4 = vweird.f32 %v6409_v37 }
0x232a   :  { %6410 = vrsqrt.f32 %v4318_v0  ;;  %vm4338_vm6 = vmor %vm4336_vm5, %vm4337_vm4  ;;  %vm4346_vm8 = vweird.f32 %v4318_v0 }
0x232b   :  { %v4332_v50 = vmul.f32 %v6409_v37, %v4331_v54  ;;  %v4329_v27 = vsel %vm4328_vm2, %v6407_v16, %v4325_v39 }
0x232c   :  { %v4360_v41 = vmul.f32 %v4329_v27, %v4292_v42 }
0x232d   :  { %v4333_v31 = vmul.f32 0.5, %v4332_v50  ;;  %v4311_v3 = vpop.xlane.xlu1 %4310 }
0x232e   :  { %v4315_v55 = vmul.f32 %v4311_v3, %v6674_v13  ;;  %v4365_v56 = vmul.f32 %v8370_v30, %v4360_v41 }
0x232f   :  { %v4334_v44 = vsub.f32 1.5, %v4333_v31 }
0x2330   :  { %v6411_v19 = vpop.eup %6410  ;;  %v4319_v20 = vadd.f32 1e-05, %v4315_v55  ;;  %v4373_v15 = vadd.f32 %v4371_v5, %v4365_v56 }
0x2331   :  { %v4335_v18 = vmul.f32 %v6409_v37, %v4334_v44  ;;  %v4341_v9 = vmul.f32 %v6411_v19, %v4318_v0  ;;  %vm4347_vm7 = vweird.f32 %v6411_v19 }
0x2332   :  { %6412 = vrsqrt.f32 %v4319_v20  ;;  %vm4348_vm9 = vmor %vm4346_vm8, %vm4347_vm7  ;;  %vm4356_vm11 = vweird.f32 %v4319_v20 }
0x2333   :  { %v4339_v40 = vsel %vm4338_vm6, %v6409_v37, %v4335_v18  ;;  %v4342_v7 = vmul.f32 %v6411_v19, %v4341_v9 }
0x2334   :  { %v4361_v49 = vmul.f32 %v4339_v40, %v8345_v24 }
0x2335   :  { %v4343_v63 = vmul.f32 0.5, %v4342_v7 }
0x2336   :  { %v4366_v29 = vmul.f32 %v8370_v30, %v4361_v49 }
0x2337   :  { %v4344_v12 = vsub.f32 1.5, %v4343_v63 }
0x2338   :  { %v6413_v22 = vpop.eup %6412  ;;  %v4374_v35 = vadd.f32 %v4371_v5, %v4366_v29 }
0x2339   :  { %v4345_v42 = vmul.f32 %v6411_v19, %v4344_v12  ;;  %v4351_v57 = vmul.f32 %v6413_v22, %v4319_v20  ;;  %vm4357_vm10 = vweird.f32 %v6413_v22 }
0x233a   :  { %v4377_v48 = vpack.c.bf16 %v4374_v35, %v4373_v15  ;;  %vm4358_vm12 = vmor %vm4356_vm11, %vm4357_vm10 }
0x233b   :  { %v4352_v4 = vmul.f32 %v6413_v22, %v4351_v57  ;;  %v4349_v24 = vsel %vm4348_vm9, %v6411_v19, %v4345_v42 }
0x233c   :  { %5833 = vmatmul.msk.bf16.vlgmr.msrb.gmra.mxu2 %vm146_vm3, %v4377_v48  ;;  %v4362_v59 = vmul.f32 %v4349_v24, %v8352_v26 }
0x233d   :  { %v4353_v38 = vmul.f32 0.5, %v4352_v4 }
0x233e   :  { %v4367_v16 = vmul.f32 %v8370_v30, %v4362_v59 }
0x233f   :  { %v4354_v11 = vsub.f32 1.5, %v4353_v38 }
0x2340   :  { %v4375_v60 = vadd.f32 %v4371_v5, %v4367_v16 }
0x2341   :  { %v4355_v34 = vmul.f32 %v6413_v22, %v4354_v11 }
0x2343   :  { %v4359_v10 = vsel %vm4358_vm12, %v6413_v22, %v4355_v34 }
0x2344   :  { %v4363_v2 = vmul.f32 %v4359_v10, %v8359_v36 }
0x2346   :  { %v4368_v6 = vmul.f32 %v8370_v30, %v4363_v2 }
0x2348   :  { %v4376_v47 = vadd.f32 %v4371_v5, %v4368_v6 }
0x234a   :  { %v4378_v51 = vpack.c.bf16 %v4376_v47, %v4375_v60 }
0x234c   :  { %5834 = vmatmul.msk.bf16.gmra.mxu2 %vm146_vm3, %v4378_v51 }
0x23bf   :  { %v4411_v46 = vpop.f32.mrf.mxu2 }
0x23c0   :  { %v4421_v21 = vmul.f32 %v4411_v46, %v6736_v1  ;;  %v4425_v26 = vmul.f32 %v4411_v46, %v6747_v8  ;;  %v4429_v43 = vmul.f32 %v4411_v46, %v6757_v17  ;;  %v4433_v37 = vmul.f32 %v4411_v46, %v6766_v25 }
0x23c7   :  { %v4413_v0 = vpop.f32.mrf.mxu2 }
0x23c8   :  { %v4422_v36 = vmul.f32 %v4413_v0, %v6736_v1  ;;  %v4426_v39 = vmul.f32 %v4413_v0, %v6747_v8  ;;  %v4430_v54 = vmul.f32 %v4413_v0, %v6757_v17  ;;  %v4434_v50 = vmul.f32 %v4413_v0, %v6766_v25 }
0x23c9   :  { %v8401_v27 = vpack.c.bf16 %v4413_v0, %v4411_v46 }
0x23ca   :  { %v4437_v31 = vpack.c.bf16 %v4422_v36, %v4421_v21  ;;  %v4439_v3 = vpack.c.bf16 %v4426_v39, %v4425_v26  ;;  %v4441_v55 = vpack.c.bf16 %v4430_v54, %v4429_v43  ;;  %v4443_v44 = vpack.c.bf16 %v4434_v50, %v4433_v37 }
0x23cb   :  { %4449 = vrot.lane.b32.xlu1 %v8401_v27, %s6505_s23 }
0x23cf   :  { %v4416_v19 = vpop.f32.mrf.mxu2 }
0x23d0   :  { %v4423_v56 = vmul.f32 %v4416_v19, %v6736_v1  ;;  %v4427_v29 = vmul.f32 %v4416_v19, %v6747_v8  ;;  %v4431_v15 = vmul.f32 %v4416_v19, %v6757_v17  ;;  %v4435_v57 = vmul.f32 %v4416_v19, %v6766_v25 }
0x23d7   :  { %v4418_v20 = vpop.f32.mrf.mxu2 }
0x23d8   :  { %v8405_v41 = vpack.c.bf16 %v4418_v20, %v4416_v19  ;;  %v4424_v49 = vmul.f32 %v4418_v20, %v6736_v1  ;;  %v4428_v5 = vmul.f32 %v4418_v20, %v6747_v8  ;;  %v4432_v22 = vmul.f32 %v4418_v20, %v6757_v17 }
0x23d9   :  { %v4436_v42 = vmul.f32 %v4418_v20, %v6766_v25 }
0x23da   :  { %4451 = vrot.lane.b32.xlu0 %v8405_v41, %s6505_s23  ;;  %v4438_v63 = vpack.c.bf16 %v4424_v49, %v4423_v56  ;;  %v4440_v12 = vpack.c.bf16 %v4428_v5, %v4427_v29  ;;  %v4442_v35 = vpack.c.bf16 %v4432_v22, %v4431_v15 }
0x23db   :  { %v4444_v48 = vpack.c.bf16 %v4436_v42, %v4435_v57 }
0x243d   :  { %v4450_v40 = vpop.permute.xlu1 %4449 }
0x243e   :  { %v4478_v7 = vsel %vm146_vm3, %v4450_v40, 0 }
0x244c   :  { %v4452_v18 = vpop.permute.xlu0 %4451 }
0x244d   :  { %v4481_v9 = vsel %vm146_vm3, %v4452_v18, 0 }
0x244e   :  { %4489 = vmatpush.bf16.xpose.msrb.mxu3 %v4481_v9 }
0x2456   :  { %4490 = vmatpush.bf16.xpose.msrb.mxu3 %v4478_v7 }
0x245d   :  { %5835 = vmatmul.msk.bf16.vlgmr.msrb.gmra.mxu3 %vm146_vm3, %v4437_v31 }
0x246d   :  { %5836 = vmatmul.msk.bf16.gmra.mxu3 %vm146_vm3, %v4438_v63 }
0x247d   :  { %5837 = vmatmul.msk.bf16.gmra.mxu3 %vm146_vm3, %v4439_v3 }
0x248d   :  { %5838 = vmatmul.msk.bf16.gmra.mxu3 %vm146_vm3, %v4440_v12 }
0x249d   :  { %5839 = vmatmul.msk.bf16.gmra.mxu3 %vm146_vm3, %v4441_v55 }
0x24ad   :  { %5840 = vmatmul.msk.bf16.gmra.mxu3 %vm146_vm3, %v4442_v35 }
0x24bd   :  { %5841 = vmatmul.msk.bf16.gmra.mxu3 %vm146_vm3, %v4443_v44 }
0x24cd   :  { %5842 = vmatmul.msk.bf16.gmra.mxu3 %vm146_vm3, %v4444_v48 }
0x24e0   :  { %v4492_v4 = vpop.f32.mrf.mxu3 }
0x24e1   :  { %v4493_v24 = vadd.f32 %v4492_v4, %v6779_v45 }
0x24e3   :  { %v4532_v38 = vsel %vm146_vm3, %v4493_v24, -inf }
0x24e4   :  { %4533 = vmax.xlane.f32.xlu2 %v4532_v38 }
0x24e8   :  { %v4494_v11 = vpop.f32.mrf.mxu3 }
0x24e9   :  { %v4495_v59 = vadd.f32 %v4494_v11, %v6783_v52 }
0x24eb   :  { %v4535_v34 = vsel %vm146_vm3, %v4495_v59, -inf }
0x24ec   :  { %4536 = vmax.xlane.f32.xlu0 %v4535_v34 }
0x24f0   :  { %v4497_v10 = vpop.f32.mrf.mxu3 }
0x24f1   :  { %v4498_v2 = vadd.f32 %v4497_v10, %v6787_v58 }
0x24f3   :  { %v4538_v16 = vsel %vm146_vm3, %v4498_v2, -inf }
0x24f4   :  { %4539 = vmax.xlane.f32.xlu1 %v4538_v16 }
0x24f8   :  { %v4499_v6 = vpop.f32.mrf.mxu3 }
0x24f9   :  { %v4500_v60 = vadd.f32 %v4499_v6, %v6794_v62 }
0x24fb   :  { %v4541_v47 = vsel %vm146_vm3, %v4500_v60, -inf }
0x24fc   :  { %4542 = vmax.xlane.f32.xlu2 %v4541_v47 }
0x2500   :  { %v4502_v51 = vpop.f32.mrf.mxu3 }
0x2501   :  { %v4503_v46 = vadd.f32 %v4502_v51, %v6779_v45 }
0x2503   :  { %v4544_v21 = vsel %vm146_vm3, %v4503_v46, -inf }
0x2504   :  { %4545 = vmax.xlane.f32.xlu0 %v4544_v21 }
0x2508   :  { %v4504_v26 = vpop.f32.mrf.mxu3 }
0x2509   :  { %v8438_v43 = vadd.f32 %v4504_v26, %v6783_v52 }
0x250b   :  { %v4547_v37 = vsel %vm146_vm3, %v8438_v43, -inf }
0x250c   :  { %4548 = vmax.xlane.f32.xlu2 %v4547_v37 }
0x2510   :  { %v4507_v0 = vpop.f32.mrf.mxu3 }
0x2511   :  { %v8443_v36 = vadd.f32 %v4507_v0, %v6787_v58 }
0x2513   :  { %v4550_v39 = vsel %vm146_vm3, %v8443_v36, -inf }
0x2514   :  { %4551 = vmax.xlane.f32.xlu1 %v4550_v39 }
0x2518   :  { %v4509_v54 = vpop.f32.mrf.mxu3 }
0x2519   :  { %v8448_v50 = vadd.f32 %v4509_v54, %v6794_v62 }
0x251b   :  { %v4553_v31 = vsel %vm146_vm3, %v8448_v50, -inf }
0x251c   :  { %4554 = vmax.xlane.f32.xlu0 %v4553_v31 }
0x2520   :  { %v4512_v3 = vpop.f32.mrf.mxu3 }
0x2521   :  { %v8453_v55 = vadd.f32 %v4512_v3, %v6779_v45 }
0x2523   :  { %v4556_v44 = vsel %vm146_vm3, %v8453_v55, -inf }
0x2524   :  { %4557 = vmax.xlane.f32.xlu1 %v4556_v44 }
0x2528   :  { %v4514_v19 = vpop.f32.mrf.mxu3 }
0x2529   :  { %v8458_v20 = vadd.f32 %v4514_v19, %v6783_v52 }
0x252b   :  { %v4559_v18 = vsel %vm146_vm3, %v8458_v20, -inf }
0x252c   :  { %4560 = vmax.xlane.f32.xlu1 %v4559_v18 }
0x2530   :  { %4718 = vrot.lane.b32.xlu0 %v8405_v41, %s6507_s5  ;;  %v8464_v9 = vpop.f32.mrf.mxu3 }
0x2538   :  { %v4519_v5 = vpop.f32.mrf.mxu3 }
0x2539   :  { %v8475_v4 = vadd.f32 %v4519_v5, %v6794_v62 }
0x253b   :  { %v4565_v34 = vsel %vm146_vm3, %v8475_v4, -inf }
0x2540   :  { %v4522_v57 = vpop.f32.mrf.mxu3 }
0x2557   :  { %v4534_v40 = vpop.xlane.xlu2 %4533 }
0x2558   :  { %v4580_v7 = vsub.f32 %v4493_v24, %v4534_v40 }
0x255a   :  { %v4596_v49 = vmul.f32 1.442695, %v4580_v7 }
0x255c   :  { %6414 = vpow2.f32 %v4596_v49 }
0x255f   :  { %v4537_v56 = vpop.xlane.xlu0 %4536 }
0x2560   :  { %v4581_v63 = vsub.f32 %v4495_v59, %v4537_v56 }
0x2562   :  { %v8466_v29 = vpop.eup %6414  ;;  %v4598_v12 = vmul.f32 1.442695, %v4581_v63 }
0x2563   :  { %v4628_v22 = vsel %vm146_vm3, %v8466_v29, 0.0 }
0x2564   :  { %6416 = vpow2.f32 %v4598_v12  ;;  %4629 = vadd.xlane.f32.xlu2 %v4628_v22  ;;  %v8517_v12 = vadd.f32 %v8464_v9, %v6787_v58 }
0x2567   :  { %v4540_v15 = vpop.xlane.xlu1 %4539 }
0x2568   :  { %v4582_v35 = vsub.f32 %v4498_v2, %v4540_v15  ;;  %v4524_v2 = vpop.f32.mrf.mxu3 }
0x2569   :  { %v8484_v6 = vadd.f32 %v4524_v2, %v6783_v52 }
0x256a   :  { %v8470_v41 = vpop.eup %6416  ;;  %v4600_v42 = vmul.f32 1.442695, %v4582_v35 }
0x256b   :  { %v4631_v48 = vsel %vm146_vm3, %v8470_v41, 0.0  ;;  %v4571_v26 = vsel %vm146_vm3, %v8484_v6, -inf }
0x256c   :  { %6418 = vpow2.f32 %v4600_v42  ;;  %4632 = vadd.xlane.f32.xlu1 %v4631_v48  ;;  %v4562_v42 = vsel %vm146_vm3, %v8517_v12, -inf }
0x256f   :  { %v4543_v24 = vpop.xlane.xlu2 %4542 }
0x2570   :  { %v4583_v38 = vsub.f32 %v4500_v60, %v4543_v24 }
0x2572   :  { %v8477_v11 = vpop.eup %6418  ;;  %v4602_v59 = vmul.f32 1.442695, %v4583_v38 }
0x2573   :  { %v4634_v10 = vsel %vm146_vm3, %v8477_v11, 0.0 }
0x2574   :  { %6420 = vpow2.f32 %v4602_v59  ;;  %4566 = vmax.xlane.f32.xlu1 %v4565_v34  ;;  %4635 = vadd.xlane.f32.xlu0 %v4634_v10 }
0x2577   :  { %v4546_v16 = vpop.xlane.xlu0 %4545 }
0x2578   :  { %v4584_v47 = vsub.f32 %v4503_v46, %v4546_v16 }
0x257a   :  { %v8486_v51 = vpop.eup %6420  ;;  %v4604_v60 = vmul.f32 1.442695, %v4584_v47 }
0x257b   :  { %v4637_v21 = vsel %vm146_vm3, %v8486_v51, 0.0 }
0x257c   :  { %6422 = vpow2.f32 %v4604_v60  ;;  %4716 = vrot.lane.b32.xlu2 %v8401_v27, %s6507_s5  ;;  %4638 = vadd.xlane.f32.xlu1 %v4637_v21 }
0x257d   :  { %4572 = vmax.xlane.f32.xlu0 %v4571_v26 }
0x257f   :  { %v4549_v37 = vpop.xlane.xlu2 %4548 }
0x2580   :  { %v4585_v52 = vsub.f32 %v8438_v43, %v4549_v37  ;;  %v8505_v43 = vadd.f32 %v4522_v57, %v6779_v45 }
0x2582   :  { %v8495_v0 = vpop.eup %6422  ;;  %v4606_v46 = vmul.f32 1.442695, %v4585_v52  ;;  %v4568_v19 = vsel %vm146_vm3, %v8505_v43, -inf }
0x2583   :  { %v4640_v39 = vsel %vm146_vm3, %v8495_v0, 0.0 }
0x2584   :  { %6424 = vpow2.f32 %v4606_v46  ;;  %4641 = vadd.xlane.f32.xlu1 %v4640_v39 }
0x2587   :  { %v4552_v54 = vpop.xlane.xlu1 %4551 }
0x2588   :  { %v4586_v27 = vsub.f32 %v8443_v36, %v4552_v54  ;;  %v4527_v54 = vpop.f32.mrf.mxu3 }
0x258a   :  { %v8499_v31 = vpop.eup %6424  ;;  %v4608_v44 = vmul.f32 1.442695, %v4586_v27 }
0x258b   :  { %v4643_v3 = vsel %vm146_vm3, %v8499_v31, 0.0 }
0x258c   :  { %4644 = vadd.xlane.f32.xlu1 %v4643_v3  ;;  %6426 = vpow2.f32 %v4608_v44 }
0x258f   :  { %v4555_v7 = vpop.xlane.xlu0 %4554 }
0x2590   :  { %v4587_v56 = vsub.f32 %v8448_v50, %v4555_v7 }
0x2592   :  { %v8509_v40 = vpop.eup %6426  ;;  %v4610_v45 = vmul.f32 1.442695, %v4587_v56 }
0x2593   :  { %v4646_v63 = vsel %vm146_vm3, %v8509_v40, 0.0 }
0x2594   :  { %4569 = vmax.xlane.f32.xlu1 %v4568_v19 }
0x2597   :  { %v4558_v18 = vpop.xlane.xlu1 %4557 }
0x2598   :  { %v4588_v49 = vsub.f32 %v8453_v55, %v4558_v18 }
0x259a   :  { %v4612_v36 = vmul.f32 1.442695, %v4588_v49 }
0x259c   :  { %6428 = vpow2.f32 %v4612_v36  ;;  %4647 = vadd.xlane.f32.xlu1 %v4646_v63 }
0x259d   :  { %6430 = vpow2.f32 %v4610_v45 }
0x259f   :  { %v4561_v5 = vpop.xlane.xlu1 %4560 }
0x25a0   :  { %v4589_v22 = vsub.f32 %v8458_v20, %v4561_v5 }
0x25a2   :  { %v8520_v15 = vpop.eup %6428  ;;  %v4614_v35 = vmul.f32 1.442695, %v4589_v22  ;;  %v4719_v55 = vpop.permute.xlu0 %4718 }
0x25a3   :  { %4752 = vmatpush.bf16.msra.mxu0 %v4719_v55  ;;  %v4652_v50 = vsel %vm146_vm3, %v8520_v15, 0.0  ;;  %v8526_v57 = vpop.eup %6430 }
0x25a4   :  { %6432 = vpow2.f32 %v4614_v35  ;;  %4653 = vadd.xlane.f32.xlu0 %v4652_v50  ;;  %v4649_v48 = vsel %vm146_vm3, %v8526_v57, 0.0  ;;  %v4529_v35 = vpop.f32.mrf.mxu3 }
0x25a5   :  { %4563 = vmax.xlane.f32.xlu2 %v4562_v42  ;;  %v8559_v55 = vadd.f32 %v4529_v35, %v6794_v62 }
0x25aa   :  { %v8528_v9 = vpop.eup %6432 }
0x25ab   :  { %v4655_v20 = vsel %vm146_vm3, %v8528_v9, 0.0 }
0x25ac   :  { %4656 = vadd.xlane.f32.xlu1 %v4655_v20  ;;  %v4577_v20 = vsel %vm146_vm3, %v8559_v55, -inf }
0x25ad   :  { %4650 = vadd.xlane.f32.xlu2 %v4649_v48 }
0x25d7   :  { %v4630_v24 = vpop.xlane.xlu2 %4629 }
0x25d8   :  { %6434 = vrcp.f32 %v4630_v24 }
0x25de   :  { %v6435_v34 = vpop.eup %6434 }
0x25df   :  { %v4717_v38 = vpop.permute.xlu2 %4716  ;;  %v4633_v59 = vpop.xlane.xlu1 %4632  ;;  %v4692_v2 = vmul.f32 %v6435_v34, %v8466_v29 }
0x25e0   :  { %6436 = vrcp.f32 %v4633_v59  ;;  %4753 = vmatpush.bf16.msra.mxu0 %v4717_v38 }
0x25e6   :  { %v6437_v10 = vpop.eup %6436 }
0x25e7   :  { %v4693_v16 = vmul.f32 %v6437_v10, %v8470_v41  ;;  %v4567_v47 = vpop.xlane.xlu1 %4566  ;;  %v4636_v37 = vpop.xlane.xlu0 %4635 }
0x25e8   :  { %v4591_v60 = vsub.f32 %v8475_v4, %v4567_v47  ;;  %v8543_v4 = vadd.f32 %v4527_v54, %v6787_v58 }
0x25e9   :  { %v4708_v21 = vpack.c.bf16 %v4693_v16, %v4692_v2 }
0x25ea   :  { %v4618_v26 = vmul.f32 1.442695, %v4591_v60  ;;  %v4574_v18 = vsel %vm146_vm3, %v8543_v4, -inf }
0x25eb   :  { %5843 = vmatmul.msk.bf16.vlgmr.msra.gmra.mxu0 %vm146_vm3, %v4708_v21 }
0x25ec   :  { %6438 = vpow2.f32 %v4618_v26 }
0x25ed   :  { %6440 = vrcp.f32 %v4636_v37 }
0x25ef   :  { %v4639_v52 = vpop.xlane.xlu1 %4638 }
0x25f0   :  { %6442 = vrcp.f32 %v4639_v52 }
0x25f2   :  { %v8538_v46 = vpop.eup %6438 }
0x25f3   :  { %v4661_v39 = vsel %vm146_vm3, %v8538_v46, 0.0  ;;  %v6441_v29 = vpop.eup %6440 }
0x25f4   :  { %4662 = vadd.xlane.f32.xlu0 %v4661_v39  ;;  %v4694_v27 = vmul.f32 %v6441_v29, %v8477_v11  ;;  %v6020_v39 = vld [vmem:[%s8745_s10 + $0x48] sm:$0xff]  ;;  %v6019_v29 = vld [vmem:[%s8745_s10 + $0x40] sm:$0xff] }
0x25f5   :  { %4866 = vmatpush.bf16.msrb.mxu1 %v6020_v39 }
0x25f6   :  { %v6443_v41 = vpop.eup %6442 }
0x25f7   :  { %v4695_v3 = vmul.f32 %v6443_v41, %v8486_v51  ;;  %v4642_v44 = vpop.xlane.xlu1 %4641 }
0x25f8   :  { %6444 = vrcp.f32 %v4642_v44 }
0x25f9   :  { %v4709_v19 = vpack.c.bf16 %v4695_v3, %v4694_v27  ;;  %4867 = vmatpush.bf16.msrb.mxu1 %v6019_v29 }
0x25fb   :  { %5844 = vmatmul.msk.bf16.gmra.mxu0 %vm146_vm3, %v4709_v19 }
0x25fc   :  { %4575 = vmax.xlane.f32.xlu0 %v4574_v18 }
0x25fe   :  { %v6445_v49 = vpop.eup %6444 }
0x25ff   :  { %v4645_v7 = vpop.xlane.xlu1 %4644  ;;  %v4696_v58 = vmul.f32 %v6445_v49, %v8495_v0  ;;  %v4573_v0 = vpop.xlane.xlu0 %4572 }
0x2600   :  { %6446 = vrcp.f32 %v4645_v7 }
0x2606   :  { %v6447_v36 = vpop.eup %6446 }
0x2607   :  { %v4697_v56 = vmul.f32 %v6447_v36, %v8499_v31  ;;  %v4570_v11 = vpop.xlane.xlu1 %4569 }
0x2608   :  { %v4592_v51 = vsub.f32 %v8505_v43, %v4570_v11  ;;  %v4593_v43 = vsub.f32 %v8484_v6, %v4573_v0 }
0x2609   :  { %v4710_v63 = vpack.c.bf16 %v4697_v56, %v4696_v58 }
0x260a   :  { %v4620_v45 = vmul.f32 1.442695, %v4592_v51  ;;  %v4622_v24 = vmul.f32 1.442695, %v4593_v43 }
0x260b   :  { %5845 = vmatmul.msk.bf16.gmra.mxu0 %vm146_vm3, %v4710_v63 }
0x260c   :  { %6448 = vpow2.f32 %v4620_v45 }
0x260f   :  { %v4648_v48 = vpop.xlane.xlu1 %4647 }
0x2612   :  { %v8554_v5 = vpop.eup %6448 }
0x2613   :  { %v4664_v22 = vsel %vm146_vm3, %v8554_v5, 0.0 }
0x2614   :  { %4665 = vadd.xlane.f32.xlu1 %v4664_v22 }
0x2617   :  { %v4654_v60 = vpop.xlane.xlu0 %4653 }
0x2618   :  { %v4564_v31 = vpop.xlane.xlu2 %4563 }
0x2619   :  { %v4590_v50 = vsub.f32 %v8517_v12, %v4564_v31 }
0x261b   :  { %v4616_v42 = vmul.f32 1.442695, %v4590_v50 }
0x261c   :  { %4578 = vmax.xlane.f32.xlu1 %v4577_v20 }
0x261d   :  { %6450 = vpow2.f32 %v4616_v42 }
0x261e   :  { %6452 = vrcp.f32 %v4648_v48 }
0x261f   :  { %v4657_v16 = vpop.xlane.xlu1 %4656 }
0x2620   :  { %v4651_v38 = vpop.xlane.xlu2 %4650 }
0x2621   :  { %6454 = vrcp.f32 %v4651_v38 }
0x2622   :  { %6456 = vpow2.f32 %v4622_v24 }
0x2623   :  { %v8565_v59 = vpop.eup %6450  ;;  %6458 = vrcp.f32 %v4657_v16 }
0x2624   :  { %v4658_v62 = vsel %vm146_vm3, %v8565_v59, 0.0  ;;  %v6453_v12 = vpop.eup %6452  ;;  %6460 = vrcp.f32 %v4654_v60 }
0x2625   :  { %4659 = vadd.xlane.f32.xlu2 %v4658_v62  ;;  %v4698_v34 = vmul.f32 %v6453_v12, %v8509_v40 }
0x2627   :  { %v6455_v6 = vpop.eup %6454 }
0x2628   :  { %v4699_v10 = vmul.f32 %v6455_v6, %v8526_v57  ;;  %v8571_v2 = vpop.eup %6456 }
0x2629   :  { %v4667_v21 = vsel %vm146_vm3, %v8571_v2, 0.0  ;;  %v6459_v26 = vpop.eup %6458 }
0x262a   :  { %v4711_v47 = vpack.c.bf16 %v4699_v10, %v4698_v34  ;;  %v6461_v37 = vpop.eup %6460  ;;  %v4701_v52 = vmul.f32 %v6459_v26, %v8528_v9 }
0x262b   :  { %v4700_v40 = vmul.f32 %v6461_v37, %v8520_v15 }
0x262c   :  { %5846 = vmatmul.msk.bf16.gmra.mxu0 %vm146_vm3, %v4711_v47 }
0x262d   :  { %4668 = vadd.xlane.f32.xlu2 %v4667_v21  ;;  %v4712_v57 = vpack.c.bf16 %v4701_v52, %v4700_v40 }
0x263c   :  { %5847 = vmatmul.msk.bf16.gmra.mxu0 %vm146_vm3, %v4712_v57 }
0x2667   :  { %v4663_v54 = vpop.xlane.xlu0 %4662 }
0x2668   :  { %v4755_v41 = vpop.f32.mrf.mxu0 }
0x2669   :  { %v4795_v15 = vmul.f32 %v4755_v41, %v6736_v1 }
0x266f   :  { %v4576_v27 = vpop.xlane.xlu0 %4575 }
0x2670   :  { %v4594_v9 = vsub.f32 %v8543_v4, %v4576_v27  ;;  %v4757_v3 = vpop.f32.mrf.mxu0 }
0x2671   :  { %v4796_v44 = vmul.f32 %v4757_v3, %v6736_v1 }
0x2672   :  { %v4624_v19 = vmul.f32 1.442695, %v4594_v9 }
0x2673   :  { %v4811_v18 = vpack.c.bf16 %v4796_v44, %v4795_v15 }
0x2674   :  { %6462 = vpow2.f32 %v4624_v19 }
0x2675   :  { %5863 = vmatmul.msk.bf16.vlgmr.msrb.gmra.mxu1 %vm146_vm3, %v4811_v18 }
0x2678   :  { %v4760_v7 = vpop.f32.mrf.mxu0 }
0x2679   :  { %v4797_v56 = vmul.f32 %v4760_v7, %v6736_v1 }
0x267a   :  { %v6463_v49 = vpop.eup %6462 }
0x267b   :  { %v4670_v36 = vsel %vm146_vm3, %v6463_v49, 0.0 }
0x267c   :  { %4671 = vadd.xlane.f32.xlu2 %v4670_v36 }
0x2680   :  { %v4762_v58 = vpop.f32.mrf.mxu0 }
0x2681   :  { %v4798_v4 = vmul.f32 %v4762_v58, %v6736_v1 }
0x2683   :  { %v4812_v11 = vpack.c.bf16 %v4798_v4, %v4797_v56 }
0x2685   :  { %5864 = vmatmul.msk.bf16.gmra.mxu1 %vm146_vm3, %v4812_v11 }
0x2687   :  { %v4666_v51 = vpop.xlane.xlu1 %4665 }
0x2688   :  { %v4765_v63 = vpop.f32.mrf.mxu0 }
0x2689   :  { %v4799_v0 = vmul.f32 %v4765_v63, %v6747_v8 }
0x268f   :  { %v4579_v45 = vpop.xlane.xlu1 %4578 }
0x2690   :  { %v4595_v22 = vsub.f32 %v8559_v55, %v4579_v45  ;;  %v4767_v35 = vpop.f32.mrf.mxu0 }
0x2691   :  { %v4800_v31 = vmul.f32 %v4767_v35, %v6747_v8 }
0x2692   :  { %v4626_v50 = vmul.f32 1.442695, %v4595_v22 }
0x2693   :  { %v4813_v43 = vpack.c.bf16 %v4800_v31, %v4799_v0 }
0x2694   :  { %6464 = vpow2.f32 %v4626_v50 }
0x2695   :  { %5865 = vmatmul.msk.bf16.gmra.mxu1 %vm146_vm3, %v4813_v43  ;;  %6466 = vrcp.f32 %v4663_v54 }
0x2698   :  { %v4660_v1 = vpop.xlane.xlu2 %4659 }
0x2699   :  { %6468 = vrcp.f32 %v4660_v1 }
0x269a   :  { %v6465_v42 = vpop.eup %6464 }
0x269b   :  { %v4673_v20 = vsel %vm146_vm3, %v6465_v42, 0.0  ;;  %v6467_v48 = vpop.eup %6466 }
0x269c   :  { %4674 = vadd.xlane.f32.xlu0 %v4673_v20  ;;  %v4703_v55 = vmul.f32 %v6467_v48, %v8538_v46 }
0x269f   :  { %v6469_v24 = vpop.eup %6468 }
0x26a0   :  { %v4702_v38 = vmul.f32 %v6469_v24, %v8565_v59  ;;  %v4669_v62 = vpop.xlane.xlu2 %4668 }
0x26a1   :  { %6470 = vrcp.f32 %v4669_v62 }
0x26a2   :  { %v4713_v12 = vpack.c.bf16 %v4703_v55, %v4702_v38  ;;  %6472 = vrcp.f32 %v4666_v51 }
0x26a4   :  { %5848 = vmatmul.msk.bf16.gmra.mxu0 %vm146_vm3, %v4713_v12 }
0x26a7   :  { %v6471_v34 = vpop.eup %6470 }
0x26a8   :  { %v6473_v10 = vpop.eup %6472  ;;  %v4705_v16 = vmul.f32 %v6471_v34, %v8571_v2 }
0x26a9   :  { %v4770_v6 = vpop.f32.mrf.mxu0  ;;  %v4704_v47 = vmul.f32 %v6473_v10, %v8554_v5 }
0x26aa   :  { %v4801_v21 = vmul.f32 %v4770_v6, %v6747_v8 }
0x26ab   :  { %v4714_v26 = vpack.c.bf16 %v4705_v16, %v4704_v47  ;;  %v4925_v16 = vperm.slane %v8367_v61, 1 }
0x26b1   :  { %v4772_v60 = vpop.f32.mrf.mxu0 }
0x26b2   :  { %v4802_v46 = vmul.f32 %v4772_v60, %v6747_v8 }
0x26b4   :  { %v4814_v59 = vpack.c.bf16 %v4802_v46, %v4801_v21  ;;  %5849 = vmatmul.msk.bf16.gmra.mxu0 %vm146_vm3, %v4714_v26 }
0x26b6   :  { %5866 = vmatmul.msk.bf16.gmra.mxu1 %vm146_vm3, %v4814_v59 }
0x26b9   :  { %v4775_v37 = vpop.f32.mrf.mxu0 }
0x26ba   :  { %v4803_v40 = vmul.f32 %v4775_v37, %v6757_v17 }
0x26c1   :  { %v4777_v52 = vpop.f32.mrf.mxu0 }
0x26c2   :  { %v4804_v57 = vmul.f32 %v4777_v52, %v6757_v17 }
0x26c4   :  { %v4815_v2 = vpack.c.bf16 %v4804_v57, %v4803_v40 }
0x26c6   :  { %5867 = vmatmul.msk.bf16.gmra.mxu1 %vm146_vm3, %v4815_v2 }
0x26ef   :  { %v4672_v29 = vpop.xlane.xlu2 %4671 }
0x26f0   :  { %6474 = vrcp.f32 %v4672_v29 }
0x26f2   :  { %v4869_v5 = vpop.f32.mrf.mxu1 }
0x26f6   :  { %v6475_v41 = vpop.eup %6474 }
0x26f7   :  { %v4706_v9 = vmul.f32 %v6475_v41, %v6463_v49 }
0x26fa   :  { %v4871_v39 = vpop.f32.mrf.mxu1 }
0x2702   :  { %v4874_v54 = vpop.f32.mrf.mxu1 }
0x270a   :  { %v4876_v3 = vpop.f32.mrf.mxu1 }
0x270f   :  { %v4675_v8 = vpop.xlane.xlu0 %4674 }
0x2710   :  { %6476 = vrcp.f32 %v4675_v8 }
0x2712   :  { %v4879_v19 = vpop.f32.mrf.mxu1 }
0x2713   :  { %v4909_v12 = vadd.f32 %v4879_v19, %v4869_v5 }
0x2716   :  { %v6477_v27 = vpop.eup %6476 }
0x2717   :  { %v4707_v15 = vmul.f32 %v6477_v27, %v6465_v42 }
0x2719   :  { %v4715_v44 = vpack.c.bf16 %v4707_v15, %v4706_v9 }
0x271a   :  { %v4881_v56 = vpop.f32.mrf.mxu1 }
0x271b   :  { %5850 = vmatmul.msk.bf16.gmra.mxu0 %vm146_vm3, %v4715_v44  ;;  %v4910_v60 = vadd.f32 %v4881_v56, %v4871_v39 }
0x2721   :  { %v4780_v18 = vpop.f32.mrf.mxu0 }
0x2722   :  { %v4805_v36 = vmul.f32 %v4780_v18, %v6757_v17 }
0x2729   :  { %v4782_v7 = vpop.f32.mrf.mxu0 }
0x272a   :  { %v4806_v58 = vmul.f32 %v4782_v7, %v6757_v17 }
0x272c   :  { %v4816_v4 = vpack.c.bf16 %v4806_v58, %v4805_v36 }
0x272e   :  { %5868 = vmatmul.msk.bf16.gmra.mxu1 %vm146_vm3, %v4816_v4 }
0x2731   :  { %v4785_v11 = vpop.f32.mrf.mxu0 }
0x2732   :  { %v4807_v45 = vmul.f32 %v4785_v11, %v6766_v25 }
0x2733   :  { %v4884_v51 = vpop.f32.mrf.mxu1 }
0x2734   :  { %v4911_v63 = vadd.f32 %v4884_v51, %v4874_v54 }
0x2739   :  { %v4787_v49 = vpop.f32.mrf.mxu0 }
0x273a   :  { %v4808_v22 = vmul.f32 %v4787_v49, %v6766_v25 }
0x273b   :  { %v4886_v35 = vpop.f32.mrf.mxu1 }
0x273c   :  { %v4817_v0 = vpack.c.bf16 %v4808_v22, %v4807_v45  ;;  %v4912_v31 = vadd.f32 %v4886_v35, %v4876_v3 }
0x273e   :  { %5869 = vmatmul.msk.bf16.gmra.mxu1 %vm146_vm3, %v4817_v0 }
0x2743   :  { %v4889_v43 = vpop.f32.mrf.mxu1 }
0x2744   :  { %v4913_v6 = vadd.f32 %v4909_v12, %v4889_v43 }
0x274b   :  { %v4891_v20 = vpop.f32.mrf.mxu1 }
0x2798   :  { %v4790_v50 = vpop.f32.mrf.mxu0 }
0x2799   :  { %v4809_v1 = vmul.f32 %v4790_v50, %v6766_v25 }
0x27a0   :  { %v4792_v17 = vpop.f32.mrf.mxu0 }
0x27a1   :  { %v4810_v42 = vmul.f32 %v4792_v17, %v6766_v25  ;;  %v4914_v25 = vadd.f32 %v4910_v60, %v4891_v20 }
0x27a3   :  { %v4818_v48 = vpack.c.bf16 %v4810_v42, %v4809_v1 }
0x27a5   :  { %5870 = vmatmul.msk.bf16.gmra.mxu1 %vm146_vm3, %v4818_v48 }
0x27ab   :  { %v4894_v24 = vpop.f32.mrf.mxu1 }
0x27ac   :  { %v4915_v55 = vadd.f32 %v4911_v63, %v4894_v24 }
0x27b3   :  { %v4896_v38 = vpop.f32.mrf.mxu1 }
0x27b4   :  { %v4916_v62 = vadd.f32 %v4912_v31, %v4896_v38 }
0x27bb   :  { %v4899_v34 = vpop.f32.mrf.mxu1 }
0x27bc   :  { %v4917_v10 = vadd.f32 %v4913_v6, %v4899_v34 }
0x27be   :  { %v4921_v47 = vadd.f32 %v4917_v10, %v8324_v28 }
0x27c0   :  { %v8622_v21 = vadd.f32 %v4925_v16, %v4921_v47 }
0x27c2   :  { %v4930_v46 = vsel %vm146_vm3, %v8622_v21, 0.0 }
0x27c3   :  { %4931 = vadd.xlane.f32.xlu1 %v4930_v46  ;;  %v4901_v26 = vpop.f32.mrf.mxu1 }
0x27c4   :  { %v4918_v59 = vadd.f32 %v4914_v25, %v4901_v26 }
0x27c6   :  { %v4922_v37 = vadd.f32 %v4918_v59, %v8328_v32 }
0x27c8   :  { %v8627_v52 = vadd.f32 %v4925_v16, %v4922_v37 }
0x27ca   :  { %v4933_v40 = vsel %vm146_vm3, %v8627_v52, 0.0 }
0x27cb   :  { %4934 = vadd.xlane.f32.xlu2 %v4933_v40 }
0x27e3   :  { %5018 = vrot.lane.b32.xlu2 %v8370_v30, %s6507_s5 }
0x27eb   :  { %5181 = vrot.lane.b32.xlu2 %v4925_v16, %s6505_s23 }
0x2822   :  { %v4904_v5 = vpop.f32.mrf.mxu1 }
0x2823   :  { %v4919_v54 = vadd.f32 %v4915_v55, %v4904_v5  ;;  %v6030_v5 = vld [vmem:[%s8747_s12 + $0x138] sm:$0xff] }
0x2825   :  { %v4923_v27 = vadd.f32 %v4919_v54, %v8332_v53  ;;  %v6022_v53 = vld [vmem:[%s8746_s11 + $0x48] sm:$0xff] }
0x2826   :  { %5064 = vmatpush.bf16.msra.mxu2 %v6022_v53 }
0x2827   :  { %v4928_v44 = vadd.f32 %v4925_v16, %v4923_v27 }
0x2829   :  { %v4936_v18 = vsel %vm146_vm3, %v4928_v44, 0.0 }
0x282a   :  { %v4906_v3 = vpop.f32.mrf.mxu1 }
0x282b   :  { %v4920_v15 = vadd.f32 %v4916_v62, %v4906_v3  ;;  %v6027_v3 = vld [vmem:[%s8747_s12 + $0x120] sm:$0xff] }
0x282d   :  { %v4924_v19 = vadd.f32 %v4920_v15, %v8336_v23  ;;  %v6021_v23 = vld [vmem:[%s8746_s11 + $0x40] sm:$0xff] }
0x282e   :  { %5065 = vmatpush.bf16.msra.mxu2 %v6021_v23 }
0x282f   :  { %v4929_v7 = vadd.f32 %v4925_v16, %v4924_v19  ;;  %v6026_v19 = vld [vmem:[%s8747_s12 + $0x118] sm:$0xff] }
0x2831   :  { %v4939_v36 = vsel %vm146_vm3, %v4929_v7, 0.0 }
0x2832   :  { %5184 = vmatpush.bf16.msrb.mxu2 %v6030_v5 }
0x2836   :  { %v4932_v28 = vpop.xlane.xlu1 %4931 }
0x2837   :  { %v4942_v61 = vmul.f32 %v4932_v28, %v6674_v13 }
0x2839   :  { %v4946_v57 = vsub.f32 %v8622_v21, %v4942_v61 }
0x283b   :  { %v4950_v2 = vmul.f32 %v4946_v57, %v4946_v57 }
0x283d   :  { %v4954_v32 = vsel %vm146_vm3, %v4950_v2, 0.0 }
0x283e   :  { %v4935_v39 = vpop.xlane.xlu2 %4934  ;;  %4955 = vadd.xlane.f32.xlu0 %v4954_v32 }
0x283f   :  { %v4943_v29 = vmul.f32 %v4935_v39, %v6674_v13  ;;  %v6029_v39 = vld [vmem:[%s8747_s12 + $0x130] sm:$0xff] }
0x2840   :  { %5185 = vmatpush.bf16.msrb.mxu2 %v6029_v39 }
0x2841   :  { %v4947_v8 = vsub.f32 %v8627_v52, %v4943_v29 }
0x2843   :  { %v4951_v41 = vmul.f32 %v4947_v8, %v4947_v8 }
0x2845   :  { %v4957_v9 = vsel %vm146_vm3, %v4951_v41, 0.0 }
0x2846   :  { %4958 = vadd.xlane.f32.xlu1 %v4957_v9  ;;  %v8663_v16 = vpop.permute.xlu2 %5018 }
0x284e   :  { %4937 = vadd.xlane.f32.xlu1 %v4936_v18 }
0x2852   :  { %5025 = vrot.lane.b32.xlu0 %v8370_v30, %s6512_s30 }
0x2856   :  { %4940 = vadd.xlane.f32.xlu1 %v4939_v36 }
0x28b1   :  { %v4956_v58 = vpop.xlane.xlu0 %4955 }
0x28b2   :  { %v4966_v56 = vmul.f32 %v4956_v58, %v6674_v13  ;;  %v6025_v58 = vld [vmem:[%s8747_s12 + $0x110] sm:$0xff] }
0x28b4   :  { %v4970_v4 = vadd.f32 1e-05, %v4966_v56 }
0x28b6   :  { %6478 = vrsqrt.f32 %v4970_v4  ;;  %vm4980_vm14 = vweird.f32 %v4970_v4 }
0x28b9   :  { %v4959_v11 = vpop.xlane.xlu1 %4958 }
0x28ba   :  { %v4967_v30 = vmul.f32 %v4959_v11, %v6674_v13  ;;  %v6024_v11 = vld [vmem:[%s8747_s12 + $0x108] sm:$0xff] }
0x28bc   :  { %v6479_v51 = vpop.eup %6478  ;;  %v4971_v63 = vadd.f32 1e-05, %v4967_v30 }
0x28bd   :  { %v4975_v49 = vmul.f32 %v6479_v51, %v4970_v4  ;;  %vm4981_vm13 = vweird.f32 %v6479_v51 }
0x28be   :  { %6480 = vrsqrt.f32 %v4971_v63  ;;  %vm4982_vm15 = vmor %vm4980_vm14, %vm4981_vm13  ;;  %vm4990_vm1 = vweird.f32 %v4971_v63 }
0x28bf   :  { %v4976_v45 = vmul.f32 %v6479_v51, %v4975_v49 }
0x28c1   :  { %v4977_v22 = vmul.f32 0.5, %v4976_v45  ;;  %v4938_v35 = vpop.xlane.xlu1 %4937  ;;  %v6502_v45 = vld [vmem:[%s8743_s13 + $0x10] sm:$0xf] }
0x28c2   :  { %v4944_v0 = vmul.f32 %v4938_v35, %v6674_v13 }
0x28c3   :  { %v4978_v31 = vsub.f32 1.5, %v4977_v22  ;;  %v5039_v22 = vperm.slane %v6502_v45, 2 }
0x28c4   :  { %v6481_v50 = vpop.eup %6480  ;;  %v8655_v43 = vsub.f32 %v4928_v44, %v4944_v0  ;;  %v5026_v59 = vpop.permute.xlu0 %5025 }
0x28c5   :  { %v4979_v17 = vmul.f32 %v6479_v51, %v4978_v31  ;;  %v4985_v1 = vmul.f32 %v6481_v50, %v4971_v63  ;;  %vm4991_vm0 = vweird.f32 %v6481_v50  ;;  %v6023_v63 = vld [vmem:[%s8747_s12 + $0x100] sm:$0xff] }
0x28c6   :  { %v4952_v42 = vmul.f32 %v8655_v43, %v8655_v43  ;;  %vm4992_vm2 = vmor %vm4990_vm1, %vm4991_vm0 }
0x28c7   :  { %v4986_v20 = vmul.f32 %v6481_v50, %v4985_v1  ;;  %v4983_v55 = vsel %vm4982_vm15, %v6479_v51, %v4979_v17 }
0x28c8   :  { %v4960_v48 = vsel %vm146_vm3, %v4952_v42, 0.0  ;;  %v5014_v6 = vmul.f32 %v4983_v55, %v4946_v57 }
0x28c9   :  { %v4987_v24 = vmul.f32 0.5, %v4986_v20  ;;  %4961 = vadd.xlane.f32.xlu1 %v4960_v48  ;;  %v4941_v38 = vpop.xlane.xlu1 %4940 }
0x28ca   :  { %v4945_v62 = vmul.f32 %v4941_v38, %v6674_v13  ;;  %v5021_v46 = vmul.f32 %v8663_v16, %v5014_v6 }
0x28cb   :  { %v4988_v12 = vsub.f32 1.5, %v4987_v24 }
0x28cc   :  { %v8661_v34 = vsub.f32 %v4929_v7, %v4945_v62  ;;  %v5028_v40 = vadd.f32 %v5026_v59, %v5021_v46 }
0x28cd   :  { %v4989_v10 = vmul.f32 %v6481_v50, %v4988_v12 }
0x28ce   :  { %v4953_v47 = vmul.f32 %v8661_v34, %v8661_v34 }
0x28cf   :  { %v4993_v60 = vsel %vm4992_vm2, %v6481_v50, %v4989_v10 }
0x28d0   :  { %v5015_v25 = vmul.f32 %v4993_v60, %v4947_v8  ;;  %v4963_v26 = vsel %vm146_vm3, %v4953_v47, 0.0  ;;  %v6028_v8 = vld [vmem:[%s8747_s12 + $0x128] sm:$0xff] }
0x28d1   :  { %4964 = vadd.xlane.f32.xlu0 %v4963_v26  ;;  %5186 = vmatpush.bf16.msrb.mxu2 %v6028_v8 }
0x28d2   :  { %v5022_v37 = vmul.f32 %v8663_v16, %v5015_v25 }
0x28d4   :  { %v5029_v28 = vadd.f32 %v5026_v59, %v5022_v37 }
0x28d5   :  { %5187 = vmatpush.bf16.msrb.mxu2 %v6027_v3 }
0x28d6   :  { %v5032_v61 = vpack.c.bf16 %v5029_v28, %v5028_v40 }
0x28d8   :  { %5883 = vmatmul.msk.bf16.vlgmr.msra.gmra.mxu2 %vm146_vm3, %v5032_v61 }
0x28d9   :  { %5188 = vmatpush.bf16.msrb.mxu2 %v6026_v19 }
0x28dd   :  { %5189 = vmatpush.bf16.msrb.mxu2 %v6025_v58 }
0x28e1   :  { %5190 = vmatpush.bf16.msrb.mxu2 %v6024_v11 }
0x28e5   :  { %5191 = vmatpush.bf16.msrb.mxu2 %v6023_v63 }
0x293c   :  { %v4962_v57 = vpop.xlane.xlu1 %4961 }
0x293d   :  { %v4968_v2 = vmul.f32 %v4962_v57, %v6674_v13 }
0x293f   :  { %v4972_v32 = vadd.f32 1e-05, %v4968_v2 }
0x2941   :  { %6482 = vrsqrt.f32 %v4972_v32  ;;  %vm5000_vm5 = vweird.f32 %v4972_v32 }
0x2944   :  { %v4965_v29 = vpop.xlane.xlu0 %4964 }
0x2945   :  { %v4969_v54 = vmul.f32 %v4965_v29, %v6674_v13 }
0x2947   :  { %v6483_v41 = vpop.eup %6482  ;;  %v4973_v27 = vadd.f32 1e-05, %v4969_v54 }
0x2948   :  { %v4995_v9 = vmul.f32 %v6483_v41, %v4972_v32  ;;  %vm5001_vm4 = vweird.f32 %v6483_v41 }
0x2949   :  { %6484 = vrsqrt.f32 %v4973_v27  ;;  %vm5002_vm6 = vmor %vm5000_vm5, %vm5001_vm4  ;;  %vm5010_vm8 = vweird.f32 %v4973_v27 }
0x294a   :  { %v4996_v15 = vmul.f32 %v6483_v41, %v4995_v9 }
0x294c   :  { %v4997_v44 = vmul.f32 0.5, %v4996_v15 }
0x294e   :  { %v4998_v18 = vsub.f32 1.5, %v4997_v44 }
0x294f   :  { %v6485_v7 = vpop.eup %6484 }
0x2950   :  { %v4999_v36 = vmul.f32 %v6483_v41, %v4998_v18  ;;  %v5005_v53 = vmul.f32 %v6485_v7, %v4973_v27  ;;  %vm5011_vm7 = vweird.f32 %v6485_v7 }
0x2951   :  { %vm5012_vm9 = vmor %vm5010_vm8, %vm5011_vm7 }
0x2952   :  { %v5006_v56 = vmul.f32 %v6485_v7, %v5005_v53  ;;  %v5003_v4 = vsel %vm5002_vm6, %v6483_v41, %v4999_v36 }
0x2953   :  { %v5016_v51 = vmul.f32 %v5003_v4, %v8655_v43 }
0x2954   :  { %v5007_v23 = vmul.f32 0.5, %v5006_v56 }
0x2955   :  { %v5023_v50 = vmul.f32 %v8663_v16, %v5016_v51 }
0x2956   :  { %v5008_v30 = vsub.f32 1.5, %v5007_v23 }
0x2957   :  { %v5030_v42 = vadd.f32 %v5026_v59, %v5023_v50 }
0x2958   :  { %v5009_v49 = vmul.f32 %v6485_v7, %v5008_v30 }
0x295a   :  { %v5013_v35 = vsel %vm5012_vm9, %v6485_v7, %v5009_v49  ;;  %v5182_v7 = vpop.permute.xlu2 %5181 }
0x295b   :  { %v5017_v0 = vmul.f32 %v5013_v35, %v8661_v34  ;;  %v5067_v31 = vpop.f32.mrf.mxu2 }
0x295c   :  { %v5068_v43 = vadd.f32 %v5067_v31, %v5039_v22 }
0x295d   :  { %v5024_v17 = vmul.f32 %v8663_v16, %v5017_v0 }
0x295e   :  { %v5081_v1 = vmul.f32 0.044715, %v5068_v43 }
0x295f   :  { %v5031_v20 = vadd.f32 %v5026_v59, %v5024_v17  ;;  %v5077_v59 = vmul.f32 0.5, %v5068_v43 }
0x2960   :  { %v5085_v48 = vmul.f32 %v5081_v1, %v5068_v43 }
0x2961   :  { %v5033_v24 = vpack.c.bf16 %v5031_v20, %v5030_v42 }
0x2962   :  { %v5089_v55 = vmul.f32 %v5085_v48, %v5068_v43 }
0x2963   :  { %v5069_v38 = vpop.f32.mrf.mxu2  ;;  %5884 = vmatmul.msk.bf16.gmra.mxu2 %vm146_vm3, %v5033_v24 }
0x2964   :  { %v5093_v62 = vadd.f32 %v5089_v55, %v5068_v43  ;;  %v5070_v12 = vadd.f32 %v5069_v38, %v5039_v22 }
0x2966   :  { %v5082_v6 = vmul.f32 0.044715, %v5070_v12  ;;  %v5097_v34 = vmul.f32 0.7978846, %v5093_v62  ;;  %v5078_v37 = vmul.f32 0.5, %v5070_v12  ;;  %v6032_v62 = vld [vmem:[%s8750_s7 + $0x8] sm:$0xff] }
0x2967   :  { %5281 = vmatpush.bf16.msra.mxu2 %v6032_v62 }
0x2968   :  { %v5086_v10 = vmul.f32 %v5082_v6, %v5070_v12  ;;  %6486 = vtanh.f32 %v5097_v34 }
0x296a   :  { %v5090_v47 = vmul.f32 %v5086_v10, %v5070_v12  ;;  %v6031_v10 = vld [vmem:[%s8750_s7] sm:$0xff] }
0x296b   :  { %5282 = vmatpush.bf16.msra.mxu2 %v6031_v10 }
0x296c   :  { %v5094_v60 = vadd.f32 %v5090_v47, %v5070_v12 }
0x296e   :  { %v5098_v25 = vmul.f32 0.7978846, %v5094_v60  ;;  %v6487_v16 = vpop.eup %6486 }
0x296f   :  { %v5105_v46 = vadd.f32 1.0, %v6487_v16 }
0x2970   :  { %6488 = vtanh.f32 %v5098_v25 }
0x2971   :  { %v5109_v28 = vmul.f32 %v5105_v46, %v5077_v59 }
0x2976   :  { %v6489_v26 = vpop.eup %6488 }
0x2977   :  { %v5106_v40 = vadd.f32 1.0, %v6489_v26 }
0x2979   :  { %v5110_v61 = vmul.f32 %v5106_v40, %v5078_v37 }
0x297b   :  { %v5113_v57 = vpack.c.bf16 %v5110_v61, %v5109_v28 }
0x297d   :  { %5192 = vmatmul.bf16.vlgmr.msrb.gmra.mxu2 %v5113_v57 }
0x29e6   :  { %v5072_v2 = vpop.f32.mrf.mxu2 }
0x29e7   :  { %v5073_v5 = vadd.f32 %v5072_v2, %v5039_v22 }
0x29e9   :  { %v5083_v32 = vmul.f32 0.044715, %v5073_v5  ;;  %v5079_v4 = vmul.f32 0.5, %v5073_v5 }
0x29eb   :  { %v5087_v39 = vmul.f32 %v5083_v32, %v5073_v5 }
0x29ed   :  { %v5091_v29 = vmul.f32 %v5087_v39, %v5073_v5 }
0x29ee   :  { %v5074_v54 = vpop.f32.mrf.mxu2 }
0x29ef   :  { %v5075_v8 = vadd.f32 %v5074_v54, %v5039_v22  ;;  %v5095_v41 = vadd.f32 %v5091_v29, %v5073_v5 }
0x29f1   :  { %v5084_v27 = vmul.f32 0.044715, %v5075_v8  ;;  %v5099_v3 = vmul.f32 0.7978846, %v5095_v41  ;;  %v5080_v23 = vmul.f32 0.5, %v5075_v8 }
0x29f3   :  { %v5088_v9 = vmul.f32 %v5084_v27, %v5075_v8  ;;  %6490 = vtanh.f32 %v5099_v3 }
0x29f5   :  { %v5092_v15 = vmul.f32 %v5088_v9, %v5075_v8 }
0x29f7   :  { %v5096_v44 = vadd.f32 %v5092_v15, %v5075_v8  ;;  %v6503_v15 = vld [vmem:[%s8741_s8] sm:$0xf] }
0x29f9   :  { %v5100_v19 = vmul.f32 0.7978846, %v5096_v44  ;;  %v6491_v18 = vpop.eup %6490  ;;  %v5259_v44 = vperm.slane %v6503_v15, 3 }
0x29fa   :  { %v5107_v53 = vadd.f32 1.0, %v6491_v18 }
0x29fb   :  { %6492 = vtanh.f32 %v5100_v19 }
0x29fc   :  { %v5111_v51 = vmul.f32 %v5107_v53, %v5079_v4 }
0x2a00   :  { %v5193_v36 = vpop.f32.mrf.mxu2 }
0x2a01   :  { %v6493_v58 = vpop.eup %6492  ;;  %v5194_v56 = vadd.f32 %v5193_v36, %v5182_v7 }
0x2a02   :  { %v5108_v11 = vadd.f32 1.0, %v6493_v58 }
0x2a03   :  { %v5201_v30 = vadd.f32 %v5194_v56, %v8622_v21 }
0x2a04   :  { %v5112_v63 = vmul.f32 %v5108_v11, %v5080_v23 }
0x2a05   :  { %v5203_v49 = vsel %vm146_vm3, %v5201_v30, 0.0 }
0x2a06   :  { %5204 = vadd.xlane.f32.xlu1 %v5203_v49  ;;  %v5114_v45 = vpack.c.bf16 %v5112_v63, %v5111_v51 }
0x2a08   :  { %v5195_v22 = vpop.f32.mrf.mxu2  ;;  %5197 = vmatmul.bf16.gmra.mxu2 %v5114_v45 }
0x2a09   :  { %v5196_v35 = vadd.f32 %v5195_v22, %v5182_v7 }
0x2a0b   :  { %v5202_v0 = vadd.f32 %v5196_v35, %v8627_v52 }
0x2a0d   :  { %v5206_v31 = vsel %vm146_vm3, %v5202_v0, 0.0 }
0x2a0e   :  { %5207 = vadd.xlane.f32.xlu2 %v5206_v31 }
0x2a79   :  { %v5205_v50 = vpop.xlane.xlu1 %5204 }
0x2a7a   :  { %v5209_v43 = vmul.f32 %v5205_v50, %v6674_v13 }
0x2a7c   :  { %v5211_v17 = vsub.f32 %v5201_v30, %v5209_v43 }
0x2a7e   :  { %v5213_v1 = vmul.f32 %v5211_v17, %v5211_v17 }
0x2a80   :  { %v5215_v21 = vsel %vm146_vm3, %v5213_v1, 0.0 }
0x2a81   :  { %v5208_v42 = vpop.xlane.xlu2 %5207  ;;  %5216 = vadd.xlane.f32.xlu1 %v5215_v21 }
0x2a82   :  { %v5210_v20 = vmul.f32 %v5208_v42, %v6674_v13 }
0x2a84   :  { %v5212_v48 = vsub.f32 %v5202_v0, %v5210_v20 }
0x2a86   :  { %v5214_v24 = vmul.f32 %v5212_v48, %v5212_v48 }
0x2a88   :  { %v5218_v55 = vsel %vm146_vm3, %v5214_v24, 0.0 }
0x2a89   :  { %5219 = vadd.xlane.f32.xlu1 %v5218_v55 }
0x2a8b   :  { %v5198_v52 = vpop.f32.mrf.mxu2 }
0x2a93   :  { %v5199_v38 = vpop.f32.mrf.mxu2 }
0x2aa2   :  { %5247 = vrot.lane.b32.xlu1 %v6654_v33, %s6512_s30 }
0x2af4   :  { %v5217_v12 = vpop.xlane.xlu1 %5216 }
0x2af5   :  { %v5221_v6 = vmul.f32 %v5217_v12, %v6674_v13 }
0x2af7   :  { %v5223_v34 = vadd.f32 1e-05, %v5221_v6 }
0x2af9   :  { %6494 = vrsqrt.f32 %v5223_v34  ;;  %vm5231_vm11 = vweird.f32 %v5223_v34 }
0x2afc   :  { %v5220_v47 = vpop.xlane.xlu1 %5219 }
0x2afd   :  { %v5222_v60 = vmul.f32 %v5220_v47, %v6674_v13 }
0x2aff   :  { %v6495_v25 = vpop.eup %6494  ;;  %v5224_v33 = vadd.f32 1e-05, %v5222_v60 }
0x2b00   :  { %v5226_v16 = vmul.f32 %v6495_v25, %v5223_v34  ;;  %vm5232_vm10 = vweird.f32 %v6495_v25 }
0x2b01   :  { %6496 = vrsqrt.f32 %v5224_v33  ;;  %vm5233_vm13 = vmor %vm5231_vm11, %vm5232_vm10  ;;  %vm5241_vm14 = vweird.f32 %v5224_v33 }
0x2b02   :  { %v5227_v46 = vmul.f32 %v6495_v25, %v5226_v16 }
0x2b04   :  { %v5228_v26 = vmul.f32 0.5, %v5227_v46 }
0x2b06   :  { %v5229_v37 = vsub.f32 1.5, %v5228_v26 }
0x2b07   :  { %v6497_v59 = vpop.eup %6496 }
0x2b08   :  { %v5236_v40 = vmul.f32 %v6497_v59, %v5224_v33  ;;  %v5230_v57 = vmul.f32 %v6495_v25, %v5229_v37  ;;  %vm5242_vm12 = vweird.f32 %v6497_v59 }
0x2b09   :  { %vm5243_vm15 = vmor %vm5241_vm14, %vm5242_vm12 }
0x2b0a   :  { %v5237_v28 = vmul.f32 %v6497_v59, %v5236_v40  ;;  %v5234_v5 = vsel %vm5233_vm13, %v6495_v25, %v5230_v57 }
0x2b0b   :  { %v5245_v39 = vmul.f32 %v5234_v5, %v5211_v17 }
0x2b0c   :  { %v5238_v61 = vmul.f32 0.5, %v5237_v28 }
0x2b0e   :  { %v5239_v2 = vsub.f32 1.5, %v5238_v61 }
0x2b10   :  { %v5240_v13 = vmul.f32 %v6497_v59, %v5239_v2 }
0x2b12   :  { %v5244_v32 = vsel %vm5243_vm15, %v6497_v59, %v5240_v13 }
0x2b13   :  { %v5246_v29 = vmul.f32 %v5244_v32, %v5212_v48 }
0x2b14   :  { %v5248_v54 = vpop.permute.xlu1 %5247 }
0x2b15   :  { %v5250_v8 = vmul.f32 %v5248_v54, %v5245_v39  ;;  %v5251_v41 = vmul.f32 %v5248_v54, %v5246_v29 }
0x2b17   :  { %v5252_v27 = vadd.f32 %v5250_v8, %v6627_v14  ;;  %v5253_v9 = vadd.f32 %v5251_v41, %v6627_v14 }
0x2b19   :  { %v5254_v3 = vpack.c.bf16 %v5253_v9, %v5252_v27 }
0x2b1b   :  { %5941 = vmatmul.msk.bf16.vlgmr.msra.gmra.mxu2 %vm146_vm3, %v5254_v3 }
0x2b9e   :  { %v5284_v19 = vpop.f32.mrf.mxu2 }
0x2b9f   :  { %v5285_v18 = vadd.f32 %v5284_v19, %v5259_v44 }
0x2ba1   :  { %5289 = vst [vmem:[%s8751_s16] sm:$0xff] %v5285_v18 }
0x2ba6   :  { %v5286_v7 = vpop.f32.mrf.mxu2 }
0x2ba7   :  { %v5287_v36 = vadd.f32 %v5286_v7, %v5259_v44 }
0x2ba9   :  { %5290 = vst [vmem:[%s8751_s16 + $0x8] sm:$0xff] %v5287_v36 }

</bundles_post_ra>
